<compile_context>
chip_gen: v6e
topology: v6e:2x2x1
jax: 0.10.0
libtpu: 0.0.40
codegen_flags: <defaults>
</compile_context>

<pallas_src>
import functools
import math

import jax
import jax.numpy as jnp
from jax.experimental import pallas as pl
from jax.experimental.pallas import tpu as pltpu

TK_MAX = 512    # K-tile upper bound (multiple of 128)
TN_MAX = 256    # N-tile upper bound (multiple of 128)
TM_MAX = 1024   # M-tile upper bound (multiple of 8)


def _round_up(x, m):
    return ((x + m - 1) // m) * m


def _pick_tile(dim, tmax):
    """Largest 128-multiple tile <= tmax that divides dim.

    Falls back to a single full-dim block when dim is not 128-aligned (allowed
    because a block equal to the full array dim satisfies the layout rule)."""
    if dim % 128 != 0:
        return dim
    nb = dim // 128
    best = 1
    for d in range(1, nb + 1):
        if nb % d == 0 and d * 128 <= tmax:
            best = d
    return best * 128


# ----------------------------------------------------------------------------
# Pallas kernels
# ----------------------------------------------------------------------------
def _mm_bn_res_kernel(relu, a_ref, w_ref, s_ref, b_ref, r_ref, o_ref, acc_ref):
    """Conv-as-matmul, f32 VMEM accumulator; epilogue = BN + residual + ReLU -> bf16."""
    k = pl.program_id(2)

    @pl.when(k == 0)
    def _():
        acc_ref[...] = jnp.zeros_like(acc_ref)

    acc_ref[...] += jnp.dot(a_ref[...], w_ref[...],
                            preferred_element_type=jnp.float32)

    @pl.when(k == pl.num_programs(2) - 1)
    def _():
        y = acc_ref[...] * s_ref[...] + b_ref[...] + r_ref[...].astype(jnp.float32)
        if relu:
            y = jnp.maximum(y, 0.0)
        o_ref[...] = y.astype(o_ref.dtype)


def _mm_bn_kernel(relu, a_ref, w_ref, s_ref, b_ref, o_ref, acc_ref):
    """Same as above, no residual input (saves an (M,N) HBM round trip)."""
    k = pl.program_id(2)

    @pl.when(k == 0)
    def _():
        acc_ref[...] = jnp.zeros_like(acc_ref)

    acc_ref[...] += jnp.dot(a_ref[...], w_ref[...],
                            preferred_element_type=jnp.float32)

    @pl.when(k == pl.num_programs(2) - 1)
    def _():
        y = acc_ref[...] * s_ref[...] + b_ref[...]
        if relu:
            y = jnp.maximum(y, 0.0)
        o_ref[...] = y.astype(o_ref.dtype)


def _head_kernel(idx_ref, f_ref, w_ref, b_ref, o_ref):
    """Global average pool + per-sample (scalar-prefetch-selected) linear head on MXU."""
    del idx_ref  # consumed by the index_maps
    pooled = jnp.mean(f_ref[0].astype(jnp.float32), axis=0, keepdims=True)   # (1, C)
    logits = jnp.dot(pooled.astype(jnp.bfloat16), w_ref[0],
                     preferred_element_type=jnp.float32)                      # (1, NCp)
    o_ref[0] = logits + b_ref[0]


# ----------------------------------------------------------------------------
# Pallas wrappers
# ----------------------------------------------------------------------------
def matmul_bn_fused(a, w, scale, bias, residual, relu):
    """a:(M,K) bf16, w:(K,N) bf16 (K already 128-aligned), scale/bias:(N,) f32,
    residual:(M,N) bf16 or None.  Returns bf16 (M,N)."""
    M, K = a.shape
    N = w.shape[1]

    tk = _pick_tile(K, TK_MAX)
    tn = _pick_tile(N, TN_MAX)
    tm = min(TM_MAX, _round_up(M, 8))
    Mp = _round_up(M, tm)

    # Give a second TensorCore (v7x megacore) something to do when M & N both fit
    # in a single block.
    if Mp // tm == 1 and N // tn == 1 and tn % 256 == 0:
        tn //= 2

    if Mp != M:
        a = jnp.pad(a, ((0, Mp - M), (0, 0)))
        if residual is not None:
            residual = jnp.pad(residual, ((0, Mp - M), (0, 0)))

    nm, nn, nk = Mp // tm, N // tn, K // tk
    scale2 = scale.reshape(1, N).astype(jnp.float32)
    bias2 = bias.reshape(1, N).astype(jnp.float32)

    base_specs = [
        pl.BlockSpec((tm, tk), lambda m, n, k: (m, k)),   # a
        pl.BlockSpec((tk, tn), lambda m, n, k: (k, n)),   # w
        pl.BlockSpec((1, tn), lambda m, n, k: (0, n)),    # scale
        pl.BlockSpec((1, tn), lambda m, n, k: (0, n)),    # bias
    ]
    if residual is not None:
        kernel = functools.partial(_mm_bn_res_kernel, relu)
        in_specs = base_specs + [pl.BlockSpec((tm, tn), lambda m, n, k: (m, n))]
        args = (a, w, scale2, bias2, residual)
    else:
        kernel = functools.partial(_mm_bn_kernel, relu)
        in_specs = base_specs
        args = (a, w, scale2, bias2)

    out = pl.pallas_call(
        kernel,
        out_shape=jax.ShapeDtypeStruct((Mp, N), jnp.bfloat16),
        grid_spec=pltpu.PrefetchScalarGridSpec(
            num_scalar_prefetch=0,
            grid=(nm, nn, nk),
            in_specs=in_specs,
            out_specs=pl.BlockSpec((tm, tn), lambda m, n, k: (m, n)),
            scratch_shapes=[pltpu.VMEM((tm, tn), jnp.float32)],
        ),
        compiler_params=pltpu.CompilerParams(
            dimension_semantics=("parallel", "parallel", "arbitrary")),
    )(*args)

    return out[:M] if Mp != M else out


def heads_pallas(fc_idx, feat, head_w, head_b):
    """fc_idx:(B,) int32, feat:(B,S,C) bf16, head_w:(H,C,NCp) bf16, head_b:(H,NCp) f32."""
    B, S, C = feat.shape
    n_heads, _, NCp = head_w.shape
    head_b3 = head_b.reshape(n_heads, 1, NCp)

    out = pl.pallas_call(
        _head_kernel,
        out_shape=jax.ShapeDtypeStruct((B, 1, NCp), jnp.float32),
        grid_spec=pltpu.PrefetchScalarGridSpec(
            num_scalar_prefetch=1,
            grid=(B,),
            in_specs=[
                pl.BlockSpec((1, S, C), lambda b, idx: (b, 0, 0)),       # feat
                pl.BlockSpec((1, C, NCp), lambda b, idx: (idx[b], 0, 0)),  # head_w
                pl.BlockSpec((1, 1, NCp), lambda b, idx: (idx[b], 0, 0)),  # head_b
            ],
            out_specs=pl.BlockSpec((1, 1, NCp), lambda b, idx: (b, 0, 0)),
        ),
        compiler_params=pltpu.CompilerParams(
            dimension_semantics=("arbitrary",)),
    )(fc_idx, feat, head_w, head_b3)
    return out.reshape(B, NCp)


# ----------------------------------------------------------------------------
# Conv3d as batched bf16 im2col + Pallas matmul (glue: slicing / reshapes)
# ----------------------------------------------------------------------------
def im2col3d_batched(x, ksize, stride, pad, k_pad):
    """x: (B, D, H, W, C) bf16 -> ((B*Do*Ho*Wo, k^3*C + k_pad) bf16, (Do,Ho,Wo))."""
    B, D, H, W, C = x.shape
    xp = jnp.pad(x, ((0, 0), (pad, pad), (pad, pad), (pad, pad), (0, 0)))
    Do = (D + 2 * pad - ksize) // stride + 1
    Ho = (H + 2 * pad - ksize) // stride + 1
    Wo = (W + 2 * pad - ksize) // stride + 1
    M = B * Do * Ho * Wo
    cols = []
    for kd in range(ksize):
        for kh in range(ksize):
            for kw in range(ksize):
                sl = xp[:, kd: kd + stride * (Do - 1) + 1: stride,
                        kh: kh + stride * (Ho - 1) + 1: stride,
                        kw: kw + stride * (Wo - 1) + 1: stride, :]
                cols.append(sl.reshape(M, C))
    if k_pad:
        cols.append(jnp.zeros((M, k_pad), x.dtype))
    a = jnp.concatenate(cols, axis=1)   # bf16, K pre-padded to a 128-multiple
    return a, (Do, Ho, Wo)


def conv_bn_act(x, w_mat, scale, bias, *, ksize, stride, relu, residual=None):
    """x: (B, D, H, W, C) channels-last bf16; all B samples share one pallas_call."""
    B, _, _, _, C = x.shape
    x = x.astype(jnp.bfloat16)
    pad = 1 if ksize == 3 else 0
    K = ksize ** 3 * C
    Kp = w_mat.shape[0]                 # weight rows already padded to 128-multiple
    a, (Do, Ho, Wo) = im2col3d_batched(x, ksize, stride, pad, Kp - K)
    M = B * Do * Ho * Wo
    N = w_mat.shape[1]
    res_flat = (residual.reshape(M, N).astype(jnp.bfloat16)
                if residual is not None else None)
    y = matmul_bn_fused(a, w_mat, scale, bias, res_flat, relu)   # bf16 (M, N)
    return y.reshape(B, Do, Ho, Wo, N)


# ----------------------------------------------------------------------------
# Parameters (deterministic, synthetic)
# ----------------------------------------------------------------------------
def kaiming_conv(key, cout, cin, ksize):
    # kaiming_normal_(mode='fan_out', nonlinearity='relu'); bf16 rows padded to 128.
    fan_out = cout * ksize ** 3
    std = math.sqrt(2.0 / fan_out)
    w = std * jax.random.normal(key, (ksize, ksize, ksize, cin, cout), jnp.float32)
    w = w.reshape(ksize ** 3 * cin, cout)     # tap-major / channel-minor = im2col order
    kp = _round_up(w.shape[0], 128)
    if kp != w.shape[0]:
        w = jnp.pad(w, ((0, kp - w.shape[0]), (0, 0)))
    return w.astype(jnp.bfloat16)


def bn_fold(c, eps=1e-5):
    gamma = jnp.ones((c,), jnp.float32)
    beta = jnp.zeros((c,), jnp.float32)
    mean = jnp.zeros((c,), jnp.float32)
    var = jnp.ones((c,), jnp.float32)
    scale = gamma / jnp.sqrt(var + eps)
    bias = beta - mean * scale
    return scale, bias


def make_block(key, inplanes, planes, stride):
    k1, k2, k3 = jax.random.split(key, 3)
    p = {"stride": stride,
         "w1": kaiming_conv(k1, planes, inplanes, 3),
         "w2": kaiming_conv(k2, planes, planes, 3)}
    p["s1"], p["b1"] = bn_fold(planes)
    p["s2"], p["b2"] = bn_fold(planes)
    if stride != 1 or inplanes != planes:
        p["wd"] = kaiming_conv(k3, planes, inplanes, 1)
        p["sd"], p["bd"] = bn_fold(planes)
    return p


def basic_block_forward(x, p):
    stride = p["stride"]
    if "wd" in p:
        identity = conv_bn_act(x, p["wd"], p["sd"], p["bd"],
                               ksize=1, stride=stride, relu=False)
    else:
        identity = x
    h = conv_bn_act(x, p["w1"], p["s1"], p["b1"],
                    ksize=3, stride=stride, relu=True)
    # conv2 + bn2 + residual add + final ReLU fused in the Pallas epilogue
    out = conv_bn_act(h, p["w2"], p["s2"], p["b2"],
                      ksize=3, stride=1, relu=True, residual=identity)
    return out


def make_heads(key, n_heads, in_f, out_f, out_pad):
    ws, bs = [], []
    bound = 1.0 / math.sqrt(in_f)
    for _ in range(n_heads):
        key, k1, k2 = jax.random.split(key, 3)
        w = jax.random.uniform(k1, (in_f, out_f), jnp.float32, -bound, bound)
        b = jax.random.uniform(k2, (out_f,), jnp.float32, -bound, bound)
        ws.append(jnp.pad(w, ((0, 0), (0, out_pad - out_f))))
        bs.append(jnp.pad(b, ((0, out_pad - out_f),)))
    # (n_heads, in_f, NCp) bf16, (n_heads, NCp) f32
    return jnp.stack(ws).astype(jnp.bfloat16), jnp.stack(bs)


# ----------------------------------------------------------------------------
# Full forward (batched; head selection via scalar prefetch, no gather)
# ----------------------------------------------------------------------------
def rn18_classifier_future_forward(feature, grad1, grad2, layer3, layer4,
                                   head_w, head_b, num_classes):
    # feature: (B, 64, D, H, W)  -- PyTorch NCDHW convention
    B = feature.shape[0]
    n_heads = head_w.shape[0]

    x = jnp.transpose(feature, (0, 2, 3, 4, 1))        # NCDHW -> NDHWC
    x = jnp.maximum(x, 0.0).astype(jnp.bfloat16)       # self.relu(feature), bf16 path
    for blk in layer3:
        x = basic_block_forward(x, blk)
    for blk in layer4:
        x = basic_block_forward(x, blk)

    _, Do, Ho, Wo, C = x.shape
    feat = x.reshape(B, Do * Ho * Wo, C)                # bf16

    # fc_index = floor((|grad2 - grad1| - 1) / 2); Python-style negative indexing via mod
    fc_idx = jnp.floor((jnp.abs(grad2 - grad1) - 1.0) / 2.0).astype(jnp.int32)
    fc_idx = jnp.mod(fc_idx, n_heads)

    out = heads_pallas(fc_idx, feat, head_w, head_b)    # (B, NCp) f32
    return out[:, :num_classes]                         # (B, num_classes)


if __name__ == "__main__":
    key = jax.random.PRNGKey(0)
    kf, kp, kh = jax.random.split(key, 3)

    # small shapes consistent with the module: feature is (B, in_planes=64, D, H, W)
    B, C, D = 2, 64, 8
    feature = jax.random.normal(kf, (B, C, D, D, D), jnp.float32)
    grad1 = jnp.array([1.0, 2.0], jnp.float32)
    grad2 = jnp.array([4.0, 9.0], jnp.float32)   # fc indices -> 1 and 3

    kb = jax.random.split(kp, 4)
    layer3 = [make_block(kb[0], 64, 256, 2), make_block(kb[1], 256, 256, 1)]
    layer4 = [make_block(kb[2], 256, 512, 2), make_block(kb[3], 512, 512, 1)]

    NUM_CLASSES = 3
    NCP = 128                                           # lane-dense head width
    head_w, head_b = make_heads(kh, 10 // 2, 512, NUM_CLASSES, NCP)

    fwd = jax.jit(lambda f, g1, g2: rn18_classifier_future_forward(
        f, g1, g2, layer3, layer4, head_w, head_b, NUM_CLASSES))

    res = fwd(feature, grad1, grad2)
    jax.block_until_ready(res)
    assert res.shape == (B, NUM_CLASSES) and res.dtype == jnp.float32
    print("KERNEL_OK")
</pallas_src>

<mosaic_0001>
module attributes {stable_mosaic.version = 11 : i64} {
  func.func @_mm_bn_kernel(%arg0: i32, %arg1: i32, %arg2: i32, %arg3: memref<128x128xbf16, #tpu.memory_space<vmem>>, %arg4: memref<128x128xbf16, #tpu.memory_space<vmem>>, %arg5: memref<1x128xf32, #tpu.memory_space<vmem>>, %arg6: memref<1x128xf32, #tpu.memory_space<vmem>>, %arg7: memref<128x128xbf16, #tpu.memory_space<vmem>>, %arg8: memref<128x128xf32, #tpu.memory_space<vmem>>) attributes {dimension_semantics = [#tpu.dimension_semantics<parallel>, #tpu.dimension_semantics<parallel>, #tpu.dimension_semantics<arbitrary>], iteration_bounds = array<i64: 1, 2, 1>, scalar_prefetch = 0 : i64, scratch_operands = 1 : i64, tpu.core_type = #tpu.core_type<tc>, window_params = [{transform_indices = @transform_0, window_bounds = array<i64: 128, 128>}, {transform_indices = @transform_1, window_bounds = array<i64: 128, 128>}, {transform_indices = @transform_2, window_bounds = array<i64: 1, 128>}, {transform_indices = @transform_3, window_bounds = array<i64: 1, 128>}, {transform_indices = @transform_4, window_bounds = array<i64: 128, 128>}]} {
    %c0_i32 = arith.constant 0 : i32
    %0 = arith.cmpi eq, %arg2, %c0_i32 : i32
    %1 = arith.extui %0 : i1 to i32
    %c0_i32_0 = arith.constant 0 : i32
    %2 = arith.cmpi ne, %1, %c0_i32_0 : i32
    scf.if %2 {
      %cst_10 = arith.constant 0.000000e+00 : f32
      %12 = vector.broadcast %cst_10 : f32 to vector<128x128xf32>
      %c0_11 = arith.constant 0 : index
      %c0_12 = arith.constant 0 : index
      %13 = vector.load %arg8[%c0_11, %c0_12] : memref<128x128xf32, #tpu.memory_space<vmem>>, vector<128x128xf32>
      tpu.vector_store %arg8[%c0_11, %c0_12], %12 {strides = array<i32>} : memref<128x128xf32, #tpu.memory_space<vmem>>, vector<128x128xf32>,
    } else {
    }
    %c0 = arith.constant 0 : index
    %c0_1 = arith.constant 0 : index
    %3 = vector.load %arg8[%c0, %c0_1] : memref<128x128xf32, #tpu.memory_space<vmem>>, vector<128x128xf32>
    %c0_2 = arith.constant 0 : index
    %c0_3 = arith.constant 0 : index
    %4 = vector.load %arg3[%c0_2, %c0_3] : memref<128x128xbf16, #tpu.memory_space<vmem>>, vector<128x128xbf16>
    %c0_4 = arith.constant 0 : index
    %c0_5 = arith.constant 0 : index
    %5 = vector.load %arg4[%c0_4, %c0_5] : memref<128x128xbf16, #tpu.memory_space<vmem>>, vector<128x128xbf16>
    %cst = arith.constant dense<0.000000e+00> : vector<128x128xf32>
    %6 = tpu.matmul %4, %5, %cst {dimension_numbers = #tpu.dot_dimension_numbers<[1], [0], [0], [1], [0, 0, 1, 1], [], []>} : vector<128x128xbf16>, vector<128x128xbf16>, vector<128x128xf32> -> vector<128x128xf32>
    %7 = arith.addf %3, %6 : vector<128x128xf32>
    %c0_6 = arith.constant 0 : index
    %c0_7 = arith.constant 0 : index
    %8 = vector.load %arg8[%c0_6, %c0_7] : memref<128x128xf32, #tpu.memory_space<vmem>>, vector<128x128xf32>
    tpu.vector_store %arg8[%c0_6, %c0_7], %7 {strides = array<i32>} : memref<128x128xf32, #tpu.memory_space<vmem>>, vector<128x128xf32>,
    %c0_i32_8 = arith.constant 0 : i32
    %9 = arith.cmpi eq, %arg2, %c0_i32_8 : i32
    %10 = arith.extui %9 : i1 to i32
    %c0_i32_9 = arith.constant 0 : i32
    %11 = arith.cmpi ne, %10, %c0_i32_9 : i32
    scf.if %11 {
      %c0_10 = arith.constant 0 : index
      %c0_11 = arith.constant 0 : index
      %12 = vector.load %arg8[%c0_10, %c0_11] : memref<128x128xf32, #tpu.memory_space<vmem>>, vector<128x128xf32>
      %c0_12 = arith.constant 0 : index
      %c0_13 = arith.constant 0 : index
      %13 = vector.load %arg5[%c0_12, %c0_13] : memref<1x128xf32, #tpu.memory_space<vmem>>, vector<1x128xf32>
      %14 = vector.broadcast %13 : vector<1x128xf32> to vector<128x128xf32>
      %15 = arith.mulf %12, %14 : vector<128x128xf32>
      %c0_14 = arith.constant 0 : index
      %c0_15 = arith.constant 0 : index
      %16 = vector.load %arg6[%c0_14, %c0_15] : memref<1x128xf32, #tpu.memory_space<vmem>>, vector<1x128xf32>
      %17 = vector.broadcast %16 : vector<1x128xf32> to vector<128x128xf32>
      %18 = arith.addf %15, %17 : vector<128x128xf32>
      %19 = arith.truncf %18 : vector<128x128xf32> to vector<128x128xbf16>
      %c0_16 = arith.constant 0 : index
      %c0_17 = arith.constant 0 : index
      %20 = vector.load %arg7[%c0_16, %c0_17] : memref<128x128xbf16, #tpu.memory_space<vmem>>, vector<128x128xbf16>
      tpu.vector_store %arg7[%c0_16, %c0_17], %19 {strides = array<i32>} : memref<128x128xbf16, #tpu.memory_space<vmem>>, vector<128x128xbf16>,
    } else {
    }
    return
  }
  func.func @transform_0(%arg0: i32, %arg1: i32, %arg2: i32) -> (i32, i32) {
    %c0_i32 = arith.constant 0 : i32
    return %arg0, %arg2 : i32, i32
  }
  func.func @transform_1(%arg0: i32, %arg1: i32, %arg2: i32) -> (i32, i32) {
    %c0_i32 = arith.constant 0 : i32
    return %arg2, %arg1 : i32, i32
  }
  func.func @transform_2(%arg0: i32, %arg1: i32, %arg2: i32) -> (i32, i32) {
    %c0_i32 = arith.constant 0 : i32
    %c0_i32_0 = arith.constant 0 : i32
    return %c0_i32, %arg1 : i32, i32
  }
  func.func @transform_3(%arg0: i32, %arg1: i32, %arg2: i32) -> (i32, i32) {
    %c0_i32 = arith.constant 0 : i32
    %c0_i32_0 = arith.constant 0 : i32
    return %c0_i32, %arg1 : i32, i32
  }
  func.func @transform_4(%arg0: i32, %arg1: i32, %arg2: i32) -> (i32, i32) {
    %c0_i32 = arith.constant 0 : i32
    return %arg0, %arg1 : i32, i32
  }
}

module attributes {stable_mosaic.version = 11 : i64} {
  func.func @_mm_bn_kernel(%arg0: i32, %arg1: i32, %arg2: i32, %arg3: memref<128x256xbf16, #tpu.memory_space<vmem>>, %arg4: memref<256x128xbf16, #tpu.memory_space<vmem>>, %arg5: memref<1x128xf32, #tpu.memory_space<vmem>>, %arg6: memref<1x128xf32, #tpu.memory_space<vmem>>, %arg7: memref<128x128xbf16, #tpu.memory_space<vmem>>, %arg8: memref<128x128xf32, #tpu.memory_space<vmem>>) attributes {dimension_semantics = [#tpu.dimension_semantics<parallel>, #tpu.dimension_semantics<parallel>, #tpu.dimension_semantics<arbitrary>], iteration_bounds = array<i64: 1, 2, 7>, scalar_prefetch = 0 : i64, scratch_operands = 1 : i64, tpu.core_type = #tpu.core_type<tc>, window_params = [{transform_indices = @transform_0, window_bounds = array<i64: 128, 256>}, {transform_indices = @transform_1, window_bounds = array<i64: 256, 128>}, {transform_indices = @transform_2, window_bounds = array<i64: 1, 128>}, {transform_indices = @transform_3, window_bounds = array<i64: 1, 128>}, {transform_indices = @transform_4, window_bounds = array<i64: 128, 128>}]} {
    %c0_i32 = arith.constant 0 : i32
    %0 = arith.cmpi eq, %arg2, %c0_i32 : i32
    %1 = arith.extui %0 : i1 to i32
    %c0_i32_0 = arith.constant 0 : i32
    %2 = arith.cmpi ne, %1, %c0_i32_0 : i32
    scf.if %2 {
      %cst_9 = arith.constant 0.000000e+00 : f32
      %12 = vector.broadcast %cst_9 : f32 to vector<128x128xf32>
      %c0_10 = arith.constant 0 : index
      %c0_11 = arith.constant 0 : index
      %13 = vector.load %arg8[%c0_10, %c0_11] : memref<128x128xf32, #tpu.memory_space<vmem>>, vector<128x128xf32>
      tpu.vector_store %arg8[%c0_10, %c0_11], %12 {strides = array<i32>} : memref<128x128xf32, #tpu.memory_space<vmem>>, vector<128x128xf32>,
    } else {
    }
    %c0 = arith.constant 0 : index
    %c0_1 = arith.constant 0 : index
    %3 = vector.load %arg8[%c0, %c0_1] : memref<128x128xf32, #tpu.memory_space<vmem>>, vector<128x128xf32>
    %c0_2 = arith.constant 0 : index
    %c0_3 = arith.constant 0 : index
    %4 = vector.load %arg3[%c0_2, %c0_3] : memref<128x256xbf16, #tpu.memory_space<vmem>>, vector<128x256xbf16>
    %c0_4 = arith.constant 0 : index
    %c0_5 = arith.constant 0 : index
    %5 = vector.load %arg4[%c0_4, %c0_5] : memref<256x128xbf16, #tpu.memory_space<vmem>>, vector<256x128xbf16>
    %cst = arith.constant dense<0.000000e+00> : vector<128x128xf32>
    %6 = tpu.matmul %4, %5, %cst {dimension_numbers = #tpu.dot_dimension_numbers<[1], [0], [0], [1], [0, 0, 1, 1], [], []>} : vector<128x256xbf16>, vector<256x128xbf16>, vector<128x128xf32> -> vector<128x128xf32>
    %7 = arith.addf %3, %6 : vector<128x128xf32>
    %c0_6 = arith.constant 0 : index
    %c0_7 = arith.constant 0 : index
    %8 = vector.load %arg8[%c0_6, %c0_7] : memref<128x128xf32, #tpu.memory_space<vmem>>, vector<128x128xf32>
    tpu.vector_store %arg8[%c0_6, %c0_7], %7 {strides = array<i32>} : memref<128x128xf32, #tpu.memory_space<vmem>>, vector<128x128xf32>,
    %c6_i32 = arith.constant 6 : i32
    %9 = arith.cmpi eq, %arg2, %c6_i32 : i32
    %10 = arith.extui %9 : i1 to i32
    %c0_i32_8 = arith.constant 0 : i32
    %11 = arith.cmpi ne, %10, %c0_i32_8 : i32
    scf.if %11 {
      %c0_9 = arith.constant 0 : index
      %c0_10 = arith.constant 0 : index
      %12 = vector.load %arg8[%c0_9, %c0_10] : memref<128x128xf32, #tpu.memory_space<vmem>>, vector<128x128xf32>
      %c0_11 = arith.constant 0 : index
      %c0_12 = arith.constant 0 : index
      %13 = vector.load %arg5[%c0_11, %c0_12] : memref<1x128xf32, #tpu.memory_space<vmem>>, vector<1x128xf32>
      %14 = vector.broadcast %13 : vector<1x128xf32> to vector<128x128xf32>
      %15 = arith.mulf %12, %14 : vector<128x128xf32>
      %c0_13 = arith.constant 0 : index
      %c0_14 = arith.constant 0 : index
      %16 = vector.load %arg6[%c0_13, %c0_14] : memref<1x128xf32, #tpu.memory_space<vmem>>, vector<1x128xf32>
      %17 = vector.broadcast %16 : vector<1x128xf32> to vector<128x128xf32>
      %18 = arith.addf %15, %17 : vector<128x128xf32>
      %cst_15 = arith.constant 0.000000e+00 : f32
      %19 = vector.broadcast %cst_15 : f32 to vector<128x128xf32>
      %20 = arith.maximumf %18, %19 : vector<128x128xf32>
      %21 = arith.truncf %20 : vector<128x128xf32> to vector<128x128xbf16>
      %c0_16 = arith.constant 0 : index
      %c0_17 = arith.constant 0 : index
      %22 = vector.load %arg7[%c0_16, %c0_17] : memref<128x128xbf16, #tpu.memory_space<vmem>>, vector<128x128xbf16>
      tpu.vector_store %arg7[%c0_16, %c0_17], %21 {strides = array<i32>} : memref<128x128xbf16, #tpu.memory_space<vmem>>, vector<128x128xbf16>,
    } else {
    }
    return
  }
  func.func @transform_0(%arg0: i32, %arg1: i32, %arg2: i32) -> (i32, i32) {
    %c0_i32 = arith.constant 0 : i32
    return %arg0, %arg2 : i32, i32
  }
  func.func @transform_1(%arg0: i32, %arg1: i32, %arg2: i32) -> (i32, i32) {
    %c0_i32 = arith.constant 0 : i32
    return %arg2, %arg1 : i32, i32
  }
  func.func @transform_2(%arg0: i32, %arg1: i32, %arg2: i32) -> (i32, i32) {
    %c0_i32 = arith.constant 0 : i32
    %c0_i32_0 = arith.constant 0 : i32
    return %c0_i32, %arg1 : i32, i32
  }
  func.func @transform_3(%arg0: i32, %arg1: i32, %arg2: i32) -> (i32, i32) {
    %c0_i32 = arith.constant 0 : i32
    %c0_i32_0 = arith.constant 0 : i32
    return %c0_i32, %arg1 : i32, i32
  }
  func.func @transform_4(%arg0: i32, %arg1: i32, %arg2: i32) -> (i32, i32) {
    %c0_i32 = arith.constant 0 : i32
    return %arg0, %arg1 : i32, i32
  }
}

module attributes {stable_mosaic.version = 11 : i64} {
  func.func @_mm_bn_res_kernel(%arg0: i32, %arg1: i32, %arg2: i32, %arg3: memref<128x384xbf16, #tpu.memory_space<vmem>>, %arg4: memref<384x128xbf16, #tpu.memory_space<vmem>>, %arg5: memref<1x128xf32, #tpu.memory_space<vmem>>, %arg6: memref<1x128xf32, #tpu.memory_space<vmem>>, %arg7: memref<128x128xbf16, #tpu.memory_space<vmem>>, %arg8: memref<128x128xbf16, #tpu.memory_space<vmem>>, %arg9: memref<128x128xf32, #tpu.memory_space<vmem>>) attributes {dimension_semantics = [#tpu.dimension_semantics<parallel>, #tpu.dimension_semantics<parallel>, #tpu.dimension_semantics<arbitrary>], iteration_bounds = array<i64: 1, 2, 18>, scalar_prefetch = 0 : i64, scratch_operands = 1 : i64, tpu.core_type = #tpu.core_type<tc>, window_params = [{transform_indices = @transform_0, window_bounds = array<i64: 128, 384>}, {transform_indices = @transform_1, window_bounds = array<i64: 384, 128>}, {transform_indices = @transform_2, window_bounds = array<i64: 1, 128>}, {transform_indices = @transform_3, window_bounds = array<i64: 1, 128>}, {transform_indices = @transform_4, window_bounds = array<i64: 128, 128>}, {transform_indices = @transform_5, window_bounds = array<i64: 128, 128>}]} {
    %c0_i32 = arith.constant 0 : i32
    %0 = arith.cmpi eq, %arg2, %c0_i32 : i32
    %1 = arith.extui %0 : i1 to i32
    %c0_i32_0 = arith.constant 0 : i32
    %2 = arith.cmpi ne, %1, %c0_i32_0 : i32
    scf.if %2 {
      %cst_9 = arith.constant 0.000000e+00 : f32
      %12 = vector.broadcast %cst_9 : f32 to vector<128x128xf32>
      %c0_10 = arith.constant 0 : index
      %c0_11 = arith.constant 0 : index
      %13 = vector.load %arg9[%c0_10, %c0_11] : memref<128x128xf32, #tpu.memory_space<vmem>>, vector<128x128xf32>
      tpu.vector_store %arg9[%c0_10, %c0_11], %12 {strides = array<i32>} : memref<128x128xf32, #tpu.memory_space<vmem>>, vector<128x128xf32>,
    } else {
    }
    %c0 = arith.constant 0 : index
    %c0_1 = arith.constant 0 : index
    %3 = vector.load %arg9[%c0, %c0_1] : memref<128x128xf32, #tpu.memory_space<vmem>>, vector<128x128xf32>
    %c0_2 = arith.constant 0 : index
    %c0_3 = arith.constant 0 : index
    %4 = vector.load %arg3[%c0_2, %c0_3] : memref<128x384xbf16, #tpu.memory_space<vmem>>, vector<128x384xbf16>
    %c0_4 = arith.constant 0 : index
    %c0_5 = arith.constant 0 : index
    %5 = vector.load %arg4[%c0_4, %c0_5] : memref<384x128xbf16, #tpu.memory_space<vmem>>, vector<384x128xbf16>
    %cst = arith.constant dense<0.000000e+00> : vector<128x128xf32>
    %6 = tpu.matmul %4, %5, %cst {dimension_numbers = #tpu.dot_dimension_numbers<[1], [0], [0], [1], [0, 0, 1, 1], [], []>} : vector<128x384xbf16>, vector<384x128xbf16>, vector<128x128xf32> -> vector<128x128xf32>
    %7 = arith.addf %3, %6 : vector<128x128xf32>
    %c0_6 = arith.constant 0 : index
    %c0_7 = arith.constant 0 : index
    %8 = vector.load %arg9[%c0_6, %c0_7] : memref<128x128xf32, #tpu.memory_space<vmem>>, vector<128x128xf32>
    tpu.vector_store %arg9[%c0_6, %c0_7], %7 {strides = array<i32>} : memref<128x128xf32, #tpu.memory_space<vmem>>, vector<128x128xf32>,
    %c17_i32 = arith.constant 17 : i32
    %9 = arith.cmpi eq, %arg2, %c17_i32 : i32
    %10 = arith.extui %9 : i1 to i32
    %c0_i32_8 = arith.constant 0 : i32
    %11 = arith.cmpi ne, %10, %c0_i32_8 : i32
    scf.if %11 {
      %c0_9 = arith.constant 0 : index
      %c0_10 = arith.constant 0 : index
      %12 = vector.load %arg9[%c0_9, %c0_10] : memref<128x128xf32, #tpu.memory_space<vmem>>, vector<128x128xf32>
      %c0_11 = arith.constant 0 : index
      %c0_12 = arith.constant 0 : index
      %13 = vector.load %arg5[%c0_11, %c0_12] : memref<1x128xf32, #tpu.memory_space<vmem>>, vector<1x128xf32>
      %14 = vector.broadcast %13 : vector<1x128xf32> to vector<128x128xf32>
      %15 = arith.mulf %12, %14 : vector<128x128xf32>
      %c0_13 = arith.constant 0 : index
      %c0_14 = arith.constant 0 : index
      %16 = vector.load %arg6[%c0_13, %c0_14] : memref<1x128xf32, #tpu.memory_space<vmem>>, vector<1x128xf32>
      %17 = vector.broadcast %16 : vector<1x128xf32> to vector<128x128xf32>
      %18 = arith.addf %15, %17 : vector<128x128xf32>
      %c0_15 = arith.constant 0 : index
      %c0_16 = arith.constant 0 : index
      %19 = vector.load %arg7[%c0_15, %c0_16] : memref<128x128xbf16, #tpu.memory_space<vmem>>, vector<128x128xbf16>
      %20 = arith.extf %19 : vector<128x128xbf16> to vector<128x128xf32>
      %21 = arith.addf %18, %20 : vector<128x128xf32>
      %cst_17 = arith.constant 0.000000e+00 : f32
      %22 = vector.broadcast %cst_17 : f32 to vector<128x128xf32>
      %23 = arith.maximumf %21, %22 : vector<128x128xf32>
      %24 = arith.truncf %23 : vector<128x128xf32> to vector<128x128xbf16>
      %c0_18 = arith.constant 0 : index
      %c0_19 = arith.constant 0 : index
      %25 = vector.load %arg8[%c0_18, %c0_19] : memref<128x128xbf16, #tpu.memory_space<vmem>>, vector<128x128xbf16>
      tpu.vector_store %arg8[%c0_18, %c0_19], %24 {strides = array<i32>} : memref<128x128xbf16, #tpu.memory_space<vmem>>, vector<128x128xbf16>,
    } else {
    }
    return
  }
  func.func @transform_0(%arg0: i32, %arg1: i32, %arg2: i32) -> (i32, i32) {
    %c0_i32 = arith.constant 0 : i32
    return %arg0, %arg2 : i32, i32
  }
  func.func @transform_1(%arg0: i32, %arg1: i32, %arg2: i32) -> (i32, i32) {
    %c0_i32 = arith.constant 0 : i32
    return %arg2, %arg1 : i32, i32
  }
  func.func @transform_2(%arg0: i32, %arg1: i32, %arg2: i32) -> (i32, i32) {
    %c0_i32 = arith.constant 0 : i32
    %c0_i32_0 = arith.constant 0 : i32
    return %c0_i32, %arg1 : i32, i32
  }
  func.func @transform_3(%arg0: i32, %arg1: i32, %arg2: i32) -> (i32, i32) {
    %c0_i32 = arith.constant 0 : i32
    %c0_i32_0 = arith.constant 0 : i32
    return %c0_i32, %arg1 : i32, i32
  }
  func.func @transform_4(%arg0: i32, %arg1: i32, %arg2: i32) -> (i32, i32) {
    %c0_i32 = arith.constant 0 : i32
    return %arg0, %arg1 : i32, i32
  }
  func.func @transform_5(%arg0: i32, %arg1: i32, %arg2: i32) -> (i32, i32) {
    %c0_i32 = arith.constant 0 : i32
    return %arg0, %arg1 : i32, i32
  }
}

module attributes {stable_mosaic.version = 11 : i64} {
  func.func @_mm_bn_kernel(%arg0: i32, %arg1: i32, %arg2: i32, %arg3: memref<128x384xbf16, #tpu.memory_space<vmem>>, %arg4: memref<384x128xbf16, #tpu.memory_space<vmem>>, %arg5: memref<1x128xf32, #tpu.memory_space<vmem>>, %arg6: memref<1x128xf32, #tpu.memory_space<vmem>>, %arg7: memref<128x128xbf16, #tpu.memory_space<vmem>>, %arg8: memref<128x128xf32, #tpu.memory_space<vmem>>) attributes {dimension_semantics = [#tpu.dimension_semantics<parallel>, #tpu.dimension_semantics<parallel>, #tpu.dimension_semantics<arbitrary>], iteration_bounds = array<i64: 1, 2, 18>, scalar_prefetch = 0 : i64, scratch_operands = 1 : i64, tpu.core_type = #tpu.core_type<tc>, window_params = [{transform_indices = @transform_0, window_bounds = array<i64: 128, 384>}, {transform_indices = @transform_1, window_bounds = array<i64: 384, 128>}, {transform_indices = @transform_2, window_bounds = array<i64: 1, 128>}, {transform_indices = @transform_3, window_bounds = array<i64: 1, 128>}, {transform_indices = @transform_4, window_bounds = array<i64: 128, 128>}]} {
    %c0_i32 = arith.constant 0 : i32
    %0 = arith.cmpi eq, %arg2, %c0_i32 : i32
    %1 = arith.extui %0 : i1 to i32
    %c0_i32_0 = arith.constant 0 : i32
    %2 = arith.cmpi ne, %1, %c0_i32_0 : i32
    scf.if %2 {
      %cst_9 = arith.constant 0.000000e+00 : f32
      %12 = vector.broadcast %cst_9 : f32 to vector<128x128xf32>
      %c0_10 = arith.constant 0 : index
      %c0_11 = arith.constant 0 : index
      %13 = vector.load %arg8[%c0_10, %c0_11] : memref<128x128xf32, #tpu.memory_space<vmem>>, vector<128x128xf32>
      tpu.vector_store %arg8[%c0_10, %c0_11], %12 {strides = array<i32>} : memref<128x128xf32, #tpu.memory_space<vmem>>, vector<128x128xf32>,
    } else {
    }
    %c0 = arith.constant 0 : index
    %c0_1 = arith.constant 0 : index
    %3 = vector.load %arg8[%c0, %c0_1] : memref<128x128xf32, #tpu.memory_space<vmem>>, vector<128x128xf32>
    %c0_2 = arith.constant 0 : index
    %c0_3 = arith.constant 0 : index
    %4 = vector.load %arg3[%c0_2, %c0_3] : memref<128x384xbf16, #tpu.memory_space<vmem>>, vector<128x384xbf16>
    %c0_4 = arith.constant 0 : index
    %c0_5 = arith.constant 0 : index
    %5 = vector.load %arg4[%c0_4, %c0_5] : memref<384x128xbf16, #tpu.memory_space<vmem>>, vector<384x128xbf16>
    %cst = arith.constant dense<0.000000e+00> : vector<128x128xf32>
    %6 = tpu.matmul %4, %5, %cst {dimension_numbers = #tpu.dot_dimension_numbers<[1], [0], [0], [1], [0, 0, 1, 1], [], []>} : vector<128x384xbf16>, vector<384x128xbf16>, vector<128x128xf32> -> vector<128x128xf32>
    %7 = arith.addf %3, %6 : vector<128x128xf32>
    %c0_6 = arith.constant 0 : index
    %c0_7 = arith.constant 0 : index
    %8 = vector.load %arg8[%c0_6, %c0_7] : memref<128x128xf32, #tpu.memory_space<vmem>>, vector<128x128xf32>
    tpu.vector_store %arg8[%c0_6, %c0_7], %7 {strides = array<i32>} : memref<128x128xf32, #tpu.memory_space<vmem>>, vector<128x128xf32>,
    %c17_i32 = arith.constant 17 : i32
    %9 = arith.cmpi eq, %arg2, %c17_i32 : i32
    %10 = arith.extui %9 : i1 to i32
    %c0_i32_8 = arith.constant 0 : i32
    %11 = arith.cmpi ne, %10, %c0_i32_8 : i32
    scf.if %11 {
      %c0_9 = arith.constant 0 : index
      %c0_10 = arith.constant 0 : index
      %12 = vector.load %arg8[%c0_9, %c0_10] : memref<128x128xf32, #tpu.memory_space<vmem>>, vector<128x128xf32>
      %c0_11 = arith.constant 0 : index
      %c0_12 = arith.constant 0 : index
      %13 = vector.load %arg5[%c0_11, %c0_12] : memref<1x128xf32, #tpu.memory_space<vmem>>, vector<1x128xf32>
      %14 = vector.broadcast %13 : vector<1x128xf32> to vector<128x128xf32>
      %15 = arith.mulf %12, %14 : vector<128x128xf32>
      %c0_13 = arith.constant 0 : index
      %c0_14 = arith.constant 0 : index
      %16 = vector.load %arg6[%c0_13, %c0_14] : memref<1x128xf32, #tpu.memory_space<vmem>>, vector<1x128xf32>
      %17 = vector.broadcast %16 : vector<1x128xf32> to vector<128x128xf32>
      %18 = arith.addf %15, %17 : vector<128x128xf32>
      %cst_15 = arith.constant 0.000000e+00 : f32
      %19 = vector.broadcast %cst_15 : f32 to vector<128x128xf32>
      %20 = arith.maximumf %18, %19 : vector<128x128xf32>
      %21 = arith.truncf %20 : vector<128x128xf32> to vector<128x128xbf16>
      %c0_16 = arith.constant 0 : index
      %c0_17 = arith.constant 0 : index
      %22 = vector.load %arg7[%c0_16, %c0_17] : memref<128x128xbf16, #tpu.memory_space<vmem>>, vector<128x128xbf16>
      tpu.vector_store %arg7[%c0_16, %c0_17], %21 {strides = array<i32>} : memref<128x128xbf16, #tpu.memory_space<vmem>>, vector<128x128xbf16>,
    } else {
    }
    return
  }
  func.func @transform_0(%arg0: i32, %arg1: i32, %arg2: i32) -> (i32, i32) {
    %c0_i32 = arith.constant 0 : i32
    return %arg0, %arg2 : i32, i32
  }
  func.func @transform_1(%arg0: i32, %arg1: i32, %arg2: i32) -> (i32, i32) {
    %c0_i32 = arith.constant 0 : i32
    return %arg2, %arg1 : i32, i32
  }
  func.func @transform_2(%arg0: i32, %arg1: i32, %arg2: i32) -> (i32, i32) {
    %c0_i32 = arith.constant 0 : i32
    %c0_i32_0 = arith.constant 0 : i32
    return %c0_i32, %arg1 : i32, i32
  }
  func.func @transform_3(%arg0: i32, %arg1: i32, %arg2: i32) -> (i32, i32) {
    %c0_i32 = arith.constant 0 : i32
    %c0_i32_0 = arith.constant 0 : i32
    return %c0_i32, %arg1 : i32, i32
  }
  func.func @transform_4(%arg0: i32, %arg1: i32, %arg2: i32) -> (i32, i32) {
    %c0_i32 = arith.constant 0 : i32
    return %arg0, %arg1 : i32, i32
  }
}

module attributes {stable_mosaic.version = 11 : i64} {
  func.func @_mm_bn_kernel(%arg0: i32, %arg1: i32, %arg2: i32, %arg3: memref<16x256xbf16, #tpu.memory_space<vmem>>, %arg4: memref<256x256xbf16, #tpu.memory_space<vmem>>, %arg5: memref<1x256xf32, #tpu.memory_space<vmem>>, %arg6: memref<1x256xf32, #tpu.memory_space<vmem>>, %arg7: memref<16x256xbf16, #tpu.memory_space<vmem>>, %arg8: memref<16x256xf32, #tpu.memory_space<vmem>>) attributes {dimension_semantics = [#tpu.dimension_semantics<parallel>, #tpu.dimension_semantics<parallel>, #tpu.dimension_semantics<arbitrary>], iteration_bounds = array<i64: 1, 2, 1>, scalar_prefetch = 0 : i64, scratch_operands = 1 : i64, tpu.core_type = #tpu.core_type<tc>, window_params = [{transform_indices = @transform_0, window_bounds = array<i64: 16, 256>}, {transform_indices = @transform_1, window_bounds = array<i64: 256, 256>}, {transform_indices = @transform_2, window_bounds = array<i64: 1, 256>}, {transform_indices = @transform_3, window_bounds = array<i64: 1, 256>}, {transform_indices = @transform_4, window_bounds = array<i64: 16, 256>}]} {
    %c0_i32 = arith.constant 0 : i32
    %0 = arith.cmpi eq, %arg2, %c0_i32 : i32
    %1 = arith.extui %0 : i1 to i32
    %c0_i32_0 = arith.constant 0 : i32
    %2 = arith.cmpi ne, %1, %c0_i32_0 : i32
    scf.if %2 {
      %cst_10 = arith.constant 0.000000e+00 : f32
      %12 = vector.broadcast %cst_10 : f32 to vector<16x256xf32>
      %c0_11 = arith.constant 0 : index
      %c0_12 = arith.constant 0 : index
      %13 = vector.load %arg8[%c0_11, %c0_12] : memref<16x256xf32, #tpu.memory_space<vmem>>, vector<16x256xf32>
      tpu.vector_store %arg8[%c0_11, %c0_12], %12 {strides = array<i32>} : memref<16x256xf32, #tpu.memory_space<vmem>>, vector<16x256xf32>,
    } else {
    }
    %c0 = arith.constant 0 : index
    %c0_1 = arith.constant 0 : index
    %3 = vector.load %arg8[%c0, %c0_1] : memref<16x256xf32, #tpu.memory_space<vmem>>, vector<16x256xf32>
    %c0_2 = arith.constant 0 : index
    %c0_3 = arith.constant 0 : index
    %4 = vector.load %arg3[%c0_2, %c0_3] : memref<16x256xbf16, #tpu.memory_space<vmem>>, vector<16x256xbf16>
    %c0_4 = arith.constant 0 : index
    %c0_5 = arith.constant 0 : index
    %5 = vector.load %arg4[%c0_4, %c0_5] : memref<256x256xbf16, #tpu.memory_space<vmem>>, vector<256x256xbf16>
    %cst = arith.constant dense<0.000000e+00> : vector<16x256xf32>
    %6 = tpu.matmul %4, %5, %cst {dimension_numbers = #tpu.dot_dimension_numbers<[1], [0], [0], [1], [0, 0, 1, 1], [], []>} : vector<16x256xbf16>, vector<256x256xbf16>, vector<16x256xf32> -> vector<16x256xf32>
    %7 = arith.addf %3, %6 : vector<16x256xf32>
    %c0_6 = arith.constant 0 : index
    %c0_7 = arith.constant 0 : index
    %8 = vector.load %arg8[%c0_6, %c0_7] : memref<16x256xf32, #tpu.memory_space<vmem>>, vector<16x256xf32>
    tpu.vector_store %arg8[%c0_6, %c0_7], %7 {strides = array<i32>} : memref<16x256xf32, #tpu.memory_space<vmem>>, vector<16x256xf32>,
    %c0_i32_8 = arith.constant 0 : i32
    %9 = arith.cmpi eq, %arg2, %c0_i32_8 : i32
    %10 = arith.extui %9 : i1 to i32
    %c0_i32_9 = arith.constant 0 : i32
    %11 = arith.cmpi ne, %10, %c0_i32_9 : i32
    scf.if %11 {
      %c0_10 = arith.constant 0 : index
      %c0_11 = arith.constant 0 : index
      %12 = vector.load %arg8[%c0_10, %c0_11] : memref<16x256xf32, #tpu.memory_space<vmem>>, vector<16x256xf32>
      %c0_12 = arith.constant 0 : index
      %c0_13 = arith.constant 0 : index
      %13 = vector.load %arg5[%c0_12, %c0_13] : memref<1x256xf32, #tpu.memory_space<vmem>>, vector<1x256xf32>
      %14 = vector.broadcast %13 : vector<1x256xf32> to vector<16x256xf32>
      %15 = arith.mulf %12, %14 : vector<16x256xf32>
      %c0_14 = arith.constant 0 : index
      %c0_15 = arith.constant 0 : index
      %16 = vector.load %arg6[%c0_14, %c0_15] : memref<1x256xf32, #tpu.memory_space<vmem>>, vector<1x256xf32>
      %17 = vector.broadcast %16 : vector<1x256xf32> to vector<16x256xf32>
      %18 = arith.addf %15, %17 : vector<16x256xf32>
      %19 = arith.truncf %18 : vector<16x256xf32> to vector<16x256xbf16>
      %c0_16 = arith.constant 0 : index
      %c0_17 = arith.constant 0 : index
      %20 = vector.load %arg7[%c0_16, %c0_17] : memref<16x256xbf16, #tpu.memory_space<vmem>>, vector<16x256xbf16>
      tpu.vector_store %arg7[%c0_16, %c0_17], %19 {strides = array<i32>} : memref<16x256xbf16, #tpu.memory_space<vmem>>, vector<16x256xbf16>,
    } else {
    }
    return
  }
  func.func @transform_0(%arg0: i32, %arg1: i32, %arg2: i32) -> (i32, i32) {
    %c0_i32 = arith.constant 0 : i32
    return %arg0, %arg2 : i32, i32
  }
  func.func @transform_1(%arg0: i32, %arg1: i32, %arg2: i32) -> (i32, i32) {
    %c0_i32 = arith.constant 0 : i32
    return %arg2, %arg1 : i32, i32
  }
  func.func @transform_2(%arg0: i32, %arg1: i32, %arg2: i32) -> (i32, i32) {
    %c0_i32 = arith.constant 0 : i32
    %c0_i32_0 = arith.constant 0 : i32
    return %c0_i32, %arg1 : i32, i32
  }
  func.func @transform_3(%arg0: i32, %arg1: i32, %arg2: i32) -> (i32, i32) {
    %c0_i32 = arith.constant 0 : i32
    %c0_i32_0 = arith.constant 0 : i32
    return %c0_i32, %arg1 : i32, i32
  }
  func.func @transform_4(%arg0: i32, %arg1: i32, %arg2: i32) -> (i32, i32) {
    %c0_i32 = arith.constant 0 : i32
    return %arg0, %arg1 : i32, i32
  }
}

module attributes {stable_mosaic.version = 11 : i64} {
  func.func @_mm_bn_kernel(%arg0: i32, %arg1: i32, %arg2: i32, %arg3: memref<16x384xbf16, #tpu.memory_space<vmem>>, %arg4: memref<384x256xbf16, #tpu.memory_space<vmem>>, %arg5: memref<1x256xf32, #tpu.memory_space<vmem>>, %arg6: memref<1x256xf32, #tpu.memory_space<vmem>>, %arg7: memref<16x256xbf16, #tpu.memory_space<vmem>>, %arg8: memref<16x256xf32, #tpu.memory_space<vmem>>) attributes {dimension_semantics = [#tpu.dimension_semantics<parallel>, #tpu.dimension_semantics<parallel>, #tpu.dimension_semantics<arbitrary>], iteration_bounds = array<i64: 1, 2, 18>, scalar_prefetch = 0 : i64, scratch_operands = 1 : i64, tpu.core_type = #tpu.core_type<tc>, window_params = [{transform_indices = @transform_0, window_bounds = array<i64: 16, 384>}, {transform_indices = @transform_1, window_bounds = array<i64: 384, 256>}, {transform_indices = @transform_2, window_bounds = array<i64: 1, 256>}, {transform_indices = @transform_3, window_bounds = array<i64: 1, 256>}, {transform_indices = @transform_4, window_bounds = array<i64: 16, 256>}]} {
    %c0_i32 = arith.constant 0 : i32
    %0 = arith.cmpi eq, %arg2, %c0_i32 : i32
    %1 = arith.extui %0 : i1 to i32
    %c0_i32_0 = arith.constant 0 : i32
    %2 = arith.cmpi ne, %1, %c0_i32_0 : i32
    scf.if %2 {
      %cst_9 = arith.constant 0.000000e+00 : f32
      %12 = vector.broadcast %cst_9 : f32 to vector<16x256xf32>
      %c0_10 = arith.constant 0 : index
      %c0_11 = arith.constant 0 : index
      %13 = vector.load %arg8[%c0_10, %c0_11] : memref<16x256xf32, #tpu.memory_space<vmem>>, vector<16x256xf32>
      tpu.vector_store %arg8[%c0_10, %c0_11], %12 {strides = array<i32>} : memref<16x256xf32, #tpu.memory_space<vmem>>, vector<16x256xf32>,
    } else {
    }
    %c0 = arith.constant 0 : index
    %c0_1 = arith.constant 0 : index
    %3 = vector.load %arg8[%c0, %c0_1] : memref<16x256xf32, #tpu.memory_space<vmem>>, vector<16x256xf32>
    %c0_2 = arith.constant 0 : index
    %c0_3 = arith.constant 0 : index
    %4 = vector.load %arg3[%c0_2, %c0_3] : memref<16x384xbf16, #tpu.memory_space<vmem>>, vector<16x384xbf16>
    %c0_4 = arith.constant 0 : index
    %c0_5 = arith.constant 0 : index
    %5 = vector.load %arg4[%c0_4, %c0_5] : memref<384x256xbf16, #tpu.memory_space<vmem>>, vector<384x256xbf16>
    %cst = arith.constant dense<0.000000e+00> : vector<16x256xf32>
    %6 = tpu.matmul %4, %5, %cst {dimension_numbers = #tpu.dot_dimension_numbers<[1], [0], [0], [1], [0, 0, 1, 1], [], []>} : vector<16x384xbf16>, vector<384x256xbf16>, vector<16x256xf32> -> vector<16x256xf32>
    %7 = arith.addf %3, %6 : vector<16x256xf32>
    %c0_6 = arith.constant 0 : index
    %c0_7 = arith.constant 0 : index
    %8 = vector.load %arg8[%c0_6, %c0_7] : memref<16x256xf32, #tpu.memory_space<vmem>>, vector<16x256xf32>
    tpu.vector_store %arg8[%c0_6, %c0_7], %7 {strides = array<i32>} : memref<16x256xf32, #tpu.memory_space<vmem>>, vector<16x256xf32>,
    %c17_i32 = arith.constant 17 : i32
    %9 = arith.cmpi eq, %arg2, %c17_i32 : i32
    %10 = arith.extui %9 : i1 to i32
    %c0_i32_8 = arith.constant 0 : i32
    %11 = arith.cmpi ne, %10, %c0_i32_8 : i32
    scf.if %11 {
      %c0_9 = arith.constant 0 : index
      %c0_10 = arith.constant 0 : index
      %12 = vector.load %arg8[%c0_9, %c0_10] : memref<16x256xf32, #tpu.memory_space<vmem>>, vector<16x256xf32>
      %c0_11 = arith.constant 0 : index
      %c0_12 = arith.constant 0 : index
      %13 = vector.load %arg5[%c0_11, %c0_12] : memref<1x256xf32, #tpu.memory_space<vmem>>, vector<1x256xf32>
      %14 = vector.broadcast %13 : vector<1x256xf32> to vector<16x256xf32>
      %15 = arith.mulf %12, %14 : vector<16x256xf32>
      %c0_13 = arith.constant 0 : index
      %c0_14 = arith.constant 0 : index
      %16 = vector.load %arg6[%c0_13, %c0_14] : memref<1x256xf32, #tpu.memory_space<vmem>>, vector<1x256xf32>
      %17 = vector.broadcast %16 : vector<1x256xf32> to vector<16x256xf32>
      %18 = arith.addf %15, %17 : vector<16x256xf32>
      %cst_15 = arith.constant 0.000000e+00 : f32
      %19 = vector.broadcast %cst_15 : f32 to vector<16x256xf32>
      %20 = arith.maximumf %18, %19 : vector<16x256xf32>
      %21 = arith.truncf %20 : vector<16x256xf32> to vector<16x256xbf16>
      %c0_16 = arith.constant 0 : index
      %c0_17 = arith.constant 0 : index
      %22 = vector.load %arg7[%c0_16, %c0_17] : memref<16x256xbf16, #tpu.memory_space<vmem>>, vector<16x256xbf16>
      tpu.vector_store %arg7[%c0_16, %c0_17], %21 {strides = array<i32>} : memref<16x256xbf16, #tpu.memory_space<vmem>>, vector<16x256xbf16>,
    } else {
    }
    return
  }
  func.func @transform_0(%arg0: i32, %arg1: i32, %arg2: i32) -> (i32, i32) {
    %c0_i32 = arith.constant 0 : i32
    return %arg0, %arg2 : i32, i32
  }
  func.func @transform_1(%arg0: i32, %arg1: i32, %arg2: i32) -> (i32, i32) {
    %c0_i32 = arith.constant 0 : i32
    return %arg2, %arg1 : i32, i32
  }
  func.func @transform_2(%arg0: i32, %arg1: i32, %arg2: i32) -> (i32, i32) {
    %c0_i32 = arith.constant 0 : i32
    %c0_i32_0 = arith.constant 0 : i32
    return %c0_i32, %arg1 : i32, i32
  }
  func.func @transform_3(%arg0: i32, %arg1: i32, %arg2: i32) -> (i32, i32) {
    %c0_i32 = arith.constant 0 : i32
    %c0_i32_0 = arith.constant 0 : i32
    return %c0_i32, %arg1 : i32, i32
  }
  func.func @transform_4(%arg0: i32, %arg1: i32, %arg2: i32) -> (i32, i32) {
    %c0_i32 = arith.constant 0 : i32
    return %arg0, %arg1 : i32, i32
  }
}

module attributes {stable_mosaic.version = 11 : i64} {
  func.func @_head_kernel(%arg0: i32, %arg1: memref<2xi32, #tpu.memory_space<smem>>, %arg2: memref<1x8x512xbf16, #tpu.memory_space<vmem>>, %arg3: memref<1x512x128xbf16, #tpu.memory_space<vmem>>, %arg4: memref<1x1x128xf32, #tpu.memory_space<vmem>>, %arg5: memref<1x1x128xf32, #tpu.memory_space<vmem>>) attributes {dimension_semantics = [#tpu.dimension_semantics<arbitrary>], iteration_bounds = array<i64: 2>, scalar_prefetch = 1 : i64, scratch_operands = 0 : i64, tpu.core_type = #tpu.core_type<tc>, window_params = [{transform_indices = @transform_0, window_bounds = array<i64: 1, 8, 512>}, {transform_indices = @transform_1, window_bounds = array<i64: 1, 512, 128>}, {transform_indices = @transform_2, window_bounds = array<i64: 1, 1, 128>}, {transform_indices = @transform_3, window_bounds = array<i64: 1, 1, 128>}]} {
    %c0 = arith.constant 0 : index
    %c0_0 = arith.constant 0 : index
    %c0_1 = arith.constant 0 : index
    %0 = vector.load %arg2[%c0, %c0_0, %c0_1] : memref<1x8x512xbf16, #tpu.memory_space<vmem>>, vector<1x8x512xbf16>
    %1 = vector.shape_cast %0 : vector<1x8x512xbf16> to vector<8x512xbf16>
    %2 = arith.extf %1 : vector<8x512xbf16> to vector<8x512xf32>
    %cst = arith.constant dense<0.000000e+00> : vector<512xf32>
    %3 = vector.multi_reduction <add>, %2, %cst [0] : vector<8x512xf32> to vector<512xf32>
    %4 = vector.shape_cast %3 : vector<512xf32> to vector<1x512xf32>
    %cst_2 = arith.constant 8.000000e+00 : f32
    %5 = vector.broadcast %cst_2 : f32 to vector<1x512xf32>
    %6 = arith.divf %4, %5 : vector<1x512xf32>
    %7 = arith.truncf %6 : vector<1x512xf32> to vector<1x512xbf16>
    %c0_3 = arith.constant 0 : index
    %c0_4 = arith.constant 0 : index
    %c0_5 = arith.constant 0 : index
    %8 = vector.load %arg3[%c0_3, %c0_4, %c0_5] : memref<1x512x128xbf16, #tpu.memory_space<vmem>>, vector<1x512x128xbf16>
    %9 = vector.shape_cast %8 : vector<1x512x128xbf16> to vector<512x128xbf16>
    %cst_6 = arith.constant dense<0.000000e+00> : vector<1x128xf32>
    %10 = tpu.matmul %7, %9, %cst_6 {dimension_numbers = #tpu.dot_dimension_numbers<[1], [0], [0], [1], [0, 0, 1, 1], [], []>} : vector<1x512xbf16>, vector<512x128xbf16>, vector<1x128xf32> -> vector<1x128xf32>
    %c0_7 = arith.constant 0 : index
    %c0_8 = arith.constant 0 : index
    %c0_9 = arith.constant 0 : index
    %11 = vector.load %arg4[%c0_7, %c0_8, %c0_9] : memref<1x1x128xf32, #tpu.memory_space<vmem>>, vector<1x1x128xf32>
    %12 = vector.shape_cast %11 : vector<1x1x128xf32> to vector<1x128xf32>
    %13 = arith.addf %10, %12 : vector<1x128xf32>
    %c0_10 = arith.constant 0 : index
    %c0_11 = arith.constant 0 : index
    %c0_12 = arith.constant 0 : index
    %14 = vector.load %arg5[%c0_10, %c0_11, %c0_12] : memref<1x1x128xf32, #tpu.memory_space<vmem>>, vector<1x1x128xf32>
    %15 = vector.shape_cast %14 : vector<1x1x128xf32> to vector<1x128xf32>
    %16 = vector.shape_cast %13 : vector<1x128xf32> to vector<1x1x128xf32>
    tpu.vector_store %arg5[%c0_10, %c0_11, %c0_12], %16 {strides = array<i32>} : memref<1x1x128xf32, #tpu.memory_space<vmem>>, vector<1x1x128xf32>,
    return
  }
  func.func @transform_0(%arg0: i32, %arg1: memref<2xi32, #tpu.memory_space<smem>>) -> (i32, i32, i32) {
    %c0_i32 = arith.constant 0 : i32
    %c0_i32_0 = arith.constant 0 : i32
    %c0_i32_1 = arith.constant 0 : i32
    return %arg0, %c0_i32, %c0_i32_0 : i32, i32, i32
  }
  func.func @transform_1(%arg0: i32, %arg1: memref<2xi32, #tpu.memory_space<smem>>) -> (i32, i32, i32) {
    %0 = arith.index_cast %arg0 : i32 to index
    %1 = memref.load %arg1[%0] : memref<2xi32, #tpu.memory_space<smem>>
    %c0_i32 = arith.constant 0 : i32
    %c0_i32_0 = arith.constant 0 : i32
    %c0_i32_1 = arith.constant 0 : i32
    return %1, %c0_i32, %c0_i32_0 : i32, i32, i32
  }
  func.func @transform_2(%arg0: i32, %arg1: memref<2xi32, #tpu.memory_space<smem>>) -> (i32, i32, i32) {
    %0 = arith.index_cast %arg0 : i32 to index
    %1 = memref.load %arg1[%0] : memref<2xi32, #tpu.memory_space<smem>>
    %c0_i32 = arith.constant 0 : i32
    %c0_i32_0 = arith.constant 0 : i32
    %c0_i32_1 = arith.constant 0 : i32
    return %1, %c0_i32, %c0_i32_0 : i32, i32, i32
  }
  func.func @transform_3(%arg0: i32, %arg1: memref<2xi32, #tpu.memory_space<smem>>) -> (i32, i32, i32) {
    %c0_i32 = arith.constant 0 : i32
    %c0_i32_0 = arith.constant 0 : i32
    %c0_i32_1 = arith.constant 0 : i32
    return %arg0, %c0_i32, %c0_i32_0 : i32, i32, i32
  }
}

module attributes {stable_mosaic.version = 11 : i64} {
  func.func @_mm_bn_kernel(%arg0: i32, %arg1: i32, %arg2: i32, %arg3: memref<16x512xbf16, #tpu.memory_space<vmem>>, %arg4: memref<512x256xbf16, #tpu.memory_space<vmem>>, %arg5: memref<1x256xf32, #tpu.memory_space<vmem>>, %arg6: memref<1x256xf32, #tpu.memory_space<vmem>>, %arg7: memref<16x256xbf16, #tpu.memory_space<vmem>>, %arg8: memref<16x256xf32, #tpu.memory_space<vmem>>) attributes {dimension_semantics = [#tpu.dimension_semantics<parallel>, #tpu.dimension_semantics<parallel>, #tpu.dimension_semantics<arbitrary>], iteration_bounds = array<i64: 1, 2, 27>, scalar_prefetch = 0 : i64, scratch_operands = 1 : i64, tpu.core_type = #tpu.core_type<tc>, window_params = [{transform_indices = @transform_0, window_bounds = array<i64: 16, 512>}, {transform_indices = @transform_1, window_bounds = array<i64: 512, 256>}, {transform_indices = @transform_2, window_bounds = array<i64: 1, 256>}, {transform_indices = @transform_3, window_bounds = array<i64: 1, 256>}, {transform_indices = @transform_4, window_bounds = array<i64: 16, 256>}]} {
    %c0_i32 = arith.constant 0 : i32
    %0 = arith.cmpi eq, %arg2, %c0_i32 : i32
    %1 = arith.extui %0 : i1 to i32
    %c0_i32_0 = arith.constant 0 : i32
    %2 = arith.cmpi ne, %1, %c0_i32_0 : i32
    scf.if %2 {
      %cst_9 = arith.constant 0.000000e+00 : f32
      %12 = vector.broadcast %cst_9 : f32 to vector<16x256xf32>
      %c0_10 = arith.constant 0 : index
      %c0_11 = arith.constant 0 : index
      %13 = vector.load %arg8[%c0_10, %c0_11] : memref<16x256xf32, #tpu.memory_space<vmem>>, vector<16x256xf32>
      tpu.vector_store %arg8[%c0_10, %c0_11], %12 {strides = array<i32>} : memref<16x256xf32, #tpu.memory_space<vmem>>, vector<16x256xf32>,
    } else {
    }
    %c0 = arith.constant 0 : index
    %c0_1 = arith.constant 0 : index
    %3 = vector.load %arg8[%c0, %c0_1] : memref<16x256xf32, #tpu.memory_space<vmem>>, vector<16x256xf32>
    %c0_2 = arith.constant 0 : index
    %c0_3 = arith.constant 0 : index
    %4 = vector.load %arg3[%c0_2, %c0_3] : memref<16x512xbf16, #tpu.memory_space<vmem>>, vector<16x512xbf16>
    %c0_4 = arith.constant 0 : index
    %c0_5 = arith.constant 0 : index
    %5 = vector.load %arg4[%c0_4, %c0_5] : memref<512x256xbf16, #tpu.memory_space<vmem>>, vector<512x256xbf16>
    %cst = arith.constant dense<0.000000e+00> : vector<16x256xf32>
    %6 = tpu.matmul %4, %5, %cst {dimension_numbers = #tpu.dot_dimension_numbers<[1], [0], [0], [1], [0, 0, 1, 1], [], []>} : vector<16x512xbf16>, vector<512x256xbf16>, vector<16x256xf32> -> vector<16x256xf32>
    %7 = arith.addf %3, %6 : vector<16x256xf32>
    %c0_6 = arith.constant 0 : index
    %c0_7 = arith.constant 0 : index
    %8 = vector.load %arg8[%c0_6, %c0_7] : memref<16x256xf32, #tpu.memory_space<vmem>>, vector<16x256xf32>
    tpu.vector_store %arg8[%c0_6, %c0_7], %7 {strides = array<i32>} : memref<16x256xf32, #tpu.memory_space<vmem>>, vector<16x256xf32>,
    %c26_i32 = arith.constant 26 : i32
    %9 = arith.cmpi eq, %arg2, %c26_i32 : i32
    %10 = arith.extui %9 : i1 to i32
    %c0_i32_8 = arith.constant 0 : i32
    %11 = arith.cmpi ne, %10, %c0_i32_8 : i32
    scf.if %11 {
      %c0_9 = arith.constant 0 : index
      %c0_10 = arith.constant 0 : index
      %12 = vector.load %arg8[%c0_9, %c0_10] : memref<16x256xf32, #tpu.memory_space<vmem>>, vector<16x256xf32>
      %c0_11 = arith.constant 0 : index
      %c0_12 = arith.constant 0 : index
      %13 = vector.load %arg5[%c0_11, %c0_12] : memref<1x256xf32, #tpu.memory_space<vmem>>, vector<1x256xf32>
      %14 = vector.broadcast %13 : vector<1x256xf32> to vector<16x256xf32>
      %15 = arith.mulf %12, %14 : vector<16x256xf32>
      %c0_13 = arith.constant 0 : index
      %c0_14 = arith.constant 0 : index
      %16 = vector.load %arg6[%c0_13, %c0_14] : memref<1x256xf32, #tpu.memory_space<vmem>>, vector<1x256xf32>
      %17 = vector.broadcast %16 : vector<1x256xf32> to vector<16x256xf32>
      %18 = arith.addf %15, %17 : vector<16x256xf32>
      %cst_15 = arith.constant 0.000000e+00 : f32
      %19 = vector.broadcast %cst_15 : f32 to vector<16x256xf32>
      %20 = arith.maximumf %18, %19 : vector<16x256xf32>
      %21 = arith.truncf %20 : vector<16x256xf32> to vector<16x256xbf16>
      %c0_16 = arith.constant 0 : index
      %c0_17 = arith.constant 0 : index
      %22 = vector.load %arg7[%c0_16, %c0_17] : memref<16x256xbf16, #tpu.memory_space<vmem>>, vector<16x256xbf16>
      tpu.vector_store %arg7[%c0_16, %c0_17], %21 {strides = array<i32>} : memref<16x256xbf16, #tpu.memory_space<vmem>>, vector<16x256xbf16>,
    } else {
    }
    return
  }
  func.func @transform_0(%arg0: i32, %arg1: i32, %arg2: i32) -> (i32, i32) {
    %c0_i32 = arith.constant 0 : i32
    return %arg0, %arg2 : i32, i32
  }
  func.func @transform_1(%arg0: i32, %arg1: i32, %arg2: i32) -> (i32, i32) {
    %c0_i32 = arith.constant 0 : i32
    return %arg2, %arg1 : i32, i32
  }
  func.func @transform_2(%arg0: i32, %arg1: i32, %arg2: i32) -> (i32, i32) {
    %c0_i32 = arith.constant 0 : i32
    %c0_i32_0 = arith.constant 0 : i32
    return %c0_i32, %arg1 : i32, i32
  }
  func.func @transform_3(%arg0: i32, %arg1: i32, %arg2: i32) -> (i32, i32) {
    %c0_i32 = arith.constant 0 : i32
    %c0_i32_0 = arith.constant 0 : i32
    return %c0_i32, %arg1 : i32, i32
  }
  func.func @transform_4(%arg0: i32, %arg1: i32, %arg2: i32) -> (i32, i32) {
    %c0_i32 = arith.constant 0 : i32
    return %arg0, %arg1 : i32, i32
  }
}

module attributes {stable_mosaic.version = 11 : i64} {
  func.func @_mm_bn_res_kernel(%arg0: i32, %arg1: i32, %arg2: i32, %arg3: memref<16x512xbf16, #tpu.memory_space<vmem>>, %arg4: memref<512x256xbf16, #tpu.memory_space<vmem>>, %arg5: memref<1x256xf32, #tpu.memory_space<vmem>>, %arg6: memref<1x256xf32, #tpu.memory_space<vmem>>, %arg7: memref<16x256xbf16, #tpu.memory_space<vmem>>, %arg8: memref<16x256xbf16, #tpu.memory_space<vmem>>, %arg9: memref<16x256xf32, #tpu.memory_space<vmem>>) attributes {dimension_semantics = [#tpu.dimension_semantics<parallel>, #tpu.dimension_semantics<parallel>, #tpu.dimension_semantics<arbitrary>], iteration_bounds = array<i64: 1, 2, 27>, scalar_prefetch = 0 : i64, scratch_operands = 1 : i64, tpu.core_type = #tpu.core_type<tc>, window_params = [{transform_indices = @transform_0, window_bounds = array<i64: 16, 512>}, {transform_indices = @transform_1, window_bounds = array<i64: 512, 256>}, {transform_indices = @transform_2, window_bounds = array<i64: 1, 256>}, {transform_indices = @transform_3, window_bounds = array<i64: 1, 256>}, {transform_indices = @transform_4, window_bounds = array<i64: 16, 256>}, {transform_indices = @transform_5, window_bounds = array<i64: 16, 256>}]} {
    %c0_i32 = arith.constant 0 : i32
    %0 = arith.cmpi eq, %arg2, %c0_i32 : i32
    %1 = arith.extui %0 : i1 to i32
    %c0_i32_0 = arith.constant 0 : i32
    %2 = arith.cmpi ne, %1, %c0_i32_0 : i32
    scf.if %2 {
      %cst_9 = arith.constant 0.000000e+00 : f32
      %12 = vector.broadcast %cst_9 : f32 to vector<16x256xf32>
      %c0_10 = arith.constant 0 : index
      %c0_11 = arith.constant 0 : index
      %13 = vector.load %arg9[%c0_10, %c0_11] : memref<16x256xf32, #tpu.memory_space<vmem>>, vector<16x256xf32>
      tpu.vector_store %arg9[%c0_10, %c0_11], %12 {strides = array<i32>} : memref<16x256xf32, #tpu.memory_space<vmem>>, vector<16x256xf32>,
    } else {
    }
    %c0 = arith.constant 0 : index
    %c0_1 = arith.constant 0 : index
    %3 = vector.load %arg9[%c0, %c0_1] : memref<16x256xf32, #tpu.memory_space<vmem>>, vector<16x256xf32>
    %c0_2 = arith.constant 0 : index
    %c0_3 = arith.constant 0 : index
    %4 = vector.load %arg3[%c0_2, %c0_3] : memref<16x512xbf16, #tpu.memory_space<vmem>>, vector<16x512xbf16>
    %c0_4 = arith.constant 0 : index
    %c0_5 = arith.constant 0 : index
    %5 = vector.load %arg4[%c0_4, %c0_5] : memref<512x256xbf16, #tpu.memory_space<vmem>>, vector<512x256xbf16>
    %cst = arith.constant dense<0.000000e+00> : vector<16x256xf32>
    %6 = tpu.matmul %4, %5, %cst {dimension_numbers = #tpu.dot_dimension_numbers<[1], [0], [0], [1], [0, 0, 1, 1], [], []>} : vector<16x512xbf16>, vector<512x256xbf16>, vector<16x256xf32> -> vector<16x256xf32>
    %7 = arith.addf %3, %6 : vector<16x256xf32>
    %c0_6 = arith.constant 0 : index
    %c0_7 = arith.constant 0 : index
    %8 = vector.load %arg9[%c0_6, %c0_7] : memref<16x256xf32, #tpu.memory_space<vmem>>, vector<16x256xf32>
    tpu.vector_store %arg9[%c0_6, %c0_7], %7 {strides = array<i32>} : memref<16x256xf32, #tpu.memory_space<vmem>>, vector<16x256xf32>,
    %c26_i32 = arith.constant 26 : i32
    %9 = arith.cmpi eq, %arg2, %c26_i32 : i32
    %10 = arith.extui %9 : i1 to i32
    %c0_i32_8 = arith.constant 0 : i32
    %11 = arith.cmpi ne, %10, %c0_i32_8 : i32
    scf.if %11 {
      %c0_9 = arith.constant 0 : index
      %c0_10 = arith.constant 0 : index
      %12 = vector.load %arg9[%c0_9, %c0_10] : memref<16x256xf32, #tpu.memory_space<vmem>>, vector<16x256xf32>
      %c0_11 = arith.constant 0 : index
      %c0_12 = arith.constant 0 : index
      %13 = vector.load %arg5[%c0_11, %c0_12] : memref<1x256xf32, #tpu.memory_space<vmem>>, vector<1x256xf32>
      %14 = vector.broadcast %13 : vector<1x256xf32> to vector<16x256xf32>
      %15 = arith.mulf %12, %14 : vector<16x256xf32>
      %c0_13 = arith.constant 0 : index
      %c0_14 = arith.constant 0 : index
      %16 = vector.load %arg6[%c0_13, %c0_14] : memref<1x256xf32, #tpu.memory_space<vmem>>, vector<1x256xf32>
      %17 = vector.broadcast %16 : vector<1x256xf32> to vector<16x256xf32>
      %18 = arith.addf %15, %17 : vector<16x256xf32>
      %c0_15 = arith.constant 0 : index
      %c0_16 = arith.constant 0 : index
      %19 = vector.load %arg7[%c0_15, %c0_16] : memref<16x256xbf16, #tpu.memory_space<vmem>>, vector<16x256xbf16>
      %20 = arith.extf %19 : vector<16x256xbf16> to vector<16x256xf32>
      %21 = arith.addf %18, %20 : vector<16x256xf32>
      %cst_17 = arith.constant 0.000000e+00 : f32
      %22 = vector.broadcast %cst_17 : f32 to vector<16x256xf32>
      %23 = arith.maximumf %21, %22 : vector<16x256xf32>
      %24 = arith.truncf %23 : vector<16x256xf32> to vector<16x256xbf16>
      %c0_18 = arith.constant 0 : index
      %c0_19 = arith.constant 0 : index
      %25 = vector.load %arg8[%c0_18, %c0_19] : memref<16x256xbf16, #tpu.memory_space<vmem>>, vector<16x256xbf16>
      tpu.vector_store %arg8[%c0_18, %c0_19], %24 {strides = array<i32>} : memref<16x256xbf16, #tpu.memory_space<vmem>>, vector<16x256xbf16>,
    } else {
    }
    return
  }
  func.func @transform_0(%arg0: i32, %arg1: i32, %arg2: i32) -> (i32, i32) {
    %c0_i32 = arith.constant 0 : i32
    return %arg0, %arg2 : i32, i32
  }
  func.func @transform_1(%arg0: i32, %arg1: i32, %arg2: i32) -> (i32, i32) {
    %c0_i32 = arith.constant 0 : i32
    return %arg2, %arg1 : i32, i32
  }
  func.func @transform_2(%arg0: i32, %arg1: i32, %arg2: i32) -> (i32, i32) {
    %c0_i32 = arith.constant 0 : i32
    %c0_i32_0 = arith.constant 0 : i32
    return %c0_i32, %arg1 : i32, i32
  }
  func.func @transform_3(%arg0: i32, %arg1: i32, %arg2: i32) -> (i32, i32) {
    %c0_i32 = arith.constant 0 : i32
    %c0_i32_0 = arith.constant 0 : i32
    return %c0_i32, %arg1 : i32, i32
  }
  func.func @transform_4(%arg0: i32, %arg1: i32, %arg2: i32) -> (i32, i32) {
    %c0_i32 = arith.constant 0 : i32
    return %arg0, %arg1 : i32, i32
  }
  func.func @transform_5(%arg0: i32, %arg1: i32, %arg2: i32) -> (i32, i32) {
    %c0_i32 = arith.constant 0 : i32
    return %arg0, %arg1 : i32, i32
  }
}

</mosaic_0001>

<bundles_post_ra>
// kernel: _lambda_.11
= control target key start
LH: loop header
LB: loop body
LE: loop exit
PB: predicated region body
PF: predicated region fallthrough
CT: control target
= control target key end

     0   :  { %9 = vsyncpa [#allocation4], 0  ;;  %s1498_s0 = inlined_call_operand.vmem [shape: bf16[128,128], index: 0, kind: input, shape index: {}]   ;;  %s1499_s1 = inlined_call_operand.hbm [shape: bf16[128,256], index: 1, kind: input, shape index: {}]   ;;  %s1500_s2 = inlined_call_operand.vmem [shape: f32[1,256], index: 2, kind: input, shape index: {}]   ;;  %s1501_s3 = inlined_call_operand.vmem [shape: f32[1,256], index: 3, kind: input, shape index: {}]   ;;  %s1502_s4 = inlined_call_operand.vmem [shape: bf16[128,256], index: 4, kind: output, shape index: {}]  }
   0x1   :  { %11 = vsyncpa [#allocation4 + $0x1], 0  ;;  %s1323_s15 = smov 0   ;;  %s1325_s16 = smov 0  }
   0x2   :  { %s1327_s17 = smov 0   ;;  %s1329_s18 = smov 0  }
   0x3   :  { %s1331_s19 = smov 0   ;;  %s1333_s20 = smov 0  }
   0x4 LB: > { %s965_s21 = sadd.s32 4294967295, %s1292_s20   ;;  %s32_s22 = sadd.s32 1, %s1288_s19  ;;  %s1292_s20 = sphi %s1333_s20, %s17_s20   ;;  %s1288_s19 = sphi %s1331_s19, %s1511_s19   ;;  %s1284_s18 = sphi %s1329_s18, %s1510_s18   ;;  %s1280_s17 = sphi %s1327_s17, %s1509_s17   ;;  %s1276_s16 = sphi %s1325_s16, %s1508_s16   ;;  %s1272_s15 = sphi %s1323_s15, %s1507_s15  }
   0x5   : > { %p34_p0 = scmp.ge.s32.totalorder %s32_s22, 2  ;;  %s73_s23 = sadd.s32 1, %s1280_s17 }
   0x6   : > { %p80_p1 = scmp.ne.s32.totalorder %s1280_s17, %s1276_s16  ;;  %p81_p2 = scmp.eq.s32.totalorder %s1292_s20, 0 }
   0x7   : > { %s1513_s22 = smov (%p34_p0, %s32_s22), 0  ;;  %p86_p4 = scmp.ne.s32.totalorder %s1276_s16, %s1272_s15 }
   0x8   : > { %p1359_p3 = por %p81_p2, %p80_p1  ;;  %s69_s25 = ssub.s32 %s1288_s19, %s1513_s22 }
   0x9   : > { %p87_p5 = scmp.eq.s32.totalorder %s965_s21, 0  ;;  %p71_p6 = scmp.eq.s32.totalorder %s69_s25, 0 }
   0xa   : > { %p164_p7 = scmp.eq.s32.totalorder %s965_s21, 1  ;;  %p1146_p10 = scmp.lt.s32.totalorder %s1292_s20, 2 }
   0xb   : > { %p1366_p8 = por %p87_p5, %p86_p4  ;;  %s202_s29 = sand.u32 1, %s1280_s17  }
   0xc   : > { %s1371_s27 = scalar_select %p71_p6, %s1280_s17, %s73_s23  }
   0xd   : > { %p1373_p9 = por %p164_p7, %p80_p1  ;;  %s971_s30 = sshll.u32 %s1288_s19, 6 }
   0xe   : > { %s970_s5 = sshll.u32 %s202_s29, 6  ;;  %s214_s8 = scalar_lea.hbm %s1499_s1, %s971_s30 }
   0xf   : > { %s206_s9 = scalar_lea.vmem [#allocation3], %s970_s5  ;;  %p1385_p11 = pnand %p1146_p10, %p1359_p3 }
  0x10   : > { %s215_s10 = sshll.u32 %s206_s9, 4  ;;  %p972_p12 = scmp.ge.s32.totalorder %s1292_s20, 1  ;;  %s216_s10 = int_to_ptr.vmem [resolvable:$true] %s215_s10 }
  0x11   : > { %s203_s12 = scalar_lea.sflag [#allocation4], %s202_s29  ;;  %p1216_p13 = pneg %p1385_p11 }
  0x12   : > { %s1227_s13 = scalar_lea.vmem %s216_s10, 1024  ;;  %s1294_s14 = smov [#allocation3]  }
  0x13   : > { %p1228_p0 = scmp.ne.s32.totalorder %s216_s10, %s1227_s13  ;;  %s1232_s15 = sshll.u32 %s1294_s14, 4  ;;  %s1233_s15 = int_to_ptr.vmem [resolvable:$false] %s1232_s15 }
  0x14   : > { %s1234_s21 = scalar_lea.vmem %s1233_s15, 2048  ;;  %p1235_p4 = scmp.lt.s32.totalorder %s216_s10, %s1233_s15 }
  0x15   : > { %p1230_p1 = pnand %p1228_p0, %p1216_p13  ;;  %p1236_p5 = scmp.lt.s32.totalorder %s1234_s21, %s1227_s13 }
  0x17   : > { %p1231_p2 = pneg %p1230_p1  ;;  %p1237_p3 = por %p1236_p5, %p1235_p4 }
  0x19   : > { %p1238_p6 = pnand %p1237_p3, %p1231_p2 }
  0x1b   : > { %1241 = shalt.err (!%p1238_p6)
}
  0x1c   : > { %s1295_s23 = smov 128   ;;  %s1296_s24 = smov 64  }
  0x1d   : > { %s1297_s25 = smov 4   ;;  %p235_p7 = scmp.lt.s32.totalorder %s1292_s20, 3 }
  0x1e   : > { %1145 = dma.hbm_to_vmem [thread:$0]  (!%p1385_p11), %s214_s8, 1024, %s216_s10, %s203_s12, %s1295_s23, %s1296_s24, %s1297_s25  }
  0x1f   : > { %p236_p10 = pnand %p972_p12, %p235_p7 }
  0x20   : > { %s241_s29 = sand.u32 (!%p236_p10), 1, %s1276_s16  }
  0x21   : > { %239 = sbr.rel (%p236_p10) target bundleno = 296 (0x128), region = 36  ;;  %s1398_s30 = sshll.u32 (!%p236_p10), %s241_s29, 6 }
  0x22   : > { %s242_s5 = scalar_lea.sflag (!%p236_p10), [#allocation4], %s241_s29  ;;  %s1401_s6 = scalar_lea.vmem (!%p236_p10), [#allocation3], %s1398_s30 }
  0x26   : > { %1267 = dma.done.wait (%p1366_p8), %s242_s5, 1024  }
  0x27   : > { %1269 = vsyncadd (%p1366_p8), %s242_s5, 4294966272  ;;  %v1198_v0 = vld [vmem:[%s1401_s6 + $0x38] sm:$0xff]   ;;  %v1199_v1 = vld [vmem:[%s1401_s6 + $0x30] sm:$0xff]   ;;  %p293_p8 = scmp.lt.s32.totalorder %s1284_s18, 1  ;;  %s1448_s12 = scalar_lea.vmem [#allocation5], %s1398_s30 }
  0x28   : > { %1092 = vmatprep.subr.bf16.mxu0 %v1198_v0  ;;  %1124 = vmatprep.subr.bf16.mxu1 %v1198_v0  ;;  %v1200_v2 = vld [vmem:[%s1401_s6 + $0x28] sm:$0xff]   ;;  %v1201_v3 = vld [vmem:[%s1401_s6 + $0x20] sm:$0xff]   ;;  %v1202_v6 = vld [vmem:[%s1401_s6 + $0x18] sm:$0xff]   ;;  %s1010_s30 = sshll.u32 (%p1373_p9), %s1284_s18, 2 }
  0x29   : > { %1093 = vmatpush3.bf16.msra.mxu0 %v1198_v0  ;;  %1132 = vmatpush3.bf16.msra.mxu1 %v1198_v0  ;;  %v1206_v4 = vld [vmem:[%s1498_s0] sm:$0xff]   ;;  %v1203_v7 = vld [vmem:[%s1401_s6 + $0x10] sm:$0xff]   ;;  %v1204_v8 = vld [vmem:[%s1401_s6 + $0x8] sm:$0xff]   ;;  %s750_s15 = scalar_lea.vmem (%p1373_p9), %s1502_s4, %s1010_s30 }
  0x2a   : > { %1094 = vmatprep.subr.bf16.mxu0 %v1199_v1  ;;  %1125 = vmatprep.subr.bf16.mxu1 %v1199_v1  ;;  %v1207_v5 = vld [vmem:[%s1498_s0 + $0x20] sm:$0xff]   ;;  %v1208_v10 = vld [vmem:[%s1498_s0 + $0x8] sm:$0xff]   ;;  %v1210_v12 = vld [vmem:[%s1498_s0 + $0x10] sm:$0xff]  }
  0x2b   : > { %1108 = vmatprep.mubr.bf16.mxu0 %v1206_v4  ;;  %1116 = vmatprep.mubr.bf16.mxu1 %v1207_v5  ;;  %v1205_v9 = vld [vmem:[%s1401_s6] sm:$0xff]   ;;  %v1209_v11 = vld [vmem:[%s1498_s0 + $0x28] sm:$0xff]   ;;  %v1211_v13 = vld [vmem:[%s1498_s0 + $0x30] sm:$0xff]   ;;  %s294_s6 = scalar_select %p293_p8, %s1284_s18, 1 }
  0x2c   : > { %v1212_v14 = vld [vmem:[%s1498_s0 + $0x18] sm:$0xff]  }
  0x2d   : > { %1095 = vmatpush3.bf16.msra.mxu0 %v1199_v1  ;;  %1133 = vmatpush3.bf16.msra.mxu1 %v1199_v1  ;;  %v1213_v15 = vld [vmem:[%s1498_s0 + $0x38] sm:$0xff]   ;;  %s295_s8 = scalar_lea.vmem %s1500_s2, %s294_s6  ;;  %s298_s11 = scalar_lea.vmem %s1501_s3, %s294_s6 }
  0x2e   : > { %1096 = vmatprep.subr.bf16.mxu0 %v1200_v2  ;;  %1126 = vmatprep.subr.bf16.mxu1 %v1200_v2  ;;  %v991_v16 = vld [vmem:[%s295_s8] ss:$0 sm:$0xff] }
  0x2f   : > { %v992_v23 = vld [vmem:[%s298_s11] ss:$0 sm:$0xff] }
  0x31   : > { %1097 = vmatpush3.bf16.msra.mxu0 %v1200_v2  ;;  %1134 = vmatpush3.bf16.msra.mxu1 %v1200_v2 }
  0x32   : > { %1098 = vmatprep.subr.bf16.mxu0 %v1201_v3  ;;  %1127 = vmatprep.subr.bf16.mxu1 %v1201_v3 }
  0x35   : > { %1099 = vmatpush3.bf16.msra.mxu0 %v1201_v3  ;;  %1135 = vmatpush3.bf16.msra.mxu1 %v1201_v3 }
  0x36   : > { %1100 = vmatprep.subr.bf16.mxu0 %v1202_v6  ;;  %1128 = vmatprep.subr.bf16.mxu1 %v1202_v6 }
  0x39   : > { %1101 = vmatpush3.bf16.msra.mxu0 %v1202_v6  ;;  %1136 = vmatpush3.bf16.msra.mxu1 %v1202_v6 }
  0x3a   : > { %1102 = vmatprep.subr.bf16.mxu0 %v1203_v7  ;;  %1129 = vmatprep.subr.bf16.mxu1 %v1203_v7 }
  0x3d   : > { %1103 = vmatpush3.bf16.msra.mxu0 %v1203_v7  ;;  %1137 = vmatpush3.bf16.msra.mxu1 %v1203_v7 }
  0x3e   : > { %1104 = vmatprep.subr.bf16.mxu0 %v1204_v8  ;;  %1130 = vmatprep.subr.bf16.mxu1 %v1204_v8 }
  0x41   : > { %1105 = vmatpush3.bf16.msra.mxu0 %v1204_v8  ;;  %1138 = vmatpush3.bf16.msra.mxu1 %v1204_v8 }
  0x42   : > { %1106 = vmatprep.subr.bf16.mxu0 %v1205_v9  ;;  %1131 = vmatprep.subr.bf16.mxu1 %v1205_v9 }
  0x45   : > { %1107 = vmatpush3.bf16.msra.mxu0 %v1205_v9  ;;  %1139 = vmatpush3.bf16.msra.mxu1 %v1205_v9 }
  0x48   : > { %1109 = vmatmul.mubr.bf16.vlgmr.msra.gmra.mxu0 %v1208_v10  ;;  %1117 = vmatmul.mubr.bf16.vlgmr.msra.gmra.mxu1 %v1209_v11 }
  0x49   : > { %1112 = vmatprep.mubr.bf16.mxu0 %v1210_v12  ;;  %1120 = vmatprep.mubr.bf16.mxu1 %v1211_v13 }
  0x50   : > { %1113 = vmatmul.mubr.bf16.gmra.mxu0 %v1212_v14  ;;  %1121 = vmatmul.mubr.bf16.gmra.mxu1 %v1213_v15 }
 0x108   : > { %v1110_v17 = vpop.f32.mrf.mxu0  ;;  %v1118_v18 = vpop.f32.mrf.mxu1 }
 0x109   : > { %v622_v19 = vmul.f32 %v1110_v17, %v991_v16  ;;  %v630_v20 = vmul.f32 %v1118_v18, %v991_v16 }
 0x10a   : > { %v499_v21 = vpop.f32.mrf.mxu0  ;;  %v531_v22 = vpop.f32.mrf.mxu1 }
 0x10b   : > { %v620_v24 = vmul.f32 %v991_v16, %v499_v21  ;;  %v628_v25 = vmul.f32 %v991_v16, %v531_v22  ;;  %v645_v30 = vadd.f32 %v992_v23, %v622_v19  ;;  %v653_v31 = vadd.f32 %v992_v23, %v630_v20 }
 0x10c   : > { %v1111_v26 = vpop.f32.mrf.mxu0  ;;  %v1119_v27 = vpop.f32.mrf.mxu1 }
 0x10d   : > { %v623_v28 = vmul.f32 %v1111_v26, %v991_v16  ;;  %v631_v29 = vmul.f32 %v1119_v27, %v991_v16  ;;  %v643_v38 = vadd.f32 %v992_v23, %v620_v24  ;;  %v651_v39 = vadd.f32 %v992_v23, %v628_v25 }
 0x10e   : > { %v502_v32 = vpop.f32.mrf.mxu0  ;;  %v534_v33 = vpop.f32.mrf.mxu1 }
 0x10f   : > { %v646_v34 = vadd.f32 %v992_v23, %v623_v28  ;;  %v654_v35 = vadd.f32 %v992_v23, %v631_v29  ;;  %v621_v36 = vmul.f32 %v991_v16, %v502_v32  ;;  %v629_v37 = vmul.f32 %v991_v16, %v534_v33 }
 0x110   : > { %v1114_v40 = vpop.f32.mrf.mxu0  ;;  %v1122_v41 = vpop.f32.mrf.mxu1 }
 0x111   : > { %v1037_v42 = vpack.c.bf16 %v646_v34, %v645_v30  ;;  %v1057_v43 = vpack.c.bf16 %v654_v35, %v653_v31  ;;  %v644_v44 = vadd.f32 %v992_v23, %v621_v36  ;;  %v652_v45 = vadd.f32 %v992_v23, %v629_v37 }
 0x112   : > { %v626_v46 = vmul.f32 %v1114_v40, %v991_v16  ;;  %v634_v47 = vmul.f32 %v1122_v41, %v991_v16  ;;  %v515_v48 = vpop.f32.mrf.mxu0  ;;  %v547_v49 = vpop.f32.mrf.mxu1 }
 0x113   : > { %1069 = vst [vmem:[%s1448_s12 + $0x8] sm:$0xff] %v1037_v42   ;;  %1073 = vst [vmem:[%s1448_s12 + $0x28] sm:$0xff] %v1057_v43   ;;  %v1032_v50 = vpack.c.bf16 %v644_v44, %v643_v38  ;;  %v1052_v51 = vpack.c.bf16 %v652_v45, %v651_v39  ;;  %v624_v52 = vmul.f32 %v991_v16, %v515_v48 }
 0x114   : > { %v632_v53 = vmul.f32 %v991_v16, %v547_v49  ;;  %v1115_v54 = vpop.f32.mrf.mxu0  ;;  %v1123_v55 = vpop.f32.mrf.mxu1  ;;  %v649_v58 = vadd.f32 %v992_v23, %v626_v46  ;;  %v657_v59 = vadd.f32 %v992_v23, %v634_v47 }
 0x115   : > { %1033 = vst [vmem:[%s1448_s12] sm:$0xff] %v1032_v50   ;;  %1072 = vst [vmem:[%s1448_s12 + $0x20] sm:$0xff] %v1052_v51   ;;  %v627_v56 = vmul.f32 %v1115_v54, %v991_v16  ;;  %v635_v57 = vmul.f32 %v1123_v55, %v991_v16  ;;  %v647_v2 = vadd.f32 %v992_v23, %v624_v52 }
 0x116   : > { %v518_v60 = vpop.f32.mrf.mxu0  ;;  %v550_v61 = vpop.f32.mrf.mxu1  ;;  %v655_v3 = vadd.f32 %v992_v23, %v632_v53 }
 0x117   : > { %v650_v62 = vadd.f32 %v992_v23, %v627_v56  ;;  %v658_v63 = vadd.f32 %v992_v23, %v635_v57  ;;  %v625_v0 = vmul.f32 %v991_v16, %v518_v60  ;;  %v633_v1 = vmul.f32 %v991_v16, %v550_v61 }
 0x119   : > { %v1047_v4 = vpack.c.bf16 %v650_v62, %v649_v58  ;;  %v1067_v5 = vpack.c.bf16 %v658_v63, %v657_v59  ;;  %v648_v6 = vadd.f32 %v992_v23, %v625_v0  ;;  %v656_v7 = vadd.f32 %v992_v23, %v633_v1  ;;  %745 = sbr.rel (!%p1373_p9) target bundleno = 296 (0x128), region = 52 }
 0x11a   : > { %v771_v12 = vld [vmem:[%s1448_s12 + $0x8] sm:$0xf] (%p1373_p9)  ;;  %v773_v13 = vld [vmem:[%s1448_s12 + $0xc] sm:$0xf] (%p1373_p9) }
 0x11b   : > { %1071 = vst [vmem:[%s1448_s12 + $0x18] sm:$0xff] %v1047_v4   ;;  %1075 = vst [vmem:[%s1448_s12 + $0x38] sm:$0xff] %v1067_v5   ;;  %v1042_v8 = vpack.c.bf16 %v648_v6, %v647_v2  ;;  %v1062_v9 = vpack.c.bf16 %v656_v7, %v655_v3  ;;  %v787_v20 = vld [vmem:[%s1448_s12 + $0x28] sm:$0xf] (%p1373_p9)  ;;  %v789_v21 = vld [vmem:[%s1448_s12 + $0x2c] sm:$0xf] (%p1373_p9) }
 0x11c   : > { %v767_v10 = vld [vmem:[%s1448_s12] sm:$0xf] (%p1373_p9)  ;;  %v769_v11 = vld [vmem:[%s1448_s12 + $0x4] sm:$0xf] (%p1373_p9)  ;;  %772 = vst [vmem:[%s750_s15 + $0x10] sm:$0xf] (%p1373_p9), %v771_v12 }
 0x11d   : > { %1070 = vst [vmem:[%s1448_s12 + $0x10] sm:$0xff] %v1042_v8   ;;  %1074 = vst [vmem:[%s1448_s12 + $0x30] sm:$0xff] %v1062_v9   ;;  %v783_v18 = vld [vmem:[%s1448_s12 + $0x20] sm:$0xf] (%p1373_p9)  ;;  %v785_v19 = vld [vmem:[%s1448_s12 + $0x24] sm:$0xf] (%p1373_p9) }
 0x11e   : > { %768 = vst [vmem:[%s750_s15] sm:$0xf] %v767_v10  ;;  %770 = vst [vmem:[%s750_s15 + $0x8] sm:$0xf] %v769_v11 }
 0x11f   : > { %774 = vst [vmem:[%s750_s15 + $0x18] sm:$0xf] %v773_v13  ;;  %784 = vst [vmem:[%s750_s15 + $0x40] sm:$0xf] %v783_v18 }
 0x120   : > { %786 = vst [vmem:[%s750_s15 + $0x48] sm:$0xf] %v785_v19  ;;  %788 = vst [vmem:[%s750_s15 + $0x50] sm:$0xf] %v787_v20 }
 0x121   : > { %790 = vst [vmem:[%s750_s15 + $0x58] sm:$0xf] %v789_v21 }
 0x122   : > { %v779_v16 = vld [vmem:[%s1448_s12 + $0x18] sm:$0xf]  ;;  %v781_v17 = vld [vmem:[%s1448_s12 + $0x1c] sm:$0xf] }
 0x123   : > { %780 = vst [vmem:[%s750_s15 + $0x30] sm:$0xf] %v779_v16  ;;  %782 = vst [vmem:[%s750_s15 + $0x38] sm:$0xf] %v781_v17  ;;  %v795_v24 = vld [vmem:[%s1448_s12 + $0x38] sm:$0xf] }
 0x124   : > { %v775_v14 = vld [vmem:[%s1448_s12 + $0x10] sm:$0xf]  ;;  %v777_v15 = vld [vmem:[%s1448_s12 + $0x14] sm:$0xf]  ;;  %v797_v25 = vld [vmem:[%s1448_s12 + $0x3c] sm:$0xf] }
 0x125   : > { %776 = vst [vmem:[%s750_s15 + $0x20] sm:$0xf] %v775_v14  ;;  %778 = vst [vmem:[%s750_s15 + $0x28] sm:$0xf] %v777_v15  ;;  %v791_v22 = vld [vmem:[%s1448_s12 + $0x30] sm:$0xf] }
 0x126   : > { %v793_v23 = vld [vmem:[%s1448_s12 + $0x34] sm:$0xf]  ;;  %792 = vst [vmem:[%s750_s15 + $0x60] sm:$0xf] %v791_v22  ;;  %796 = vst [vmem:[%s750_s15 + $0x70] sm:$0xf] %v795_v24 }
 0x127   : > { %794 = vst [vmem:[%s750_s15 + $0x68] sm:$0xf] %v793_v23  ;;  %798 = vst [vmem:[%s750_s15 + $0x78] sm:$0xf] %v797_v25 }
 0x128 PF: > { %s17_s20 = sadd.s32 1, %s1292_s20   ;;  %s1507_s15 = smov %s1276_s16 }
 0x129   : > { %p14_p9 = scmp.ge.s32.totalorder %s17_s20, 4   ;;  %s1508_s16 = smov %s1280_s17 }
 0x12a   : > { %s1509_s17 = smov %s1371_s27  ;;  %s1510_s18 = smov %s1288_s19 }
 0x12b   : > { %s1511_s19 = smov %s1513_s22  ;;  %16 = sbr.rel (!%p14_p9) target bundleno = 4 (0x4), region = 134 }
 0x130   :  { %864 = vsyncpa [#allocation4], 1 }
 0x131   :  { %866 = vsyncpa [#allocation4 + $0x1], 1 }

// kernel: _lambda_.12
= control target key start
LH: loop header
LB: loop body
LE: loop exit
PB: predicated region body
PF: predicated region fallthrough
CT: control target
= control target key end

     0   :  { %s2142_s0 = inlined_call_operand.vmem [shape: bf16[128,1792], index: 0, kind: input, shape index: {}]   ;;  %s2143_s1 = inlined_call_operand.vmem [shape: bf16[1792,256], index: 1, kind: input, shape index: {}]   ;;  %s2144_s2 = inlined_call_operand.vmem [shape: f32[1,256], index: 2, kind: input, shape index: {}]   ;;  %s2145_s3 = inlined_call_operand.vmem [shape: f32[1,256], index: 3, kind: input, shape index: {}]   ;;  %s2146_s4 = inlined_call_operand.vmem [shape: bf16[128,256], index: 4, kind: output, shape index: {}]  }
   0x1   :  { %2150 = sst [smem:[#allocation9_spill]] %s2142_s0 }
   0x2   :  { %2151 = sst [smem:[#allocation10_spill]] %s2143_s1 }
   0x3   :  { %s1776_s15 = smov 0   ;;  %s1778_s16 = smov 0  }
   0x4   :  { %s1780_s17 = smov 0   ;;  %s1782_s18 = smov 0  }
   0x5   :  { %s1784_s19 = smov 0   ;;  %s1786_s20 = smov 0  }
   0x6   :  { %s1788_s21 = smov 0   ;;  %s1790_s22 = smov 0  }
   0x7   :  { %s1792_s23 = smov 0   ;;  %s1794_s24 = smov 0  }
   0x8   :  { %s1796_s25 = smov 0  }
   0x9 LB: > { %2152 = sst [smem:[#allocation6_spill]] %s1744_s24  ;;  %s1317_s26 = sadd.s32 4294967295, %s1748_s25   ;;  %s1748_s25 = sphi %s1796_s25, %s14_s25   ;;  %s1744_s24 = sphi %s1794_s24, %s2162_s24   ;;  %s1740_s23 = sphi %s1792_s23, %s2170_s23   ;;  %s1736_s22 = sphi %s1790_s22, %s2160_s22   ;;  %s1732_s21 = sphi %s1788_s21, %s2169_s21   ;;  %s1728_s20 = sphi %s1786_s20, %s2168_s20   ;;  %s1724_s19 = sphi %s1784_s19, %s2167_s19   ;;  %s1720_s18 = sphi %s1782_s18, %s2166_s18   ;;  %s1716_s17 = sphi %s1780_s17, %s2165_s17   ;;  %s1712_s16 = sphi %s1778_s16, %s2164_s16   ;;  %s1708_s15 = sphi %s1776_s15, %s2163_s15  }
   0xa   : > { %s26_s27 = sadd.s32 1, %s1740_s23  ;;  %s29_s28 = sadd.s32 1, %s1744_s24 }
   0xb   : > { %p27_p0 = scmp.ge.s32.totalorder %s26_s27, 7  ;;  %s42_s29 = sadd.s32 1, %s1728_s20 }
   0xc   : > { %p49_p1 = scmp.ne.s32.totalorder %s1728_s20, %s1724_s19  ;;  %p50_p2 = scmp.eq.s32.totalorder %s1748_s25, 0 }
   0xd   : > { %s2172_s27 = smov (%p27_p0, %s26_s27), 0  ;;  %s2174_s28 = smov (!%p27_p0, %s29_s28), %s1744_s24 }
   0xe   : > { %2153 = sst [smem:[#allocation7_spill]] %s2172_s27  ;;  %s38_s30 = ssub.s32 %s1740_s23, %s2172_s27 }
   0xf   : > { %p31_p3 = scmp.ge.s32.totalorder %s2174_s28, 2  ;;  %p40_p4 = scmp.eq.s32.totalorder %s38_s30, 0 }
  0x10   : > { %p1843_p5 = por %p50_p2, %p49_p1  ;;  %s70_s6 = sadd.s32 1, %s1720_s18 }
  0x11   : > { %s2176_s28 = smov (%p31_p3, %s2174_s28), 0  ;;  %p77_p6 = scmp.ne.s32.totalorder %s1720_s18, %s1716_s17 }
  0x12   : > { %2155 = sst [smem:[#allocation8_spill]] %s2176_s28  ;;  %s66_s8 = ssub.s32 %s1744_s24, %s2176_s28 }
  0x13   : > { %s1851_s7 = scalar_select %p40_p4, %s1728_s20, %s42_s29  }
  0x14   : > { %s67_s9 = sor.u32 %s66_s8, %s38_s30  ;;  %p148_p7 = scmp.eq.s32.totalorder %s66_s8, 0 }
  0x15   : > { %p68_p8 = scmp.eq.s32.totalorder %s67_s9, 0  ;;  %p1857_p9 = por %p77_p6, %p50_p2 }
  0x16   : > { %s150_s11 = sadd.s32 1, %s1712_s16  ;;  %p160_p10 = scmp.ne.s32.totalorder %s1712_s16, %s1708_s15 }
  0x17   : > { %s1865_s12 = scalar_select %p68_p8, %s1720_s18, %s70_s6  }
  0x18   : > { %s1868_s13 = scalar_select %p148_p7, %s1712_s16, %s150_s11  }
  0x19   : > { %p161_p11 = scmp.eq.s32.totalorder %s1317_s26, 13  ;;  %p1320_p13 = scmp.ge.s32.totalorder %s1748_s25, 14 }
  0x1b   : > { %p1870_p12 = por %p161_p11, %p160_p10  ;;  %183 = sbr.rel (%p1320_p13) target bundleno = 81 (0x51), region = 16 }
  0x20   : > { %186 = sbr.rel (!%p1843_p5) target bundleno = 50 (0x32), region = 20  ;;  %s188_s29 = sand.u32 (%p1843_p5), 1, %s1728_s20  }
  0x21   : > { %s1388_s30 = sshll.u32 (%p1843_p5), %s1740_s23, 3  ;;  %s1321_s8 = sshll.u32 (%p1843_p5), %s188_s29, 7 }
  0x22   : > { %s2158_s0 = sld [smem:[#allocation9_spill]] (%p1843_p5)  ;;  %s190_s26 = scalar_lea.vmem (%p1843_p5), [#allocation3], %s1321_s8 }
  0x28   : > { %s1882_s11 = scalar_lea.vmem %s2158_s0, %s1388_s30 }
  0x29   : > { %v255_v0 = vld [vmem:[%s1882_s11] sm:$0xff]  ;;  %v257_v1 = vld [vmem:[%s1882_s11 + $0x38] sm:$0xff]  ;;  %v259_v2 = vld [vmem:[%s1882_s11 + $0x70] sm:$0xff] }
  0x2a   : > { %256 = vst [vmem:[%s190_s26] sm:$0xff] %v255_v0  ;;  %258 = vst [vmem:[%s190_s26 + $0x8] sm:$0xff] %v257_v1  ;;  %v261_v3 = vld [vmem:[%s1882_s11 + $0xa8] sm:$0xff]  ;;  %v263_v4 = vld [vmem:[%s1882_s11 + $0xe0] sm:$0xff] }
  0x2b   : > { %260 = vst [vmem:[%s190_s26 + $0x10] sm:$0xff] %v259_v2  ;;  %v265_v5 = vld [vmem:[%s1882_s11 + $0x118] sm:$0xff]  ;;  %262 = vst [vmem:[%s190_s26 + $0x18] sm:$0xff] %v261_v3  ;;  %v267_v6 = vld [vmem:[%s1882_s11 + $0x150] sm:$0xff] }
  0x2c   : > { %264 = vst [vmem:[%s190_s26 + $0x20] sm:$0xff] %v263_v4  ;;  %266 = vst [vmem:[%s190_s26 + $0x28] sm:$0xff] %v265_v5  ;;  %v269_v7 = vld [vmem:[%s1882_s11 + $0x188] sm:$0xff]  ;;  %v271_v8 = vld [vmem:[%s1882_s11 + $0x1c0] sm:$0xff] }
  0x2d   : > { %268 = vst [vmem:[%s190_s26 + $0x30] sm:$0xff] %v267_v6  ;;  %270 = vst [vmem:[%s190_s26 + $0x38] sm:$0xff] %v269_v7  ;;  %v273_v9 = vld [vmem:[%s1882_s11 + $0x1f8] sm:$0xff]  ;;  %v275_v10 = vld [vmem:[%s1882_s11 + $0x230] sm:$0xff] }
  0x2e   : > { %272 = vst [vmem:[%s190_s26 + $0x40] sm:$0xff] %v271_v8  ;;  %v277_v11 = vld [vmem:[%s1882_s11 + $0x268] sm:$0xff]  ;;  %274 = vst [vmem:[%s190_s26 + $0x48] sm:$0xff] %v273_v9  ;;  %v279_v12 = vld [vmem:[%s1882_s11 + $0x2a0] sm:$0xff] }
  0x2f   : > { %276 = vst [vmem:[%s190_s26 + $0x50] sm:$0xff] %v275_v10  ;;  %278 = vst [vmem:[%s190_s26 + $0x58] sm:$0xff] %v277_v11  ;;  %v281_v13 = vld [vmem:[%s1882_s11 + $0x2d8] sm:$0xff]  ;;  %v283_v14 = vld [vmem:[%s1882_s11 + $0x310] sm:$0xff] }
  0x30   : > { %280 = vst [vmem:[%s190_s26 + $0x60] sm:$0xff] %v279_v12  ;;  %282 = vst [vmem:[%s190_s26 + $0x68] sm:$0xff] %v281_v13  ;;  %v285_v15 = vld [vmem:[%s1882_s11 + $0x348] sm:$0xff] }
  0x31   : > { %284 = vst [vmem:[%s190_s26 + $0x70] sm:$0xff] %v283_v14  ;;  %286 = vst [vmem:[%s190_s26 + $0x78] sm:$0xff] %v285_v15 }
  0x32 PF: > { %292 = sbr.rel (!%p1857_p9) target bundleno = 81 (0x51), region = 58  ;;  %s294_s5 = sand.u32 (%p1857_p9), 1, %s1720_s18  }
  0x33   : > { %s1389_s29 = sshll.u32 (%p1857_p9), %s1740_s23, 6  ;;  %s1324_s30 = sshll.u32 (%p1857_p9), %s294_s5, 7 }
  0x34   : > { %s299_s8 = sadd.s32 (%p1857_p9), %s1744_s24, %s1389_s29  ;;  %s2159_s1 = sld [smem:[#allocation10_spill]] (%p1857_p9) }
  0x35   : > { %s1327_s6 = sshll.u32 (%p1857_p9), %s299_s8, 2  ;;  %s1913_s10 = scalar_lea.vmem (%p1857_p9), [#allocation4], %s1324_s30 }
  0x3a   : > { %s1908_s28 = scalar_lea.vmem %s2159_s1, %s1327_s6 }
  0x3b   : > { %v318_v16 = vld [vmem:[%s1908_s28] sm:$0xf]  ;;  %v320_v17 = vld [vmem:[%s1908_s28 + $0x8] sm:$0xf]  ;;  %v322_v18 = vld [vmem:[%s1908_s28 + $0x10] sm:$0xf] }
  0x3c   : > { %319 = vst [vmem:[%s1913_s10] sm:$0xf] %v318_v16  ;;  %321 = vst [vmem:[%s1913_s10 + $0x4] sm:$0xf] %v320_v17  ;;  %v324_v19 = vld [vmem:[%s1908_s28 + $0x18] sm:$0xf] }
  0x3d   : > { %323 = vst [vmem:[%s1913_s10 + $0x8] sm:$0xf] %v322_v18  ;;  %v326_v20 = vld [vmem:[%s1908_s28 + $0x20] sm:$0xf]  ;;  %v328_v21 = vld [vmem:[%s1908_s28 + $0x28] sm:$0xf] }
  0x3e   : > { %325 = vst [vmem:[%s1913_s10 + $0xc] sm:$0xf] %v324_v19  ;;  %327 = vst [vmem:[%s1913_s10 + $0x10] sm:$0xf] %v326_v20  ;;  %v330_v22 = vld [vmem:[%s1908_s28 + $0x30] sm:$0xf] }
  0x3f   : > { %329 = vst [vmem:[%s1913_s10 + $0x14] sm:$0xf] %v328_v21  ;;  %v332_v23 = vld [vmem:[%s1908_s28 + $0x38] sm:$0xf]  ;;  %v334_v24 = vld [vmem:[%s1908_s28 + $0x40] sm:$0xf] }
  0x40   : > { %331 = vst [vmem:[%s1913_s10 + $0x18] sm:$0xf] %v330_v22  ;;  %333 = vst [vmem:[%s1913_s10 + $0x1c] sm:$0xf] %v332_v23  ;;  %v336_v25 = vld [vmem:[%s1908_s28 + $0x48] sm:$0xf] }
  0x41   : > { %335 = vst [vmem:[%s1913_s10 + $0x20] sm:$0xf] %v334_v24  ;;  %v338_v26 = vld [vmem:[%s1908_s28 + $0x50] sm:$0xf]  ;;  %v340_v27 = vld [vmem:[%s1908_s28 + $0x58] sm:$0xf] }
  0x42   : > { %337 = vst [vmem:[%s1913_s10 + $0x24] sm:$0xf] %v336_v25  ;;  %339 = vst [vmem:[%s1913_s10 + $0x28] sm:$0xf] %v338_v26  ;;  %v342_v28 = vld [vmem:[%s1908_s28 + $0x60] sm:$0xf] }
  0x43   : > { %341 = vst [vmem:[%s1913_s10 + $0x2c] sm:$0xf] %v340_v27  ;;  %v344_v29 = vld [vmem:[%s1908_s28 + $0x68] sm:$0xf]  ;;  %v346_v30 = vld [vmem:[%s1908_s28 + $0x70] sm:$0xf] }
  0x44   : > { %343 = vst [vmem:[%s1913_s10 + $0x30] sm:$0xf] %v342_v28  ;;  %345 = vst [vmem:[%s1913_s10 + $0x34] sm:$0xf] %v344_v29  ;;  %v348_v31 = vld [vmem:[%s1908_s28 + $0x78] sm:$0xf] }
  0x45   : > { %347 = vst [vmem:[%s1913_s10 + $0x38] sm:$0xf] %v346_v30  ;;  %v350_v32 = vld [vmem:[%s1908_s28 + $0x80] sm:$0xf]  ;;  %v352_v33 = vld [vmem:[%s1908_s28 + $0x88] sm:$0xf] }
  0x46   : > { %349 = vst [vmem:[%s1913_s10 + $0x3c] sm:$0xf] %v348_v31  ;;  %351 = vst [vmem:[%s1913_s10 + $0x40] sm:$0xf] %v350_v32  ;;  %v354_v34 = vld [vmem:[%s1908_s28 + $0x90] sm:$0xf] }
  0x47   : > { %353 = vst [vmem:[%s1913_s10 + $0x44] sm:$0xf] %v352_v33  ;;  %v356_v35 = vld [vmem:[%s1908_s28 + $0x98] sm:$0xf]  ;;  %v358_v36 = vld [vmem:[%s1908_s28 + $0xa0] sm:$0xf] }
  0x48   : > { %355 = vst [vmem:[%s1913_s10 + $0x48] sm:$0xf] %v354_v34  ;;  %357 = vst [vmem:[%s1913_s10 + $0x4c] sm:$0xf] %v356_v35  ;;  %v360_v37 = vld [vmem:[%s1908_s28 + $0xa8] sm:$0xf] }
  0x49   : > { %359 = vst [vmem:[%s1913_s10 + $0x50] sm:$0xf] %v358_v36  ;;  %v362_v38 = vld [vmem:[%s1908_s28 + $0xb0] sm:$0xf]  ;;  %v364_v39 = vld [vmem:[%s1908_s28 + $0xb8] sm:$0xf] }
  0x4a   : > { %361 = vst [vmem:[%s1913_s10 + $0x54] sm:$0xf] %v360_v37  ;;  %363 = vst [vmem:[%s1913_s10 + $0x58] sm:$0xf] %v362_v38  ;;  %v366_v40 = vld [vmem:[%s1908_s28 + $0xc0] sm:$0xf] }
  0x4b   : > { %365 = vst [vmem:[%s1913_s10 + $0x5c] sm:$0xf] %v364_v39  ;;  %v368_v41 = vld [vmem:[%s1908_s28 + $0xc8] sm:$0xf]  ;;  %v370_v42 = vld [vmem:[%s1908_s28 + $0xd0] sm:$0xf] }
  0x4c   : > { %367 = vst [vmem:[%s1913_s10 + $0x60] sm:$0xf] %v366_v40  ;;  %369 = vst [vmem:[%s1913_s10 + $0x64] sm:$0xf] %v368_v41  ;;  %v372_v43 = vld [vmem:[%s1908_s28 + $0xd8] sm:$0xf] }
  0x4d   : > { %371 = vst [vmem:[%s1913_s10 + $0x68] sm:$0xf] %v370_v42  ;;  %v374_v44 = vld [vmem:[%s1908_s28 + $0xe0] sm:$0xf]  ;;  %v376_v45 = vld [vmem:[%s1908_s28 + $0xe8] sm:$0xf] }
  0x4e   : > { %373 = vst [vmem:[%s1913_s10 + $0x6c] sm:$0xf] %v372_v43  ;;  %375 = vst [vmem:[%s1913_s10 + $0x70] sm:$0xf] %v374_v44  ;;  %v378_v46 = vld [vmem:[%s1908_s28 + $0xf0] sm:$0xf] }
  0x4f   : > { %377 = vst [vmem:[%s1913_s10 + $0x74] sm:$0xf] %v376_v45  ;;  %v380_v47 = vld [vmem:[%s1908_s28 + $0xf8] sm:$0xf]  ;;  %379 = vst [vmem:[%s1913_s10 + $0x78] sm:$0xf] %v378_v46 }
  0x50   : > { %381 = vst [vmem:[%s1913_s10 + $0x7c] sm:$0xf] %v380_v47 }
  0x51 PF: > { %p1328_p0 = scmp.ge.s32.totalorder %s1748_s25, 1  ;;  %p480_p1 = scmp.lt.s32.totalorder %s1748_s25, 15 }
  0x53   : > { %p481_p2 = pnand %p1328_p0, %p480_p1 }
  0x54   : > { %s487_s0 = sand.u32 (!%p481_p2), 1, %s1724_s19   ;;  %s494_s11 = sand.u32 (!%p481_p2), 1, %s1716_s17  }
  0x55   : > { %484 = sbr.rel (%p481_p2) target bundleno = 399 (0x18f), region = 107  ;;  %s1329_s26 = sshll.u32 (!%p481_p2), %s487_s0, 7 }
  0x56   : > { %s1330_s5 = sshll.u32 (!%p481_p2), %s494_s11, 7  ;;  %s525_s28 = sand.u32 (!%p481_p2), 1, %s1708_s15  }
  0x57   : > { %p531_p3 = scmp.lt.s32.totalorder (!%p481_p2), %s1736_s22, 1  ;;  %s1331_s29 = sshll.u32 (!%p481_p2), %s525_s28, 6 }
  0x58   : > { %s1993_s24 = scalar_lea.vmem (!%p481_p2), [#allocation3], %s1329_s26  ;;  %s1995_s17 = scalar_lea.vmem (!%p481_p2), [#allocation4], %s1330_s5 }
  0x59   : > { %s1997_s19 = scalar_lea.vmem (!%p481_p2), [#allocation5], %s1331_s29  ;;  %p1332_p4 = scmp.ne.s32.totalorder (!%p481_p2), %s1732_s21, 0 }
  0x5a   : > { %s1983_s30 = scalar_select %p531_p3, %s1736_s22, 1 }
  0x5b   : > { %542 = sbr.rel (%p1332_p4) target bundleno = 105 (0x69), region = 119 }
  0x5c   : > { %s533_s9 = scalar_lea.vmem %s2144_s2, %s1983_s30  ;;  %s536_s27 = scalar_lea.vmem %s2145_s3, %s1983_s30 }
  0x60   : > { %v1750_v48 = vmov 0.0  }
  0x61   : > { %543 = vst [vmem:[#allocation2 + $0x30] sm:$0xff] %v1750_v48  ;;  %544 = vst [vmem:[#allocation2] sm:$0xff] %v1750_v48 }
  0x62   : > { %545 = vst [vmem:[#allocation2 + $0x58] sm:$0xff] %v1750_v48  ;;  %546 = vst [vmem:[#allocation2 + $0x18] sm:$0xff] %v1750_v48 }
  0x63   : > { %547 = vst [vmem:[#allocation2 + $0x50] sm:$0xff] %v1750_v48  ;;  %548 = vst [vmem:[#allocation2 + $0x68] sm:$0xff] %v1750_v48 }
  0x64   : > { %549 = vst [vmem:[#allocation2 + $0x8] sm:$0xff] %v1750_v48  ;;  %550 = vst [vmem:[#allocation2 + $0x48] sm:$0xff] %v1750_v48 }
  0x65   : > { %551 = vst [vmem:[#allocation2 + $0x40] sm:$0xff] %v1750_v48  ;;  %552 = vst [vmem:[#allocation2 + $0x20] sm:$0xff] %v1750_v48 }
  0x66   : > { %553 = vst [vmem:[#allocation2 + $0x10] sm:$0xff] %v1750_v48  ;;  %554 = vst [vmem:[#allocation2 + $0x38] sm:$0xff] %v1750_v48 }
  0x67   : > { %555 = vst [vmem:[#allocation2 + $0x60] sm:$0xff] %v1750_v48  ;;  %556 = vst [vmem:[#allocation2 + $0x70] sm:$0xff] %v1750_v48 }
  0x68   : > { %557 = vst [vmem:[#allocation2 + $0x78] sm:$0xff] %v1750_v48  ;;  %558 = vst [vmem:[#allocation2 + $0x28] sm:$0xff] %v1750_v48 }
  0x69 PF: > { %v1622_v49 = vld [vmem:[%s1995_s17 + $0x78] sm:$0xff]   ;;  %v1624_v51 = vld [vmem:[%s1995_s17 + $0x70] sm:$0xff]   ;;  %v1626_v53 = vld [vmem:[%s1995_s17 + $0x68] sm:$0xff]   ;;  %p1365_p5 = scmp.ne.s32.totalorder %s1732_s21, 6 }
  0x6a   : > { %v1623_v50 = vld [vmem:[%s1995_s17 + $0x38] sm:$0xff]   ;;  %1453 = vmatprep.subr.bf16.mxu0 %v1622_v49  ;;  %1517 = vmatprep.subr.bf16.mxu1 %v1622_v49  ;;  %v1625_v52 = vld [vmem:[%s1995_s17 + $0x30] sm:$0xff]   ;;  %v1627_v54 = vld [vmem:[%s1995_s17 + $0x28] sm:$0xff]  }
  0x6b   : > { %1454 = vmatpush3.bf16.msra.mxu0 %v1623_v50  ;;  %1525 = vmatpush3.bf16.msra.mxu1 %v1623_v50  ;;  %v1628_v55 = vld [vmem:[%s1995_s17 + $0x60] sm:$0xff]   ;;  %v1630_v57 = vld [vmem:[%s1995_s17 + $0x58] sm:$0xff]   ;;  %v1632_v59 = vld [vmem:[%s1995_s17 + $0x50] sm:$0xff]  }
  0x6c   : > { %1455 = vmatprep.subr.bf16.mxu0 %v1624_v51  ;;  %1518 = vmatprep.subr.bf16.mxu1 %v1624_v51  ;;  %v1629_v56 = vld [vmem:[%s1995_s17 + $0x20] sm:$0xff]   ;;  %v1631_v58 = vld [vmem:[%s1995_s17 + $0x18] sm:$0xff]   ;;  %v1633_v62 = vld [vmem:[%s1995_s17 + $0x10] sm:$0xff]  }
  0x6d   : > { %v1640_v60 = vld [vmem:[%s1993_s24 + $0x4] ss:$8 sps:$4 sm:$0xff]   ;;  %v1638_v3 = vld [vmem:[%s1993_s24] ss:$8 sps:$4 sm:$0xff]   ;;  %v1644_v5 = vld [vmem:[%s1993_s24 + $0x14] ss:$8 sps:$4 sm:$0xff]  }
  0x6e   : > { %v1643_v61 = vld [vmem:[%s1993_s24 + $0x44] ss:$8 sps:$4 sm:$0xff]   ;;  %831 = vmatprep.mubr.bf16.mxu0 %v1640_v60  ;;  %v1641_v4 = vld [vmem:[%s1993_s24 + $0x40] ss:$8 sps:$4 sm:$0xff]   ;;  %v1646_v6 = vld [vmem:[%s1993_s24 + $0x54] ss:$8 sps:$4 sm:$0xff]  }
  0x6f   : > { %1456 = vmatpush3.bf16.msra.mxu0 %v1625_v52  ;;  %1526 = vmatpush3.bf16.msra.mxu1 %v1625_v52  ;;  %v1634_v63 = vld [vmem:[%s1995_s17 + $0x48] sm:$0xff]   ;;  %v1636_v1 = vld [vmem:[%s1995_s17 + $0x40] sm:$0xff]   ;;  %v1648_v7 = vld [vmem:[%s1993_s24 + $0x10] ss:$8 sps:$4 sm:$0xff]  }
  0x70   : > { %1457 = vmatprep.subr.bf16.mxu0 %v1626_v53  ;;  %1519 = vmatprep.subr.bf16.mxu1 %v1626_v53  ;;  %v1635_v0 = vld [vmem:[%s1995_s17 + $0x8] sm:$0xff]   ;;  %v1637_v2 = vld [vmem:[%s1995_s17] sm:$0xff]   ;;  %v1649_v8 = vld [vmem:[%s1993_s24 + $0x50] ss:$8 sps:$4 sm:$0xff]  }
  0x71   : > { %863 = vmatprep.mubr.bf16.mxu1 %v1643_v61  ;;  %v1650_v9 = vld [vmem:[%s1993_s24 + $0x24] ss:$8 sps:$4 sm:$0xff]   ;;  %v1654_v11 = vld [vmem:[%s1993_s24 + $0x20] ss:$8 sps:$4 sm:$0xff]   ;;  %v1656_v13 = vld [vmem:[%s1993_s24 + $0x34] ss:$8 sps:$4 sm:$0xff]  }
  0x72   : > { %v1652_v10 = vld [vmem:[%s1993_s24 + $0x64] ss:$8 sps:$4 sm:$0xff]   ;;  %v1655_v12 = vld [vmem:[%s1993_s24 + $0x60] ss:$8 sps:$4 sm:$0xff]   ;;  %v1658_v14 = vld [vmem:[%s1993_s24 + $0x74] ss:$8 sps:$4 sm:$0xff]  }
  0x73   : > { %1458 = vmatpush3.bf16.msra.mxu0 %v1627_v54  ;;  %1527 = vmatpush3.bf16.msra.mxu1 %v1627_v54  ;;  %v1660_v15 = vld [vmem:[%s1993_s24 + $0x30] ss:$8 sps:$4 sm:$0xff]   ;;  %v567_v21 = vld [vmem:[#allocation2 + $0x40] sm:$0xff] }
  0x74   : > { %1459 = vmatprep.subr.bf16.mxu0 %v1628_v55  ;;  %1520 = vmatprep.subr.bf16.mxu1 %v1628_v55  ;;  %v1661_v16 = vld [vmem:[%s1993_s24 + $0x70] ss:$8 sps:$4 sm:$0xff]   ;;  %v560_v29 = vld [vmem:[#allocation2] sm:$0xff] }
  0x75   : > { %v559_v19 = vld [vmem:[#allocation2 + $0x30] sm:$0xff]  ;;  %v568_v31 = vld [vmem:[#allocation2 + $0x20] sm:$0xff]  ;;  %v561_v39 = vld [vmem:[#allocation2 + $0x58] sm:$0xff] }
  0x76   : > { %v569_v41 = vld [vmem:[#allocation2 + $0x10] sm:$0xff]  ;;  %v562_v49 = vld [vmem:[#allocation2 + $0x18] sm:$0xff]  ;;  %v571_v61 = vld [vmem:[#allocation2 + $0x60] sm:$0xff] }
  0x77   : > { %1460 = vmatpush3.bf16.msra.mxu0 %v1629_v56  ;;  %1528 = vmatpush3.bf16.msra.mxu1 %v1629_v56  ;;  %v570_v51 = vld [vmem:[#allocation2 + $0x38] sm:$0xff] }
  0x78   : > { %1461 = vmatprep.subr.bf16.mxu0 %v1630_v57  ;;  %1521 = vmatprep.subr.bf16.mxu1 %v1630_v57 }
  0x7b   : > { %1462 = vmatpush3.bf16.msra.mxu0 %v1631_v58  ;;  %1529 = vmatpush3.bf16.msra.mxu1 %v1631_v58 }
  0x7c   : > { %1463 = vmatprep.subr.bf16.mxu0 %v1632_v59  ;;  %1522 = vmatprep.subr.bf16.mxu1 %v1632_v59  ;;  %v563_v59 = vld [vmem:[#allocation2 + $0x50] sm:$0xff] }
  0x7f   : > { %1464 = vmatpush3.bf16.msra.mxu0 %v1633_v62  ;;  %1530 = vmatpush3.bf16.msra.mxu1 %v1633_v62 }
  0x80   : > { %1465 = vmatprep.subr.bf16.mxu0 %v1634_v63  ;;  %1523 = vmatprep.subr.bf16.mxu1 %v1634_v63 }
  0x83   : > { %1466 = vmatpush3.bf16.msra.mxu0 %v1635_v0  ;;  %1531 = vmatpush3.bf16.msra.mxu1 %v1635_v0 }
  0x84   : > { %1467 = vmatprep.subr.bf16.mxu0 %v1636_v1  ;;  %1524 = vmatprep.subr.bf16.mxu1 %v1636_v1 }
  0x87   : > { %1468 = vmatpush3.bf16.msra.mxu0 %v1637_v2  ;;  %1532 = vmatpush3.bf16.msra.mxu1 %v1637_v2 }
  0x8a   : > { %832 = vmatmul.mubr.bf16.vlgmr.msra.gmra.mxu0 %v1638_v3  ;;  %864 = vmatmul.mubr.bf16.vlgmr.msra.gmra.mxu1 %v1641_v4 }
  0x8b   : > { %839 = vmatprep.mubr.bf16.mxu0 %v1644_v5  ;;  %871 = vmatprep.mubr.bf16.mxu1 %v1646_v6  ;;  %v564_v5 = vld [vmem:[#allocation2 + $0x68] sm:$0xff] }
  0x92   : > { %840 = vmatmul.mubr.bf16.gmra.mxu0 %v1648_v7  ;;  %872 = vmatmul.mubr.bf16.gmra.mxu1 %v1649_v8  ;;  %v572_v7 = vld [vmem:[#allocation2 + $0x70] sm:$0xff] }
  0x93   : > { %847 = vmatprep.mubr.bf16.mxu0 %v1650_v9  ;;  %879 = vmatprep.mubr.bf16.mxu1 %v1652_v10 }
  0x9a   : > { %848 = vmatmul.mubr.bf16.gmra.mxu0 %v1654_v11  ;;  %880 = vmatmul.mubr.bf16.gmra.mxu1 %v1655_v12 }
  0x9b   : > { %855 = vmatprep.mubr.bf16.mxu0 %v1656_v13  ;;  %887 = vmatprep.mubr.bf16.mxu1 %v1658_v14 }
  0xa2   : > { %856 = vmatmul.mubr.bf16.gmra.mxu0 %v1660_v15  ;;  %888 = vmatmul.mubr.bf16.gmra.mxu1 %v1661_v16  ;;  %v565_v15 = vld [vmem:[#allocation2 + $0x8] sm:$0xff] }
 0x14a   : > { %v1469_v17 = vpop.f32.mrf.mxu0  ;;  %v1493_v18 = vpop.f32.mrf.mxu1 }
 0x14c   : > { %v1470_v20 = vpop.f32.mrf.mxu0  ;;  %v1494_v22 = vpop.f32.mrf.mxu1 }
 0x14d   : > { %v1471_v23 = vadd.f32 %v1470_v20, %v1469_v17  ;;  %v1495_v24 = vadd.f32 %v1494_v22, %v1493_v18  ;;  %v573_v17 = vld [vmem:[#allocation2 + $0x78] sm:$0xff] }
 0x14e   : > { %v1472_v25 = vpop.f32.mrf.mxu0  ;;  %v1496_v26 = vpop.f32.mrf.mxu1 }
 0x14f   : > { %v896_v27 = vadd.f32 %v1471_v23, %v559_v19  ;;  %v904_v28 = vadd.f32 %v1495_v24, %v567_v21 }
 0x150   : > { %v1473_v30 = vpop.f32.mrf.mxu0  ;;  %v1497_v32 = vpop.f32.mrf.mxu1 }
 0x151   : > { %912 = vst [vmem:[#allocation2 + $0x30] sm:$0xff] %v896_v27  ;;  %920 = vst [vmem:[#allocation2 + $0x40] sm:$0xff] %v904_v28  ;;  %v1474_v33 = vadd.f32 %v1473_v30, %v1472_v25  ;;  %v1498_v34 = vadd.f32 %v1497_v32, %v1496_v26  ;;  %v566_v25 = vld [vmem:[#allocation2 + $0x48] sm:$0xff] }
 0x152   : > { %v1475_v35 = vpop.f32.mrf.mxu0  ;;  %v1499_v36 = vpop.f32.mrf.mxu1  ;;  %v574_v27 = vld [vmem:[#allocation2 + $0x28] sm:$0xff] }
 0x153   : > { %v897_v37 = vadd.f32 %v1474_v33, %v560_v29  ;;  %v905_v38 = vadd.f32 %v1498_v34, %v568_v31 }
 0x154   : > { %v1476_v40 = vpop.f32.mrf.mxu0  ;;  %v1500_v42 = vpop.f32.mrf.mxu1 }
 0x155   : > { %913 = vst [vmem:[#allocation2] sm:$0xff] %v897_v37  ;;  %921 = vst [vmem:[#allocation2 + $0x20] sm:$0xff] %v905_v38  ;;  %v1477_v43 = vadd.f32 %v1476_v40, %v1475_v35  ;;  %v1501_v44 = vadd.f32 %v1500_v42, %v1499_v36 }
 0x156   : > { %v1478_v45 = vpop.f32.mrf.mxu0  ;;  %v1502_v46 = vpop.f32.mrf.mxu1 }
 0x157   : > { %v898_v47 = vadd.f32 %v1477_v43, %v561_v39  ;;  %v906_v48 = vadd.f32 %v1501_v44, %v569_v41 }
 0x158   : > { %v1479_v50 = vpop.f32.mrf.mxu0  ;;  %v1503_v52 = vpop.f32.mrf.mxu1 }
 0x159   : > { %914 = vst [vmem:[#allocation2 + $0x58] sm:$0xff] %v898_v47  ;;  %922 = vst [vmem:[#allocation2 + $0x10] sm:$0xff] %v906_v48  ;;  %v1480_v53 = vadd.f32 %v1479_v50, %v1478_v45  ;;  %v1504_v54 = vadd.f32 %v1503_v52, %v1502_v46 }
 0x15a   : > { %v1481_v55 = vpop.f32.mrf.mxu0  ;;  %v1505_v56 = vpop.f32.mrf.mxu1 }
 0x15b   : > { %v899_v57 = vadd.f32 %v1480_v53, %v562_v49  ;;  %v907_v58 = vadd.f32 %v1504_v54, %v570_v51 }
 0x15c   : > { %v1482_v60 = vpop.f32.mrf.mxu0  ;;  %v1506_v62 = vpop.f32.mrf.mxu1 }
 0x15d   : > { %915 = vst [vmem:[#allocation2 + $0x18] sm:$0xff] %v899_v57  ;;  %923 = vst [vmem:[#allocation2 + $0x38] sm:$0xff] %v907_v58  ;;  %v1483_v63 = vadd.f32 %v1482_v60, %v1481_v55  ;;  %v1507_v0 = vadd.f32 %v1506_v62, %v1505_v56 }
 0x15e   : > { %v1484_v1 = vpop.f32.mrf.mxu0  ;;  %v1508_v2 = vpop.f32.mrf.mxu1 }
 0x15f   : > { %v900_v3 = vadd.f32 %v1483_v63, %v563_v59  ;;  %v908_v4 = vadd.f32 %v1507_v0, %v571_v61 }
 0x160   : > { %v1485_v6 = vpop.f32.mrf.mxu0  ;;  %v1509_v8 = vpop.f32.mrf.mxu1 }
 0x161   : > { %916 = vst [vmem:[#allocation2 + $0x50] sm:$0xff] %v900_v3  ;;  %924 = vst [vmem:[#allocation2 + $0x60] sm:$0xff] %v908_v4  ;;  %v1486_v9 = vadd.f32 %v1485_v6, %v1484_v1  ;;  %v1510_v10 = vadd.f32 %v1509_v8, %v1508_v2 }
 0x162   : > { %v1487_v11 = vpop.f32.mrf.mxu0  ;;  %v1511_v12 = vpop.f32.mrf.mxu1 }
 0x163   : > { %v901_v13 = vadd.f32 %v1486_v9, %v564_v5  ;;  %v909_v14 = vadd.f32 %v1510_v10, %v572_v7 }
 0x164   : > { %v1488_v16 = vpop.f32.mrf.mxu0  ;;  %v1512_v18 = vpop.f32.mrf.mxu1 }
 0x165   : > { %917 = vst [vmem:[#allocation2 + $0x68] sm:$0xff] %v901_v13  ;;  %925 = vst [vmem:[#allocation2 + $0x70] sm:$0xff] %v909_v14  ;;  %v1489_v19 = vadd.f32 %v1488_v16, %v1487_v11  ;;  %v1513_v20 = vadd.f32 %v1512_v18, %v1511_v12 }
 0x166   : > { %v1490_v21 = vpop.f32.mrf.mxu0  ;;  %v1514_v22 = vpop.f32.mrf.mxu1 }
 0x167   : > { %v902_v23 = vadd.f32 %v1489_v19, %v565_v15  ;;  %v910_v24 = vadd.f32 %v1513_v20, %v573_v17 }
 0x168   : > { %v1491_v26 = vpop.f32.mrf.mxu0  ;;  %v1515_v28 = vpop.f32.mrf.mxu1 }
 0x169   : > { %918 = vst [vmem:[#allocation2 + $0x8] sm:$0xff] %v902_v23  ;;  %926 = vst [vmem:[#allocation2 + $0x78] sm:$0xff] %v910_v24  ;;  %v1492_v29 = vadd.f32 %v1491_v26, %v1490_v21  ;;  %v1516_v30 = vadd.f32 %v1515_v28, %v1514_v22  ;;  %931 = sbr.rel (%p1365_p5) target bundleno = 387 (0x183), region = 123 }
 0x16b   : > { %v903_v31 = vadd.f32 %v1492_v29, %v566_v25  ;;  %v911_v32 = vadd.f32 %v1516_v30, %v574_v27 }
 0x16d   : > { %919 = vst [vmem:[#allocation2 + $0x48] sm:$0xff] %v903_v31  ;;  %927 = vst [vmem:[#allocation2 + $0x28] sm:$0xff] %v911_v32 }
 0x16e   : > { %v932_v33 = vld [vmem:[#allocation2 + $0x30] sm:$0xff]  ;;  %v933_v34 = vld [vmem:[#allocation2] sm:$0xff]  ;;  %v934_v39 = vld [vmem:[#allocation2 + $0x58] sm:$0xff] }
 0x16f   : > { %v2038_v35 = vld [vmem:[%s533_s9] ss:$0 sm:$0xff]  ;;  %v935_v40 = vld [vmem:[#allocation2 + $0x18] sm:$0xff]  ;;  %v936_v43 = vld [vmem:[#allocation2 + $0x50] sm:$0xff] }
 0x170   : > { %v955_v36 = vmul.f32 %v2038_v35, %v932_v33  ;;  %v956_v37 = vmul.f32 %v2038_v35, %v933_v34  ;;  %v2047_v38 = vld [vmem:[%s536_s27] ss:$0 sm:$0xff]  ;;  %v957_v41 = vmul.f32 %v2038_v35, %v934_v39  ;;  %v958_v42 = vmul.f32 %v2038_v35, %v935_v40  ;;  %v937_v44 = vld [vmem:[#allocation2 + $0x68] sm:$0xff]  ;;  %v942_v1 = vld [vmem:[#allocation2 + $0x10] sm:$0xff] }
 0x171   : > { %v938_v45 = vld [vmem:[#allocation2 + $0x8] sm:$0xff]  ;;  %v959_v48 = vmul.f32 %v2038_v35, %v936_v43  ;;  %v960_v49 = vmul.f32 %v2038_v35, %v937_v44  ;;  %v940_v55 = vld [vmem:[#allocation2 + $0x40] sm:$0xff]  ;;  %v943_v2 = vld [vmem:[#allocation2 + $0x38] sm:$0xff]  ;;  %v965_v16 = vmul.f32 %v2038_v35, %v942_v1 }
 0x172   : > { %v978_v46 = vadd.f32 %v2047_v38, %v955_v36  ;;  %v979_v47 = vadd.f32 %v2047_v38, %v956_v37  ;;  %v980_v51 = vadd.f32 %v2047_v38, %v957_v41  ;;  %v981_v52 = vadd.f32 %v2047_v38, %v958_v42  ;;  %v941_v60 = vld [vmem:[#allocation2 + $0x20] sm:$0xff]  ;;  %v945_v8 = vld [vmem:[#allocation2 + $0x70] sm:$0xff]  ;;  %v946_v13 = vld [vmem:[#allocation2 + $0x78] sm:$0xff] }
 0x173   : > { %v961_v53 = vmul.f32 %v2038_v35, %v938_v45  ;;  %v982_v58 = vadd.f32 %v2047_v38, %v959_v48  ;;  %v983_v59 = vadd.f32 %v2047_v38, %v960_v49  ;;  %v963_v6 = vmul.f32 %v2038_v35, %v940_v55  ;;  %v944_v7 = vld [vmem:[#allocation2 + $0x60] sm:$0xff] }
 0x174   : > { %v939_v50 = vld [vmem:[#allocation2 + $0x48] sm:$0xff]  ;;  %v994_v56 = vmax.f32 %v978_v46, 0.0  ;;  %v995_v57 = vmax.f32 %v979_v47, 0.0  ;;  %v996_v61 = vmax.f32 %v980_v51, 0.0  ;;  %v997_v62 = vmax.f32 %v981_v52, 0.0 }
 0x175   : > { %v962_v54 = vmul.f32 %v2038_v35, %v939_v50  ;;  %v984_v63 = vadd.f32 %v2047_v38, %v961_v53  ;;  %v998_v4 = vmax.f32 %v982_v58, 0.0  ;;  %v999_v5 = vmax.f32 %v983_v59, 0.0  ;;  %v947_v18 = vld [vmem:[#allocation2 + $0x28] sm:$0xff] }
 0x176   : > { %v1409_v3 = vpack.c.bf16 %v995_v57, %v994_v56  ;;  %v1414_v9 = vpack.c.bf16 %v997_v62, %v996_v61  ;;  %v964_v12 = vmul.f32 %v2038_v35, %v941_v60  ;;  %v986_v15 = vadd.f32 %v2047_v38, %v963_v6 }
 0x177   : > { %v985_v0 = vadd.f32 %v2047_v38, %v962_v54  ;;  %v1000_v10 = vmax.f32 %v984_v63, 0.0  ;;  %v1419_v14 = vpack.c.bf16 %v999_v5, %v998_v4  ;;  %v966_v17 = vmul.f32 %v2038_v35, %v943_v2 }
 0x178   : > { %1410 = vst [vmem:[%s1997_s19] sm:$0xff] %v1409_v3   ;;  %1446 = vst [vmem:[%s1997_s19 + $0x8] sm:$0xff] %v1414_v9   ;;  %v987_v20 = vadd.f32 %v2047_v38, %v964_v12  ;;  %v967_v21 = vmul.f32 %v2038_v35, %v944_v7  ;;  %v968_v22 = vmul.f32 %v2038_v35, %v945_v8  ;;  %v1002_v23 = vmax.f32 %v986_v15, 0.0 }
 0x179   : > { %v1001_v11 = vmax.f32 %v985_v0, 0.0  ;;  %1447 = vst [vmem:[%s1997_s19 + $0x10] sm:$0xff] %v1419_v14   ;;  %v988_v24 = vadd.f32 %v2047_v38, %v965_v16  ;;  %v989_v25 = vadd.f32 %v2047_v38, %v966_v17  ;;  %v969_v26 = vmul.f32 %v2038_v35, %v946_v13 }
 0x17a   : > { %v1003_v27 = vmax.f32 %v987_v20, 0.0  ;;  %v990_v28 = vadd.f32 %v2047_v38, %v967_v21  ;;  %v991_v29 = vadd.f32 %v2047_v38, %v968_v22  ;;  %v970_v30 = vmul.f32 %v2038_v35, %v947_v18 }
 0x17b   : > { %v1424_v19 = vpack.c.bf16 %v1001_v11, %v1000_v10  ;;  %v1004_v31 = vmax.f32 %v988_v24, 0.0  ;;  %v1005_v32 = vmax.f32 %v989_v25, 0.0  ;;  %v992_v33 = vadd.f32 %v2047_v38, %v969_v26 }
 0x17c   : > { %v1429_v34 = vpack.c.bf16 %v1003_v27, %v1002_v23  ;;  %v1006_v36 = vmax.f32 %v990_v28, 0.0  ;;  %v1007_v37 = vmax.f32 %v991_v29, 0.0  ;;  %v993_v39 = vadd.f32 %v2047_v38, %v970_v30 }
 0x17d   : > { %1448 = vst [vmem:[%s1997_s19 + $0x18] sm:$0xff] %v1424_v19   ;;  %v1434_v40 = vpack.c.bf16 %v1005_v32, %v1004_v31  ;;  %v1008_v41 = vmax.f32 %v992_v33, 0.0 }
 0x17e   : > { %1449 = vst [vmem:[%s1997_s19 + $0x20] sm:$0xff] %v1429_v34   ;;  %v1439_v42 = vpack.c.bf16 %v1007_v37, %v1006_v36  ;;  %v1009_v43 = vmax.f32 %v993_v39, 0.0 }
 0x17f   : > { %1450 = vst [vmem:[%s1997_s19 + $0x28] sm:$0xff] %v1434_v40  }
 0x180   : > { %1451 = vst [vmem:[%s1997_s19 + $0x30] sm:$0xff] %v1439_v42   ;;  %v1444_v44 = vpack.c.bf16 %v1009_v43, %v1008_v41 }
 0x182   : > { %1452 = vst [vmem:[%s1997_s19 + $0x38] sm:$0xff] %v1444_v44  }
 0x183 PF: > { %1096 = sbr.rel (!%p1870_p12) target bundleno = 399 (0x18f), region = 127  ;;  %s1385_s21 = sshll.u32 (%p1870_p12), %s1736_s22, 2  ;;  %v1118_v35 = vld [vmem:[%s1997_s19] sm:$0xf] (%p1870_p12)  ;;  %v1120_v38 = vld [vmem:[%s1997_s19 + $0x4] sm:$0xf] (%p1870_p12) }
 0x184   : > { %s1101_s26 = scalar_lea.vmem (%p1870_p12), %s2146_s4, %s1385_s21  ;;  %v1122_v45 = vld [vmem:[%s1997_s19 + $0x8] sm:$0xf] (%p1870_p12)  ;;  %v1124_v46 = vld [vmem:[%s1997_s19 + $0xc] sm:$0xf] (%p1870_p12)  ;;  %v1126_v47 = vld [vmem:[%s1997_s19 + $0x10] sm:$0xf] (%p1870_p12) }
 0x185   : > { %1119 = vst [vmem:[%s1101_s26] sm:$0xf] (%p1870_p12), %v1118_v35  ;;  %1121 = vst [vmem:[%s1101_s26 + $0x8] sm:$0xf] (%p1870_p12), %v1120_v38  ;;  %v1128_v48 = vld [vmem:[%s1997_s19 + $0x14] sm:$0xf] (%p1870_p12) }
 0x186   : > { %1123 = vst [vmem:[%s1101_s26 + $0x10] sm:$0xf] (%p1870_p12), %v1122_v45  ;;  %1125 = vst [vmem:[%s1101_s26 + $0x18] sm:$0xf] (%p1870_p12), %v1124_v46  ;;  %v1130_v49 = vld [vmem:[%s1997_s19 + $0x18] sm:$0xf] (%p1870_p12) }
 0x187   : > { %1127 = vst [vmem:[%s1101_s26 + $0x20] sm:$0xf] (%p1870_p12), %v1126_v47  ;;  %v1132_v50 = vld [vmem:[%s1997_s19 + $0x1c] sm:$0xf] (%p1870_p12)  ;;  %1129 = vst [vmem:[%s1101_s26 + $0x28] sm:$0xf] (%p1870_p12), %v1128_v48 }
 0x188   : > { %1131 = vst [vmem:[%s1101_s26 + $0x30] sm:$0xf] %v1130_v49  ;;  %1133 = vst [vmem:[%s1101_s26 + $0x38] sm:$0xf] %v1132_v50  ;;  %v1134_v51 = vld [vmem:[%s1997_s19 + $0x20] sm:$0xf] }
 0x189   : > { %v1136_v52 = vld [vmem:[%s1997_s19 + $0x24] sm:$0xf]  ;;  %v1138_v53 = vld [vmem:[%s1997_s19 + $0x28] sm:$0xf]  ;;  %1135 = vst [vmem:[%s1101_s26 + $0x40] sm:$0xf] %v1134_v51 }
 0x18a   : > { %1137 = vst [vmem:[%s1101_s26 + $0x48] sm:$0xf] %v1136_v52  ;;  %1139 = vst [vmem:[%s1101_s26 + $0x50] sm:$0xf] %v1138_v53  ;;  %v1140_v54 = vld [vmem:[%s1997_s19 + $0x2c] sm:$0xf] }
 0x18b   : > { %v1142_v55 = vld [vmem:[%s1997_s19 + $0x30] sm:$0xf]  ;;  %v1144_v56 = vld [vmem:[%s1997_s19 + $0x34] sm:$0xf]  ;;  %1141 = vst [vmem:[%s1101_s26 + $0x58] sm:$0xf] %v1140_v54 }
 0x18c   : > { %1143 = vst [vmem:[%s1101_s26 + $0x60] sm:$0xf] %v1142_v55  ;;  %1145 = vst [vmem:[%s1101_s26 + $0x68] sm:$0xf] %v1144_v56  ;;  %v1146_v57 = vld [vmem:[%s1997_s19 + $0x38] sm:$0xf] }
 0x18d   : > { %v1148_v58 = vld [vmem:[%s1997_s19 + $0x3c] sm:$0xf]  ;;  %1147 = vst [vmem:[%s1101_s26 + $0x70] sm:$0xf] %v1146_v57 }
 0x18e   : > { %1149 = vst [vmem:[%s1101_s26 + $0x78] sm:$0xf] %v1148_v58 }
 0x18f PF: > { %s14_s25 = sadd.s32 1, %s1748_s25   ;;  %s2160_s22 = sld [smem:[#allocation6_spill]] }
 0x190   : > { %p11_p6 = scmp.ge.s32.totalorder %s14_s25, 16   ;;  %s2161_s14 = sld [smem:[#allocation7_spill]] }
 0x191   : > { %s2162_s24 = sld [smem:[#allocation8_spill]]  ;;  %s2163_s15 = smov %s1712_s16 }
 0x192   : > { %s2164_s16 = smov %s1868_s13  ;;  %s2165_s17 = smov %s1720_s18 }
 0x193   : > { %s2166_s18 = smov %s1865_s12  ;;  %s2167_s19 = smov %s1728_s20 }
 0x194   : > { %s2168_s20 = smov %s1851_s7  ;;  %s2169_s21 = smov %s1740_s23 }
 0x195   :  { %13 = sbr.rel (!%p11_p6) target bundleno = 9 (0x9), region = 213 }
 0x196   : > { %s2170_s23 = smov %s2161_s14 }

// kernel: _lambda_.16
= control target key start
LH: loop header
LB: loop body
LE: loop exit
PB: predicated region body
PF: predicated region fallthrough
CT: control target
= control target key end

     0   :  { %s1158_s15 = smov 0   ;;  %s1160_s16 = smov 0   ;;  %s1349_s0 = inlined_call_operand.vmem [shape: bf16[16,256], index: 0, kind: input, shape index: {}]   ;;  %s1350_s1 = inlined_call_operand.vmem [shape: bf16[256,512], index: 1, kind: input, shape index: {}]   ;;  %s1351_s2 = inlined_call_operand.vmem [shape: f32[1,512], index: 2, kind: input, shape index: {}]   ;;  %s1352_s3 = inlined_call_operand.vmem [shape: f32[1,512], index: 3, kind: input, shape index: {}]   ;;  %s1353_s4 = inlined_call_operand.vmem [shape: bf16[16,512], index: 4, kind: output, shape index: {}]  }
   0x1   :  { %s1162_s17 = smov 0   ;;  %s1164_s18 = smov 0  }
   0x2   :  { %s1166_s19 = smov 0  }
   0x3 LB: > { %s29_s20 = sadd.s32 1, %s1127_s18  ;;  %s944_s21 = sadd.s32 4294967295, %s1131_s19   ;;  %s1131_s19 = sphi %s1166_s19, %s14_s19   ;;  %s1127_s18 = sphi %s1164_s18, %s1358_s18   ;;  %s1123_s17 = sphi %s1162_s17, %s1357_s17   ;;  %s1119_s16 = sphi %s1160_s16, %s1356_s16   ;;  %s1115_s15 = sphi %s1158_s15, %s1355_s15  }
   0x4   : > { %p31_p0 = scmp.ge.s32.totalorder %s29_s20, 2  ;;  %p77_p1 = scmp.ne.s32.totalorder %s1119_s16, %s1115_s15 }
   0x5   : > { %p78_p2 = scmp.eq.s32.totalorder %s1131_s19, 0  ;;  %p161_p4 = scmp.eq.s32.totalorder %s944_s21, 1 }
   0x6   : > { %s1360_s20 = smov (%p31_p0, %s29_s20), 0  ;;  %s70_s23 = sadd.s32 1, %s1119_s16 }
   0x7   : > { %p79_p3 = por %p78_p2, %p77_p1  ;;  %s66_s22 = ssub.s32 %s1127_s18, %s1360_s20 }
   0x8   : > { %p68_p5 = scmp.eq.s32.totalorder %s66_s22, 0  ;;  %p1193_p6 = por %p161_p4, %p77_p1 }
   0x9   : > { %p948_p7 = scmp.ge.s32.totalorder %s1131_s19, 2 }
   0xa   : > { %s1198_s25 = scalar_select %p68_p5, %s1119_s16, %s70_s23  }
   0xb   : > { %198 = sbr.rel (%p948_p7) target bundleno = 36 (0x24), region = 20 }
  0x10   : > { %201 = sbr.rel (!%p79_p3) target bundleno = 36 (0x24), region = 24  ;;  %s203_s26 = sand.u32 (%p79_p3), 1, %s1119_s16  }
  0x11   : > { %s998_s27 = sshll.u32 (%p79_p3), %s1127_s18, 3  ;;  %s949_s28 = sshll.u32 (%p79_p3), %s203_s26, 8 }
  0x12   : > { %s1206_s5 = scalar_lea.vmem (%p79_p3), %s1350_s1, %s998_s27  ;;  %s1211_s6 = scalar_lea.vmem (%p79_p3), [#allocation3], %s949_s28 }
  0x13   : > { %v302_v0 = vld [vmem:[%s1206_s5] sm:$0xff] (%p79_p3)  ;;  %v304_v1 = vld [vmem:[%s1206_s5 + $0x10] sm:$0xff] (%p79_p3) }
  0x14   : > { %v306_v2 = vld [vmem:[%s1206_s5 + $0x20] sm:$0xff] (%p79_p3)  ;;  %303 = vst [vmem:[%s1211_s6] sm:$0xff] (%p79_p3), %v302_v0  ;;  %305 = vst [vmem:[%s1211_s6 + $0x8] sm:$0xff] (%p79_p3), %v304_v1  ;;  %v308_v3 = vld [vmem:[%s1206_s5 + $0x30] sm:$0xff] (%p79_p3) }
  0x15   : > { %307 = vst [vmem:[%s1211_s6 + $0x10] sm:$0xff] %v306_v2  ;;  %v310_v4 = vld [vmem:[%s1206_s5 + $0x40] sm:$0xff]  ;;  %v312_v5 = vld [vmem:[%s1206_s5 + $0x50] sm:$0xff]  ;;  %309 = vst [vmem:[%s1211_s6 + $0x18] sm:$0xff] %v308_v3 }
  0x16   : > { %311 = vst [vmem:[%s1211_s6 + $0x20] sm:$0xff] %v310_v4  ;;  %313 = vst [vmem:[%s1211_s6 + $0x28] sm:$0xff] %v312_v5  ;;  %v314_v6 = vld [vmem:[%s1206_s5 + $0x60] sm:$0xff]  ;;  %v316_v7 = vld [vmem:[%s1206_s5 + $0x70] sm:$0xff] }
  0x17   : > { %v318_v8 = vld [vmem:[%s1206_s5 + $0x80] sm:$0xff]  ;;  %315 = vst [vmem:[%s1211_s6 + $0x30] sm:$0xff] %v314_v6  ;;  %317 = vst [vmem:[%s1211_s6 + $0x38] sm:$0xff] %v316_v7  ;;  %v320_v9 = vld [vmem:[%s1206_s5 + $0x90] sm:$0xff] }
  0x18   : > { %319 = vst [vmem:[%s1211_s6 + $0x40] sm:$0xff] %v318_v8  ;;  %v322_v10 = vld [vmem:[%s1206_s5 + $0xa0] sm:$0xff]  ;;  %v324_v11 = vld [vmem:[%s1206_s5 + $0xb0] sm:$0xff]  ;;  %321 = vst [vmem:[%s1211_s6 + $0x48] sm:$0xff] %v320_v9 }
  0x19   : > { %323 = vst [vmem:[%s1211_s6 + $0x50] sm:$0xff] %v322_v10  ;;  %325 = vst [vmem:[%s1211_s6 + $0x58] sm:$0xff] %v324_v11  ;;  %v326_v12 = vld [vmem:[%s1206_s5 + $0xc0] sm:$0xff]  ;;  %v328_v13 = vld [vmem:[%s1206_s5 + $0xd0] sm:$0xff] }
  0x1a   : > { %v330_v14 = vld [vmem:[%s1206_s5 + $0xe0] sm:$0xff]  ;;  %327 = vst [vmem:[%s1211_s6 + $0x60] sm:$0xff] %v326_v12  ;;  %329 = vst [vmem:[%s1211_s6 + $0x68] sm:$0xff] %v328_v13  ;;  %v332_v15 = vld [vmem:[%s1206_s5 + $0xf0] sm:$0xff] }
  0x1b   : > { %331 = vst [vmem:[%s1211_s6 + $0x70] sm:$0xff] %v330_v14  ;;  %v334_v16 = vld [vmem:[%s1206_s5 + $0x100] sm:$0xff]  ;;  %v336_v17 = vld [vmem:[%s1206_s5 + $0x110] sm:$0xff]  ;;  %333 = vst [vmem:[%s1211_s6 + $0x78] sm:$0xff] %v332_v15 }
  0x1c   : > { %335 = vst [vmem:[%s1211_s6 + $0x80] sm:$0xff] %v334_v16  ;;  %337 = vst [vmem:[%s1211_s6 + $0x88] sm:$0xff] %v336_v17  ;;  %v338_v18 = vld [vmem:[%s1206_s5 + $0x120] sm:$0xff]  ;;  %v340_v19 = vld [vmem:[%s1206_s5 + $0x130] sm:$0xff] }
  0x1d   : > { %v342_v20 = vld [vmem:[%s1206_s5 + $0x140] sm:$0xff]  ;;  %339 = vst [vmem:[%s1211_s6 + $0x90] sm:$0xff] %v338_v18  ;;  %341 = vst [vmem:[%s1211_s6 + $0x98] sm:$0xff] %v340_v19  ;;  %v344_v21 = vld [vmem:[%s1206_s5 + $0x150] sm:$0xff] }
  0x1e   : > { %343 = vst [vmem:[%s1211_s6 + $0xa0] sm:$0xff] %v342_v20  ;;  %v346_v22 = vld [vmem:[%s1206_s5 + $0x160] sm:$0xff]  ;;  %v348_v23 = vld [vmem:[%s1206_s5 + $0x170] sm:$0xff]  ;;  %345 = vst [vmem:[%s1211_s6 + $0xa8] sm:$0xff] %v344_v21 }
  0x1f   : > { %347 = vst [vmem:[%s1211_s6 + $0xb0] sm:$0xff] %v346_v22  ;;  %349 = vst [vmem:[%s1211_s6 + $0xb8] sm:$0xff] %v348_v23  ;;  %v350_v24 = vld [vmem:[%s1206_s5 + $0x180] sm:$0xff]  ;;  %v352_v25 = vld [vmem:[%s1206_s5 + $0x190] sm:$0xff] }
  0x20   : > { %v354_v26 = vld [vmem:[%s1206_s5 + $0x1a0] sm:$0xff]  ;;  %351 = vst [vmem:[%s1211_s6 + $0xc0] sm:$0xff] %v350_v24  ;;  %353 = vst [vmem:[%s1211_s6 + $0xc8] sm:$0xff] %v352_v25  ;;  %v356_v27 = vld [vmem:[%s1206_s5 + $0x1b0] sm:$0xff] }
  0x21   : > { %355 = vst [vmem:[%s1211_s6 + $0xd0] sm:$0xff] %v354_v26  ;;  %v358_v28 = vld [vmem:[%s1206_s5 + $0x1c0] sm:$0xff]  ;;  %v360_v29 = vld [vmem:[%s1206_s5 + $0x1d0] sm:$0xff]  ;;  %357 = vst [vmem:[%s1211_s6 + $0xd8] sm:$0xff] %v356_v27 }
  0x22   : > { %359 = vst [vmem:[%s1211_s6 + $0xe0] sm:$0xff] %v358_v28  ;;  %361 = vst [vmem:[%s1211_s6 + $0xe8] sm:$0xff] %v360_v29  ;;  %v362_v30 = vld [vmem:[%s1206_s5 + $0x1e0] sm:$0xff]  ;;  %v364_v31 = vld [vmem:[%s1206_s5 + $0x1f0] sm:$0xff] }
  0x23   : > { %363 = vst [vmem:[%s1211_s6 + $0xf0] sm:$0xff] %v362_v30  ;;  %365 = vst [vmem:[%s1211_s6 + $0xf8] sm:$0xff] %v364_v31 }
  0x24 PF: > { %p952_p8 = scmp.ge.s32.totalorder %s1131_s19, 1  ;;  %p386_p9 = scmp.lt.s32.totalorder %s1131_s19, 3 }
  0x26   : > { %p387_p10 = pnand %p952_p8, %p386_p9 }
  0x27   : > { %s393_s7 = sand.u32 (!%p387_p10), 1, %s1115_s15   ;;  %s955_s14 = sshll.u32 (!%p387_p10), %s1123_s17, 1 }
  0x28   : > { %390 = sbr.rel (%p387_p10) target bundleno = 324 (0x144), region = 70  ;;  %s953_s8 = sshll.u32 (!%p387_p10), %s393_s7, 8 }
  0x29   : > { %s1282_s11 = scalar_lea.vmem (!%p387_p10), [#allocation3], %s953_s8  ;;  %p450_p11 = scmp.lt.s32.totalorder (!%p387_p10), %s955_s14, 3 }
  0x2a   : > { %s954_s29 = sshll.u32 (!%p387_p10), %s393_s7, 4 }
  0x2b   : > { %s434_s30 = scalar_lea.vmem (!%p387_p10), [#allocation4], %s954_s29 }
  0x2d   : > { %v1092_v32 = vld [vmem:[%s1349_s0 + $0x4] ss:$8 sps:$4 sm:$0xff]   ;;  %v1042_v33 = vld [vmem:[%s1282_s11 + $0x74] ss:$8 sps:$4 sm:$0xff]   ;;  %v1044_v34 = vld [vmem:[%s1282_s11 + $0x70] ss:$8 sps:$4 sm:$0xff]   ;;  %v737_v2 = vlaneseq }
  0x2e   : > { %709 = vmatprep.mubr.bf16.mxu0 %v1092_v32  ;;  %677 = vmatprep.subr.bf16.mxu0 %v1042_v33  ;;  %v1045_v35 = vld [vmem:[%s1282_s11 + $0x64] ss:$8 sps:$4 sm:$0xff]   ;;  %v1047_v36 = vld [vmem:[%s1282_s11 + $0x60] ss:$8 sps:$4 sm:$0xff]   ;;  %v1048_v37 = vld [vmem:[%s1282_s11 + $0x54] ss:$8 sps:$4 sm:$0xff]  }
  0x2f   : > { %678 = vmatpush1.bf16.msra.mxu0 %v1044_v34  ;;  %v1050_v38 = vld [vmem:[%s1282_s11 + $0x50] ss:$8 sps:$4 sm:$0xff]   ;;  %v1051_v39 = vld [vmem:[%s1282_s11 + $0x44] ss:$8 sps:$4 sm:$0xff]   ;;  %v1053_v40 = vld [vmem:[%s1282_s11 + $0x40] ss:$8 sps:$4 sm:$0xff]  }
  0x30   : > { %679 = vmatprep.subr.bf16.mxu0 %v1045_v35  ;;  %v1054_v41 = vld [vmem:[%s1282_s11 + $0x34] ss:$8 sps:$4 sm:$0xff]   ;;  %v1056_v42 = vld [vmem:[%s1282_s11 + $0x30] ss:$8 sps:$4 sm:$0xff]   ;;  %v1057_v43 = vld [vmem:[%s1282_s11 + $0x24] ss:$8 sps:$4 sm:$0xff]  }
  0x31   : > { %v1059_v44 = vld [vmem:[%s1282_s11 + $0x20] ss:$8 sps:$4 sm:$0xff]   ;;  %v1060_v45 = vld [vmem:[%s1282_s11 + $0x14] ss:$8 sps:$4 sm:$0xff]   ;;  %v1062_v46 = vld [vmem:[%s1282_s11 + $0x10] ss:$8 sps:$4 sm:$0xff]  }
  0x32   : > { %v1063_v47 = vld [vmem:[%s1282_s11 + $0x4] ss:$8 sps:$4 sm:$0xff]   ;;  %v1065_v48 = vld [vmem:[%s1282_s11] ss:$8 sps:$4 sm:$0xff]   ;;  %v1066_v49 = vld [vmem:[%s1282_s11 + $0xf4] ss:$8 sps:$4 sm:$0xff]  }
  0x33   : > { %680 = vmatpush1.bf16.msra.mxu0 %v1047_v36  ;;  %v1068_v50 = vld [vmem:[%s1282_s11 + $0xf0] ss:$8 sps:$4 sm:$0xff]   ;;  %v1069_v51 = vld [vmem:[%s1282_s11 + $0xe4] ss:$8 sps:$4 sm:$0xff]   ;;  %v1071_v52 = vld [vmem:[%s1282_s11 + $0xe0] ss:$8 sps:$4 sm:$0xff]  }
  0x34   : > { %681 = vmatprep.subr.bf16.mxu0 %v1048_v37  ;;  %v1072_v53 = vld [vmem:[%s1282_s11 + $0xd4] ss:$8 sps:$4 sm:$0xff]   ;;  %v1074_v54 = vld [vmem:[%s1282_s11 + $0xd0] ss:$8 sps:$4 sm:$0xff]   ;;  %v1075_v55 = vld [vmem:[%s1282_s11 + $0xc4] ss:$8 sps:$4 sm:$0xff]  }
  0x35   : > { %v1077_v56 = vld [vmem:[%s1282_s11 + $0xc0] ss:$8 sps:$4 sm:$0xff]   ;;  %v1078_v57 = vld [vmem:[%s1282_s11 + $0xb4] ss:$8 sps:$4 sm:$0xff]   ;;  %v1080_v58 = vld [vmem:[%s1282_s11 + $0xb0] ss:$8 sps:$4 sm:$0xff]  }
  0x36   : > { %v1081_v59 = vld [vmem:[%s1282_s11 + $0xa4] ss:$8 sps:$4 sm:$0xff]   ;;  %v1083_v60 = vld [vmem:[%s1282_s11 + $0xa0] ss:$8 sps:$4 sm:$0xff]   ;;  %v1084_v61 = vld [vmem:[%s1282_s11 + $0x94] ss:$8 sps:$4 sm:$0xff]  }
  0x37   : > { %682 = vmatpush1.bf16.msra.mxu0 %v1050_v38  ;;  %v1086_v62 = vld [vmem:[%s1282_s11 + $0x90] ss:$8 sps:$4 sm:$0xff]   ;;  %v1087_v63 = vld [vmem:[%s1282_s11 + $0x84] ss:$8 sps:$4 sm:$0xff]   ;;  %v1089_v0 = vld [vmem:[%s1282_s11 + $0x80] ss:$8 sps:$4 sm:$0xff]  }
  0x38   : > { %683 = vmatprep.subr.bf16.mxu0 %v1051_v39  ;;  %v1090_v1 = vld [vmem:[%s1349_s0] ss:$8 sps:$4 sm:$0xff]   ;;  %s1362_s14 = smov (!%p450_p11, %s955_s14), 3  ;;  %v738_v3 = vshrl.u32 %v737_v2, 7  ;;  %s1001_s15 = sshll.u32 (%p1193_p6), %s1123_s17, 3 }
  0x39   : > { %s452_s23 = scalar_lea.vmem %s1351_s2, %s1362_s14  ;;  %s457_s28 = scalar_lea.vmem %s1352_s3, %s1362_s14 }
  0x3a   : > { %v739_v4 = vsub.s32 0, %v738_v3  ;;  %v735_v5 = vld [vmem:[%s452_s23] sm:$0x3]  ;;  %v743_v6 = vsub.s32 1, %v738_v3  ;;  %s793_s7 = scalar_lea.vmem (%p1193_p6), %s1353_s4, %s1001_s15 }
  0x3b   : > { %684 = vmatpush1.bf16.msra.mxu0 %v1053_v40  ;;  %v751_v8 = vld [vmem:[%s457_s28] sm:$0x3] }
  0x3c   : > { %685 = vmatprep.subr.bf16.mxu0 %v1054_v41  ;;  %v740_v7 = vrot.slane %v735_v5, %v739_v4  ;;  %v744_v9 = vrot.slane %v735_v5, %v743_v6  ;;  %v756_v12 = vrot.slane %v751_v8, %v739_v4  ;;  %v760_v13 = vrot.slane %v751_v8, %v743_v6 }
  0x3f   : > { %686 = vmatpush1.bf16.msra.mxu0 %v1056_v42 }
  0x40   : > { %687 = vmatprep.subr.bf16.mxu0 %v1057_v43 }
  0x43   : > { %688 = vmatpush1.bf16.msra.mxu0 %v1059_v44 }
  0x44   : > { %689 = vmatprep.subr.bf16.mxu0 %v1060_v45 }
  0x47   : > { %690 = vmatpush1.bf16.msra.mxu0 %v1062_v46 }
  0x48   : > { %691 = vmatprep.subr.bf16.mxu0 %v1063_v47 }
  0x4b   : > { %692 = vmatpush1.bf16.msra.mxu0 %v1065_v48 }
  0x4c   : > { %693 = vmatprep.subr.bf16.mxu0 %v1066_v49 }
  0x4f   : > { %694 = vmatpush2.bf16.msra.mxu0 %v1068_v50 }
  0x50   : > { %695 = vmatprep.subr.bf16.mxu0 %v1069_v51 }
  0x53   : > { %696 = vmatpush2.bf16.msra.mxu0 %v1071_v52 }
  0x54   : > { %697 = vmatprep.subr.bf16.mxu0 %v1072_v53 }
  0x57   : > { %698 = vmatpush2.bf16.msra.mxu0 %v1074_v54 }
  0x58   : > { %699 = vmatprep.subr.bf16.mxu0 %v1075_v55 }
  0x5b   : > { %700 = vmatpush2.bf16.msra.mxu0 %v1077_v56 }
  0x5c   : > { %701 = vmatprep.subr.bf16.mxu0 %v1078_v57 }
  0x5f   : > { %702 = vmatpush2.bf16.msra.mxu0 %v1080_v58 }
  0x60   : > { %703 = vmatprep.subr.bf16.mxu0 %v1081_v59 }
  0x63   : > { %704 = vmatpush2.bf16.msra.mxu0 %v1083_v60 }
  0x64   : > { %705 = vmatprep.subr.bf16.mxu0 %v1084_v61 }
  0x67   : > { %706 = vmatpush2.bf16.msra.mxu0 %v1086_v62 }
  0x68   : > { %707 = vmatprep.subr.bf16.mxu0 %v1087_v63 }
  0x6b   : > { %708 = vmatpush2.bf16.msra.mxu0 %v1089_v0 }
  0x6e   : > { %710 = vmatmul.mubr.bf16.vlgmr.msra.gmra.mxu0 %v1090_v1 }
 0x12e   : > { %v711_v10 = vpop.f32.mrf.mxu0 }
 0x12f   : > { %v747_v11 = vmul.f32 %v740_v7, %v711_v10 }
 0x130   : > { %v713_v14 = vpop.f32.mrf.mxu0 }
 0x131   : > { %v748_v15 = vmul.f32 %v744_v9, %v713_v14  ;;  %v763_v17 = vadd.f32 %v756_v12, %v747_v11 }
 0x132   : > { %v715_v16 = vpop.f32.mrf.mxu0 }
 0x133   : > { %v764_v18 = vadd.f32 %v760_v13, %v748_v15  ;;  %v749_v19 = vmul.f32 %v740_v7, %v715_v16 }
 0x134   : > { %v717_v20 = vpop.f32.mrf.mxu0 }
 0x135   : > { %v999_v21 = vpack.c.bf16 %v764_v18, %v763_v17  ;;  %v750_v22 = vmul.f32 %v744_v9, %v717_v20  ;;  %v765_v23 = vadd.f32 %v756_v12, %v749_v19 }
 0x137   : > { %779 = vst [vmem:[%s434_s30] sm:$0xff] %v999_v21  ;;  %v766_v24 = vadd.f32 %v760_v13, %v750_v22  ;;  %787 = sbr.rel (!%p1193_p6) target bundleno = 324 (0x144), region = 86 }
 0x139   : > { %v1000_v25 = vpack.c.bf16 %v766_v24, %v765_v23 }
 0x13b   : > { %780 = vst [vmem:[%s434_s30 + $0x8] sm:$0xff] %v1000_v25 }
 0x13e   : > { %v824_v26 = vld [vmem:[%s434_s30] sm:$0xff] }
 0x13f   : > { %825 = vst [vmem:[%s793_s7] sm:$0xff] %v824_v26 }
 0x142   : > { %v826_v27 = vld [vmem:[%s434_s30 + $0x8] sm:$0xff] }
 0x143   : > { %827 = vst [vmem:[%s793_s7 + $0x10] sm:$0xff] %v826_v27 }
 0x144 PF: > { %s14_s19 = sadd.s32 1, %s1131_s19   ;;  %s1355_s15 = smov %s1119_s16 }
 0x145   : > { %p11_p12 = scmp.ge.s32.totalorder %s14_s19, 4   ;;  %s1356_s16 = smov %s1198_s25 }
 0x146   : > { %s1357_s17 = smov %s1127_s18  ;;  %s1358_s18 = smov %s1360_s20 }
 0x147   :  { %13 = sbr.rel (!%p11_p12) target bundleno = 3 (0x3), region = 164 }

// kernel: _lambda_.13
= control target key start
LH: loop header
LB: loop body
LE: loop exit
PB: predicated region body
PF: predicated region fallthrough
CT: control target
= control target key end

     0   :  { %s2939_s0 = inlined_call_operand.vmem [shape: bf16[128,6912], index: 0, kind: input, shape index: {}]   ;;  %s2940_s1 = inlined_call_operand.vmem [shape: bf16[6912,256], index: 1, kind: input, shape index: {}]   ;;  %s2941_s2 = inlined_call_operand.vmem [shape: f32[1,256], index: 2, kind: input, shape index: {}]   ;;  %s2942_s3 = inlined_call_operand.vmem [shape: f32[1,256], index: 3, kind: input, shape index: {}]   ;;  %s2943_s4 = inlined_call_operand.vmem [shape: bf16[128,256], index: 4, kind: input, shape index: {}]   ;;  %s2944_s5 = inlined_call_operand.vmem [shape: bf16[128,256], index: 5, kind: output, shape index: {}]  }
   0x1   :  { %2947 = sst [smem:[#allocation10_spill]] %s2939_s0 }
   0x2   :  { %2948 = sst [smem:[#allocation11_spill]] %s2940_s1 }
   0x3   :  { %2949 = sst [smem:[#allocation12_spill]] %s2943_s4 }
   0x4   :  { %s2430_s18 = smov 0   ;;  %s2432_s19 = smov 0  }
   0x5   :  { %s2434_s20 = smov 0   ;;  %s2436_s21 = smov 0  }
   0x6   :  { %s2438_s22 = smov 0   ;;  %s2440_s23 = smov 0  }
   0x7   :  { %s2442_s24 = smov 0   ;;  %s2444_s25 = smov 0  }
   0x8   :  { %s2446_s26 = smov 0   ;;  %s2448_s27 = smov 0  }
   0x9   :  { %s2450_s28 = smov 0  }
   0xa LB: > { %s1830_s29 = sadd.s32 4294967295, %s2397_s28   ;;  %s27_s30 = sadd.s32 1, %s2389_s26  ;;  %s2397_s28 = sphi %s2450_s28, %s15_s28   ;;  %s2393_s27 = sphi %s2448_s27, %s2972_s27   ;;  %s2389_s26 = sphi %s2446_s26, %s2971_s26   ;;  %s2385_s25 = sphi %s2444_s25, %s2970_s25   ;;  %s2381_s24 = sphi %s2442_s24, %s2969_s24   ;;  %s2377_s23 = sphi %s2440_s23, %s2968_s23   ;;  %s2373_s22 = sphi %s2438_s22, %s2967_s22   ;;  %s2369_s21 = sphi %s2436_s21, %s2966_s21   ;;  %s2365_s20 = sphi %s2434_s20, %s2965_s20   ;;  %s2361_s19 = sphi %s2432_s19, %s2964_s19   ;;  %s2357_s18 = sphi %s2430_s18, %s2963_s18  }
   0xb   : > { %p28_p0 = scmp.ge.s32.totalorder %s27_s30, 18  ;;  %s30_s6 = sadd.s32 1, %s2393_s27 }
   0xc   : > { %s43_s7 = sadd.s32 1, %s2377_s23  ;;  %p50_p1 = scmp.ne.s32.totalorder %s2377_s23, %s2373_s22 }
   0xd   : > { %s2974_s30 = smov (%p28_p0, %s27_s30), 0  ;;  %s2976_s6 = smov (!%p28_p0, %s30_s6), %s2393_s27 }
   0xe   : > { %2950 = sst [smem:[#allocation7_spill]] %s2974_s30  ;;  %s39_s8 = ssub.s32 %s2389_s26, %s2974_s30 }
   0xf   : > { %p51_p2 = scmp.eq.s32.totalorder %s2397_s28, 0  ;;  %p32_p3 = scmp.ge.s32.totalorder %s2976_s6, 2 }
  0x10   : > { %p41_p4 = scmp.eq.s32.totalorder %s39_s8, 0  ;;  %s71_s10 = sadd.s32 1, %s2369_s21 }
  0x11   : > { %p2499_p5 = por %p51_p2, %p50_p1  ;;  %s2978_s6 = smov (%p32_p3, %s2976_s6), 0 }
  0x12   : > { %2952 = sst [smem:[#allocation8_spill]] %s2978_s6  ;;  %s67_s12 = ssub.s32 %s2393_s27, %s2978_s6 }
  0x13   : > { %s2507_s11 = scalar_select %p41_p4, %s2377_s23, %s43_s7  }
  0x14   : > { %p78_p6 = scmp.ne.s32.totalorder %s2369_s21, %s2365_s20  ;;  %s68_s13 = sor.u32 %s67_s12, %s39_s8 }
  0x15   : > { %2953 = sst [smem:[#allocation9_spill]] %s2507_s11  ;;  %p149_p7 = scmp.eq.s32.totalorder %s67_s12, 0 }
  0x16   : > { %p69_p8 = scmp.eq.s32.totalorder %s68_s13, 0  ;;  %p2515_p9 = por %p78_p6, %p51_p2 }
  0x17   : > { %s151_s15 = sadd.s32 1, %s2361_s19  ;;  %p158_p10 = scmp.ne.s32.totalorder %s2361_s19, %s2357_s18 }
  0x18   : > { %s2523_s16 = scalar_select %p69_p8, %s2369_s21, %s71_s10  }
  0x19   : > { %s2526_s17 = scalar_select %p149_p7, %s2361_s19, %s151_s15  }
  0x1a   : > { %p2530_p11 = por %p158_p10, %p51_p2  ;;  %p190_p12 = scmp.eq.s32.totalorder %s1830_s29, 35 }
  0x1b   : > { %p1833_p0 = scmp.ge.s32.totalorder %s2397_s28, 36 }
  0x1c   : > { %p2534_p13 = por %p190_p12, %p158_p10 }
  0x1d   : > { %212 = sbr.rel (%p1833_p0) target bundleno = 122 (0x7a), region = 16 }
  0x22   : > { %215 = sbr.rel (!%p2499_p5) target bundleno = 61 (0x3d), region = 20  ;;  %s217_s10 = sand.u32 (%p2499_p5), 1, %s2377_s23  }
  0x23   : > { %s1946_s12 = smul.u32 (%p2499_p5), 12, %s2389_s26  ;;  %s2957_s0 = sld [smem:[#allocation10_spill]] (%p2499_p5) }
  0x24   : > { %s2162_s13 = smul.u32 (%p2499_p5), 192, %s217_s10 }
  0x26   : > { %s2551_s29 = scalar_lea.vmem (%p2499_p5), [#allocation3], %s2162_s13 }
  0x29   : > { %s2546_s30 = scalar_lea.vmem %s2957_s0, %s1946_s12 }
  0x2a   : > { %v240_v0 = vld [vmem:[%s2546_s30] sm:$0xff]  ;;  %v242_v1 = vld [vmem:[%s2546_s30 + $0xd8] sm:$0xff]  ;;  %v244_v2 = vld [vmem:[%s2546_s30 + $0x1b0] sm:$0xff] }
  0x2b   : > { %241 = vst [vmem:[%s2551_s29] sm:$0xff] %v240_v0  ;;  %243 = vst [vmem:[%s2551_s29 + $0xc] sm:$0xff] %v242_v1  ;;  %v246_v3 = vld [vmem:[%s2546_s30 + $0x288] sm:$0xff]  ;;  %v248_v4 = vld [vmem:[%s2546_s30 + $0x360] sm:$0xff] }
  0x2c   : > { %245 = vst [vmem:[%s2551_s29 + $0x18] sm:$0xff] %v244_v2  ;;  %v250_v5 = vld [vmem:[%s2546_s30 + $0x438] sm:$0xff]  ;;  %247 = vst [vmem:[%s2551_s29 + $0x24] sm:$0xff] %v246_v3  ;;  %v252_v6 = vld [vmem:[%s2546_s30 + $0x510] sm:$0xff] }
  0x2d   : > { %249 = vst [vmem:[%s2551_s29 + $0x30] sm:$0xff] %v248_v4  ;;  %251 = vst [vmem:[%s2551_s29 + $0x3c] sm:$0xff] %v250_v5  ;;  %v254_v7 = vld [vmem:[%s2546_s30 + $0x5e8] sm:$0xff]  ;;  %v256_v8 = vld [vmem:[%s2546_s30 + $0x6c0] sm:$0xff] }
  0x2e   : > { %253 = vst [vmem:[%s2551_s29 + $0x48] sm:$0xff] %v252_v6  ;;  %255 = vst [vmem:[%s2551_s29 + $0x54] sm:$0xff] %v254_v7  ;;  %v258_v9 = vld [vmem:[%s2546_s30 + $0x798] sm:$0xff]  ;;  %v260_v10 = vld [vmem:[%s2546_s30 + $0x870] sm:$0xff] }
  0x2f   : > { %257 = vst [vmem:[%s2551_s29 + $0x60] sm:$0xff] %v256_v8  ;;  %v262_v11 = vld [vmem:[%s2546_s30 + $0x948] sm:$0xff]  ;;  %259 = vst [vmem:[%s2551_s29 + $0x6c] sm:$0xff] %v258_v9  ;;  %v264_v12 = vld [vmem:[%s2546_s30 + $0xa20] sm:$0xff] }
  0x30   : > { %261 = vst [vmem:[%s2551_s29 + $0x78] sm:$0xff] %v260_v10  ;;  %263 = vst [vmem:[%s2551_s29 + $0x84] sm:$0xff] %v262_v11  ;;  %v266_v13 = vld [vmem:[%s2546_s30 + $0xaf8] sm:$0xff]  ;;  %v268_v14 = vld [vmem:[%s2546_s30 + $0xbd0] sm:$0xff] }
  0x31   : > { %265 = vst [vmem:[%s2551_s29 + $0x90] sm:$0xff] %v264_v12  ;;  %267 = vst [vmem:[%s2551_s29 + $0x9c] sm:$0xff] %v266_v13  ;;  %v270_v15 = vld [vmem:[%s2546_s30 + $0xca8] sm:$0xff]  ;;  %v1837_v17 = vld [vmem:[%s2546_s30 + $0xe0] sm:$0xf] }
  0x32   : > { %269 = vst [vmem:[%s2551_s29 + $0xa8] sm:$0xff] %v268_v14  ;;  %v1835_v16 = vld [vmem:[%s2546_s30 + $0x8] sm:$0xf]  ;;  %271 = vst [vmem:[%s2551_s29 + $0xb4] sm:$0xff] %v270_v15  ;;  %v1839_v18 = vld [vmem:[%s2546_s30 + $0x1b8] sm:$0xf] }
  0x33   : > { %1836 = vst [vmem:[%s2551_s29 + $0x8] sm:$0xf] %v1835_v16  ;;  %1838 = vst [vmem:[%s2551_s29 + $0x14] sm:$0xf] %v1837_v17  ;;  %v1841_v19 = vld [vmem:[%s2546_s30 + $0x290] sm:$0xf] }
  0x34   : > { %v1843_v20 = vld [vmem:[%s2546_s30 + $0x368] sm:$0xf]  ;;  %1840 = vst [vmem:[%s2551_s29 + $0x20] sm:$0xf] %v1839_v18  ;;  %1842 = vst [vmem:[%s2551_s29 + $0x2c] sm:$0xf] %v1841_v19 }
  0x35   : > { %1844 = vst [vmem:[%s2551_s29 + $0x38] sm:$0xf] %v1843_v20  ;;  %v1845_v21 = vld [vmem:[%s2546_s30 + $0x440] sm:$0xf]  ;;  %v1847_v22 = vld [vmem:[%s2546_s30 + $0x518] sm:$0xf] }
  0x36   : > { %v1849_v23 = vld [vmem:[%s2546_s30 + $0x5f0] sm:$0xf]  ;;  %1846 = vst [vmem:[%s2551_s29 + $0x44] sm:$0xf] %v1845_v21  ;;  %1848 = vst [vmem:[%s2551_s29 + $0x50] sm:$0xf] %v1847_v22 }
  0x37   : > { %1850 = vst [vmem:[%s2551_s29 + $0x5c] sm:$0xf] %v1849_v23  ;;  %v1851_v24 = vld [vmem:[%s2546_s30 + $0x6c8] sm:$0xf]  ;;  %v1853_v25 = vld [vmem:[%s2546_s30 + $0x7a0] sm:$0xf] }
  0x38   : > { %v1855_v26 = vld [vmem:[%s2546_s30 + $0x878] sm:$0xf]  ;;  %1852 = vst [vmem:[%s2551_s29 + $0x68] sm:$0xf] %v1851_v24  ;;  %1854 = vst [vmem:[%s2551_s29 + $0x74] sm:$0xf] %v1853_v25 }
  0x39   : > { %1856 = vst [vmem:[%s2551_s29 + $0x80] sm:$0xf] %v1855_v26  ;;  %v1857_v27 = vld [vmem:[%s2546_s30 + $0x950] sm:$0xf]  ;;  %v1859_v28 = vld [vmem:[%s2546_s30 + $0xa28] sm:$0xf] }
  0x3a   : > { %v1861_v29 = vld [vmem:[%s2546_s30 + $0xb00] sm:$0xf]  ;;  %1858 = vst [vmem:[%s2551_s29 + $0x8c] sm:$0xf] %v1857_v27  ;;  %1860 = vst [vmem:[%s2551_s29 + $0x98] sm:$0xf] %v1859_v28 }
  0x3b   : > { %1862 = vst [vmem:[%s2551_s29 + $0xa4] sm:$0xf] %v1861_v29  ;;  %v1863_v30 = vld [vmem:[%s2546_s30 + $0xbd8] sm:$0xf]  ;;  %v1865_v31 = vld [vmem:[%s2546_s30 + $0xcb0] sm:$0xf] }
  0x3c   : > { %1864 = vst [vmem:[%s2551_s29 + $0xb0] sm:$0xf] %v1863_v30  ;;  %1866 = vst [vmem:[%s2551_s29 + $0xbc] sm:$0xf] %v1865_v31 }
  0x3d PF: > { %317 = sbr.rel (!%p2515_p9) target bundleno = 102 (0x66), region = 46  ;;  %s319_s6 = sand.u32 (%p2515_p9), 1, %s2369_s21  }
  0x3e   : > { %s1947_s9 = smul.u32 (%p2515_p9), 96, %s2389_s26  ;;  %s2958_s1 = sld [smem:[#allocation11_spill]] (%p2515_p9) }
  0x3f   : > { %s2163_s10 = smul.u32 (%p2515_p9), 192, %s319_s6 }
  0x40   : > { %s324_s12 = sadd.s32 (%p2515_p9), %s2393_s27, %s1947_s9 }
  0x41   : > { %s1868_s13 = sshll.u32 (%p2515_p9), %s324_s12, 2  ;;  %s2627_s30 = scalar_lea.vmem (%p2515_p9), [#allocation4], %s2163_s10 }
  0x44   : > { %s2622_s11 = scalar_lea.vmem %s2958_s1, %s1868_s13 }
  0x45   : > { %v343_v32 = vld [vmem:[%s2622_s11] sm:$0xf]  ;;  %v345_v33 = vld [vmem:[%s2622_s11 + $0x8] sm:$0xf]  ;;  %v347_v34 = vld [vmem:[%s2622_s11 + $0x10] sm:$0xf] }
  0x46   : > { %344 = vst [vmem:[%s2627_s30] sm:$0xf] %v343_v32  ;;  %346 = vst [vmem:[%s2627_s30 + $0x4] sm:$0xf] %v345_v33  ;;  %v349_v35 = vld [vmem:[%s2622_s11 + $0x18] sm:$0xf] }
  0x47   : > { %348 = vst [vmem:[%s2627_s30 + $0x8] sm:$0xf] %v347_v34  ;;  %v351_v36 = vld [vmem:[%s2622_s11 + $0x20] sm:$0xf]  ;;  %v353_v37 = vld [vmem:[%s2622_s11 + $0x28] sm:$0xf] }
  0x48   : > { %350 = vst [vmem:[%s2627_s30 + $0xc] sm:$0xf] %v349_v35  ;;  %352 = vst [vmem:[%s2627_s30 + $0x10] sm:$0xf] %v351_v36  ;;  %v355_v38 = vld [vmem:[%s2622_s11 + $0x30] sm:$0xf] }
  0x49   : > { %354 = vst [vmem:[%s2627_s30 + $0x14] sm:$0xf] %v353_v37  ;;  %v357_v39 = vld [vmem:[%s2622_s11 + $0x38] sm:$0xf]  ;;  %v359_v40 = vld [vmem:[%s2622_s11 + $0x40] sm:$0xf] }
  0x4a   : > { %356 = vst [vmem:[%s2627_s30 + $0x18] sm:$0xf] %v355_v38  ;;  %358 = vst [vmem:[%s2627_s30 + $0x1c] sm:$0xf] %v357_v39  ;;  %v361_v41 = vld [vmem:[%s2622_s11 + $0x48] sm:$0xf] }
  0x4b   : > { %360 = vst [vmem:[%s2627_s30 + $0x20] sm:$0xf] %v359_v40  ;;  %v363_v42 = vld [vmem:[%s2622_s11 + $0x50] sm:$0xf]  ;;  %v365_v43 = vld [vmem:[%s2622_s11 + $0x58] sm:$0xf] }
  0x4c   : > { %362 = vst [vmem:[%s2627_s30 + $0x24] sm:$0xf] %v361_v41  ;;  %364 = vst [vmem:[%s2627_s30 + $0x28] sm:$0xf] %v363_v42  ;;  %v367_v44 = vld [vmem:[%s2622_s11 + $0x60] sm:$0xf] }
  0x4d   : > { %366 = vst [vmem:[%s2627_s30 + $0x2c] sm:$0xf] %v365_v43  ;;  %v369_v45 = vld [vmem:[%s2622_s11 + $0x68] sm:$0xf]  ;;  %v371_v46 = vld [vmem:[%s2622_s11 + $0x70] sm:$0xf] }
  0x4e   : > { %368 = vst [vmem:[%s2627_s30 + $0x30] sm:$0xf] %v367_v44  ;;  %370 = vst [vmem:[%s2627_s30 + $0x34] sm:$0xf] %v369_v45  ;;  %v373_v47 = vld [vmem:[%s2622_s11 + $0x78] sm:$0xf] }
  0x4f   : > { %372 = vst [vmem:[%s2627_s30 + $0x38] sm:$0xf] %v371_v46  ;;  %v375_v48 = vld [vmem:[%s2622_s11 + $0x80] sm:$0xf]  ;;  %v377_v49 = vld [vmem:[%s2622_s11 + $0x88] sm:$0xf] }
  0x50   : > { %374 = vst [vmem:[%s2627_s30 + $0x3c] sm:$0xf] %v373_v47  ;;  %376 = vst [vmem:[%s2627_s30 + $0x40] sm:$0xf] %v375_v48  ;;  %v379_v50 = vld [vmem:[%s2622_s11 + $0x90] sm:$0xf] }
  0x51   : > { %378 = vst [vmem:[%s2627_s30 + $0x44] sm:$0xf] %v377_v49  ;;  %v381_v51 = vld [vmem:[%s2622_s11 + $0x98] sm:$0xf]  ;;  %v383_v52 = vld [vmem:[%s2622_s11 + $0xa0] sm:$0xf] }
  0x52   : > { %380 = vst [vmem:[%s2627_s30 + $0x48] sm:$0xf] %v379_v50  ;;  %382 = vst [vmem:[%s2627_s30 + $0x4c] sm:$0xf] %v381_v51  ;;  %v385_v53 = vld [vmem:[%s2622_s11 + $0xa8] sm:$0xf] }
  0x53   : > { %384 = vst [vmem:[%s2627_s30 + $0x50] sm:$0xf] %v383_v52  ;;  %v387_v54 = vld [vmem:[%s2622_s11 + $0xb0] sm:$0xf]  ;;  %v389_v55 = vld [vmem:[%s2622_s11 + $0xb8] sm:$0xf] }
  0x54   : > { %386 = vst [vmem:[%s2627_s30 + $0x54] sm:$0xf] %v385_v53  ;;  %388 = vst [vmem:[%s2627_s30 + $0x58] sm:$0xf] %v387_v54  ;;  %v391_v56 = vld [vmem:[%s2622_s11 + $0xc0] sm:$0xf] }
  0x55   : > { %390 = vst [vmem:[%s2627_s30 + $0x5c] sm:$0xf] %v389_v55  ;;  %v393_v57 = vld [vmem:[%s2622_s11 + $0xc8] sm:$0xf]  ;;  %v395_v58 = vld [vmem:[%s2622_s11 + $0xd0] sm:$0xf] }
  0x56   : > { %392 = vst [vmem:[%s2627_s30 + $0x60] sm:$0xf] %v391_v56  ;;  %394 = vst [vmem:[%s2627_s30 + $0x64] sm:$0xf] %v393_v57  ;;  %v397_v59 = vld [vmem:[%s2622_s11 + $0xd8] sm:$0xf] }
  0x57   : > { %396 = vst [vmem:[%s2627_s30 + $0x68] sm:$0xf] %v395_v58  ;;  %v399_v60 = vld [vmem:[%s2622_s11 + $0xe0] sm:$0xf]  ;;  %v401_v61 = vld [vmem:[%s2622_s11 + $0xe8] sm:$0xf] }
  0x58   : > { %398 = vst [vmem:[%s2627_s30 + $0x6c] sm:$0xf] %v397_v59  ;;  %400 = vst [vmem:[%s2627_s30 + $0x70] sm:$0xf] %v399_v60  ;;  %v403_v62 = vld [vmem:[%s2622_s11 + $0xf0] sm:$0xf] }
  0x59   : > { %402 = vst [vmem:[%s2627_s30 + $0x74] sm:$0xf] %v401_v61  ;;  %v405_v63 = vld [vmem:[%s2622_s11 + $0xf8] sm:$0xf]  ;;  %v407_v0 = vld [vmem:[%s2622_s11 + $0x100] sm:$0xf] }
  0x5a   : > { %404 = vst [vmem:[%s2627_s30 + $0x78] sm:$0xf] %v403_v62  ;;  %406 = vst [vmem:[%s2627_s30 + $0x7c] sm:$0xf] %v405_v63  ;;  %v409_v1 = vld [vmem:[%s2622_s11 + $0x108] sm:$0xf] }
  0x5b   : > { %408 = vst [vmem:[%s2627_s30 + $0x80] sm:$0xf] %v407_v0  ;;  %v411_v2 = vld [vmem:[%s2622_s11 + $0x110] sm:$0xf]  ;;  %v413_v3 = vld [vmem:[%s2622_s11 + $0x118] sm:$0xf] }
  0x5c   : > { %410 = vst [vmem:[%s2627_s30 + $0x84] sm:$0xf] %v409_v1  ;;  %412 = vst [vmem:[%s2627_s30 + $0x88] sm:$0xf] %v411_v2  ;;  %v415_v4 = vld [vmem:[%s2622_s11 + $0x120] sm:$0xf] }
  0x5d   : > { %414 = vst [vmem:[%s2627_s30 + $0x8c] sm:$0xf] %v413_v3  ;;  %v417_v5 = vld [vmem:[%s2622_s11 + $0x128] sm:$0xf]  ;;  %v419_v6 = vld [vmem:[%s2622_s11 + $0x130] sm:$0xf] }
  0x5e   : > { %416 = vst [vmem:[%s2627_s30 + $0x90] sm:$0xf] %v415_v4  ;;  %418 = vst [vmem:[%s2627_s30 + $0x94] sm:$0xf] %v417_v5  ;;  %v421_v7 = vld [vmem:[%s2622_s11 + $0x138] sm:$0xf] }
  0x5f   : > { %420 = vst [vmem:[%s2627_s30 + $0x98] sm:$0xf] %v419_v6  ;;  %v423_v8 = vld [vmem:[%s2622_s11 + $0x140] sm:$0xf]  ;;  %v425_v9 = vld [vmem:[%s2622_s11 + $0x148] sm:$0xf] }
  0x60   : > { %422 = vst [vmem:[%s2627_s30 + $0x9c] sm:$0xf] %v421_v7  ;;  %424 = vst [vmem:[%s2627_s30 + $0xa0] sm:$0xf] %v423_v8  ;;  %v427_v10 = vld [vmem:[%s2622_s11 + $0x150] sm:$0xf] }
  0x61   : > { %426 = vst [vmem:[%s2627_s30 + $0xa4] sm:$0xf] %v425_v9  ;;  %v429_v11 = vld [vmem:[%s2622_s11 + $0x158] sm:$0xf]  ;;  %v431_v12 = vld [vmem:[%s2622_s11 + $0x160] sm:$0xf] }
  0x62   : > { %428 = vst [vmem:[%s2627_s30 + $0xa8] sm:$0xf] %v427_v10  ;;  %430 = vst [vmem:[%s2627_s30 + $0xac] sm:$0xf] %v429_v11  ;;  %v433_v13 = vld [vmem:[%s2622_s11 + $0x168] sm:$0xf] }
  0x63   : > { %432 = vst [vmem:[%s2627_s30 + $0xb0] sm:$0xf] %v431_v12  ;;  %v435_v14 = vld [vmem:[%s2622_s11 + $0x170] sm:$0xf]  ;;  %v437_v15 = vld [vmem:[%s2622_s11 + $0x178] sm:$0xf] }
  0x64   : > { %434 = vst [vmem:[%s2627_s30 + $0xb4] sm:$0xf] %v433_v13  ;;  %436 = vst [vmem:[%s2627_s30 + $0xb8] sm:$0xf] %v435_v14 }
  0x65   : > { %438 = vst [vmem:[%s2627_s30 + $0xbc] sm:$0xf] %v437_v15 }
  0x66 PF: > { %570 = sbr.rel (!%p2530_p11) target bundleno = 122 (0x7a), region = 95  ;;  %s572_s0 = sand.u32 (%p2530_p11), 1, %s2361_s19  }
  0x67   : > { %s1870_s14 = sshll.u32 (%p2530_p11), %s2393_s27, 2  ;;  %s1869_s29 = sshll.u32 (%p2530_p11), %s572_s0, 6 }
  0x68   : > { %s2959_s4 = sld [smem:[#allocation12_spill]] (%p2530_p11)  ;;  %s574_s11 = scalar_lea.vmem (%p2530_p11), [#allocation5], %s1869_s29 }
  0x6e   : > { %s2729_s10 = scalar_lea.vmem %s2959_s4, %s1870_s14 }
  0x6f   : > { %v596_v16 = vld [vmem:[%s2729_s10] sm:$0xf]  ;;  %v598_v17 = vld [vmem:[%s2729_s10 + $0x8] sm:$0xf]  ;;  %v600_v18 = vld [vmem:[%s2729_s10 + $0x10] sm:$0xf] }
  0x70   : > { %597 = vst [vmem:[%s574_s11] sm:$0xf] %v596_v16  ;;  %599 = vst [vmem:[%s574_s11 + $0x4] sm:$0xf] %v598_v17  ;;  %v602_v19 = vld [vmem:[%s2729_s10 + $0x18] sm:$0xf] }
  0x71   : > { %v604_v20 = vld [vmem:[%s2729_s10 + $0x20] sm:$0xf]  ;;  %601 = vst [vmem:[%s574_s11 + $0x8] sm:$0xf] %v600_v18  ;;  %603 = vst [vmem:[%s574_s11 + $0xc] sm:$0xf] %v602_v19 }
  0x72   : > { %605 = vst [vmem:[%s574_s11 + $0x10] sm:$0xf] %v604_v20  ;;  %v606_v21 = vld [vmem:[%s2729_s10 + $0x28] sm:$0xf]  ;;  %v608_v22 = vld [vmem:[%s2729_s10 + $0x30] sm:$0xf] }
  0x73   : > { %v610_v23 = vld [vmem:[%s2729_s10 + $0x38] sm:$0xf]  ;;  %607 = vst [vmem:[%s574_s11 + $0x14] sm:$0xf] %v606_v21  ;;  %609 = vst [vmem:[%s574_s11 + $0x18] sm:$0xf] %v608_v22 }
  0x74   : > { %611 = vst [vmem:[%s574_s11 + $0x1c] sm:$0xf] %v610_v23  ;;  %v612_v24 = vld [vmem:[%s2729_s10 + $0x40] sm:$0xf]  ;;  %v614_v25 = vld [vmem:[%s2729_s10 + $0x48] sm:$0xf] }
  0x75   : > { %v616_v26 = vld [vmem:[%s2729_s10 + $0x50] sm:$0xf]  ;;  %613 = vst [vmem:[%s574_s11 + $0x20] sm:$0xf] %v612_v24  ;;  %615 = vst [vmem:[%s574_s11 + $0x24] sm:$0xf] %v614_v25 }
  0x76   : > { %617 = vst [vmem:[%s574_s11 + $0x28] sm:$0xf] %v616_v26  ;;  %v618_v27 = vld [vmem:[%s2729_s10 + $0x58] sm:$0xf]  ;;  %v620_v28 = vld [vmem:[%s2729_s10 + $0x60] sm:$0xf] }
  0x77   : > { %v622_v29 = vld [vmem:[%s2729_s10 + $0x68] sm:$0xf]  ;;  %619 = vst [vmem:[%s574_s11 + $0x2c] sm:$0xf] %v618_v27  ;;  %621 = vst [vmem:[%s574_s11 + $0x30] sm:$0xf] %v620_v28 }
  0x78   : > { %623 = vst [vmem:[%s574_s11 + $0x34] sm:$0xf] %v622_v29  ;;  %v624_v30 = vld [vmem:[%s2729_s10 + $0x70] sm:$0xf]  ;;  %v626_v31 = vld [vmem:[%s2729_s10 + $0x78] sm:$0xf] }
  0x79   : > { %625 = vst [vmem:[%s574_s11 + $0x38] sm:$0xf] %v624_v30  ;;  %627 = vst [vmem:[%s574_s11 + $0x3c] sm:$0xf] %v626_v31 }
  0x7a PF: > { %p1871_p1 = scmp.ge.s32.totalorder %s2397_s28, 1  ;;  %p682_p2 = scmp.lt.s32.totalorder %s2397_s28, 37 }
  0x7c   : > { %p683_p3 = pnand %p1871_p1, %p682_p2 }
  0x7d   : > { %s689_s7 = sand.u32 (!%p683_p3), 1, %s2373_s22   ;;  %s696_s12 = sand.u32 (!%p683_p3), 1, %s2365_s20  }
  0x7e   : > { %686 = sbr.rel (%p683_p3) target bundleno = 485 (0x1e5), region = 136  ;;  %s703_s15 = sand.u32 (!%p683_p3), 1, %s2357_s18  }
  0x7f   : > { %s2164_s13 = smul.u32 (!%p683_p3), 192, %s689_s7  ;;  %s1872_s0 = sshll.u32 (!%p683_p3), %s703_s15, 6 }
  0x80   : > { %s2165_s30 = smul.u32 (!%p683_p3), 192, %s696_s12  ;;  %p746_p4 = scmp.lt.s32.totalorder (!%p683_p3), %s2385_s25, 1 }
  0x81   : > { %s2764_s4 = scalar_lea.vmem (!%p683_p3), [#allocation3], %s2164_s13  ;;  %s2768_s18 = scalar_lea.vmem (!%p683_p3), [#allocation5], %s1872_s0 }
  0x82   : > { %s2766_s20 = scalar_lea.vmem (!%p683_p3), [#allocation4], %s2165_s30  ;;  %s2770_s22 = scalar_lea.vmem (!%p683_p3), [#allocation6], %s1872_s0 }
  0x83   : > { %s2754_s14 = scalar_select %p746_p4, %s2385_s25, 1 }
  0x84   : > { %p1874_p5 = scmp.ne.s32.totalorder %s2381_s24, 0 }
  0x85   : > { %s748_s9 = scalar_lea.vmem %s2941_s2, %s2754_s14  ;;  %s751_s1 = scalar_lea.vmem %s2942_s3, %s2754_s14 }
  0x86   : > { %758 = sbr.rel (%p1874_p5) target bundleno = 148 (0x94), region = 152 }
  0x8b   : > { %v2399_v32 = vmov 0.0  }
  0x8c   : > { %759 = vst [vmem:[#allocation2 + $0x30] sm:$0xff] %v2399_v32  ;;  %760 = vst [vmem:[#allocation2] sm:$0xff] %v2399_v32 }
  0x8d   : > { %761 = vst [vmem:[#allocation2 + $0x58] sm:$0xff] %v2399_v32  ;;  %762 = vst [vmem:[#allocation2 + $0x18] sm:$0xff] %v2399_v32 }
  0x8e   : > { %763 = vst [vmem:[#allocation2 + $0x50] sm:$0xff] %v2399_v32  ;;  %764 = vst [vmem:[#allocation2 + $0x68] sm:$0xff] %v2399_v32 }
  0x8f   : > { %765 = vst [vmem:[#allocation2 + $0x8] sm:$0xff] %v2399_v32  ;;  %766 = vst [vmem:[#allocation2 + $0x48] sm:$0xff] %v2399_v32 }
  0x90   : > { %767 = vst [vmem:[#allocation2 + $0x40] sm:$0xff] %v2399_v32  ;;  %768 = vst [vmem:[#allocation2 + $0x20] sm:$0xff] %v2399_v32 }
  0x91   : > { %769 = vst [vmem:[#allocation2 + $0x10] sm:$0xff] %v2399_v32  ;;  %770 = vst [vmem:[#allocation2 + $0x38] sm:$0xff] %v2399_v32 }
  0x92   : > { %771 = vst [vmem:[#allocation2 + $0x60] sm:$0xff] %v2399_v32  ;;  %772 = vst [vmem:[#allocation2 + $0x70] sm:$0xff] %v2399_v32 }
  0x93   : > { %773 = vst [vmem:[#allocation2 + $0x78] sm:$0xff] %v2399_v32  ;;  %774 = vst [vmem:[#allocation2 + $0x28] sm:$0xff] %v2399_v32 }
  0x94 PF: > { %v2255_v33 = vld [vmem:[%s2766_s20 + $0x78] sm:$0xff]   ;;  %v2258_v36 = vld [vmem:[%s2766_s20 + $0x70] sm:$0xff]   ;;  %v2261_v39 = vld [vmem:[%s2766_s20 + $0x68] sm:$0xff]   ;;  %p1923_p6 = scmp.ne.s32.totalorder %s2381_s24, 17 }
  0x95   : > { %v2256_v34 = vld [vmem:[%s2766_s20 + $0x38] sm:$0xff]   ;;  %2050 = vmatprep.subr.bf16.mxu0 %v2255_v33  ;;  %v2259_v37 = vld [vmem:[%s2766_s20 + $0x30] sm:$0xff]   ;;  %v2262_v40 = vld [vmem:[%s2766_s20 + $0x28] sm:$0xff]  }
  0x96   : > { %v2257_v35 = vld [vmem:[%s2766_s20 + $0xb8] sm:$0xff]   ;;  %2051 = vmatpush3.bf16.msra.mxu0 %v2256_v34  ;;  %v2260_v38 = vld [vmem:[%s2766_s20 + $0xb0] sm:$0xff]   ;;  %v2263_v41 = vld [vmem:[%s2766_s20 + $0xa8] sm:$0xff]  }
  0x97   : > { %2130 = vmatprep.subr.bf16.mxu1 %v2257_v35  ;;  %2052 = vmatprep.subr.bf16.mxu0 %v2258_v36  ;;  %v2264_v42 = vld [vmem:[%s2766_s20 + $0x60] sm:$0xff]   ;;  %v2267_v45 = vld [vmem:[%s2766_s20 + $0x58] sm:$0xff]   ;;  %v2270_v48 = vld [vmem:[%s2766_s20 + $0x50] sm:$0xff]  }
  0x98   : > { %2131 = vmatpush3.bf16.msra.mxu1 %v2257_v35  ;;  %v2265_v43 = vld [vmem:[%s2766_s20 + $0x20] sm:$0xff]   ;;  %v2269_v46 = vld [vmem:[%s2766_s20 + $0x98] sm:$0xff]   ;;  %v2272_v49 = vld [vmem:[%s2766_s20 + $0x90] sm:$0xff]  }
  0x99   : > { %2132 = vmatprep.subr.bf16.mxu1 %v2260_v38  ;;  %v2266_v44 = vld [vmem:[%s2766_s20 + $0xa0] sm:$0xff]   ;;  %v2268_v47 = vld [vmem:[%s2766_s20 + $0x18] sm:$0xff]   ;;  %v2271_v50 = vld [vmem:[%s2766_s20 + $0x10] sm:$0xff]  }
  0x9a   : > { %2053 = vmatpush3.bf16.msra.mxu0 %v2259_v37  ;;  %v2273_v51 = vld [vmem:[%s2766_s20 + $0x48] sm:$0xff]   ;;  %v2276_v54 = vld [vmem:[%s2766_s20 + $0x40] sm:$0xff]   ;;  %v2291_v1 = vld [vmem:[%s2764_s4 + $0x50] ss:$12 sps:$4 sm:$0xff]  }
  0x9b   : > { %2054 = vmatprep.subr.bf16.mxu0 %v2261_v39  ;;  %v2274_v52 = vld [vmem:[%s2766_s20 + $0x8] sm:$0xff]   ;;  %v2278_v55 = vld [vmem:[%s2766_s20 + $0x80] sm:$0xff]   ;;  %v2289_v3 = vld [vmem:[%s2764_s4 + $0x30] ss:$12 sps:$4 sm:$0xff]  }
  0x9c   : > { %2133 = vmatpush3.bf16.msra.mxu1 %v2260_v38  ;;  %v2275_v53 = vld [vmem:[%s2766_s20 + $0x88] sm:$0xff]   ;;  %v2281_v56 = vld [vmem:[%s2764_s4 + $0x4] ss:$12 sps:$4 sm:$0xff]   ;;  %v2287_v0 = vld [vmem:[%s2764_s4 + $0x34] ss:$12 sps:$4 sm:$0xff]  }
  0x9d   : > { %2134 = vmatprep.subr.bf16.mxu1 %v2263_v41  ;;  %v2282_v57 = vld [vmem:[%s2764_s4 + $0x8] ss:$12 sps:$4 sm:$0xff]   ;;  %v2277_v58 = vld [vmem:[%s2766_s20] sm:$0xff]   ;;  %1175 = vmatprep.mubr.bf16.mxu0 %v2281_v56  ;;  %v2292_v4 = vld [vmem:[%s2764_s4 + $0x4c] ss:$12 sps:$4 sm:$0xff]  }
  0x9e   : > { %2055 = vmatpush3.bf16.msra.mxu0 %v2262_v40  ;;  %2146 = vmatprep.mubr.bf16.mxu1 %v2282_v57  ;;  %v2279_v59 = vld [vmem:[%s2764_s4] ss:$12 sps:$4 sm:$0xff]   ;;  %v2284_v60 = vld [vmem:[%s2764_s4 + $0x1c] ss:$12 sps:$4 sm:$0xff]   ;;  %v2290_v62 = vld [vmem:[%s2764_s4 + $0x38] ss:$12 sps:$4 sm:$0xff]  }
  0x9f   : > { %2056 = vmatprep.subr.bf16.mxu0 %v2264_v42  ;;  %v2283_v61 = vld [vmem:[%s2764_s4 + $0x20] ss:$12 sps:$4 sm:$0xff]   ;;  %v2286_v63 = vld [vmem:[%s2764_s4 + $0x18] ss:$12 sps:$4 sm:$0xff]   ;;  %v2298_v2 = vld [vmem:[%s2764_s4 + $0x68] ss:$12 sps:$4 sm:$0xff]  }
  0xa0   : > { %2135 = vmatpush3.bf16.msra.mxu1 %v2263_v41  ;;  %v2299_v5 = vld [vmem:[%s2764_s4 + $0x80] ss:$12 sps:$4 sm:$0xff]   ;;  %v2306_v6 = vld [vmem:[%s2764_s4 + $0x98] ss:$12 sps:$4 sm:$0xff]   ;;  %v2294_v7 = vld [vmem:[%s2764_s4 + $0x48] ss:$12 sps:$4 sm:$0xff]  }
  0xa1   : > { %2136 = vmatprep.subr.bf16.mxu1 %v2266_v44  ;;  %v2295_v8 = vld [vmem:[%s2764_s4 + $0x64] ss:$12 sps:$4 sm:$0xff]   ;;  %v2297_v10 = vld [vmem:[%s2764_s4 + $0x60] ss:$12 sps:$4 sm:$0xff]   ;;  %v2300_v11 = vld [vmem:[%s2764_s4 + $0x7c] ss:$12 sps:$4 sm:$0xff]  }
  0xa2   : > { %2057 = vmatpush3.bf16.msra.mxu0 %v2265_v43  ;;  %v2307_v9 = vld [vmem:[%s2764_s4 + $0xb0] ss:$12 sps:$4 sm:$0xff]   ;;  %v2302_v12 = vld [vmem:[%s2764_s4 + $0x78] ss:$12 sps:$4 sm:$0xff]   ;;  %v2303_v13 = vld [vmem:[%s2764_s4 + $0x94] ss:$12 sps:$4 sm:$0xff]  }
  0xa3   : > { %2058 = vmatprep.subr.bf16.mxu0 %v2267_v45  ;;  %v2305_v14 = vld [vmem:[%s2764_s4 + $0x90] ss:$12 sps:$4 sm:$0xff]   ;;  %v2308_v15 = vld [vmem:[%s2764_s4 + $0xac] ss:$12 sps:$4 sm:$0xff]   ;;  %v2310_v16 = vld [vmem:[%s2764_s4 + $0xa8] ss:$12 sps:$4 sm:$0xff]  }
  0xa4   : > { %2137 = vmatpush3.bf16.msra.mxu1 %v2266_v44  ;;  %v775_v22 = vld [vmem:[#allocation2 + $0x30] sm:$0xff]  ;;  %v776_v30 = vld [vmem:[#allocation2] sm:$0xff]  ;;  %v777_v37 = vld [vmem:[#allocation2 + $0x58] sm:$0xff] }
  0xa5   : > { %2138 = vmatprep.subr.bf16.mxu1 %v2269_v46  ;;  %v778_v44 = vld [vmem:[#allocation2 + $0x18] sm:$0xff] }
  0xa6   : > { %2059 = vmatpush3.bf16.msra.mxu0 %v2268_v47 }
  0xa7   : > { %2060 = vmatprep.subr.bf16.mxu0 %v2270_v48 }
  0xa8   : > { %2139 = vmatpush3.bf16.msra.mxu1 %v2269_v46 }
  0xa9   : > { %2140 = vmatprep.subr.bf16.mxu1 %v2272_v49 }
  0xaa   : > { %2061 = vmatpush3.bf16.msra.mxu0 %v2271_v50 }
  0xab   : > { %2062 = vmatprep.subr.bf16.mxu0 %v2273_v51 }
  0xac   : > { %2141 = vmatpush3.bf16.msra.mxu1 %v2272_v49 }
  0xad   : > { %2142 = vmatprep.subr.bf16.mxu1 %v2275_v53 }
  0xae   : > { %2063 = vmatpush3.bf16.msra.mxu0 %v2274_v52  ;;  %v779_v52 = vld [vmem:[#allocation2 + $0x50] sm:$0xff] }
  0xaf   : > { %2064 = vmatprep.subr.bf16.mxu0 %v2276_v54 }
  0xb0   : > { %2143 = vmatpush3.bf16.msra.mxu1 %v2275_v53 }
  0xb1   : > { %2144 = vmatprep.subr.bf16.mxu1 %v2278_v55 }
  0xb2   : > { %2065 = vmatpush3.bf16.msra.mxu0 %v2277_v58 }
  0xb4   : > { %2145 = vmatpush3.bf16.msra.mxu1 %v2278_v55 }
  0xb5   : > { %1176 = vmatmul.mubr.bf16.vlgmr.msra.gmra.mxu0 %v2279_v59  ;;  %v780_v59 = vld [vmem:[#allocation2 + $0x68] sm:$0xff] }
  0xb6   : > { %1183 = vmatprep.mubr.bf16.mxu0 %v2284_v60 }
  0xb7   : > { %2147 = vmatmul.mubr.bf16.vlgmr.msra.gmra.mxu1 %v2283_v61 }
  0xb8   : > { %2150 = vmatprep.mubr.bf16.mxu1 %v2290_v62 }
  0xbd   : > { %1184 = vmatmul.mubr.bf16.gmra.mxu0 %v2286_v63 }
  0xbe   : > { %1191 = vmatprep.mubr.bf16.mxu0 %v2287_v0 }
  0xbf   : > { %2151 = vmatmul.mubr.bf16.gmra.mxu1 %v2291_v1  ;;  %v781_v1 = vld [vmem:[#allocation2 + $0x8] sm:$0xff] }
  0xc0   : > { %2154 = vmatprep.mubr.bf16.mxu1 %v2298_v2 }
  0xc5   : > { %1192 = vmatmul.mubr.bf16.gmra.mxu0 %v2289_v3 }
  0xc6   : > { %1199 = vmatprep.mubr.bf16.mxu0 %v2292_v4 }
  0xc7   : > { %2155 = vmatmul.mubr.bf16.gmra.mxu1 %v2299_v5 }
  0xc8   : > { %2158 = vmatprep.mubr.bf16.mxu1 %v2306_v6 }
  0xcd   : > { %1200 = vmatmul.mubr.bf16.gmra.mxu0 %v2294_v7 }
  0xce   : > { %1207 = vmatprep.mubr.bf16.mxu0 %v2295_v8  ;;  %v782_v8 = vld [vmem:[#allocation2 + $0x48] sm:$0xff] }
  0xcf   : > { %2159 = vmatmul.mubr.bf16.gmra.mxu1 %v2307_v9 }
  0xd5   : > { %1208 = vmatmul.mubr.bf16.gmra.mxu0 %v2297_v10 }
  0xd6   : > { %1215 = vmatprep.mubr.bf16.mxu0 %v2300_v11 }
  0xdd   : > { %1216 = vmatmul.mubr.bf16.gmra.mxu0 %v2302_v12 }
  0xde   : > { %1223 = vmatprep.mubr.bf16.mxu0 %v2303_v13 }
  0xe5   : > { %1224 = vmatmul.mubr.bf16.gmra.mxu0 %v2305_v14 }
  0xe6   : > { %1231 = vmatprep.mubr.bf16.mxu0 %v2308_v15 }
  0xed   : > { %1232 = vmatmul.mubr.bf16.gmra.mxu0 %v2310_v16  ;;  %v783_v16 = vld [vmem:[#allocation2 + $0x40] sm:$0xff] }
 0x175   : > { %v2066_v17 = vpop.f32.mrf.mxu0 }
 0x177   : > { %v2067_v18 = vpop.f32.mrf.mxu0  ;;  %v2148_v19 = vpop.f32.mrf.mxu1 }
 0x178   : > { %v2068_v20 = vadd.f32 %v2067_v18, %v2066_v17 }
 0x179   : > { %v2069_v21 = vpop.f32.mrf.mxu0  ;;  %v1274_v23 = vpop.f32.mrf.mxu1 }
 0x17a   : > { %v1275_v24 = vadd.f32 %v2068_v20, %v1274_v23  ;;  %v784_v23 = vld [vmem:[#allocation2 + $0x20] sm:$0xff] }
 0x17b   : > { %v2070_v25 = vpop.f32.mrf.mxu0  ;;  %v2149_v26 = vpop.f32.mrf.mxu1 }
 0x17c   : > { %v1337_v27 = vadd.f32 %v1275_v24, %v775_v22  ;;  %v2071_v28 = vadd.f32 %v2070_v25, %v2069_v21 }
 0x17d   : > { %v2072_v29 = vpop.f32.mrf.mxu0  ;;  %v1277_v31 = vpop.f32.mrf.mxu1 }
 0x17e   : > { %1353 = vst [vmem:[#allocation2 + $0x30] sm:$0xff] %v1337_v27  ;;  %v1278_v32 = vadd.f32 %v2071_v28, %v1277_v31 }
 0x17f   : > { %v2073_v33 = vpop.f32.mrf.mxu0  ;;  %v2152_v34 = vpop.f32.mrf.mxu1 }
 0x180   : > { %v1338_v35 = vadd.f32 %v1278_v32, %v776_v30  ;;  %v2074_v36 = vadd.f32 %v2073_v33, %v2072_v29  ;;  %v785_v29 = vld [vmem:[#allocation2 + $0x10] sm:$0xff] }
 0x181   : > { %v2075_v38 = vpop.f32.mrf.mxu0  ;;  %v1290_v41 = vpop.f32.mrf.mxu1 }
 0x182   : > { %1354 = vst [vmem:[#allocation2] sm:$0xff] %v1338_v35  ;;  %v1283_v39 = vadd.f32 %v2148_v19, %v2074_v36  ;;  %v786_v36 = vld [vmem:[#allocation2 + $0x38] sm:$0xff] }
 0x183   : > { %v2076_v40 = vpop.f32.mrf.mxu0  ;;  %v2153_v48 = vpop.f32.mrf.mxu1 }
 0x184   : > { %v1339_v42 = vadd.f32 %v1283_v39, %v777_v37  ;;  %v2077_v43 = vadd.f32 %v2076_v40, %v2075_v38 }
 0x185   : > { %v2078_v45 = vpop.f32.mrf.mxu0  ;;  %v1293_v55 = vpop.f32.mrf.mxu1 }
 0x186   : > { %1355 = vst [vmem:[#allocation2 + $0x58] sm:$0xff] %v1339_v42  ;;  %v1286_v46 = vadd.f32 %v2149_v26, %v2077_v43 }
 0x187   : > { %v2079_v47 = vpop.f32.mrf.mxu0  ;;  %v2156_v62 = vpop.f32.mrf.mxu1 }
 0x188   : > { %v1340_v49 = vadd.f32 %v1286_v46, %v778_v44  ;;  %v2080_v50 = vadd.f32 %v2079_v47, %v2078_v45  ;;  %v787_v44 = vld [vmem:[#allocation2 + $0x60] sm:$0xff] }
 0x189   : > { %v2081_v51 = vpop.f32.mrf.mxu0  ;;  %v1306_v5 = vpop.f32.mrf.mxu1 }
 0x18a   : > { %1356 = vst [vmem:[#allocation2 + $0x18] sm:$0xff] %v1340_v49  ;;  %v1291_v53 = vadd.f32 %v2080_v50, %v1290_v41 }
 0x18b   : > { %v2082_v54 = vpop.f32.mrf.mxu0  ;;  %v2157_v12 = vpop.f32.mrf.mxu1 }
 0x18c   : > { %v1341_v56 = vadd.f32 %v1291_v53, %v779_v52  ;;  %v2083_v57 = vadd.f32 %v2082_v54, %v2081_v51  ;;  %v788_v51 = vld [vmem:[#allocation2 + $0x70] sm:$0xff] }
 0x18d   : > { %v2084_v58 = vpop.f32.mrf.mxu0  ;;  %v1309_v19 = vpop.f32.mrf.mxu1 }
 0x18e   : > { %1357 = vst [vmem:[#allocation2 + $0x50] sm:$0xff] %v1341_v56  ;;  %v1294_v60 = vadd.f32 %v2083_v57, %v1293_v55  ;;  %v789_v56 = vld [vmem:[#allocation2 + $0x78] sm:$0xff] }
 0x18f   : > { %v2085_v61 = vpop.f32.mrf.mxu0  ;;  %v2160_v26 = vpop.f32.mrf.mxu1 }
 0x190   : > { %v1342_v63 = vadd.f32 %v1294_v60, %v780_v59  ;;  %v2086_v0 = vadd.f32 %v2085_v61, %v2084_v58 }
 0x191   : > { %v2087_v2 = vpop.f32.mrf.mxu0  ;;  %v1322_v33 = vpop.f32.mrf.mxu1 }
 0x192   : > { %1358 = vst [vmem:[#allocation2 + $0x68] sm:$0xff] %v1342_v63  ;;  %v1299_v3 = vadd.f32 %v2152_v34, %v2086_v0 }
 0x193   : > { %v2088_v4 = vpop.f32.mrf.mxu0  ;;  %v2161_v40 = vpop.f32.mrf.mxu1 }
 0x194   : > { %v1343_v6 = vadd.f32 %v1299_v3, %v781_v1  ;;  %v2089_v7 = vadd.f32 %v2088_v4, %v2087_v2 }
 0x195   : > { %v2090_v9 = vpop.f32.mrf.mxu0  ;;  %v1325_v47 = vpop.f32.mrf.mxu1 }
 0x196   : > { %1359 = vst [vmem:[#allocation2 + $0x8] sm:$0xff] %v1343_v6  ;;  %v1302_v10 = vadd.f32 %v2153_v48, %v2089_v7 }
 0x197   : > { %v2091_v11 = vpop.f32.mrf.mxu0 }
 0x198   : > { %v1344_v13 = vadd.f32 %v1302_v10, %v782_v8  ;;  %v2092_v14 = vadd.f32 %v2091_v11, %v2090_v9 }
 0x199   : > { %v2093_v15 = vpop.f32.mrf.mxu0 }
 0x19a   : > { %1360 = vst [vmem:[#allocation2 + $0x48] sm:$0xff] %v1344_v13  ;;  %v1307_v17 = vadd.f32 %v2092_v14, %v1306_v5 }
 0x19b   : > { %v2094_v18 = vpop.f32.mrf.mxu0 }
 0x19c   : > { %v1345_v20 = vadd.f32 %v1307_v17, %v783_v16  ;;  %v2095_v21 = vadd.f32 %v2094_v18, %v2093_v15 }
 0x19d   : > { %v2096_v22 = vpop.f32.mrf.mxu0 }
 0x19e   : > { %1361 = vst [vmem:[#allocation2 + $0x40] sm:$0xff] %v1345_v20  ;;  %v1310_v24 = vadd.f32 %v2095_v21, %v1309_v19 }
 0x19f   : > { %v2097_v25 = vpop.f32.mrf.mxu0 }
 0x1a0   : > { %v1346_v27 = vadd.f32 %v1310_v24, %v784_v23  ;;  %v2098_v28 = vadd.f32 %v2097_v25, %v2096_v22 }
 0x1a1   : > { %v2099_v30 = vpop.f32.mrf.mxu0 }
 0x1a2   : > { %1362 = vst [vmem:[#allocation2 + $0x20] sm:$0xff] %v1346_v27  ;;  %v1315_v31 = vadd.f32 %v2156_v62, %v2098_v28  ;;  %v790_v62 = vld [vmem:[#allocation2 + $0x28] sm:$0xff] }
 0x1a3   : > { %v2100_v32 = vpop.f32.mrf.mxu0 }
 0x1a4   : > { %v1347_v34 = vadd.f32 %v1315_v31, %v785_v29  ;;  %v2101_v35 = vadd.f32 %v2100_v32, %v2099_v30 }
 0x1a5   : > { %v2102_v37 = vpop.f32.mrf.mxu0 }
 0x1a6   : > { %1363 = vst [vmem:[#allocation2 + $0x10] sm:$0xff] %v1347_v34  ;;  %v1318_v38 = vadd.f32 %v2157_v12, %v2101_v35 }
 0x1a7   : > { %v2103_v39 = vpop.f32.mrf.mxu0 }
 0x1a8   : > { %v1348_v41 = vadd.f32 %v1318_v38, %v786_v36  ;;  %v2104_v42 = vadd.f32 %v2103_v39, %v2102_v37 }
 0x1a9   : > { %v2105_v43 = vpop.f32.mrf.mxu0 }
 0x1aa   : > { %1364 = vst [vmem:[#allocation2 + $0x38] sm:$0xff] %v1348_v41  ;;  %v1323_v45 = vadd.f32 %v2104_v42, %v1322_v33 }
 0x1ab   : > { %v2106_v46 = vpop.f32.mrf.mxu0 }
 0x1ac   : > { %v1349_v48 = vadd.f32 %v1323_v45, %v787_v44  ;;  %v2107_v49 = vadd.f32 %v2106_v46, %v2105_v43 }
 0x1ad   : > { %v2108_v50 = vpop.f32.mrf.mxu0 }
 0x1ae   : > { %1365 = vst [vmem:[#allocation2 + $0x60] sm:$0xff] %v1349_v48  ;;  %v1326_v52 = vadd.f32 %v2107_v49, %v1325_v47 }
 0x1af   : > { %v2109_v53 = vpop.f32.mrf.mxu0 }
 0x1b0   : > { %v1350_v54 = vadd.f32 %v1326_v52, %v788_v51  ;;  %v2110_v55 = vadd.f32 %v2109_v53, %v2108_v50 }
 0x1b1   : > { %v2111_v57 = vpop.f32.mrf.mxu0 }
 0x1b2   : > { %1366 = vst [vmem:[#allocation2 + $0x70] sm:$0xff] %v1350_v54  ;;  %v1331_v58 = vadd.f32 %v2160_v26, %v2110_v55 }
 0x1b3   : > { %v2112_v59 = vpop.f32.mrf.mxu0 }
 0x1b4   : > { %v1351_v60 = vadd.f32 %v1331_v58, %v789_v56  ;;  %v2113_v61 = vadd.f32 %v2112_v59, %v2111_v57 }
 0x1b6   : > { %1367 = vst [vmem:[#allocation2 + $0x78] sm:$0xff] %v1351_v60  ;;  %v1334_v63 = vadd.f32 %v2161_v40, %v2113_v61  ;;  %1372 = sbr.rel (%p1923_p6) target bundleno = 473 (0x1d9), region = 156 }
 0x1b8   : > { %v1352_v0 = vadd.f32 %v1334_v63, %v790_v62 }
 0x1ba   : > { %1368 = vst [vmem:[#allocation2 + $0x28] sm:$0xff] %v1352_v0 }
 0x1bb   : > { %v1373_v1 = vld [vmem:[#allocation2 + $0x30] sm:$0xff]  ;;  %v1374_v2 = vld [vmem:[#allocation2] sm:$0xff]  ;;  %v1375_v8 = vld [vmem:[#allocation2 + $0x58] sm:$0xff] }
 0x1bc   : > { %v2827_v3 = vld [vmem:[%s748_s9] ss:$0 sm:$0xff]  ;;  %v1376_v11 = vld [vmem:[#allocation2 + $0x18] sm:$0xff]  ;;  %v2036_v13 = vld [vmem:[%s2768_s18 + $0x8] sm:$0xff]  }
 0x1bd   : > { %v1396_v4 = vmul.f32 %v2827_v3, %v1373_v1  ;;  %v1397_v5 = vmul.f32 %v2827_v3, %v1374_v2  ;;  %v2836_v6 = vld [vmem:[%s751_s1] ss:$0 sm:$0xff]  ;;  %v1398_v12 = vmul.f32 %v2827_v3, %v1375_v8  ;;  %v1377_v14 = vld [vmem:[#allocation2 + $0x50] sm:$0xff]  ;;  %v1399_v17 = vmul.f32 %v2827_v3, %v1376_v11  ;;  %v1378_v19 = vld [vmem:[#allocation2 + $0x68] sm:$0xff] }
 0x1be   : > { %v1965_v7 = vld [vmem:[%s2768_s18] sm:$0xff]   ;;  %v1970_v18 = vunpack.c.l.bf16 %v2036_v13  ;;  %v2037_v20 = vld [vmem:[%s2768_s18 + $0x10] sm:$0xff]   ;;  %v1971_v22 = vunpack.c.h.bf16 %v2036_v13  ;;  %v1400_v23 = vmul.f32 %v2827_v3, %v1377_v14  ;;  %v1401_v24 = vmul.f32 %v2827_v3, %v1378_v19  ;;  %v1379_v25 = vld [vmem:[#allocation2 + $0x8] sm:$0xff] }
 0x1bf   : > { %v1966_v9 = vunpack.c.l.bf16 %v1965_v7  ;;  %v1967_v10 = vunpack.c.h.bf16 %v1965_v7  ;;  %v1419_v15 = vadd.f32 %v2836_v6, %v1396_v4  ;;  %v1420_v16 = vadd.f32 %v2836_v6, %v1397_v5  ;;  %v1380_v30 = vld [vmem:[#allocation2 + $0x48] sm:$0xff]  ;;  %v2038_v35 = vld [vmem:[%s2768_s18 + $0x18] sm:$0xff]   ;;  %v1381_v44 = vld [vmem:[#allocation2 + $0x40] sm:$0xff] }
 0x1c0   : > { %v1421_v21 = vadd.f32 %v2836_v6, %v1398_v12  ;;  %v1422_v28 = vadd.f32 %v2836_v6, %v1399_v17  ;;  %v1974_v29 = vunpack.c.l.bf16 %v2037_v20  ;;  %v1423_v32 = vadd.f32 %v2836_v6, %v1400_v23  ;;  %v1382_v45 = vld [vmem:[#allocation2 + $0x20] sm:$0xff]  ;;  %v1383_v55 = vld [vmem:[#allocation2 + $0x10] sm:$0xff]  ;;  %v1384_v60 = vld [vmem:[#allocation2 + $0x38] sm:$0xff] }
 0x1c1   : > { %v1467_v26 = vadd.f32 %v1966_v9, %v1419_v15  ;;  %v1468_v27 = vadd.f32 %v1967_v10, %v1420_v16  ;;  %v1424_v33 = vadd.f32 %v2836_v6, %v1401_v24  ;;  %v1975_v34 = vunpack.c.h.bf16 %v2037_v20  ;;  %v2039_v50 = vld [vmem:[%s2768_s18 + $0x20] sm:$0xff]   ;;  %v2040_v61 = vld [vmem:[%s2768_s18 + $0x28] sm:$0xff]   ;;  %v1386_v9 = vld [vmem:[#allocation2 + $0x70] sm:$0xff] }
 0x1c2   : > { %v1469_v31 = vadd.f32 %v1970_v18, %v1421_v21  ;;  %v1470_v38 = vadd.f32 %v1971_v22, %v1422_v28  ;;  %v1402_v39 = vmul.f32 %v2827_v3, %v1379_v25  ;;  %v1471_v41 = vadd.f32 %v1974_v29, %v1423_v32  ;;  %v1385_v2 = vld [vmem:[#allocation2 + $0x60] sm:$0xff]  ;;  %v2041_v10 = vld [vmem:[%s2768_s18 + $0x30] sm:$0xff]   ;;  %v1387_v19 = vld [vmem:[#allocation2 + $0x78] sm:$0xff] }
 0x1c3   : > { %v1483_v36 = vmax.f32 %v1467_v26, 0.0  ;;  %v1484_v37 = vmax.f32 %v1468_v27, 0.0  ;;  %v1472_v42 = vadd.f32 %v1975_v34, %v1424_v33  ;;  %v1403_v43 = vmul.f32 %v2827_v3, %v1380_v30  ;;  %v1388_v24 = vld [vmem:[#allocation2 + $0x28] sm:$0xff]  ;;  %v2042_v29 = vld [vmem:[%s2768_s18 + $0x38] sm:$0xff]  }
 0x1c4   : > { %v1485_v40 = vmax.f32 %v1469_v31, 0.0  ;;  %v1486_v47 = vmax.f32 %v1470_v38, 0.0  ;;  %v1425_v48 = vadd.f32 %v2836_v6, %v1402_v39  ;;  %v1978_v49 = vunpack.c.l.bf16 %v2038_v35 }
 0x1c5   : > { %v1999_v46 = vpack.c.bf16 %v1484_v37, %v1483_v36  ;;  %v1487_v51 = vmax.f32 %v1471_v41, 0.0  ;;  %v1488_v52 = vmax.f32 %v1472_v42, 0.0  ;;  %v1426_v53 = vadd.f32 %v2836_v6, %v1403_v43 }
 0x1c6   : > { %v1979_v54 = vunpack.c.h.bf16 %v2038_v35  ;;  %v2004_v56 = vpack.c.bf16 %v1486_v47, %v1485_v40  ;;  %v1473_v57 = vadd.f32 %v1978_v49, %v1425_v48  ;;  %v1404_v58 = vmul.f32 %v2827_v3, %v1381_v44 }
 0x1c7   : > { %2000 = vst [vmem:[%s2770_s22] sm:$0xff] %v1999_v46   ;;  %v1405_v59 = vmul.f32 %v2827_v3, %v1382_v45  ;;  %v2009_v62 = vpack.c.bf16 %v1488_v52, %v1487_v51  ;;  %v1982_v0 = vunpack.c.l.bf16 %v2039_v50  ;;  %v1983_v1 = vunpack.c.h.bf16 %v2039_v50 }
 0x1c8   : > { %v1474_v63 = vadd.f32 %v1979_v54, %v1426_v53  ;;  %2043 = vst [vmem:[%s2770_s22 + $0x8] sm:$0xff] %v2004_v56   ;;  %v1489_v4 = vmax.f32 %v1473_v57, 0.0  ;;  %v1427_v5 = vadd.f32 %v2836_v6, %v1404_v58  ;;  %v1406_v8 = vmul.f32 %v2827_v3, %v1383_v55 }
 0x1c9   : > { %v1428_v7 = vadd.f32 %v2836_v6, %v1405_v59  ;;  %2044 = vst [vmem:[%s2770_s22 + $0x10] sm:$0xff] %v2009_v62   ;;  %v1407_v12 = vmul.f32 %v2827_v3, %v1384_v60  ;;  %v1986_v13 = vunpack.c.l.bf16 %v2040_v61  ;;  %v1987_v14 = vunpack.c.h.bf16 %v2040_v61 }
 0x1ca   : > { %v1490_v11 = vmax.f32 %v1474_v63, 0.0  ;;  %v1475_v15 = vadd.f32 %v1982_v0, %v1427_v5  ;;  %v1429_v17 = vadd.f32 %v2836_v6, %v1406_v8  ;;  %v1408_v18 = vmul.f32 %v2827_v3, %v1385_v2 }
 0x1cb   : > { %v1476_v16 = vadd.f32 %v1983_v1, %v1428_v7  ;;  %v1430_v21 = vadd.f32 %v2836_v6, %v1407_v12  ;;  %v1409_v22 = vmul.f32 %v2827_v3, %v1386_v9  ;;  %v1990_v23 = vunpack.c.l.bf16 %v2041_v10 }
 0x1cc   : > { %v2014_v20 = vpack.c.bf16 %v1490_v11, %v1489_v4  ;;  %v1491_v25 = vmax.f32 %v1475_v15, 0.0  ;;  %v1477_v27 = vadd.f32 %v1986_v13, %v1429_v17  ;;  %v1431_v28 = vadd.f32 %v2836_v6, %v1408_v18 }
 0x1cd   : > { %v1492_v26 = vmax.f32 %v1476_v16, 0.0  ;;  %v1478_v30 = vadd.f32 %v1987_v14, %v1430_v21  ;;  %v1432_v31 = vadd.f32 %v2836_v6, %v1409_v22  ;;  %v1991_v32 = vunpack.c.h.bf16 %v2041_v10 }
 0x1ce   : > { %2045 = vst [vmem:[%s2770_s22 + $0x18] sm:$0xff] %v2014_v20   ;;  %v1410_v33 = vmul.f32 %v2827_v3, %v1387_v19  ;;  %v1493_v35 = vmax.f32 %v1477_v27, 0.0  ;;  %v1479_v36 = vadd.f32 %v1990_v23, %v1431_v28  ;;  %v1411_v37 = vmul.f32 %v2827_v3, %v1388_v24 }
 0x1cf   : > { %v2019_v34 = vpack.c.bf16 %v1492_v26, %v1491_v25  ;;  %v1494_v38 = vmax.f32 %v1478_v30, 0.0  ;;  %v1480_v39 = vadd.f32 %v1991_v32, %v1432_v31  ;;  %v1994_v41 = vunpack.c.l.bf16 %v2042_v29 }
 0x1d0   : > { %v1433_v40 = vadd.f32 %v2836_v6, %v1410_v33  ;;  %v1495_v42 = vmax.f32 %v1479_v36, 0.0  ;;  %v1434_v43 = vadd.f32 %v2836_v6, %v1411_v37  ;;  %v1995_v44 = vunpack.c.h.bf16 %v2042_v29 }
 0x1d1   : > { %2046 = vst [vmem:[%s2770_s22 + $0x20] sm:$0xff] %v2019_v34   ;;  %v2024_v45 = vpack.c.bf16 %v1494_v38, %v1493_v35  ;;  %v1496_v46 = vmax.f32 %v1480_v39, 0.0 }
 0x1d2   : > { %v1481_v47 = vadd.f32 %v1994_v41, %v1433_v40  ;;  %v1482_v48 = vadd.f32 %v1995_v44, %v1434_v43 }
 0x1d3   : > { %2047 = vst [vmem:[%s2770_s22 + $0x28] sm:$0xff] %v2024_v45   ;;  %v2029_v49 = vpack.c.bf16 %v1496_v46, %v1495_v42 }
 0x1d4   : > { %v1497_v50 = vmax.f32 %v1481_v47, 0.0  ;;  %v1498_v3 = vmax.f32 %v1482_v48, 0.0 }
 0x1d5   : > { %2048 = vst [vmem:[%s2770_s22 + $0x30] sm:$0xff] %v2029_v49  }
 0x1d6   : > { %v2034_v51 = vpack.c.bf16 %v1498_v3, %v1497_v50 }
 0x1d8   : > { %2049 = vst [vmem:[%s2770_s22 + $0x38] sm:$0xff] %v2034_v51  }
 0x1d9 PF: > { %1585 = sbr.rel (!%p2534_p13) target bundleno = 485 (0x1e5), region = 160  ;;  %s1943_s1 = sshll.u32 (%p2534_p13), %s2385_s25, 2  ;;  %v1607_v6 = vld [vmem:[%s2770_s22] sm:$0xf] (%p2534_p13)  ;;  %v1609_v52 = vld [vmem:[%s2770_s22 + $0x4] sm:$0xf] (%p2534_p13) }
 0x1da   : > { %s1590_s30 = scalar_lea.vmem (%p2534_p13), %s2944_s5, %s1943_s1  ;;  %v1611_v53 = vld [vmem:[%s2770_s22 + $0x8] sm:$0xf] (%p2534_p13)  ;;  %v1613_v54 = vld [vmem:[%s2770_s22 + $0xc] sm:$0xf] (%p2534_p13)  ;;  %v1615_v55 = vld [vmem:[%s2770_s22 + $0x10] sm:$0xf] (%p2534_p13) }
 0x1db   : > { %1608 = vst [vmem:[%s1590_s30] sm:$0xf] (%p2534_p13), %v1607_v6  ;;  %1610 = vst [vmem:[%s1590_s30 + $0x8] sm:$0xf] (%p2534_p13), %v1609_v52  ;;  %v1617_v56 = vld [vmem:[%s2770_s22 + $0x14] sm:$0xf] (%p2534_p13) }
 0x1dc   : > { %1612 = vst [vmem:[%s1590_s30 + $0x10] sm:$0xf] (%p2534_p13), %v1611_v53  ;;  %1614 = vst [vmem:[%s1590_s30 + $0x18] sm:$0xf] (%p2534_p13), %v1613_v54  ;;  %v1619_v57 = vld [vmem:[%s2770_s22 + $0x18] sm:$0xf] (%p2534_p13) }
 0x1dd   : > { %1616 = vst [vmem:[%s1590_s30 + $0x20] sm:$0xf] (%p2534_p13), %v1615_v55  ;;  %v1621_v58 = vld [vmem:[%s2770_s22 + $0x1c] sm:$0xf] (%p2534_p13)  ;;  %1618 = vst [vmem:[%s1590_s30 + $0x28] sm:$0xf] (%p2534_p13), %v1617_v56 }
 0x1de   : > { %1620 = vst [vmem:[%s1590_s30 + $0x30] sm:$0xf] %v1619_v57  ;;  %1622 = vst [vmem:[%s1590_s30 + $0x38] sm:$0xf] %v1621_v58  ;;  %v1623_v59 = vld [vmem:[%s2770_s22 + $0x20] sm:$0xf] }
 0x1df   : > { %v1625_v60 = vld [vmem:[%s2770_s22 + $0x24] sm:$0xf]  ;;  %v1627_v61 = vld [vmem:[%s2770_s22 + $0x28] sm:$0xf]  ;;  %1624 = vst [vmem:[%s1590_s30 + $0x40] sm:$0xf] %v1623_v59 }
 0x1e0   : > { %1626 = vst [vmem:[%s1590_s30 + $0x48] sm:$0xf] %v1625_v60  ;;  %1628 = vst [vmem:[%s1590_s30 + $0x50] sm:$0xf] %v1627_v61  ;;  %v1629_v62 = vld [vmem:[%s2770_s22 + $0x2c] sm:$0xf] }
 0x1e1   : > { %v1631_v63 = vld [vmem:[%s2770_s22 + $0x30] sm:$0xf]  ;;  %v1633_v0 = vld [vmem:[%s2770_s22 + $0x34] sm:$0xf]  ;;  %1630 = vst [vmem:[%s1590_s30 + $0x58] sm:$0xf] %v1629_v62 }
 0x1e2   : > { %1632 = vst [vmem:[%s1590_s30 + $0x60] sm:$0xf] %v1631_v63  ;;  %1634 = vst [vmem:[%s1590_s30 + $0x68] sm:$0xf] %v1633_v0  ;;  %v1635_v1 = vld [vmem:[%s2770_s22 + $0x38] sm:$0xf] }
 0x1e3   : > { %v1637_v2 = vld [vmem:[%s2770_s22 + $0x3c] sm:$0xf]  ;;  %1636 = vst [vmem:[%s1590_s30 + $0x70] sm:$0xf] %v1635_v1 }
 0x1e4   : > { %1638 = vst [vmem:[%s1590_s30 + $0x78] sm:$0xf] %v1637_v2 }
 0x1e5 PF: > { %s15_s28 = sadd.s32 1, %s2397_s28   ;;  %s2960_s25 = sld [smem:[#allocation9_spill]] }
 0x1e6   : > { %p12_p7 = scmp.ge.s32.totalorder %s15_s28, 38   ;;  %s2961_s8 = sld [smem:[#allocation7_spill]] }
 0x1e7   : > { %s2962_s0 = sld [smem:[#allocation8_spill]]  ;;  %s2963_s18 = smov %s2361_s19 }
 0x1e8   : > { %s2964_s19 = smov %s2526_s17  ;;  %s2965_s20 = smov %s2369_s21 }
 0x1e9   : > { %s2966_s21 = smov %s2523_s16  ;;  %s2967_s22 = smov %s2377_s23 }
 0x1ea   : > { %s2969_s24 = smov %s2389_s26  ;;  %14 = sbr.rel (!%p12_p7) target bundleno = 10 (0xa), region = 260 }
 0x1eb   : > { %s2968_s23 = smov %s2960_s25  ;;  %s2970_s25 = smov %s2393_s27 }
 0x1ec   : > { %s2971_s26 = smov %s2961_s8 }
 0x1ed   : > { %s2972_s27 = smov %s2962_s0 }

// kernel: _lambda_.14
= control target key start
LH: loop header
LB: loop body
LE: loop exit
PB: predicated region body
PF: predicated region fallthrough
CT: control target
= control target key end

     0   :  { %s2623_s0 = inlined_call_operand.vmem [shape: bf16[128,6912], index: 0, kind: input, shape index: {}]   ;;  %s2624_s1 = inlined_call_operand.vmem [shape: bf16[6912,256], index: 1, kind: input, shape index: {}]   ;;  %s2625_s2 = inlined_call_operand.vmem [shape: f32[1,256], index: 2, kind: input, shape index: {}]   ;;  %s2626_s3 = inlined_call_operand.vmem [shape: f32[1,256], index: 3, kind: input, shape index: {}]   ;;  %s2627_s4 = inlined_call_operand.vmem [shape: bf16[128,256], index: 4, kind: output, shape index: {}]  }
   0x1   :  { %2631 = sst [smem:[#allocation9_spill]] %s2623_s0 }
   0x2   :  { %2632 = sst [smem:[#allocation10_spill]] %s2624_s1 }
   0x3   :  { %s2159_s15 = smov 0   ;;  %s2161_s16 = smov 0  }
   0x4   :  { %s2163_s17 = smov 0   ;;  %s2165_s18 = smov 0  }
   0x5   :  { %s2167_s19 = smov 0   ;;  %s2169_s20 = smov 0  }
   0x6   :  { %s2171_s21 = smov 0   ;;  %s2173_s22 = smov 0  }
   0x7   :  { %s2175_s23 = smov 0   ;;  %s2177_s24 = smov 0  }
   0x8   :  { %s2179_s25 = smov 0  }
   0x9 LB: > { %2633 = sst [smem:[#allocation6_spill]] %s2127_s24  ;;  %s1606_s26 = sadd.s32 4294967295, %s2131_s25   ;;  %s2131_s25 = sphi %s2179_s25, %s14_s25   ;;  %s2127_s24 = sphi %s2177_s24, %s2643_s24   ;;  %s2123_s23 = sphi %s2175_s23, %s2651_s23   ;;  %s2119_s22 = sphi %s2173_s22, %s2641_s22   ;;  %s2115_s21 = sphi %s2171_s21, %s2650_s21   ;;  %s2111_s20 = sphi %s2169_s20, %s2649_s20   ;;  %s2107_s19 = sphi %s2167_s19, %s2648_s19   ;;  %s2103_s18 = sphi %s2165_s18, %s2647_s18   ;;  %s2099_s17 = sphi %s2163_s17, %s2646_s17   ;;  %s2095_s16 = sphi %s2161_s16, %s2645_s16   ;;  %s2091_s15 = sphi %s2159_s15, %s2644_s15  }
   0xa   : > { %s26_s27 = sadd.s32 1, %s2123_s23  ;;  %s29_s28 = sadd.s32 1, %s2127_s24 }
   0xb   : > { %p27_p0 = scmp.ge.s32.totalorder %s26_s27, 18  ;;  %s42_s29 = sadd.s32 1, %s2111_s20 }
   0xc   : > { %p49_p1 = scmp.ne.s32.totalorder %s2111_s20, %s2107_s19  ;;  %p50_p2 = scmp.eq.s32.totalorder %s2131_s25, 0 }
   0xd   : > { %s2653_s27 = smov (%p27_p0, %s26_s27), 0  ;;  %s2655_s28 = smov (!%p27_p0, %s29_s28), %s2127_s24 }
   0xe   : > { %2634 = sst [smem:[#allocation7_spill]] %s2653_s27  ;;  %s38_s30 = ssub.s32 %s2123_s23, %s2653_s27 }
   0xf   : > { %p31_p3 = scmp.ge.s32.totalorder %s2655_s28, 2  ;;  %p40_p4 = scmp.eq.s32.totalorder %s38_s30, 0 }
  0x10   : > { %p2226_p5 = por %p50_p2, %p49_p1  ;;  %s70_s6 = sadd.s32 1, %s2103_s18 }
  0x11   : > { %s2657_s28 = smov (%p31_p3, %s2655_s28), 0  ;;  %p77_p6 = scmp.ne.s32.totalorder %s2103_s18, %s2099_s17 }
  0x12   : > { %2636 = sst [smem:[#allocation8_spill]] %s2657_s28  ;;  %s66_s8 = ssub.s32 %s2127_s24, %s2657_s28 }
  0x13   : > { %s2234_s7 = scalar_select %p40_p4, %s2111_s20, %s42_s29  }
  0x14   : > { %s67_s9 = sor.u32 %s66_s8, %s38_s30  ;;  %p148_p7 = scmp.eq.s32.totalorder %s66_s8, 0 }
  0x15   : > { %p68_p8 = scmp.eq.s32.totalorder %s67_s9, 0  ;;  %p2240_p9 = por %p77_p6, %p50_p2 }
  0x16   : > { %s150_s11 = sadd.s32 1, %s2095_s16  ;;  %p160_p10 = scmp.ne.s32.totalorder %s2095_s16, %s2091_s15 }
  0x17   : > { %s2248_s12 = scalar_select %p68_p8, %s2103_s18, %s70_s6  }
  0x18   : > { %s2251_s13 = scalar_select %p148_p7, %s2095_s16, %s150_s11  }
  0x19   : > { %p161_p11 = scmp.eq.s32.totalorder %s1606_s26, 35  ;;  %p1609_p13 = scmp.ge.s32.totalorder %s2131_s25, 36 }
  0x1b   : > { %p2253_p12 = por %p161_p11, %p160_p10  ;;  %183 = sbr.rel (%p1609_p13) target bundleno = 100 (0x64), region = 16 }
  0x20   : > { %186 = sbr.rel (!%p2226_p5) target bundleno = 59 (0x3b), region = 20  ;;  %s188_s29 = sand.u32 (%p2226_p5), 1, %s2111_s20  }
  0x21   : > { %s1719_s30 = smul.u32 (%p2226_p5), 12, %s2123_s23  ;;  %s2639_s0 = sld [smem:[#allocation9_spill]] (%p2226_p5) }
  0x22   : > { %s1896_s8 = smul.u32 (%p2226_p5), 192, %s188_s29 }
  0x24   : > { %s2270_s26 = scalar_lea.vmem (%p2226_p5), [#allocation3], %s1896_s8 }
  0x27   : > { %s2265_s11 = scalar_lea.vmem %s2639_s0, %s1719_s30 }
  0x28   : > { %v211_v0 = vld [vmem:[%s2265_s11] sm:$0xff]  ;;  %v213_v1 = vld [vmem:[%s2265_s11 + $0xd8] sm:$0xff]  ;;  %v215_v2 = vld [vmem:[%s2265_s11 + $0x1b0] sm:$0xff] }
  0x29   : > { %212 = vst [vmem:[%s2270_s26] sm:$0xff] %v211_v0  ;;  %214 = vst [vmem:[%s2270_s26 + $0xc] sm:$0xff] %v213_v1  ;;  %v217_v3 = vld [vmem:[%s2265_s11 + $0x288] sm:$0xff]  ;;  %v219_v4 = vld [vmem:[%s2265_s11 + $0x360] sm:$0xff] }
  0x2a   : > { %216 = vst [vmem:[%s2270_s26 + $0x18] sm:$0xff] %v215_v2  ;;  %v221_v5 = vld [vmem:[%s2265_s11 + $0x438] sm:$0xff]  ;;  %218 = vst [vmem:[%s2270_s26 + $0x24] sm:$0xff] %v217_v3  ;;  %v223_v6 = vld [vmem:[%s2265_s11 + $0x510] sm:$0xff] }
  0x2b   : > { %220 = vst [vmem:[%s2270_s26 + $0x30] sm:$0xff] %v219_v4  ;;  %222 = vst [vmem:[%s2270_s26 + $0x3c] sm:$0xff] %v221_v5  ;;  %v225_v7 = vld [vmem:[%s2265_s11 + $0x5e8] sm:$0xff]  ;;  %v227_v8 = vld [vmem:[%s2265_s11 + $0x6c0] sm:$0xff] }
  0x2c   : > { %224 = vst [vmem:[%s2270_s26 + $0x48] sm:$0xff] %v223_v6  ;;  %226 = vst [vmem:[%s2270_s26 + $0x54] sm:$0xff] %v225_v7  ;;  %v229_v9 = vld [vmem:[%s2265_s11 + $0x798] sm:$0xff]  ;;  %v231_v10 = vld [vmem:[%s2265_s11 + $0x870] sm:$0xff] }
  0x2d   : > { %228 = vst [vmem:[%s2270_s26 + $0x60] sm:$0xff] %v227_v8  ;;  %v233_v11 = vld [vmem:[%s2265_s11 + $0x948] sm:$0xff]  ;;  %230 = vst [vmem:[%s2270_s26 + $0x6c] sm:$0xff] %v229_v9  ;;  %v235_v12 = vld [vmem:[%s2265_s11 + $0xa20] sm:$0xff] }
  0x2e   : > { %232 = vst [vmem:[%s2270_s26 + $0x78] sm:$0xff] %v231_v10  ;;  %234 = vst [vmem:[%s2270_s26 + $0x84] sm:$0xff] %v233_v11  ;;  %v237_v13 = vld [vmem:[%s2265_s11 + $0xaf8] sm:$0xff]  ;;  %v239_v14 = vld [vmem:[%s2265_s11 + $0xbd0] sm:$0xff] }
  0x2f   : > { %236 = vst [vmem:[%s2270_s26 + $0x90] sm:$0xff] %v235_v12  ;;  %238 = vst [vmem:[%s2270_s26 + $0x9c] sm:$0xff] %v237_v13  ;;  %v241_v15 = vld [vmem:[%s2265_s11 + $0xca8] sm:$0xff]  ;;  %v1613_v17 = vld [vmem:[%s2265_s11 + $0xe0] sm:$0xf] }
  0x30   : > { %240 = vst [vmem:[%s2270_s26 + $0xa8] sm:$0xff] %v239_v14  ;;  %v1611_v16 = vld [vmem:[%s2265_s11 + $0x8] sm:$0xf]  ;;  %242 = vst [vmem:[%s2270_s26 + $0xb4] sm:$0xff] %v241_v15  ;;  %v1615_v18 = vld [vmem:[%s2265_s11 + $0x1b8] sm:$0xf] }
  0x31   : > { %1612 = vst [vmem:[%s2270_s26 + $0x8] sm:$0xf] %v1611_v16  ;;  %1614 = vst [vmem:[%s2270_s26 + $0x14] sm:$0xf] %v1613_v17  ;;  %v1617_v19 = vld [vmem:[%s2265_s11 + $0x290] sm:$0xf] }
  0x32   : > { %v1619_v20 = vld [vmem:[%s2265_s11 + $0x368] sm:$0xf]  ;;  %1616 = vst [vmem:[%s2270_s26 + $0x20] sm:$0xf] %v1615_v18  ;;  %1618 = vst [vmem:[%s2270_s26 + $0x2c] sm:$0xf] %v1617_v19 }
  0x33   : > { %1620 = vst [vmem:[%s2270_s26 + $0x38] sm:$0xf] %v1619_v20  ;;  %v1621_v21 = vld [vmem:[%s2265_s11 + $0x440] sm:$0xf]  ;;  %v1623_v22 = vld [vmem:[%s2265_s11 + $0x518] sm:$0xf] }
  0x34   : > { %v1625_v23 = vld [vmem:[%s2265_s11 + $0x5f0] sm:$0xf]  ;;  %1622 = vst [vmem:[%s2270_s26 + $0x44] sm:$0xf] %v1621_v21  ;;  %1624 = vst [vmem:[%s2270_s26 + $0x50] sm:$0xf] %v1623_v22 }
  0x35   : > { %1626 = vst [vmem:[%s2270_s26 + $0x5c] sm:$0xf] %v1625_v23  ;;  %v1627_v24 = vld [vmem:[%s2265_s11 + $0x6c8] sm:$0xf]  ;;  %v1629_v25 = vld [vmem:[%s2265_s11 + $0x7a0] sm:$0xf] }
  0x36   : > { %v1631_v26 = vld [vmem:[%s2265_s11 + $0x878] sm:$0xf]  ;;  %1628 = vst [vmem:[%s2270_s26 + $0x68] sm:$0xf] %v1627_v24  ;;  %1630 = vst [vmem:[%s2270_s26 + $0x74] sm:$0xf] %v1629_v25 }
  0x37   : > { %1632 = vst [vmem:[%s2270_s26 + $0x80] sm:$0xf] %v1631_v26  ;;  %v1633_v27 = vld [vmem:[%s2265_s11 + $0x950] sm:$0xf]  ;;  %v1635_v28 = vld [vmem:[%s2265_s11 + $0xa28] sm:$0xf] }
  0x38   : > { %v1637_v29 = vld [vmem:[%s2265_s11 + $0xb00] sm:$0xf]  ;;  %1634 = vst [vmem:[%s2270_s26 + $0x8c] sm:$0xf] %v1633_v27  ;;  %1636 = vst [vmem:[%s2270_s26 + $0x98] sm:$0xf] %v1635_v28 }
  0x39   : > { %1638 = vst [vmem:[%s2270_s26 + $0xa4] sm:$0xf] %v1637_v29  ;;  %v1639_v30 = vld [vmem:[%s2265_s11 + $0xbd8] sm:$0xf]  ;;  %v1641_v31 = vld [vmem:[%s2265_s11 + $0xcb0] sm:$0xf] }
  0x3a   : > { %1640 = vst [vmem:[%s2270_s26 + $0xb0] sm:$0xf] %v1639_v30  ;;  %1642 = vst [vmem:[%s2270_s26 + $0xbc] sm:$0xf] %v1641_v31 }
  0x3b PF: > { %288 = sbr.rel (!%p2240_p9) target bundleno = 100 (0x64), region = 46  ;;  %s290_s5 = sand.u32 (%p2240_p9), 1, %s2103_s18  }
  0x3c   : > { %s1720_s29 = smul.u32 (%p2240_p9), 96, %s2123_s23  ;;  %s2640_s1 = sld [smem:[#allocation10_spill]] (%p2240_p9) }
  0x3d   : > { %s1897_s30 = smul.u32 (%p2240_p9), 192, %s290_s5 }
  0x3e   : > { %s295_s8 = sadd.s32 (%p2240_p9), %s2127_s24, %s1720_s29 }
  0x3f   : > { %s1644_s6 = sshll.u32 (%p2240_p9), %s295_s8, 2  ;;  %s2346_s10 = scalar_lea.vmem (%p2240_p9), [#allocation4], %s1897_s30 }
  0x42   : > { %s2341_s28 = scalar_lea.vmem %s2640_s1, %s1644_s6 }
  0x43   : > { %v314_v32 = vld [vmem:[%s2341_s28] sm:$0xf]  ;;  %v316_v33 = vld [vmem:[%s2341_s28 + $0x8] sm:$0xf]  ;;  %v318_v34 = vld [vmem:[%s2341_s28 + $0x10] sm:$0xf] }
  0x44   : > { %315 = vst [vmem:[%s2346_s10] sm:$0xf] %v314_v32  ;;  %317 = vst [vmem:[%s2346_s10 + $0x4] sm:$0xf] %v316_v33  ;;  %v320_v35 = vld [vmem:[%s2341_s28 + $0x18] sm:$0xf] }
  0x45   : > { %319 = vst [vmem:[%s2346_s10 + $0x8] sm:$0xf] %v318_v34  ;;  %v322_v36 = vld [vmem:[%s2341_s28 + $0x20] sm:$0xf]  ;;  %v324_v37 = vld [vmem:[%s2341_s28 + $0x28] sm:$0xf] }
  0x46   : > { %321 = vst [vmem:[%s2346_s10 + $0xc] sm:$0xf] %v320_v35  ;;  %323 = vst [vmem:[%s2346_s10 + $0x10] sm:$0xf] %v322_v36  ;;  %v326_v38 = vld [vmem:[%s2341_s28 + $0x30] sm:$0xf] }
  0x47   : > { %325 = vst [vmem:[%s2346_s10 + $0x14] sm:$0xf] %v324_v37  ;;  %v328_v39 = vld [vmem:[%s2341_s28 + $0x38] sm:$0xf]  ;;  %v330_v40 = vld [vmem:[%s2341_s28 + $0x40] sm:$0xf] }
  0x48   : > { %327 = vst [vmem:[%s2346_s10 + $0x18] sm:$0xf] %v326_v38  ;;  %329 = vst [vmem:[%s2346_s10 + $0x1c] sm:$0xf] %v328_v39  ;;  %v332_v41 = vld [vmem:[%s2341_s28 + $0x48] sm:$0xf] }
  0x49   : > { %331 = vst [vmem:[%s2346_s10 + $0x20] sm:$0xf] %v330_v40  ;;  %v334_v42 = vld [vmem:[%s2341_s28 + $0x50] sm:$0xf]  ;;  %v336_v43 = vld [vmem:[%s2341_s28 + $0x58] sm:$0xf] }
  0x4a   : > { %333 = vst [vmem:[%s2346_s10 + $0x24] sm:$0xf] %v332_v41  ;;  %335 = vst [vmem:[%s2346_s10 + $0x28] sm:$0xf] %v334_v42  ;;  %v338_v44 = vld [vmem:[%s2341_s28 + $0x60] sm:$0xf] }
  0x4b   : > { %337 = vst [vmem:[%s2346_s10 + $0x2c] sm:$0xf] %v336_v43  ;;  %v340_v45 = vld [vmem:[%s2341_s28 + $0x68] sm:$0xf]  ;;  %v342_v46 = vld [vmem:[%s2341_s28 + $0x70] sm:$0xf] }
  0x4c   : > { %339 = vst [vmem:[%s2346_s10 + $0x30] sm:$0xf] %v338_v44  ;;  %341 = vst [vmem:[%s2346_s10 + $0x34] sm:$0xf] %v340_v45  ;;  %v344_v47 = vld [vmem:[%s2341_s28 + $0x78] sm:$0xf] }
  0x4d   : > { %343 = vst [vmem:[%s2346_s10 + $0x38] sm:$0xf] %v342_v46  ;;  %v346_v48 = vld [vmem:[%s2341_s28 + $0x80] sm:$0xf]  ;;  %v348_v49 = vld [vmem:[%s2341_s28 + $0x88] sm:$0xf] }
  0x4e   : > { %345 = vst [vmem:[%s2346_s10 + $0x3c] sm:$0xf] %v344_v47  ;;  %347 = vst [vmem:[%s2346_s10 + $0x40] sm:$0xf] %v346_v48  ;;  %v350_v50 = vld [vmem:[%s2341_s28 + $0x90] sm:$0xf] }
  0x4f   : > { %349 = vst [vmem:[%s2346_s10 + $0x44] sm:$0xf] %v348_v49  ;;  %v352_v51 = vld [vmem:[%s2341_s28 + $0x98] sm:$0xf]  ;;  %v354_v52 = vld [vmem:[%s2341_s28 + $0xa0] sm:$0xf] }
  0x50   : > { %351 = vst [vmem:[%s2346_s10 + $0x48] sm:$0xf] %v350_v50  ;;  %353 = vst [vmem:[%s2346_s10 + $0x4c] sm:$0xf] %v352_v51  ;;  %v356_v53 = vld [vmem:[%s2341_s28 + $0xa8] sm:$0xf] }
  0x51   : > { %355 = vst [vmem:[%s2346_s10 + $0x50] sm:$0xf] %v354_v52  ;;  %v358_v54 = vld [vmem:[%s2341_s28 + $0xb0] sm:$0xf]  ;;  %v360_v55 = vld [vmem:[%s2341_s28 + $0xb8] sm:$0xf] }
  0x52   : > { %357 = vst [vmem:[%s2346_s10 + $0x54] sm:$0xf] %v356_v53  ;;  %359 = vst [vmem:[%s2346_s10 + $0x58] sm:$0xf] %v358_v54  ;;  %v362_v56 = vld [vmem:[%s2341_s28 + $0xc0] sm:$0xf] }
  0x53   : > { %361 = vst [vmem:[%s2346_s10 + $0x5c] sm:$0xf] %v360_v55  ;;  %v364_v57 = vld [vmem:[%s2341_s28 + $0xc8] sm:$0xf]  ;;  %v366_v58 = vld [vmem:[%s2341_s28 + $0xd0] sm:$0xf] }
  0x54   : > { %363 = vst [vmem:[%s2346_s10 + $0x60] sm:$0xf] %v362_v56  ;;  %365 = vst [vmem:[%s2346_s10 + $0x64] sm:$0xf] %v364_v57  ;;  %v368_v59 = vld [vmem:[%s2341_s28 + $0xd8] sm:$0xf] }
  0x55   : > { %367 = vst [vmem:[%s2346_s10 + $0x68] sm:$0xf] %v366_v58  ;;  %v370_v60 = vld [vmem:[%s2341_s28 + $0xe0] sm:$0xf]  ;;  %v372_v61 = vld [vmem:[%s2341_s28 + $0xe8] sm:$0xf] }
  0x56   : > { %369 = vst [vmem:[%s2346_s10 + $0x6c] sm:$0xf] %v368_v59  ;;  %371 = vst [vmem:[%s2346_s10 + $0x70] sm:$0xf] %v370_v60  ;;  %v374_v62 = vld [vmem:[%s2341_s28 + $0xf0] sm:$0xf] }
  0x57   : > { %373 = vst [vmem:[%s2346_s10 + $0x74] sm:$0xf] %v372_v61  ;;  %v376_v63 = vld [vmem:[%s2341_s28 + $0xf8] sm:$0xf]  ;;  %v378_v0 = vld [vmem:[%s2341_s28 + $0x100] sm:$0xf] }
  0x58   : > { %375 = vst [vmem:[%s2346_s10 + $0x78] sm:$0xf] %v374_v62  ;;  %377 = vst [vmem:[%s2346_s10 + $0x7c] sm:$0xf] %v376_v63  ;;  %v380_v1 = vld [vmem:[%s2341_s28 + $0x108] sm:$0xf] }
  0x59   : > { %379 = vst [vmem:[%s2346_s10 + $0x80] sm:$0xf] %v378_v0  ;;  %v382_v2 = vld [vmem:[%s2341_s28 + $0x110] sm:$0xf]  ;;  %v384_v3 = vld [vmem:[%s2341_s28 + $0x118] sm:$0xf] }
  0x5a   : > { %381 = vst [vmem:[%s2346_s10 + $0x84] sm:$0xf] %v380_v1  ;;  %383 = vst [vmem:[%s2346_s10 + $0x88] sm:$0xf] %v382_v2  ;;  %v386_v4 = vld [vmem:[%s2341_s28 + $0x120] sm:$0xf] }
  0x5b   : > { %385 = vst [vmem:[%s2346_s10 + $0x8c] sm:$0xf] %v384_v3  ;;  %v388_v5 = vld [vmem:[%s2341_s28 + $0x128] sm:$0xf]  ;;  %v390_v6 = vld [vmem:[%s2341_s28 + $0x130] sm:$0xf] }
  0x5c   : > { %387 = vst [vmem:[%s2346_s10 + $0x90] sm:$0xf] %v386_v4  ;;  %389 = vst [vmem:[%s2346_s10 + $0x94] sm:$0xf] %v388_v5  ;;  %v392_v7 = vld [vmem:[%s2341_s28 + $0x138] sm:$0xf] }
  0x5d   : > { %391 = vst [vmem:[%s2346_s10 + $0x98] sm:$0xf] %v390_v6  ;;  %v394_v8 = vld [vmem:[%s2341_s28 + $0x140] sm:$0xf]  ;;  %v396_v9 = vld [vmem:[%s2341_s28 + $0x148] sm:$0xf] }
  0x5e   : > { %393 = vst [vmem:[%s2346_s10 + $0x9c] sm:$0xf] %v392_v7  ;;  %395 = vst [vmem:[%s2346_s10 + $0xa0] sm:$0xf] %v394_v8  ;;  %v398_v10 = vld [vmem:[%s2341_s28 + $0x150] sm:$0xf] }
  0x5f   : > { %397 = vst [vmem:[%s2346_s10 + $0xa4] sm:$0xf] %v396_v9  ;;  %v400_v11 = vld [vmem:[%s2341_s28 + $0x158] sm:$0xf]  ;;  %v402_v12 = vld [vmem:[%s2341_s28 + $0x160] sm:$0xf] }
  0x60   : > { %399 = vst [vmem:[%s2346_s10 + $0xa8] sm:$0xf] %v398_v10  ;;  %401 = vst [vmem:[%s2346_s10 + $0xac] sm:$0xf] %v400_v11  ;;  %v404_v13 = vld [vmem:[%s2341_s28 + $0x168] sm:$0xf] }
  0x61   : > { %403 = vst [vmem:[%s2346_s10 + $0xb0] sm:$0xf] %v402_v12  ;;  %v406_v14 = vld [vmem:[%s2341_s28 + $0x170] sm:$0xf]  ;;  %v408_v15 = vld [vmem:[%s2341_s28 + $0x178] sm:$0xf] }
  0x62   : > { %405 = vst [vmem:[%s2346_s10 + $0xb4] sm:$0xf] %v404_v13  ;;  %407 = vst [vmem:[%s2346_s10 + $0xb8] sm:$0xf] %v406_v14 }
  0x63   : > { %409 = vst [vmem:[%s2346_s10 + $0xbc] sm:$0xf] %v408_v15 }
  0x64 PF: > { %p1645_p0 = scmp.ge.s32.totalorder %s2131_s25, 1  ;;  %p540_p1 = scmp.lt.s32.totalorder %s2131_s25, 37 }
  0x66   : > { %p541_p2 = pnand %p1645_p0, %p540_p1 }
  0x67   : > { %s547_s0 = sand.u32 (!%p541_p2), 1, %s2107_s19   ;;  %s554_s11 = sand.u32 (!%p541_p2), 1, %s2099_s17  }
  0x68   : > { %544 = sbr.rel (%p541_p2) target bundleno = 453 (0x1c5), region = 95  ;;  %s585_s28 = sand.u32 (!%p541_p2), 1, %s2091_s15  }
  0x69   : > { %s1898_s26 = smul.u32 (!%p541_p2), 192, %s547_s0  ;;  %s1646_s29 = sshll.u32 (!%p541_p2), %s585_s28, 6 }
  0x6a   : > { %s1899_s5 = smul.u32 (!%p541_p2), 192, %s554_s11  ;;  %p591_p3 = scmp.lt.s32.totalorder (!%p541_p2), %s2119_s22, 1 }
  0x6b   : > { %s2458_s24 = scalar_lea.vmem (!%p541_p2), [#allocation3], %s1898_s26  ;;  %s2462_s15 = scalar_lea.vmem (!%p541_p2), [#allocation5], %s1646_s29 }
  0x6c   : > { %s2460_s17 = scalar_lea.vmem (!%p541_p2), [#allocation4], %s1899_s5  ;;  %p1647_p4 = scmp.ne.s32.totalorder (!%p541_p2), %s2115_s21, 0 }
  0x6d   : > { %s2448_s30 = scalar_select %p591_p3, %s2119_s22, 1 }
  0x6e   : > { %602 = sbr.rel (%p1647_p4) target bundleno = 124 (0x7c), region = 107 }
  0x6f   : > { %s593_s9 = scalar_lea.vmem %s2625_s2, %s2448_s30  ;;  %s596_s27 = scalar_lea.vmem %s2626_s3, %s2448_s30 }
  0x73   : > { %v2133_v16 = vmov 0.0  }
  0x74   : > { %603 = vst [vmem:[#allocation2 + $0x30] sm:$0xff] %v2133_v16  ;;  %604 = vst [vmem:[#allocation2] sm:$0xff] %v2133_v16 }
  0x75   : > { %605 = vst [vmem:[#allocation2 + $0x58] sm:$0xff] %v2133_v16  ;;  %606 = vst [vmem:[#allocation2 + $0x18] sm:$0xff] %v2133_v16 }
  0x76   : > { %607 = vst [vmem:[#allocation2 + $0x50] sm:$0xff] %v2133_v16  ;;  %608 = vst [vmem:[#allocation2 + $0x68] sm:$0xff] %v2133_v16 }
  0x77   : > { %609 = vst [vmem:[#allocation2 + $0x8] sm:$0xff] %v2133_v16  ;;  %610 = vst [vmem:[#allocation2 + $0x48] sm:$0xff] %v2133_v16 }
  0x78   : > { %611 = vst [vmem:[#allocation2 + $0x40] sm:$0xff] %v2133_v16  ;;  %612 = vst [vmem:[#allocation2 + $0x20] sm:$0xff] %v2133_v16 }
  0x79   : > { %613 = vst [vmem:[#allocation2 + $0x10] sm:$0xff] %v2133_v16  ;;  %614 = vst [vmem:[#allocation2 + $0x38] sm:$0xff] %v2133_v16 }
  0x7a   : > { %615 = vst [vmem:[#allocation2 + $0x60] sm:$0xff] %v2133_v16  ;;  %616 = vst [vmem:[#allocation2 + $0x70] sm:$0xff] %v2133_v16 }
  0x7b   : > { %617 = vst [vmem:[#allocation2 + $0x78] sm:$0xff] %v2133_v16  ;;  %618 = vst [vmem:[#allocation2 + $0x28] sm:$0xff] %v2133_v16 }
  0x7c PF: > { %v1989_v17 = vld [vmem:[%s2460_s17 + $0x78] sm:$0xff]   ;;  %v1992_v20 = vld [vmem:[%s2460_s17 + $0x70] sm:$0xff]   ;;  %v1995_v23 = vld [vmem:[%s2460_s17 + $0x68] sm:$0xff]   ;;  %p1696_p5 = scmp.ne.s32.totalorder %s2115_s21, 17 }
  0x7d   : > { %v1990_v18 = vld [vmem:[%s2460_s17 + $0x38] sm:$0xff]   ;;  %1784 = vmatprep.subr.bf16.mxu0 %v1989_v17  ;;  %v1993_v21 = vld [vmem:[%s2460_s17 + $0x30] sm:$0xff]   ;;  %v1996_v24 = vld [vmem:[%s2460_s17 + $0x28] sm:$0xff]  }
  0x7e   : > { %v1991_v19 = vld [vmem:[%s2460_s17 + $0xb8] sm:$0xff]   ;;  %1785 = vmatpush3.bf16.msra.mxu0 %v1990_v18  ;;  %v1994_v22 = vld [vmem:[%s2460_s17 + $0xb0] sm:$0xff]   ;;  %v1997_v25 = vld [vmem:[%s2460_s17 + $0xa8] sm:$0xff]  }
  0x7f   : > { %1864 = vmatprep.subr.bf16.mxu1 %v1991_v19  ;;  %1786 = vmatprep.subr.bf16.mxu0 %v1992_v20  ;;  %v1998_v26 = vld [vmem:[%s2460_s17 + $0x60] sm:$0xff]   ;;  %v2001_v29 = vld [vmem:[%s2460_s17 + $0x58] sm:$0xff]   ;;  %v2004_v32 = vld [vmem:[%s2460_s17 + $0x50] sm:$0xff]  }
  0x80   : > { %1865 = vmatpush3.bf16.msra.mxu1 %v1991_v19  ;;  %v1999_v27 = vld [vmem:[%s2460_s17 + $0x20] sm:$0xff]   ;;  %v2003_v30 = vld [vmem:[%s2460_s17 + $0x98] sm:$0xff]   ;;  %v2006_v33 = vld [vmem:[%s2460_s17 + $0x90] sm:$0xff]  }
  0x81   : > { %1866 = vmatprep.subr.bf16.mxu1 %v1994_v22  ;;  %v2000_v28 = vld [vmem:[%s2460_s17 + $0xa0] sm:$0xff]   ;;  %v2002_v31 = vld [vmem:[%s2460_s17 + $0x18] sm:$0xff]   ;;  %v2005_v34 = vld [vmem:[%s2460_s17 + $0x10] sm:$0xff]  }
  0x82   : > { %1787 = vmatpush3.bf16.msra.mxu0 %v1993_v21  ;;  %v2007_v35 = vld [vmem:[%s2460_s17 + $0x48] sm:$0xff]   ;;  %v2010_v38 = vld [vmem:[%s2460_s17 + $0x40] sm:$0xff]   ;;  %v2025_v49 = vld [vmem:[%s2458_s24 + $0x50] ss:$12 sps:$4 sm:$0xff]  }
  0x83   : > { %1788 = vmatprep.subr.bf16.mxu0 %v1995_v23  ;;  %v2008_v36 = vld [vmem:[%s2460_s17 + $0x8] sm:$0xff]   ;;  %v2012_v39 = vld [vmem:[%s2460_s17 + $0x80] sm:$0xff]   ;;  %v2023_v51 = vld [vmem:[%s2458_s24 + $0x30] ss:$12 sps:$4 sm:$0xff]  }
  0x84   : > { %1867 = vmatpush3.bf16.msra.mxu1 %v1994_v22  ;;  %v2009_v37 = vld [vmem:[%s2460_s17 + $0x88] sm:$0xff]   ;;  %v2015_v40 = vld [vmem:[%s2458_s24 + $0x4] ss:$12 sps:$4 sm:$0xff]   ;;  %v2021_v48 = vld [vmem:[%s2458_s24 + $0x34] ss:$12 sps:$4 sm:$0xff]  }
  0x85   : > { %1868 = vmatprep.subr.bf16.mxu1 %v1997_v25  ;;  %v2016_v41 = vld [vmem:[%s2458_s24 + $0x8] ss:$12 sps:$4 sm:$0xff]   ;;  %v2011_v42 = vld [vmem:[%s2460_s17] sm:$0xff]   ;;  %1019 = vmatprep.mubr.bf16.mxu0 %v2015_v40  ;;  %v2026_v52 = vld [vmem:[%s2458_s24 + $0x4c] ss:$12 sps:$4 sm:$0xff]  }
  0x86   : > { %1789 = vmatpush3.bf16.msra.mxu0 %v1996_v24  ;;  %1880 = vmatprep.mubr.bf16.mxu1 %v2016_v41  ;;  %v2013_v43 = vld [vmem:[%s2458_s24] ss:$12 sps:$4 sm:$0xff]   ;;  %v2018_v44 = vld [vmem:[%s2458_s24 + $0x1c] ss:$12 sps:$4 sm:$0xff]   ;;  %v2024_v46 = vld [vmem:[%s2458_s24 + $0x38] ss:$12 sps:$4 sm:$0xff]  }
  0x87   : > { %1790 = vmatprep.subr.bf16.mxu0 %v1998_v26  ;;  %v2017_v45 = vld [vmem:[%s2458_s24 + $0x20] ss:$12 sps:$4 sm:$0xff]   ;;  %v2020_v47 = vld [vmem:[%s2458_s24 + $0x18] ss:$12 sps:$4 sm:$0xff]   ;;  %v2032_v50 = vld [vmem:[%s2458_s24 + $0x68] ss:$12 sps:$4 sm:$0xff]  }
  0x88   : > { %1869 = vmatpush3.bf16.msra.mxu1 %v1997_v25  ;;  %v2033_v53 = vld [vmem:[%s2458_s24 + $0x80] ss:$12 sps:$4 sm:$0xff]   ;;  %v2040_v54 = vld [vmem:[%s2458_s24 + $0x98] ss:$12 sps:$4 sm:$0xff]   ;;  %v2028_v55 = vld [vmem:[%s2458_s24 + $0x48] ss:$12 sps:$4 sm:$0xff]  }
  0x89   : > { %1870 = vmatprep.subr.bf16.mxu1 %v2000_v28  ;;  %v2029_v56 = vld [vmem:[%s2458_s24 + $0x64] ss:$12 sps:$4 sm:$0xff]   ;;  %v2031_v58 = vld [vmem:[%s2458_s24 + $0x60] ss:$12 sps:$4 sm:$0xff]   ;;  %v2034_v59 = vld [vmem:[%s2458_s24 + $0x7c] ss:$12 sps:$4 sm:$0xff]  }
  0x8a   : > { %1791 = vmatpush3.bf16.msra.mxu0 %v1999_v27  ;;  %v2041_v57 = vld [vmem:[%s2458_s24 + $0xb0] ss:$12 sps:$4 sm:$0xff]   ;;  %v2036_v60 = vld [vmem:[%s2458_s24 + $0x78] ss:$12 sps:$4 sm:$0xff]   ;;  %v2037_v61 = vld [vmem:[%s2458_s24 + $0x94] ss:$12 sps:$4 sm:$0xff]  }
  0x8b   : > { %1792 = vmatprep.subr.bf16.mxu0 %v2001_v29  ;;  %v2039_v62 = vld [vmem:[%s2458_s24 + $0x90] ss:$12 sps:$4 sm:$0xff]   ;;  %v2042_v63 = vld [vmem:[%s2458_s24 + $0xac] ss:$12 sps:$4 sm:$0xff]   ;;  %v2044_v0 = vld [vmem:[%s2458_s24 + $0xa8] ss:$12 sps:$4 sm:$0xff]  }
  0x8c   : > { %1871 = vmatpush3.bf16.msra.mxu1 %v2000_v28  ;;  %v619_v6 = vld [vmem:[#allocation2 + $0x30] sm:$0xff]  ;;  %v620_v14 = vld [vmem:[#allocation2] sm:$0xff]  ;;  %v621_v21 = vld [vmem:[#allocation2 + $0x58] sm:$0xff] }
  0x8d   : > { %1872 = vmatprep.subr.bf16.mxu1 %v2003_v30  ;;  %v622_v28 = vld [vmem:[#allocation2 + $0x18] sm:$0xff] }
  0x8e   : > { %1793 = vmatpush3.bf16.msra.mxu0 %v2002_v31 }
  0x8f   : > { %1794 = vmatprep.subr.bf16.mxu0 %v2004_v32 }
  0x90   : > { %1873 = vmatpush3.bf16.msra.mxu1 %v2003_v30 }
  0x91   : > { %1874 = vmatprep.subr.bf16.mxu1 %v2006_v33 }
  0x92   : > { %1795 = vmatpush3.bf16.msra.mxu0 %v2005_v34 }
  0x93   : > { %1796 = vmatprep.subr.bf16.mxu0 %v2007_v35 }
  0x94   : > { %1875 = vmatpush3.bf16.msra.mxu1 %v2006_v33 }
  0x95   : > { %1876 = vmatprep.subr.bf16.mxu1 %v2009_v37 }
  0x96   : > { %1797 = vmatpush3.bf16.msra.mxu0 %v2008_v36  ;;  %v623_v36 = vld [vmem:[#allocation2 + $0x50] sm:$0xff] }
  0x97   : > { %1798 = vmatprep.subr.bf16.mxu0 %v2010_v38 }
  0x98   : > { %1877 = vmatpush3.bf16.msra.mxu1 %v2009_v37 }
  0x99   : > { %1878 = vmatprep.subr.bf16.mxu1 %v2012_v39 }
  0x9a   : > { %1799 = vmatpush3.bf16.msra.mxu0 %v2011_v42 }
  0x9c   : > { %1879 = vmatpush3.bf16.msra.mxu1 %v2012_v39 }
  0x9d   : > { %1020 = vmatmul.mubr.bf16.vlgmr.msra.gmra.mxu0 %v2013_v43  ;;  %v624_v43 = vld [vmem:[#allocation2 + $0x68] sm:$0xff] }
  0x9e   : > { %1027 = vmatprep.mubr.bf16.mxu0 %v2018_v44 }
  0x9f   : > { %1881 = vmatmul.mubr.bf16.vlgmr.msra.gmra.mxu1 %v2017_v45 }
  0xa0   : > { %1884 = vmatprep.mubr.bf16.mxu1 %v2024_v46 }
  0xa5   : > { %1028 = vmatmul.mubr.bf16.gmra.mxu0 %v2020_v47 }
  0xa6   : > { %1035 = vmatprep.mubr.bf16.mxu0 %v2021_v48 }
  0xa7   : > { %1885 = vmatmul.mubr.bf16.gmra.mxu1 %v2025_v49  ;;  %v625_v49 = vld [vmem:[#allocation2 + $0x8] sm:$0xff] }
  0xa8   : > { %1888 = vmatprep.mubr.bf16.mxu1 %v2032_v50 }
  0xad   : > { %1036 = vmatmul.mubr.bf16.gmra.mxu0 %v2023_v51 }
  0xae   : > { %1043 = vmatprep.mubr.bf16.mxu0 %v2026_v52 }
  0xaf   : > { %1889 = vmatmul.mubr.bf16.gmra.mxu1 %v2033_v53 }
  0xb0   : > { %1892 = vmatprep.mubr.bf16.mxu1 %v2040_v54 }
  0xb5   : > { %1044 = vmatmul.mubr.bf16.gmra.mxu0 %v2028_v55 }
  0xb6   : > { %1051 = vmatprep.mubr.bf16.mxu0 %v2029_v56  ;;  %v626_v56 = vld [vmem:[#allocation2 + $0x48] sm:$0xff] }
  0xb7   : > { %1893 = vmatmul.mubr.bf16.gmra.mxu1 %v2041_v57 }
  0xbd   : > { %1052 = vmatmul.mubr.bf16.gmra.mxu0 %v2031_v58 }
  0xbe   : > { %1059 = vmatprep.mubr.bf16.mxu0 %v2034_v59 }
  0xc5   : > { %1060 = vmatmul.mubr.bf16.gmra.mxu0 %v2036_v60 }
  0xc6   : > { %1067 = vmatprep.mubr.bf16.mxu0 %v2037_v61 }
  0xcd   : > { %1068 = vmatmul.mubr.bf16.gmra.mxu0 %v2039_v62 }
  0xce   : > { %1075 = vmatprep.mubr.bf16.mxu0 %v2042_v63 }
  0xd5   : > { %1076 = vmatmul.mubr.bf16.gmra.mxu0 %v2044_v0  ;;  %v627_v0 = vld [vmem:[#allocation2 + $0x40] sm:$0xff] }
 0x15d   : > { %v1800_v1 = vpop.f32.mrf.mxu0 }
 0x15f   : > { %v1801_v2 = vpop.f32.mrf.mxu0  ;;  %v1882_v3 = vpop.f32.mrf.mxu1 }
 0x160   : > { %v1802_v4 = vadd.f32 %v1801_v2, %v1800_v1 }
 0x161   : > { %v1803_v5 = vpop.f32.mrf.mxu0  ;;  %v1118_v7 = vpop.f32.mrf.mxu1 }
 0x162   : > { %v1119_v8 = vadd.f32 %v1802_v4, %v1118_v7  ;;  %v628_v7 = vld [vmem:[#allocation2 + $0x20] sm:$0xff] }
 0x163   : > { %v1804_v9 = vpop.f32.mrf.mxu0  ;;  %v1883_v10 = vpop.f32.mrf.mxu1 }
 0x164   : > { %v1181_v11 = vadd.f32 %v1119_v8, %v619_v6  ;;  %v1805_v12 = vadd.f32 %v1804_v9, %v1803_v5 }
 0x165   : > { %v1806_v13 = vpop.f32.mrf.mxu0  ;;  %v1121_v15 = vpop.f32.mrf.mxu1 }
 0x166   : > { %1197 = vst [vmem:[#allocation2 + $0x30] sm:$0xff] %v1181_v11  ;;  %v1122_v16 = vadd.f32 %v1805_v12, %v1121_v15 }
 0x167   : > { %v1807_v17 = vpop.f32.mrf.mxu0  ;;  %v1886_v18 = vpop.f32.mrf.mxu1 }
 0x168   : > { %v1182_v19 = vadd.f32 %v1122_v16, %v620_v14  ;;  %v1808_v20 = vadd.f32 %v1807_v17, %v1806_v13  ;;  %v629_v13 = vld [vmem:[#allocation2 + $0x10] sm:$0xff] }
 0x169   : > { %v1809_v22 = vpop.f32.mrf.mxu0  ;;  %v1134_v25 = vpop.f32.mrf.mxu1 }
 0x16a   : > { %1198 = vst [vmem:[#allocation2] sm:$0xff] %v1182_v19  ;;  %v1127_v23 = vadd.f32 %v1882_v3, %v1808_v20  ;;  %v630_v20 = vld [vmem:[#allocation2 + $0x38] sm:$0xff] }
 0x16b   : > { %v1810_v24 = vpop.f32.mrf.mxu0  ;;  %v1887_v32 = vpop.f32.mrf.mxu1 }
 0x16c   : > { %v1183_v26 = vadd.f32 %v1127_v23, %v621_v21  ;;  %v1811_v27 = vadd.f32 %v1810_v24, %v1809_v22 }
 0x16d   : > { %v1812_v29 = vpop.f32.mrf.mxu0  ;;  %v1137_v39 = vpop.f32.mrf.mxu1 }
 0x16e   : > { %1199 = vst [vmem:[#allocation2 + $0x58] sm:$0xff] %v1183_v26  ;;  %v1130_v30 = vadd.f32 %v1883_v10, %v1811_v27 }
 0x16f   : > { %v1813_v31 = vpop.f32.mrf.mxu0  ;;  %v1890_v46 = vpop.f32.mrf.mxu1 }
 0x170   : > { %v1184_v33 = vadd.f32 %v1130_v30, %v622_v28  ;;  %v1814_v34 = vadd.f32 %v1813_v31, %v1812_v29  ;;  %v631_v28 = vld [vmem:[#allocation2 + $0x60] sm:$0xff] }
 0x171   : > { %v1815_v35 = vpop.f32.mrf.mxu0  ;;  %v1150_v53 = vpop.f32.mrf.mxu1 }
 0x172   : > { %1200 = vst [vmem:[#allocation2 + $0x18] sm:$0xff] %v1184_v33  ;;  %v1135_v37 = vadd.f32 %v1814_v34, %v1134_v25 }
 0x173   : > { %v1816_v38 = vpop.f32.mrf.mxu0  ;;  %v1891_v60 = vpop.f32.mrf.mxu1 }
 0x174   : > { %v1185_v40 = vadd.f32 %v1135_v37, %v623_v36  ;;  %v1817_v41 = vadd.f32 %v1816_v38, %v1815_v35  ;;  %v632_v35 = vld [vmem:[#allocation2 + $0x70] sm:$0xff] }
 0x175   : > { %v1818_v42 = vpop.f32.mrf.mxu0  ;;  %v1153_v3 = vpop.f32.mrf.mxu1 }
 0x176   : > { %1201 = vst [vmem:[#allocation2 + $0x50] sm:$0xff] %v1185_v40  ;;  %v1138_v44 = vadd.f32 %v1817_v41, %v1137_v39  ;;  %v633_v40 = vld [vmem:[#allocation2 + $0x78] sm:$0xff] }
 0x177   : > { %v1819_v45 = vpop.f32.mrf.mxu0  ;;  %v1894_v10 = vpop.f32.mrf.mxu1 }
 0x178   : > { %v1186_v47 = vadd.f32 %v1138_v44, %v624_v43  ;;  %v1820_v48 = vadd.f32 %v1819_v45, %v1818_v42 }
 0x179   : > { %v1821_v50 = vpop.f32.mrf.mxu0  ;;  %v1166_v17 = vpop.f32.mrf.mxu1 }
 0x17a   : > { %1202 = vst [vmem:[#allocation2 + $0x68] sm:$0xff] %v1186_v47  ;;  %v1143_v51 = vadd.f32 %v1886_v18, %v1820_v48 }
 0x17b   : > { %v1822_v52 = vpop.f32.mrf.mxu0  ;;  %v1895_v24 = vpop.f32.mrf.mxu1 }
 0x17c   : > { %v1187_v54 = vadd.f32 %v1143_v51, %v625_v49  ;;  %v1823_v55 = vadd.f32 %v1822_v52, %v1821_v50 }
 0x17d   : > { %v1824_v57 = vpop.f32.mrf.mxu0  ;;  %v1169_v31 = vpop.f32.mrf.mxu1 }
 0x17e   : > { %1203 = vst [vmem:[#allocation2 + $0x8] sm:$0xff] %v1187_v54  ;;  %v1146_v58 = vadd.f32 %v1887_v32, %v1823_v55 }
 0x17f   : > { %v1825_v59 = vpop.f32.mrf.mxu0 }
 0x180   : > { %v1188_v61 = vadd.f32 %v1146_v58, %v626_v56  ;;  %v1826_v62 = vadd.f32 %v1825_v59, %v1824_v57 }
 0x181   : > { %v1827_v63 = vpop.f32.mrf.mxu0 }
 0x182   : > { %1204 = vst [vmem:[#allocation2 + $0x48] sm:$0xff] %v1188_v61  ;;  %v1151_v1 = vadd.f32 %v1826_v62, %v1150_v53 }
 0x183   : > { %v1828_v2 = vpop.f32.mrf.mxu0 }
 0x184   : > { %v1189_v4 = vadd.f32 %v1151_v1, %v627_v0  ;;  %v1829_v5 = vadd.f32 %v1828_v2, %v1827_v63 }
 0x185   : > { %v1830_v6 = vpop.f32.mrf.mxu0 }
 0x186   : > { %1205 = vst [vmem:[#allocation2 + $0x40] sm:$0xff] %v1189_v4  ;;  %v1154_v8 = vadd.f32 %v1829_v5, %v1153_v3 }
 0x187   : > { %v1831_v9 = vpop.f32.mrf.mxu0 }
 0x188   : > { %v1190_v11 = vadd.f32 %v1154_v8, %v628_v7  ;;  %v1832_v12 = vadd.f32 %v1831_v9, %v1830_v6 }
 0x189   : > { %v1833_v14 = vpop.f32.mrf.mxu0 }
 0x18a   : > { %1206 = vst [vmem:[#allocation2 + $0x20] sm:$0xff] %v1190_v11  ;;  %v1159_v15 = vadd.f32 %v1890_v46, %v1832_v12  ;;  %v634_v46 = vld [vmem:[#allocation2 + $0x28] sm:$0xff] }
 0x18b   : > { %v1834_v16 = vpop.f32.mrf.mxu0 }
 0x18c   : > { %v1191_v18 = vadd.f32 %v1159_v15, %v629_v13  ;;  %v1835_v19 = vadd.f32 %v1834_v16, %v1833_v14 }
 0x18d   : > { %v1836_v21 = vpop.f32.mrf.mxu0 }
 0x18e   : > { %1207 = vst [vmem:[#allocation2 + $0x10] sm:$0xff] %v1191_v18  ;;  %v1162_v22 = vadd.f32 %v1891_v60, %v1835_v19 }
 0x18f   : > { %v1837_v23 = vpop.f32.mrf.mxu0 }
 0x190   : > { %v1192_v25 = vadd.f32 %v1162_v22, %v630_v20  ;;  %v1838_v26 = vadd.f32 %v1837_v23, %v1836_v21 }
 0x191   : > { %v1839_v27 = vpop.f32.mrf.mxu0 }
 0x192   : > { %1208 = vst [vmem:[#allocation2 + $0x38] sm:$0xff] %v1192_v25  ;;  %v1167_v29 = vadd.f32 %v1838_v26, %v1166_v17 }
 0x193   : > { %v1840_v30 = vpop.f32.mrf.mxu0 }
 0x194   : > { %v1193_v32 = vadd.f32 %v1167_v29, %v631_v28  ;;  %v1841_v33 = vadd.f32 %v1840_v30, %v1839_v27 }
 0x195   : > { %v1842_v34 = vpop.f32.mrf.mxu0 }
 0x196   : > { %1209 = vst [vmem:[#allocation2 + $0x60] sm:$0xff] %v1193_v32  ;;  %v1170_v36 = vadd.f32 %v1841_v33, %v1169_v31 }
 0x197   : > { %v1843_v37 = vpop.f32.mrf.mxu0 }
 0x198   : > { %v1194_v38 = vadd.f32 %v1170_v36, %v632_v35  ;;  %v1844_v39 = vadd.f32 %v1843_v37, %v1842_v34 }
 0x199   : > { %v1845_v41 = vpop.f32.mrf.mxu0 }
 0x19a   : > { %1210 = vst [vmem:[#allocation2 + $0x70] sm:$0xff] %v1194_v38  ;;  %v1175_v42 = vadd.f32 %v1894_v10, %v1844_v39 }
 0x19b   : > { %v1846_v43 = vpop.f32.mrf.mxu0 }
 0x19c   : > { %v1195_v44 = vadd.f32 %v1175_v42, %v633_v40  ;;  %v1847_v45 = vadd.f32 %v1846_v43, %v1845_v41 }
 0x19e   : > { %1211 = vst [vmem:[#allocation2 + $0x78] sm:$0xff] %v1195_v44  ;;  %v1178_v47 = vadd.f32 %v1895_v24, %v1847_v45  ;;  %1216 = sbr.rel (%p1696_p5) target bundleno = 441 (0x1b9), region = 111 }
 0x1a0   : > { %v1196_v48 = vadd.f32 %v1178_v47, %v634_v46 }
 0x1a2   : > { %1212 = vst [vmem:[#allocation2 + $0x28] sm:$0xff] %v1196_v48 }
 0x1a3   : > { %v1217_v49 = vld [vmem:[#allocation2 + $0x30] sm:$0xff]  ;;  %v1218_v50 = vld [vmem:[#allocation2] sm:$0xff]  ;;  %v1219_v55 = vld [vmem:[#allocation2 + $0x58] sm:$0xff] }
 0x1a4   : > { %v2519_v51 = vld [vmem:[%s593_s9] ss:$0 sm:$0xff]  ;;  %v1220_v56 = vld [vmem:[#allocation2 + $0x18] sm:$0xff]  ;;  %v1221_v59 = vld [vmem:[#allocation2 + $0x50] sm:$0xff] }
 0x1a5   : > { %v1240_v52 = vmul.f32 %v2519_v51, %v1217_v49  ;;  %v1241_v53 = vmul.f32 %v2519_v51, %v1218_v50  ;;  %v2528_v54 = vld [vmem:[%s596_s27] ss:$0 sm:$0xff]  ;;  %v1242_v57 = vmul.f32 %v2519_v51, %v1219_v55  ;;  %v1243_v58 = vmul.f32 %v2519_v51, %v1220_v56  ;;  %v1222_v60 = vld [vmem:[#allocation2 + $0x68] sm:$0xff]  ;;  %v1227_v17 = vld [vmem:[#allocation2 + $0x10] sm:$0xff] }
 0x1a6   : > { %v1223_v61 = vld [vmem:[#allocation2 + $0x8] sm:$0xff]  ;;  %v1244_v0 = vmul.f32 %v2519_v51, %v1221_v59  ;;  %v1245_v1 = vmul.f32 %v2519_v51, %v1222_v60  ;;  %v1225_v7 = vld [vmem:[#allocation2 + $0x40] sm:$0xff]  ;;  %v1228_v18 = vld [vmem:[#allocation2 + $0x38] sm:$0xff]  ;;  %v1250_v32 = vmul.f32 %v2519_v51, %v1227_v17 }
 0x1a7   : > { %v1263_v62 = vadd.f32 %v2528_v54, %v1240_v52  ;;  %v1264_v63 = vadd.f32 %v2528_v54, %v1241_v53  ;;  %v1224_v2 = vld [vmem:[#allocation2 + $0x48] sm:$0xff]  ;;  %v1265_v3 = vadd.f32 %v2528_v54, %v1242_v57  ;;  %v1266_v4 = vadd.f32 %v2528_v54, %v1243_v58  ;;  %v1226_v12 = vld [vmem:[#allocation2 + $0x20] sm:$0xff]  ;;  %v1230_v24 = vld [vmem:[#allocation2 + $0x70] sm:$0xff] }
 0x1a8   : > { %v1246_v5 = vmul.f32 %v2519_v51, %v1223_v61  ;;  %v1247_v6 = vmul.f32 %v2519_v51, %v1224_v2  ;;  %v1267_v10 = vadd.f32 %v2528_v54, %v1244_v0  ;;  %v1268_v11 = vadd.f32 %v2528_v54, %v1245_v1  ;;  %v1229_v23 = vld [vmem:[#allocation2 + $0x60] sm:$0xff]  ;;  %v1231_v29 = vld [vmem:[#allocation2 + $0x78] sm:$0xff] }
 0x1a9   : > { %v1279_v8 = vmax.f32 %v1263_v62, 0.0  ;;  %v1280_v9 = vmax.f32 %v1264_v63, 0.0  ;;  %v1281_v13 = vmax.f32 %v1265_v3, 0.0  ;;  %v1282_v14 = vmax.f32 %v1266_v4, 0.0  ;;  %v1232_v34 = vld [vmem:[#allocation2 + $0x28] sm:$0xff] }
 0x1aa   : > { %v1269_v15 = vadd.f32 %v2528_v54, %v1246_v5  ;;  %v1270_v16 = vadd.f32 %v2528_v54, %v1247_v6  ;;  %v1283_v20 = vmax.f32 %v1267_v10, 0.0  ;;  %v1284_v21 = vmax.f32 %v1268_v11, 0.0 }
 0x1ab   : > { %v1740_v19 = vpack.c.bf16 %v1280_v9, %v1279_v8  ;;  %v1248_v22 = vmul.f32 %v2519_v51, %v1225_v7  ;;  %v1745_v25 = vpack.c.bf16 %v1282_v14, %v1281_v13  ;;  %v1249_v28 = vmul.f32 %v2519_v51, %v1226_v12 }
 0x1ac   : > { %v1285_v26 = vmax.f32 %v1269_v15, 0.0  ;;  %v1286_v27 = vmax.f32 %v1270_v16, 0.0  ;;  %v1750_v30 = vpack.c.bf16 %v1284_v21, %v1283_v20  ;;  %v1251_v33 = vmul.f32 %v2519_v51, %v1228_v18 }
 0x1ad   : > { %1741 = vst [vmem:[%s2462_s15] sm:$0xff] %v1740_v19   ;;  %v1271_v31 = vadd.f32 %v2528_v54, %v1248_v22  ;;  %1777 = vst [vmem:[%s2462_s15 + $0x8] sm:$0xff] %v1745_v25   ;;  %v1272_v36 = vadd.f32 %v2528_v54, %v1249_v28  ;;  %v1252_v37 = vmul.f32 %v2519_v51, %v1229_v23 }
 0x1ae   : > { %v1755_v35 = vpack.c.bf16 %v1286_v27, %v1285_v26  ;;  %v1253_v38 = vmul.f32 %v2519_v51, %v1230_v24  ;;  %1778 = vst [vmem:[%s2462_s15 + $0x10] sm:$0xff] %v1750_v30   ;;  %v1273_v40 = vadd.f32 %v2528_v54, %v1250_v32  ;;  %v1274_v41 = vadd.f32 %v2528_v54, %v1251_v33 }
 0x1af   : > { %v1287_v39 = vmax.f32 %v1271_v31, 0.0  ;;  %v1254_v42 = vmul.f32 %v2519_v51, %v1231_v29  ;;  %v1288_v43 = vmax.f32 %v1272_v36, 0.0  ;;  %v1275_v44 = vadd.f32 %v2528_v54, %v1252_v37 }
 0x1b0   : > { %1779 = vst [vmem:[%s2462_s15 + $0x18] sm:$0xff] %v1755_v35   ;;  %v1276_v45 = vadd.f32 %v2528_v54, %v1253_v38  ;;  %v1255_v46 = vmul.f32 %v2519_v51, %v1232_v34  ;;  %v1289_v47 = vmax.f32 %v1273_v40, 0.0  ;;  %v1290_v48 = vmax.f32 %v1274_v41, 0.0 }
 0x1b1   : > { %v1277_v49 = vadd.f32 %v2528_v54, %v1254_v42  ;;  %v1760_v50 = vpack.c.bf16 %v1288_v43, %v1287_v39  ;;  %v1291_v52 = vmax.f32 %v1275_v44, 0.0 }
 0x1b2   : > { %v1292_v53 = vmax.f32 %v1276_v45, 0.0  ;;  %v1278_v55 = vadd.f32 %v2528_v54, %v1255_v46  ;;  %v1765_v56 = vpack.c.bf16 %v1290_v48, %v1289_v47 }
 0x1b3   : > { %v1293_v57 = vmax.f32 %v1277_v49, 0.0  ;;  %1780 = vst [vmem:[%s2462_s15 + $0x20] sm:$0xff] %v1760_v50  }
 0x1b4   : > { %v1770_v58 = vpack.c.bf16 %v1292_v53, %v1291_v52  ;;  %v1294_v59 = vmax.f32 %v1278_v55, 0.0  ;;  %1781 = vst [vmem:[%s2462_s15 + $0x28] sm:$0xff] %v1765_v56  }
 0x1b6   : > { %1782 = vst [vmem:[%s2462_s15 + $0x30] sm:$0xff] %v1770_v58   ;;  %v1775_v60 = vpack.c.bf16 %v1294_v59, %v1293_v57 }
 0x1b8   : > { %1783 = vst [vmem:[%s2462_s15 + $0x38] sm:$0xff] %v1775_v60  }
 0x1b9 PF: > { %1381 = sbr.rel (!%p2253_p12) target bundleno = 453 (0x1c5), region = 115  ;;  %s1716_s21 = sshll.u32 (%p2253_p12), %s2119_s22, 2  ;;  %v1403_v51 = vld [vmem:[%s2462_s15] sm:$0xf] (%p2253_p12)  ;;  %v1405_v54 = vld [vmem:[%s2462_s15 + $0x4] sm:$0xf] (%p2253_p12) }
 0x1ba   : > { %s1386_s26 = scalar_lea.vmem (%p2253_p12), %s2627_s4, %s1716_s21  ;;  %v1407_v61 = vld [vmem:[%s2462_s15 + $0x8] sm:$0xf] (%p2253_p12)  ;;  %v1409_v62 = vld [vmem:[%s2462_s15 + $0xc] sm:$0xf] (%p2253_p12)  ;;  %v1411_v63 = vld [vmem:[%s2462_s15 + $0x10] sm:$0xf] (%p2253_p12) }
 0x1bb   : > { %1404 = vst [vmem:[%s1386_s26] sm:$0xf] (%p2253_p12), %v1403_v51  ;;  %1406 = vst [vmem:[%s1386_s26 + $0x8] sm:$0xf] (%p2253_p12), %v1405_v54  ;;  %v1413_v0 = vld [vmem:[%s2462_s15 + $0x14] sm:$0xf] (%p2253_p12) }
 0x1bc   : > { %1408 = vst [vmem:[%s1386_s26 + $0x10] sm:$0xf] (%p2253_p12), %v1407_v61  ;;  %1410 = vst [vmem:[%s1386_s26 + $0x18] sm:$0xf] (%p2253_p12), %v1409_v62  ;;  %v1415_v1 = vld [vmem:[%s2462_s15 + $0x18] sm:$0xf] (%p2253_p12) }
 0x1bd   : > { %1412 = vst [vmem:[%s1386_s26 + $0x20] sm:$0xf] (%p2253_p12), %v1411_v63  ;;  %v1417_v2 = vld [vmem:[%s2462_s15 + $0x1c] sm:$0xf] (%p2253_p12)  ;;  %1414 = vst [vmem:[%s1386_s26 + $0x28] sm:$0xf] (%p2253_p12), %v1413_v0 }
 0x1be   : > { %1416 = vst [vmem:[%s1386_s26 + $0x30] sm:$0xf] %v1415_v1  ;;  %1418 = vst [vmem:[%s1386_s26 + $0x38] sm:$0xf] %v1417_v2  ;;  %v1419_v3 = vld [vmem:[%s2462_s15 + $0x20] sm:$0xf] }
 0x1bf   : > { %v1421_v4 = vld [vmem:[%s2462_s15 + $0x24] sm:$0xf]  ;;  %v1423_v5 = vld [vmem:[%s2462_s15 + $0x28] sm:$0xf]  ;;  %1420 = vst [vmem:[%s1386_s26 + $0x40] sm:$0xf] %v1419_v3 }
 0x1c0   : > { %1422 = vst [vmem:[%s1386_s26 + $0x48] sm:$0xf] %v1421_v4  ;;  %1424 = vst [vmem:[%s1386_s26 + $0x50] sm:$0xf] %v1423_v5  ;;  %v1425_v6 = vld [vmem:[%s2462_s15 + $0x2c] sm:$0xf] }
 0x1c1   : > { %v1427_v7 = vld [vmem:[%s2462_s15 + $0x30] sm:$0xf]  ;;  %v1429_v8 = vld [vmem:[%s2462_s15 + $0x34] sm:$0xf]  ;;  %1426 = vst [vmem:[%s1386_s26 + $0x58] sm:$0xf] %v1425_v6 }
 0x1c2   : > { %1428 = vst [vmem:[%s1386_s26 + $0x60] sm:$0xf] %v1427_v7  ;;  %1430 = vst [vmem:[%s1386_s26 + $0x68] sm:$0xf] %v1429_v8  ;;  %v1431_v9 = vld [vmem:[%s2462_s15 + $0x38] sm:$0xf] }
 0x1c3   : > { %v1433_v10 = vld [vmem:[%s2462_s15 + $0x3c] sm:$0xf]  ;;  %1432 = vst [vmem:[%s1386_s26 + $0x70] sm:$0xf] %v1431_v9 }
 0x1c4   : > { %1434 = vst [vmem:[%s1386_s26 + $0x78] sm:$0xf] %v1433_v10 }
 0x1c5 PF: > { %s14_s25 = sadd.s32 1, %s2131_s25   ;;  %s2641_s22 = sld [smem:[#allocation6_spill]] }
 0x1c6   : > { %p11_p6 = scmp.ge.s32.totalorder %s14_s25, 38   ;;  %s2642_s14 = sld [smem:[#allocation7_spill]] }
 0x1c7   : > { %s2643_s24 = sld [smem:[#allocation8_spill]]  ;;  %s2644_s15 = smov %s2095_s16 }
 0x1c8   : > { %s2645_s16 = smov %s2251_s13  ;;  %s2646_s17 = smov %s2103_s18 }
 0x1c9   : > { %s2647_s18 = smov %s2248_s12  ;;  %s2648_s19 = smov %s2111_s20 }
 0x1ca   : > { %s2649_s20 = smov %s2234_s7  ;;  %s2650_s21 = smov %s2123_s23 }
 0x1cb   :  { %13 = sbr.rel (!%p11_p6) target bundleno = 9 (0x9), region = 207 }
 0x1cc   : > { %s2651_s23 = smov %s2642_s14 }

// kernel: _lambda_.17
= control target key start
LH: loop header
LB: loop body
LE: loop exit
PB: predicated region body
PF: predicated region fallthrough
CT: control target
= control target key end

     0   :  { %s1898_s0 = inlined_call_operand.vmem [shape: bf16[16,6912], index: 0, kind: input, shape index: {}]   ;;  %s1899_s1 = inlined_call_operand.vmem [shape: bf16[6912,512], index: 1, kind: input, shape index: {}]   ;;  %s1900_s2 = inlined_call_operand.vmem [shape: f32[1,512], index: 2, kind: input, shape index: {}]   ;;  %s1901_s3 = inlined_call_operand.vmem [shape: f32[1,512], index: 3, kind: input, shape index: {}]   ;;  %s1902_s4 = inlined_call_operand.vmem [shape: bf16[16,512], index: 4, kind: output, shape index: {}]  }
   0x1   :  { %1905 = sst [smem:[#allocation8_spill]] %s1898_s0 }
   0x2   :  { %1906 = sst [smem:[#allocation9_spill]] %s1899_s1 }
   0x3   :  { %s1556_s15 = smov 0   ;;  %s1558_s16 = smov 0  }
   0x4   :  { %s1560_s17 = smov 0   ;;  %s1562_s18 = smov 0  }
   0x5   :  { %s1564_s19 = smov 0   ;;  %s1566_s20 = smov 0  }
   0x6   :  { %s1568_s21 = smov 0   ;;  %s1570_s22 = smov 0  }
   0x7   :  { %s1572_s23 = smov 0   ;;  %s1574_s24 = smov 0  }
   0x8   :  { %s1576_s25 = smov 0  }
   0x9 LB: > { %s1190_s26 = sadd.s32 4294967295, %s1527_s25   ;;  %s26_s27 = sadd.s32 1, %s1519_s23  ;;  %s1527_s25 = sphi %s1576_s25, %s14_s25   ;;  %s1523_s24 = sphi %s1574_s24, %s1925_s24   ;;  %s1519_s23 = sphi %s1572_s23, %s1924_s23   ;;  %s1515_s22 = sphi %s1570_s22, %s1923_s22   ;;  %s1511_s21 = sphi %s1568_s21, %s1922_s21   ;;  %s1507_s20 = sphi %s1566_s20, %s1921_s20   ;;  %s1503_s19 = sphi %s1564_s19, %s1920_s19   ;;  %s1499_s18 = sphi %s1562_s18, %s1919_s18   ;;  %s1495_s17 = sphi %s1560_s17, %s1918_s17   ;;  %s1491_s16 = sphi %s1558_s16, %s1917_s16   ;;  %s1487_s15 = sphi %s1556_s15, %s1916_s15  }
   0xa   : > { %p27_p0 = scmp.ge.s32.totalorder %s26_s27, 18  ;;  %s29_s28 = sadd.s32 1, %s1523_s24 }
   0xb   : > { %s42_s29 = sadd.s32 1, %s1507_s20  ;;  %p49_p1 = scmp.ne.s32.totalorder %s1507_s20, %s1503_s19 }
   0xc   : > { %s1927_s27 = smov (%p27_p0, %s26_s27), 0  ;;  %s1929_s28 = smov (!%p27_p0, %s29_s28), %s1523_s24 }
   0xd   : > { %1907 = sst [smem:[#allocation6_spill]] %s1927_s27  ;;  %s38_s30 = ssub.s32 %s1519_s23, %s1927_s27 }
   0xe   : > { %p50_p2 = scmp.eq.s32.totalorder %s1527_s25, 0  ;;  %p31_p3 = scmp.ge.s32.totalorder %s1929_s28, 2 }
   0xf   : > { %p40_p4 = scmp.eq.s32.totalorder %s38_s30, 0  ;;  %s70_s6 = sadd.s32 1, %s1499_s18 }
  0x10   : > { %p1623_p5 = por %p50_p2, %p49_p1  ;;  %s1931_s28 = smov (%p31_p3, %s1929_s28), 0 }
  0x11   : > { %1909 = sst [smem:[#allocation7_spill]] %s1931_s28  ;;  %s66_s8 = ssub.s32 %s1523_s24, %s1931_s28 }
  0x12   : > { %s1631_s7 = scalar_select %p40_p4, %s1507_s20, %s42_s29  }
  0x13   : > { %p77_p6 = scmp.ne.s32.totalorder %s1499_s18, %s1495_s17  ;;  %s67_s9 = sor.u32 %s66_s8, %s38_s30 }
  0x14   : > { %p148_p7 = scmp.eq.s32.totalorder %s66_s8, 0  ;;  %p68_p8 = scmp.eq.s32.totalorder %s67_s9, 0 }
  0x15   : > { %p1637_p9 = por %p77_p6, %p50_p2  ;;  %s150_s11 = sadd.s32 1, %s1491_s16 }
  0x16   : > { %p160_p10 = scmp.ne.s32.totalorder %s1491_s16, %s1487_s15  ;;  %p161_p11 = scmp.eq.s32.totalorder %s1190_s26, 35 }
  0x17   : > { %s1645_s12 = scalar_select %p68_p8, %s1499_s18, %s70_s6  }
  0x18   : > { %s1648_s13 = scalar_select %p148_p7, %s1491_s16, %s150_s11  }
  0x19   : > { %p1650_p12 = por %p161_p11, %p160_p10  ;;  %p1193_p13 = scmp.ge.s32.totalorder %s1527_s25, 36 }
  0x1b   : > { %183 = sbr.rel (%p1193_p13) target bundleno = 77 (0x4d), region = 16 }
  0x20   : > { %186 = sbr.rel (!%p1623_p5) target bundleno = 43 (0x2b), region = 20  ;;  %s188_s29 = sand.u32 (%p1623_p5), 1, %s1507_s20  }
  0x21   : > { %s1266_s30 = smul.u32 (%p1623_p5), 12, %s1519_s23  ;;  %s1912_s0 = sld [smem:[#allocation8_spill]] (%p1623_p5) }
  0x22   : > { %s1271_s8 = smul.u32 (%p1623_p5), 24, %s188_s29 }
  0x24   : > { %s190_s26 = scalar_lea.vmem (%p1623_p5), [#allocation3], %s1271_s8 }
  0x27   : > { %s196_s11 = scalar_lea.vmem %s1912_s0, %s1266_s30 }
  0x28   : > { %v211_v0 = vld [vmem:[%s196_s11] sm:$0xff]  ;;  %v213_v1 = vld [vmem:[%s196_s11 + $0xd8] sm:$0xff]  ;;  %v1195_v2 = vld [vmem:[%s196_s11 + $0x8] sm:$0xf] }
  0x29   : > { %212 = vst [vmem:[%s190_s26] sm:$0xff] %v211_v0  ;;  %214 = vst [vmem:[%s190_s26 + $0xc] sm:$0xff] %v213_v1  ;;  %v1197_v3 = vld [vmem:[%s196_s11 + $0xe0] sm:$0xf] }
  0x2a   : > { %1196 = vst [vmem:[%s190_s26 + $0x8] sm:$0xf] %v1195_v2  ;;  %1198 = vst [vmem:[%s190_s26 + $0x14] sm:$0xf] %v1197_v3 }
  0x2b PF: > { %232 = sbr.rel (!%p1637_p9) target bundleno = 77 (0x4d), region = 46  ;;  %s234_s5 = sand.u32 (%p1637_p9), 1, %s1499_s18  }
  0x2c   : > { %s1272_s29 = smul.u32 (%p1637_p9), 384, %s234_s5  ;;  %s1199_s6 = sshll.u32 (%p1637_p9), %s1523_s24, 1 }
  0x2d   : > { %s1267_s30 = smul.u32 (%p1637_p9), 192, %s1519_s23  ;;  %s1913_s1 = sld [smem:[#allocation9_spill]] (%p1637_p9) }
  0x2e   : > { %s1675_s10 = scalar_lea.vmem (%p1637_p9), [#allocation4], %s1272_s29 }
  0x2f   : > { %s240_s9 = sadd.s32 (%p1637_p9), %s1267_s30, %s1199_s6 }
  0x30   : > { %s1201_s0 = sshll.u32 %s240_s9, 2 }
  0x33   : > { %s1670_s27 = scalar_lea.vmem %s1913_s1, %s1201_s0 }
  0x34   : > { %v365_v4 = vld [vmem:[%s1670_s27] sm:$0xff]  ;;  %v367_v5 = vld [vmem:[%s1670_s27 + $0x10] sm:$0xff] }
  0x35   : > { %v369_v6 = vld [vmem:[%s1670_s27 + $0x20] sm:$0xff]  ;;  %366 = vst [vmem:[%s1675_s10] sm:$0xff] %v365_v4  ;;  %368 = vst [vmem:[%s1675_s10 + $0x8] sm:$0xff] %v367_v5  ;;  %v371_v7 = vld [vmem:[%s1670_s27 + $0x30] sm:$0xff] }
  0x36   : > { %370 = vst [vmem:[%s1675_s10 + $0x10] sm:$0xff] %v369_v6  ;;  %v373_v8 = vld [vmem:[%s1670_s27 + $0x40] sm:$0xff]  ;;  %v375_v9 = vld [vmem:[%s1670_s27 + $0x50] sm:$0xff]  ;;  %372 = vst [vmem:[%s1675_s10 + $0x18] sm:$0xff] %v371_v7 }
  0x37   : > { %374 = vst [vmem:[%s1675_s10 + $0x20] sm:$0xff] %v373_v8  ;;  %376 = vst [vmem:[%s1675_s10 + $0x28] sm:$0xff] %v375_v9  ;;  %v377_v10 = vld [vmem:[%s1670_s27 + $0x60] sm:$0xff]  ;;  %v379_v11 = vld [vmem:[%s1670_s27 + $0x70] sm:$0xff] }
  0x38   : > { %v381_v12 = vld [vmem:[%s1670_s27 + $0x80] sm:$0xff]  ;;  %378 = vst [vmem:[%s1675_s10 + $0x30] sm:$0xff] %v377_v10  ;;  %380 = vst [vmem:[%s1675_s10 + $0x38] sm:$0xff] %v379_v11  ;;  %v383_v13 = vld [vmem:[%s1670_s27 + $0x90] sm:$0xff] }
  0x39   : > { %382 = vst [vmem:[%s1675_s10 + $0x40] sm:$0xff] %v381_v12  ;;  %v385_v14 = vld [vmem:[%s1670_s27 + $0xa0] sm:$0xff]  ;;  %v387_v15 = vld [vmem:[%s1670_s27 + $0xb0] sm:$0xff]  ;;  %384 = vst [vmem:[%s1675_s10 + $0x48] sm:$0xff] %v383_v13 }
  0x3a   : > { %386 = vst [vmem:[%s1675_s10 + $0x50] sm:$0xff] %v385_v14  ;;  %388 = vst [vmem:[%s1675_s10 + $0x58] sm:$0xff] %v387_v15  ;;  %v389_v16 = vld [vmem:[%s1670_s27 + $0xc0] sm:$0xff]  ;;  %v391_v17 = vld [vmem:[%s1670_s27 + $0xd0] sm:$0xff] }
  0x3b   : > { %v393_v18 = vld [vmem:[%s1670_s27 + $0xe0] sm:$0xff]  ;;  %390 = vst [vmem:[%s1675_s10 + $0x60] sm:$0xff] %v389_v16  ;;  %392 = vst [vmem:[%s1675_s10 + $0x68] sm:$0xff] %v391_v17  ;;  %v395_v19 = vld [vmem:[%s1670_s27 + $0xf0] sm:$0xff] }
  0x3c   : > { %394 = vst [vmem:[%s1675_s10 + $0x70] sm:$0xff] %v393_v18  ;;  %v397_v20 = vld [vmem:[%s1670_s27 + $0x100] sm:$0xff]  ;;  %v399_v21 = vld [vmem:[%s1670_s27 + $0x110] sm:$0xff]  ;;  %396 = vst [vmem:[%s1675_s10 + $0x78] sm:$0xff] %v395_v19 }
  0x3d   : > { %398 = vst [vmem:[%s1675_s10 + $0x80] sm:$0xff] %v397_v20  ;;  %400 = vst [vmem:[%s1675_s10 + $0x88] sm:$0xff] %v399_v21  ;;  %v401_v22 = vld [vmem:[%s1670_s27 + $0x120] sm:$0xff]  ;;  %v403_v23 = vld [vmem:[%s1670_s27 + $0x130] sm:$0xff] }
  0x3e   : > { %v405_v24 = vld [vmem:[%s1670_s27 + $0x140] sm:$0xff]  ;;  %402 = vst [vmem:[%s1675_s10 + $0x90] sm:$0xff] %v401_v22  ;;  %404 = vst [vmem:[%s1675_s10 + $0x98] sm:$0xff] %v403_v23  ;;  %v407_v25 = vld [vmem:[%s1670_s27 + $0x150] sm:$0xff] }
  0x3f   : > { %406 = vst [vmem:[%s1675_s10 + $0xa0] sm:$0xff] %v405_v24  ;;  %v409_v26 = vld [vmem:[%s1670_s27 + $0x160] sm:$0xff]  ;;  %v411_v27 = vld [vmem:[%s1670_s27 + $0x170] sm:$0xff]  ;;  %408 = vst [vmem:[%s1675_s10 + $0xa8] sm:$0xff] %v407_v25 }
  0x40   : > { %410 = vst [vmem:[%s1675_s10 + $0xb0] sm:$0xff] %v409_v26  ;;  %412 = vst [vmem:[%s1675_s10 + $0xb8] sm:$0xff] %v411_v27  ;;  %v413_v28 = vld [vmem:[%s1670_s27 + $0x180] sm:$0xff]  ;;  %v415_v29 = vld [vmem:[%s1670_s27 + $0x190] sm:$0xff] }
  0x41   : > { %v417_v30 = vld [vmem:[%s1670_s27 + $0x1a0] sm:$0xff]  ;;  %414 = vst [vmem:[%s1675_s10 + $0xc0] sm:$0xff] %v413_v28  ;;  %416 = vst [vmem:[%s1675_s10 + $0xc8] sm:$0xff] %v415_v29  ;;  %v419_v31 = vld [vmem:[%s1670_s27 + $0x1b0] sm:$0xff] }
  0x42   : > { %418 = vst [vmem:[%s1675_s10 + $0xd0] sm:$0xff] %v417_v30  ;;  %v421_v32 = vld [vmem:[%s1670_s27 + $0x1c0] sm:$0xff]  ;;  %v423_v33 = vld [vmem:[%s1670_s27 + $0x1d0] sm:$0xff]  ;;  %420 = vst [vmem:[%s1675_s10 + $0xd8] sm:$0xff] %v419_v31 }
  0x43   : > { %422 = vst [vmem:[%s1675_s10 + $0xe0] sm:$0xff] %v421_v32  ;;  %424 = vst [vmem:[%s1675_s10 + $0xe8] sm:$0xff] %v423_v33  ;;  %v425_v34 = vld [vmem:[%s1670_s27 + $0x1e0] sm:$0xff]  ;;  %v427_v35 = vld [vmem:[%s1670_s27 + $0x1f0] sm:$0xff] }
  0x44   : > { %v429_v36 = vld [vmem:[%s1670_s27 + $0x200] sm:$0xff]  ;;  %426 = vst [vmem:[%s1675_s10 + $0xf0] sm:$0xff] %v425_v34  ;;  %428 = vst [vmem:[%s1675_s10 + $0xf8] sm:$0xff] %v427_v35  ;;  %v431_v37 = vld [vmem:[%s1670_s27 + $0x210] sm:$0xff] }
  0x45   : > { %430 = vst [vmem:[%s1675_s10 + $0x100] sm:$0xff] %v429_v36  ;;  %v433_v38 = vld [vmem:[%s1670_s27 + $0x220] sm:$0xff]  ;;  %v435_v39 = vld [vmem:[%s1670_s27 + $0x230] sm:$0xff]  ;;  %432 = vst [vmem:[%s1675_s10 + $0x108] sm:$0xff] %v431_v37 }
  0x46   : > { %434 = vst [vmem:[%s1675_s10 + $0x110] sm:$0xff] %v433_v38  ;;  %436 = vst [vmem:[%s1675_s10 + $0x118] sm:$0xff] %v435_v39  ;;  %v437_v40 = vld [vmem:[%s1670_s27 + $0x240] sm:$0xff]  ;;  %v439_v41 = vld [vmem:[%s1670_s27 + $0x250] sm:$0xff] }
  0x47   : > { %v441_v42 = vld [vmem:[%s1670_s27 + $0x260] sm:$0xff]  ;;  %438 = vst [vmem:[%s1675_s10 + $0x120] sm:$0xff] %v437_v40  ;;  %440 = vst [vmem:[%s1675_s10 + $0x128] sm:$0xff] %v439_v41  ;;  %v443_v43 = vld [vmem:[%s1670_s27 + $0x270] sm:$0xff] }
  0x48   : > { %442 = vst [vmem:[%s1675_s10 + $0x130] sm:$0xff] %v441_v42  ;;  %v445_v44 = vld [vmem:[%s1670_s27 + $0x280] sm:$0xff]  ;;  %v447_v45 = vld [vmem:[%s1670_s27 + $0x290] sm:$0xff]  ;;  %444 = vst [vmem:[%s1675_s10 + $0x138] sm:$0xff] %v443_v43 }
  0x49   : > { %446 = vst [vmem:[%s1675_s10 + $0x140] sm:$0xff] %v445_v44  ;;  %448 = vst [vmem:[%s1675_s10 + $0x148] sm:$0xff] %v447_v45  ;;  %v449_v46 = vld [vmem:[%s1670_s27 + $0x2a0] sm:$0xff]  ;;  %v451_v47 = vld [vmem:[%s1670_s27 + $0x2b0] sm:$0xff] }
  0x4a   : > { %v453_v48 = vld [vmem:[%s1670_s27 + $0x2c0] sm:$0xff]  ;;  %450 = vst [vmem:[%s1675_s10 + $0x150] sm:$0xff] %v449_v46  ;;  %452 = vst [vmem:[%s1675_s10 + $0x158] sm:$0xff] %v451_v47  ;;  %v455_v49 = vld [vmem:[%s1670_s27 + $0x2d0] sm:$0xff] }
  0x4b   : > { %454 = vst [vmem:[%s1675_s10 + $0x160] sm:$0xff] %v453_v48  ;;  %v457_v50 = vld [vmem:[%s1670_s27 + $0x2e0] sm:$0xff]  ;;  %v459_v51 = vld [vmem:[%s1670_s27 + $0x2f0] sm:$0xff]  ;;  %456 = vst [vmem:[%s1675_s10 + $0x168] sm:$0xff] %v455_v49 }
  0x4c   : > { %458 = vst [vmem:[%s1675_s10 + $0x170] sm:$0xff] %v457_v50  ;;  %460 = vst [vmem:[%s1675_s10 + $0x178] sm:$0xff] %v459_v51 }
  0x4d PF: > { %p1202_p0 = scmp.ge.s32.totalorder %s1527_s25, 1  ;;  %p481_p1 = scmp.lt.s32.totalorder %s1527_s25, 37 }
  0x4f   : > { %p482_p2 = pnand %p1202_p0, %p481_p1 }
  0x50   : > { %s488_s0 = sand.u32 (!%p482_p2), 1, %s1503_s19   ;;  %s495_s28 = sand.u32 (!%p482_p2), 1, %s1495_s17  }
  0x51   : > { %485 = sbr.rel (%p482_p2) target bundleno = 390 (0x186), region = 92  ;;  %s528_s26 = sand.u32 (!%p482_p2), 1, %s1487_s15  }
  0x52   : > { %s1273_s11 = smul.u32 (!%p482_p2), 24, %s488_s0  ;;  %s1203_s5 = sshll.u32 (!%p482_p2), %s528_s26, 4 }
  0x53   : > { %s1274_s27 = smul.u32 (!%p482_p2), 384, %s495_s28  ;;  %s1204_s29 = sshll.u32 (!%p482_p2), %s1515_s22, 1 }
  0x54   : > { %p536_p3 = scmp.lt.s32.totalorder (!%p482_p2), %s1204_s29, 3  ;;  %s1786_s19 = scalar_lea.vmem (!%p482_p2), [#allocation3], %s1273_s11 }
  0x55   : > { %s1788_s17 = scalar_lea.vmem (!%p482_p2), [#allocation4], %s1274_s27  ;;  %s1790_s15 = scalar_lea.vmem (!%p482_p2), [#allocation5], %s1203_s5 }
  0x56   : > { %s1933_s29 = smov (!%p536_p3, %s1204_s29), 3  ;;  %p1206_p4 = scmp.ne.s32.totalorder %s1511_s21, 0 }
  0x57   : > { %s538_s9 = scalar_lea.vmem %s1900_s2, %s1933_s29  ;;  %s543_s1 = scalar_lea.vmem %s1901_s3, %s1933_s29 }
  0x58   : > { %551 = sbr.rel (%p1206_p4) target bundleno = 96 (0x60), region = 104 }
  0x5d   : > { %v1529_v52 = vmov 0.0  }
  0x5e   : > { %552 = vst [vmem:[#allocation2 + $0x10] sm:$0xff] %v1529_v52  ;;  %553 = vst [vmem:[#allocation2] sm:$0xff] %v1529_v52 }
  0x5f   : > { %554 = vst [vmem:[#allocation2 + $0x18] sm:$0xff] %v1529_v52  ;;  %555 = vst [vmem:[#allocation2 + $0x8] sm:$0xff] %v1529_v52 }
  0x60 PF: > { %v1365_v53 = vld [vmem:[%s1788_s17 + $0x74] ss:$8 sps:$4 sm:$0xff]   ;;  %v1367_v54 = vld [vmem:[%s1788_s17 + $0x70] ss:$8 sps:$4 sm:$0xff]   ;;  %v1530_v55 = vmov 0   ;;  %p1258_p5 = scmp.ne.s32.totalorder %s1511_s21, 17 }
  0x61   : > { %943 = vmatprep.mubr.bf16.mxu1 %v1530_v55  ;;  %868 = vmatprep.subr.bf16.mxu0 %v1365_v53  ;;  %v1368_v56 = vld [vmem:[%s1788_s17 + $0x64] ss:$8 sps:$4 sm:$0xff]   ;;  %v1370_v57 = vld [vmem:[%s1788_s17 + $0x60] ss:$8 sps:$4 sm:$0xff]   ;;  %v1371_v58 = vld [vmem:[%s1788_s17 + $0x54] ss:$8 sps:$4 sm:$0xff]  }
  0x62   : > { %869 = vmatpush1.bf16.msra.mxu0 %v1367_v54  ;;  %v1373_v59 = vld [vmem:[%s1788_s17 + $0x50] ss:$8 sps:$4 sm:$0xff]   ;;  %v1374_v60 = vld [vmem:[%s1788_s17 + $0x44] ss:$8 sps:$4 sm:$0xff]   ;;  %v1386_v61 = vld [vmem:[%s1788_s17 + $0x174] ss:$8 sps:$4 sm:$0xff]  }
  0x63   : > { %870 = vmatprep.subr.bf16.mxu0 %v1368_v56  ;;  %v1388_v62 = vld [vmem:[%s1788_s17 + $0x170] ss:$8 sps:$4 sm:$0xff]   ;;  %v1376_v63 = vld [vmem:[%s1788_s17 + $0x40] ss:$8 sps:$4 sm:$0xff]   ;;  %v1377_v0 = vld [vmem:[%s1788_s17 + $0x34] ss:$8 sps:$4 sm:$0xff]   ;;  %911 = vmatprep.subr.bf16.mxu1 %v1386_v61 }
  0x64   : > { %v1392_v1 = vld [vmem:[%s1788_s17 + $0x164] ss:$8 sps:$4 sm:$0xff]   ;;  %912 = vmatpush1.bf16.msra.mxu1 %v1388_v62  ;;  %v1394_v2 = vld [vmem:[%s1788_s17 + $0x160] ss:$8 sps:$4 sm:$0xff]   ;;  %v1379_v3 = vld [vmem:[%s1788_s17 + $0x30] ss:$8 sps:$4 sm:$0xff]  }
  0x65   : > { %913 = vmatprep.subr.bf16.mxu1 %v1392_v1  ;;  %v1398_v4 = vld [vmem:[%s1788_s17 + $0x154] ss:$8 sps:$4 sm:$0xff]   ;;  %v1380_v5 = vld [vmem:[%s1788_s17 + $0x24] ss:$8 sps:$4 sm:$0xff]   ;;  %v1400_v6 = vld [vmem:[%s1788_s17 + $0x150] ss:$8 sps:$4 sm:$0xff]  }
  0x66   : > { %871 = vmatpush1.bf16.msra.mxu0 %v1370_v57  ;;  %v1404_v7 = vld [vmem:[%s1788_s17 + $0x144] ss:$8 sps:$4 sm:$0xff]   ;;  %v1382_v8 = vld [vmem:[%s1788_s17 + $0x20] ss:$8 sps:$4 sm:$0xff]   ;;  %v1383_v9 = vld [vmem:[%s1788_s17 + $0x14] ss:$8 sps:$4 sm:$0xff]  }
  0x67   : > { %872 = vmatprep.subr.bf16.mxu0 %v1371_v58  ;;  %v1406_v10 = vld [vmem:[%s1788_s17 + $0x140] ss:$8 sps:$4 sm:$0xff]   ;;  %v1410_v11 = vld [vmem:[%s1788_s17 + $0x134] ss:$8 sps:$4 sm:$0xff]   ;;  %v1385_v12 = vld [vmem:[%s1788_s17 + $0x10] ss:$8 sps:$4 sm:$0xff]  }
  0x68   : > { %914 = vmatpush1.bf16.msra.mxu1 %v1394_v2  ;;  %v1389_v13 = vld [vmem:[%s1788_s17 + $0x4] ss:$8 sps:$4 sm:$0xff]   ;;  %v1412_v14 = vld [vmem:[%s1788_s17 + $0x130] ss:$8 sps:$4 sm:$0xff]   ;;  %v1391_v16 = vld [vmem:[%s1788_s17] ss:$8 sps:$4 sm:$0xff]  }
  0x69   : > { %915 = vmatprep.subr.bf16.mxu1 %v1398_v4  ;;  %v1416_v15 = vld [vmem:[%s1788_s17 + $0x124] ss:$8 sps:$4 sm:$0xff]   ;;  %v1395_v17 = vld [vmem:[%s1788_s17 + $0xf4] ss:$8 sps:$4 sm:$0xff]   ;;  %v1418_v18 = vld [vmem:[%s1788_s17 + $0x120] ss:$8 sps:$4 sm:$0xff]  }
  0x6a   : > { %873 = vmatpush1.bf16.msra.mxu0 %v1373_v59  ;;  %v1422_v19 = vld [vmem:[%s1788_s17 + $0x114] ss:$8 sps:$4 sm:$0xff]   ;;  %v1397_v20 = vld [vmem:[%s1788_s17 + $0xf0] ss:$8 sps:$4 sm:$0xff]   ;;  %v1401_v21 = vld [vmem:[%s1788_s17 + $0xe4] ss:$8 sps:$4 sm:$0xff]  }
  0x6b   : > { %874 = vmatprep.subr.bf16.mxu0 %v1374_v60  ;;  %v1424_v22 = vld [vmem:[%s1788_s17 + $0x110] ss:$8 sps:$4 sm:$0xff]   ;;  %v1428_v23 = vld [vmem:[%s1788_s17 + $0x104] ss:$8 sps:$4 sm:$0xff]   ;;  %v1403_v25 = vld [vmem:[%s1788_s17 + $0xe0] ss:$8 sps:$4 sm:$0xff]  }
  0x6c   : > { %916 = vmatpush1.bf16.msra.mxu1 %v1400_v6  ;;  %v1440_v24 = vld [vmem:[%s1786_s19 + $0x4] ss:$12 sps:$4 sm:$0xff]   ;;  %v1434_v30 = vld [vmem:[%s1786_s19 + $0x8] ss:$12 sps:$4 sm:$0xff]   ;;  %v1438_v40 = vld [vmem:[%s1786_s19] ss:$12 sps:$4 sm:$0xff]  }
  0x6d   : > { %917 = vmatprep.subr.bf16.mxu1 %v1404_v7  ;;  %v1407_v26 = vld [vmem:[%s1788_s17 + $0xd4] ss:$8 sps:$4 sm:$0xff]   ;;  %900 = vmatprep.mubr.bf16.mxu0 %v1440_v24  ;;  %v1430_v27 = vld [vmem:[%s1788_s17 + $0x100] ss:$8 sps:$4 sm:$0xff]   ;;  %v1409_v28 = vld [vmem:[%s1788_s17 + $0xd0] ss:$8 sps:$4 sm:$0xff]  }
  0x6e   : > { %875 = vmatpush1.bf16.msra.mxu0 %v1376_v63  ;;  %v1413_v29 = vld [vmem:[%s1788_s17 + $0xc4] ss:$8 sps:$4 sm:$0xff]   ;;  %v1415_v31 = vld [vmem:[%s1788_s17 + $0xc0] ss:$8 sps:$4 sm:$0xff]   ;;  %v1419_v32 = vld [vmem:[%s1788_s17 + $0xb4] ss:$8 sps:$4 sm:$0xff]  }
  0x6f   : > { %876 = vmatprep.subr.bf16.mxu0 %v1377_v0  ;;  %v1421_v33 = vld [vmem:[%s1788_s17 + $0xb0] ss:$8 sps:$4 sm:$0xff]   ;;  %v1425_v34 = vld [vmem:[%s1788_s17 + $0xa4] ss:$8 sps:$4 sm:$0xff]   ;;  %v1427_v35 = vld [vmem:[%s1788_s17 + $0xa0] ss:$8 sps:$4 sm:$0xff]  }
  0x70   : > { %918 = vmatpush1.bf16.msra.mxu1 %v1406_v10  ;;  %v1431_v36 = vld [vmem:[%s1788_s17 + $0x94] ss:$8 sps:$4 sm:$0xff]   ;;  %v1433_v37 = vld [vmem:[%s1788_s17 + $0x90] ss:$8 sps:$4 sm:$0xff]   ;;  %v1435_v38 = vld [vmem:[%s1788_s17 + $0x84] ss:$8 sps:$4 sm:$0xff]  }
  0x71   : > { %919 = vmatprep.subr.bf16.mxu1 %v1410_v11  ;;  %v1437_v39 = vld [vmem:[%s1788_s17 + $0x80] ss:$8 sps:$4 sm:$0xff]   ;;  %v557_v47 = vld [vmem:[#allocation2] sm:$0xff]  ;;  %v559_v56 = vld [vmem:[#allocation2 + $0x8] sm:$0xff] }
  0x72   : > { %877 = vmatpush1.bf16.msra.mxu0 %v1379_v3  ;;  %v556_v43 = vld [vmem:[#allocation2 + $0x10] sm:$0xff]  ;;  %v558_v51 = vld [vmem:[#allocation2 + $0x18] sm:$0xff] }
  0x73   : > { %878 = vmatprep.subr.bf16.mxu0 %v1380_v5 }
  0x74   : > { %920 = vmatpush1.bf16.msra.mxu1 %v1412_v14 }
  0x75   : > { %921 = vmatprep.subr.bf16.mxu1 %v1416_v15 }
  0x76   : > { %879 = vmatpush1.bf16.msra.mxu0 %v1382_v8 }
  0x77   : > { %880 = vmatprep.subr.bf16.mxu0 %v1383_v9 }
  0x78   : > { %922 = vmatpush1.bf16.msra.mxu1 %v1418_v18 }
  0x79   : > { %923 = vmatprep.subr.bf16.mxu1 %v1422_v19 }
  0x7a   : > { %881 = vmatpush1.bf16.msra.mxu0 %v1385_v12 }
  0x7b   : > { %882 = vmatprep.subr.bf16.mxu0 %v1389_v13 }
  0x7c   : > { %924 = vmatpush1.bf16.msra.mxu1 %v1424_v22 }
  0x7d   : > { %925 = vmatprep.subr.bf16.mxu1 %v1428_v23 }
  0x7e   : > { %883 = vmatpush1.bf16.msra.mxu0 %v1391_v16 }
  0x7f   : > { %884 = vmatprep.subr.bf16.mxu0 %v1395_v17 }
  0x80   : > { %926 = vmatpush1.bf16.msra.mxu1 %v1430_v27 }
  0x82   : > { %885 = vmatpush2.bf16.msra.mxu0 %v1397_v20 }
  0x83   : > { %886 = vmatprep.subr.bf16.mxu0 %v1401_v21  ;;  %944 = vmatmul.mubr.bf16.vlgmr.msra.gmra.mxu1 %v1434_v30 }
  0x86   : > { %887 = vmatpush2.bf16.msra.mxu0 %v1403_v25 }
  0x87   : > { %888 = vmatprep.subr.bf16.mxu0 %v1407_v26 }
  0x8a   : > { %889 = vmatpush2.bf16.msra.mxu0 %v1409_v28 }
  0x8b   : > { %890 = vmatprep.subr.bf16.mxu0 %v1413_v29 }
  0x8e   : > { %891 = vmatpush2.bf16.msra.mxu0 %v1415_v31 }
  0x8f   : > { %892 = vmatprep.subr.bf16.mxu0 %v1419_v32 }
  0x92   : > { %893 = vmatpush2.bf16.msra.mxu0 %v1421_v33 }
  0x93   : > { %894 = vmatprep.subr.bf16.mxu0 %v1425_v34 }
  0x96   : > { %895 = vmatpush2.bf16.msra.mxu0 %v1427_v35 }
  0x97   : > { %896 = vmatprep.subr.bf16.mxu0 %v1431_v36 }
  0x9a   : > { %897 = vmatpush2.bf16.msra.mxu0 %v1433_v37 }
  0x9b   : > { %898 = vmatprep.subr.bf16.mxu0 %v1435_v38 }
  0x9e   : > { %899 = vmatpush2.bf16.msra.mxu0 %v1437_v39 }
  0xa1   : > { %901 = vmatmul.mubr.bf16.vlgmr.msra.gmra.mxu0 %v1438_v40 }
 0x143   : > { %v945_v41 = vpop.f32.mrf.mxu1 }
 0x145   : > { %v947_v42 = vpop.f32.mrf.mxu1 }
 0x147   : > { %v949_v46 = vpop.f32.mrf.mxu1 }
 0x149   : > { %v951_v55 = vpop.f32.mrf.mxu1 }
 0x161   : > { %v902_v44 = vpop.f32.mrf.mxu0 }
 0x162   : > { %v946_v45 = vadd.f32 %v945_v41, %v902_v44 }
 0x163   : > { %v904_v48 = vpop.f32.mrf.mxu0 }
 0x164   : > { %v954_v49 = vadd.f32 %v946_v45, %v556_v43  ;;  %v948_v50 = vadd.f32 %v947_v42, %v904_v48 }
 0x165   : > { %v906_v52 = vpop.f32.mrf.mxu0 }
 0x166   : > { %958 = vst [vmem:[#allocation2 + $0x10] sm:$0xff] %v954_v49  ;;  %v955_v53 = vadd.f32 %v948_v50, %v557_v47  ;;  %v950_v54 = vadd.f32 %v949_v46, %v906_v52 }
 0x167   : > { %v908_v57 = vpop.f32.mrf.mxu0 }
 0x168   : > { %959 = vst [vmem:[#allocation2] sm:$0xff] %v955_v53  ;;  %v956_v58 = vadd.f32 %v950_v54, %v558_v51  ;;  %v952_v59 = vadd.f32 %v951_v55, %v908_v57  ;;  %965 = sbr.rel (%p1258_p5) target bundleno = 382 (0x17e), region = 108 }
 0x16a   : > { %960 = vst [vmem:[#allocation2 + $0x18] sm:$0xff] %v956_v58  ;;  %v957_v60 = vadd.f32 %v952_v59, %v559_v56 }
 0x16c   : > { %961 = vst [vmem:[#allocation2 + $0x8] sm:$0xff] %v957_v60 }
 0x16d   : > { %v972_v61 = vlaneseq  ;;  %v970_v63 = vld [vmem:[%s538_s9] sm:$0x3]  ;;  %v966_v1 = vld [vmem:[#allocation2 + $0x10] sm:$0xff] }
 0x16e   : > { %v986_v0 = vld [vmem:[%s543_s1] sm:$0x3] }
 0x16f   : > { %v973_v62 = vshrl.u32 %v972_v61, 7  ;;  %v967_v4 = vld [vmem:[#allocation2] sm:$0xff] }
 0x171   : > { %v974_v2 = vsub.s32 0, %v973_v62  ;;  %v978_v3 = vsub.s32 1, %v973_v62  ;;  %v968_v5 = vld [vmem:[#allocation2 + $0x18] sm:$0xff] }
 0x173   : > { %v969_v6 = vld [vmem:[#allocation2 + $0x8] sm:$0xff]  ;;  %v975_v7 = vrot.slane %v970_v63, %v974_v2  ;;  %v979_v8 = vrot.slane %v970_v63, %v978_v3  ;;  %v991_v9 = vrot.slane %v986_v0, %v974_v2  ;;  %v995_v10 = vrot.slane %v986_v0, %v978_v3 }
 0x175   : > { %v982_v11 = vmul.f32 %v975_v7, %v966_v1  ;;  %v983_v12 = vmul.f32 %v979_v8, %v967_v4  ;;  %v984_v13 = vmul.f32 %v975_v7, %v968_v5  ;;  %v985_v14 = vmul.f32 %v979_v8, %v969_v6 }
 0x177   : > { %v998_v15 = vadd.f32 %v991_v9, %v982_v11  ;;  %v999_v16 = vadd.f32 %v995_v10, %v983_v12  ;;  %v1000_v17 = vadd.f32 %v991_v9, %v984_v13  ;;  %v1001_v18 = vadd.f32 %v995_v10, %v985_v14 }
 0x179   : > { %v1002_v19 = vmax.f32 %v998_v15, 0.0  ;;  %v1003_v20 = vmax.f32 %v999_v16, 0.0  ;;  %v1004_v21 = vmax.f32 %v1000_v17, 0.0  ;;  %v1005_v22 = vmax.f32 %v1001_v18, 0.0 }
 0x17b   : > { %v1268_v23 = vpack.c.bf16 %v1003_v20, %v1002_v19  ;;  %v1269_v24 = vpack.c.bf16 %v1005_v22, %v1004_v21 }
 0x17d   : > { %1018 = vst [vmem:[%s1790_s15] sm:$0xff] %v1268_v23  ;;  %1019 = vst [vmem:[%s1790_s15 + $0x8] sm:$0xff] %v1269_v24 }
 0x17e PF: > { %1026 = sbr.rel (!%p1650_p12) target bundleno = 390 (0x186), region = 112  ;;  %s1270_s1 = sshll.u32 (%p1650_p12), %s1515_s22, 3 }
 0x17f   : > { %s1032_s5 = scalar_lea.vmem (%p1650_p12), %s1902_s4, %s1270_s1 }
 0x184   : > { %v1063_v25 = vld [vmem:[%s1790_s15] sm:$0xff]  ;;  %v1065_v26 = vld [vmem:[%s1790_s15 + $0x8] sm:$0xff] }
 0x185   : > { %1064 = vst [vmem:[%s1032_s5] sm:$0xff] %v1063_v25  ;;  %1066 = vst [vmem:[%s1032_s5 + $0x10] sm:$0xff] %v1065_v26 }
 0x186 PF: > { %s14_s25 = sadd.s32 1, %s1527_s25   ;;  %s1914_s14 = sld [smem:[#allocation6_spill]] }
 0x187   : > { %p11_p6 = scmp.ge.s32.totalorder %s14_s25, 38   ;;  %s1915_s29 = sld [smem:[#allocation7_spill]] }
 0x188   : > { %s1916_s15 = smov %s1491_s16  ;;  %s1917_s16 = smov %s1648_s13 }
 0x189   : > { %s1918_s17 = smov %s1499_s18  ;;  %s1919_s18 = smov %s1645_s12 }
 0x18a   : > { %s1920_s19 = smov %s1507_s20  ;;  %s1921_s20 = smov %s1631_s7 }
 0x18b   : > { %s1922_s21 = smov %s1519_s23  ;;  %s1923_s22 = smov %s1523_s24 }
 0x18c   : > { %s1924_s23 = smov %s1914_s14  ;;  %13 = sbr.rel (!%p11_p6) target bundleno = 9 (0x9), region = 201 }
 0x18d   : > { %s1925_s24 = smov %s1915_s29 }

// kernel: _lambda_.21
= control target key start
LH: loop header
LB: loop body
LE: loop exit
PB: predicated region body
PF: predicated region fallthrough
CT: control target
= control target key end

     0   :  { %s1086_s0 = inlined_call_operand.vmem [shape: s32[2], index: 0, kind: input, shape index: {}]   ;;  %s1087_s1 = inlined_call_operand.vmem [shape: bf16[2,8,512], index: 1, kind: input, shape index: {}]   ;;  %s1088_s2 = inlined_call_operand.vmem [shape: bf16[5,512,128], index: 2, kind: input, shape index: {}]   ;;  %s1089_s3 = inlined_call_operand.vmem [shape: f32[5,1,128], index: 3, kind: input, shape index: {}]   ;;  %s1090_s4 = inlined_call_operand.hbm [shape: f32[2,1,128], index: 4, kind: output, shape index: {}]  }
   0x1   :  { %s9_s17 = sshll.u32 %s1086_s0, 4  ;;  %s10_s17 = int_to_ptr.vmem [resolvable:$true] %s9_s17 }
   0x2   :  { %s851_s18 = scalar_lea.vmem %s10_s17, 16  ;;  %p856_p1 = scmp.lt.s32.totalorder %s10_s17, %s10_s17 }
   0x3   :  { %p852_p0 = scmp.ne.s32.totalorder %s10_s17, %s851_s18  ;;  %p857_p2 = scmp.lt.s32.totalorder %s851_s18, %s851_s18 }
   0x5   :  { %p858_p3 = por %p857_p2, %p856_p1 }
   0x7   :  { %p859_p4 = pnand %p858_p3, %p852_p0 }
   0x9   :  { %862 = shalt.err (!%p859_p4)  }
   0xa   :  { %s927_s19 = smov [#allocation3]  }
   0xb   :  { %12 = dma.vmem_to_smem %s10_s17, 16, %s927_s19, [#allocation2] }
   0xc   :  { %905 = dma.done.wait [#allocation2], 16 }
   0xd   :  { %906 = vsyncadd [#allocation2], 4294967280 }
   0xe   :  { %14 = sfence }
   0xf   :  { %15 = vsyncpa [#allocation5], 0 }
  0x10   :  { %17 = vsyncpa [#allocation5 + $0x1], 0  ;;  %s957_s20 = smov 0   ;;  %s959_s21 = smov 0  }
  0x11   :  { %s961_s0 = smov 0   ;;  %s963_s22 = smov 0  }
  0x12 LB: > { %s978_s23 = sadd.s32 4294967295, %s925_s22   ;;  %s690_s24 = sadd.s32 4294967294, %s925_s22   ;;  %s925_s22 = sphi %s963_s22, %s1096_s22   ;;  %s921_s0 = sphi %s961_s0, %s1095_s0   ;;  %s917_s21 = sphi %s959_s21, %s1094_s21   ;;  %s913_s20 = sphi %s957_s20, %s1093_s20  }
  0x13   : > { %s982_s25 = sadd.s32 1, %s925_s22   ;;  %s112_s26 = sadd.s32 1, %s921_s0 }
  0x14   : > { %s109_s27 = ssub.s32 %s925_s22, %s982_s25  ;;  %p122_p5 = scmp.ne.s32.totalorder %s921_s0, %s917_s21 }
  0x15   : > { %p110_p6 = scmp.eq.s32.totalorder %s109_s27, 0  ;;  %p123_p7 = scmp.eq.s32.totalorder %s978_s23, 1 }
  0x16   : > { %p128_p8 = scmp.ne.s32.totalorder %s917_s21, %s913_s20  ;;  %p129_p9 = scmp.eq.s32.totalorder %s690_s24, 1 }
  0x17   : > { %s993_s28 = scalar_select %p110_p6, %s921_s0, %s112_s26  }
  0x18   : > { %p995_p10 = por %p123_p7, %p122_p5  ;;  %p999_p11 = por %p129_p9, %p128_p8 }
  0x19   : > { %p693_p12 = scmp.ge.s32.totalorder %s925_s22, 1  ;;  %p173_p13 = scmp.lt.s32.totalorder %s925_s22, 3 }
  0x1b   : > { %p174_p0 = pnand %p693_p12, %p173_p13 }
  0x1c   : > { %s211_s5 = sld [smem:[#allocation3 + %s978_s23]] (!%p174_p0)  ;;  %p206_p1 = scmp.lt.s32.totalorder (!%p174_p0), %s978_s23, 1 }
  0x1d   : > { %177 = sbr.rel (%p174_p0) target bundleno = 288 (0x120), region = 32  ;;  %s218_s15 = sld [smem:[#allocation3 + %s978_s23]] (!%p174_p0) }
  0x1e   : > { %s204_s16 = sand.u32 (!%p174_p0), 1, %s917_s21   ;;  %s730_s24 = sshll.u32 (!%p174_p0), %s978_s23, 4 }
  0x1f   : > { %s205_s26 = scalar_lea.vmem (!%p174_p0), [#allocation4], %s204_s16  ;;  %s602_s8 = scalar_lea.sflag (!%p174_p0), [#allocation5], %s204_s16 }
  0x20   : > { %s614_s27 = sshll.u32 (!%p174_p0), %s205_s26, 4  ;;  %s615_s27 = int_to_ptr.vmem [resolvable:$true] %s614_s27 }
  0x21   : > { %s863_s9 = scalar_lea.vmem (!%p174_p0), %s615_s27, 16 }
  0x22   : > { %s207_s6 = scalar_select %p206_p1, %s978_s23, 1 }
  0x23   : > { %p212_p2 = scmp.lt.s32.totalorder %s211_s5, 4  ;;  %p219_p3 = scmp.lt.s32.totalorder %s218_s15, 4 }
  0x24   : > { %s733_s7 = sshll.u32 %s207_s6, 4  ;;  %p864_p4 = scmp.ne.s32.totalorder %s615_s27, %s863_s9 }
  0x25   : > { %s210_s10 = scalar_lea.vmem %s1087_s1, %s733_s7  ;;  %s1098_s5 = smov (!%p212_p2, %s211_s5), 4 }
  0x26   : > { %v224_v0 = vld [vmem:[%s210_s10] sm:$0xff]  ;;  %v225_v1 = vld [vmem:[%s210_s10 + $0x8] sm:$0xff]  ;;  %s734_s11 = sshll.u32 %s1098_s5, 8  ;;  %s1100_s15 = smov (!%p219_p3, %s218_s15), 4 }
  0x27   : > { %v227_v2 = vunpack.c.h.bf16 %v224_v0  ;;  %v229_v3 = vunpack.c.h.bf16 %v225_v1  ;;  %s1014_s14 = scalar_lea.vmem %s1088_s2, %s734_s11  ;;  %v226_v6 = vunpack.c.l.bf16 %v224_v0  ;;  %v228_v10 = vunpack.c.l.bf16 %v225_v1  ;;  %s221_s19 = scalar_lea.vmem %s1089_s3, %s1100_s15 }
  0x28   : > { %v819_v9 = vld [vmem:[%s1014_s14 + $0x78] sm:$0xff]   ;;  %v823_v18 = vld [vmem:[%s1014_s14 + $0x70] sm:$0xff]   ;;  %v827_v28 = vld [vmem:[%s1014_s14 + $0x68] sm:$0xff]   ;;  %s612_s7 = scalar_lea.hbm %s1090_s4, %s730_s24  ;;  %p865_p5 = pnand %p864_p4, %p995_p10 }
  0x29   : > { %v236_v4 = vrot.slane %v227_v2, 4  ;;  %v248_v5 = vrot.slane %v229_v3, 4  ;;  %v820_v11 = vld [vmem:[%s1014_s14 + $0xf8] sm:$0xff]   ;;  %735 = vmatprep.subr.bf16.mxu0 %v819_v9  ;;  %v230_v17 = vrot.slane %v226_v6, 4  ;;  %v242_v20 = vrot.slane %v228_v10, 4  ;;  %v824_v21 = vld [vmem:[%s1014_s14 + $0xf0] sm:$0xff]  }
  0x2a   : > { %v821_v13 = vld [vmem:[%s1014_s14 + $0x38] sm:$0xff]   ;;  %757 = vmatprep.subr.bf16.mxu1 %v820_v11  ;;  %v825_v23 = vld [vmem:[%s1014_s14 + $0x30] sm:$0xff]   ;;  %v828_v31 = vld [vmem:[%s1014_s14 + $0xe8] sm:$0xff]   ;;  %p866_p6 = pneg %p865_p5  ;;  %s928_s23 = smov [#allocation4]  }
  0x2b   : > { %v237_v7 = vadd.f32 %v236_v4, %v227_v2  ;;  %v249_v8 = vadd.f32 %v248_v5, %v229_v3  ;;  %v822_v15 = vld [vmem:[%s1014_s14 + $0xb8] sm:$0xff]   ;;  %736 = vmatpush3.bf16.msra.mxu0 %v821_v13  ;;  %v826_v25 = vld [vmem:[%s1014_s14 + $0xb0] sm:$0xff]   ;;  %v231_v27 = vadd.f32 %v230_v17, %v226_v6  ;;  %v243_v30 = vadd.f32 %v242_v20, %v228_v10  ;;  %v829_v33 = vld [vmem:[%s1014_s14 + $0x28] sm:$0xff]   ;;  %s867_s10 = sshll.u32 %s928_s23, 4  ;;  %s868_s10 = int_to_ptr.vmem [resolvable:$false] %s867_s10 }
  0x2c   : > { %758 = vmatpush3.bf16.msra.mxu1 %v822_v15  ;;  %737 = vmatprep.subr.bf16.mxu0 %v823_v18  ;;  %v830_v35 = vld [vmem:[%s1014_s14 + $0xa8] sm:$0xff]   ;;  %v831_v38 = vld [vmem:[%s1014_s14 + $0x60] sm:$0xff]   ;;  %v835_v45 = vld [vmem:[%s1014_s14 + $0x58] sm:$0xff]   ;;  %s869_s11 = scalar_lea.vmem %s868_s10, 32  ;;  %p870_p7 = scmp.lt.s32.totalorder %s615_s27, %s868_s10 }
  0x2d   : > { %v238_v12 = vrot.slane %v237_v7, 2  ;;  %v250_v14 = vrot.slane %v249_v8, 2  ;;  %759 = vmatprep.subr.bf16.mxu1 %v824_v21  ;;  %v232_v37 = vrot.slane %v231_v27, 2  ;;  %v244_v40 = vrot.slane %v243_v30, 2  ;;  %v832_v41 = vld [vmem:[%s1014_s14 + $0xe0] sm:$0xff]   ;;  %v836_v47 = vld [vmem:[%s1014_s14 + $0xd8] sm:$0xff]   ;;  %p871_p8 = scmp.lt.s32.totalorder %s869_s11, %s863_s9 }
  0x2e   : > { %v833_v42 = vld [vmem:[%s1014_s14 + $0x20] sm:$0xff]   ;;  %v837_v48 = vld [vmem:[%s1014_s14 + $0x18] sm:$0xff]   ;;  %v839_v51 = vld [vmem:[%s1014_s14 + $0x50] sm:$0xff]  }
  0x2f   : > { %v239_v16 = vadd.f32 %v238_v12, %v237_v7  ;;  %v251_v19 = vadd.f32 %v250_v14, %v249_v8  ;;  %738 = vmatpush3.bf16.msra.mxu0 %v825_v23  ;;  %v834_v43 = vld [vmem:[%s1014_s14 + $0xa0] sm:$0xff]   ;;  %v233_v44 = vadd.f32 %v232_v37, %v231_v27  ;;  %v245_v46 = vadd.f32 %v244_v40, %v243_v30  ;;  %v838_v49 = vld [vmem:[%s1014_s14 + $0x98] sm:$0xff]   ;;  %v840_v53 = vld [vmem:[%s1014_s14 + $0xd0] sm:$0xff]   ;;  %p872_p9 = por %p871_p8, %p870_p7 }
  0x30   : > { %760 = vmatpush3.bf16.msra.mxu1 %v826_v25  ;;  %739 = vmatprep.subr.bf16.mxu0 %v827_v28  ;;  %v841_v54 = vld [vmem:[%s1014_s14 + $0x10] sm:$0xff]   ;;  %v843_v57 = vld [vmem:[%s1014_s14 + $0x48] sm:$0xff]   ;;  %v847_v63 = vld [vmem:[%s1014_s14 + $0x40] sm:$0xff]  }
  0x31   : > { %v240_v22 = vrot.slane %v239_v16, 1  ;;  %v252_v24 = vrot.slane %v251_v19, 1  ;;  %761 = vmatprep.subr.bf16.mxu1 %v828_v31  ;;  %v234_v50 = vrot.slane %v233_v44, 1  ;;  %v246_v52 = vrot.slane %v245_v46, 1  ;;  %v842_v55 = vld [vmem:[%s1014_s14 + $0x90] sm:$0xff]   ;;  %v844_v59 = vld [vmem:[%s1014_s14 + $0xc8] sm:$0xff]   ;;  %p873_p12 = pnand %p872_p9, %p866_p6 }
  0x32   : > { %v845_v60 = vld [vmem:[%s1014_s14 + $0x8] sm:$0xff]   ;;  %v848_v1 = vld [vmem:[%s1014_s14 + $0xc0] sm:$0xff]  }
  0x33   : > { %v241_v26 = vadd.f32 %v240_v22, %v239_v16  ;;  %v253_v29 = vadd.f32 %v252_v24, %v251_v19  ;;  %740 = vmatpush3.bf16.msra.mxu0 %v829_v33  ;;  %v235_v56 = vadd.f32 %v234_v50, %v233_v44  ;;  %v247_v58 = vadd.f32 %v246_v52, %v245_v46  ;;  %v846_v61 = vld [vmem:[%s1014_s14 + $0x88] sm:$0xff]   ;;  %v849_v2 = vld [vmem:[%s1014_s14] sm:$0xff]  }
  0x34   : > { %762 = vmatpush3.bf16.msra.mxu1 %v830_v35  ;;  %741 = vmatprep.subr.bf16.mxu0 %v831_v38  ;;  %v850_v3 = vld [vmem:[%s1014_s14 + $0x80] sm:$0xff]  }
  0x35   : > { %v256_v32 = vmul.f32 0.125, %v241_v26  ;;  %v258_v34 = vmul.f32 0.125, %v253_v29  ;;  %763 = vmatprep.subr.bf16.mxu1 %v832_v41  ;;  %v255_v62 = vmul.f32 0.125, %v235_v56  ;;  %v257_v0 = vmul.f32 0.125, %v247_v58  ;;  %v327_v8 = vld [vmem:[%s221_s19] sm:$0x1] }
  0x37   : > { %v260_v36 = vpack.c.bf16 %v256_v32, %v256_v32  ;;  %v262_v39 = vpack.c.bf16 %v258_v34, %v258_v34  ;;  %742 = vmatpush3.bf16.msra.mxu0 %v833_v42  ;;  %v259_v4 = vpack.c.bf16 %v255_v62, %v255_v62  ;;  %v261_v5 = vpack.c.bf16 %v257_v0, %v257_v0 }
  0x38   : > { %764 = vmatpush3.bf16.msra.mxu1 %v834_v43  ;;  %743 = vmatprep.subr.bf16.mxu0 %v835_v45 }
  0x39   : > { %552 = vmatprep.mubr.bf16.mxu0 %v260_v36  ;;  %592 = vmatprep.mubr.bf16.mxu1 %v262_v39 }
  0x3a   : > { %765 = vmatprep.subr.bf16.mxu1 %v836_v47 }
  0x3b   : > { %744 = vmatpush3.bf16.msra.mxu0 %v837_v48 }
  0x3c   : > { %766 = vmatpush3.bf16.msra.mxu1 %v838_v49  ;;  %745 = vmatprep.subr.bf16.mxu0 %v839_v51 }
  0x3d   : > { %767 = vmatprep.subr.bf16.mxu1 %v840_v53 }
  0x3f   : > { %746 = vmatpush3.bf16.msra.mxu0 %v841_v54 }
  0x40   : > { %768 = vmatpush3.bf16.msra.mxu1 %v842_v55  ;;  %747 = vmatprep.subr.bf16.mxu0 %v843_v57 }
  0x41   : > { %769 = vmatprep.subr.bf16.mxu1 %v844_v59 }
  0x43   : > { %748 = vmatpush3.bf16.msra.mxu0 %v845_v60 }
  0x44   : > { %770 = vmatpush3.bf16.msra.mxu1 %v846_v61  ;;  %749 = vmatprep.subr.bf16.mxu0 %v847_v63 }
  0x45   : > { %771 = vmatprep.subr.bf16.mxu1 %v848_v1 }
  0x47   : > { %750 = vmatpush3.bf16.msra.mxu0 %v849_v2 }
  0x48   : > { %772 = vmatpush3.bf16.msra.mxu1 %v850_v3 }
  0x4a   : > { %553 = vmatmul.mubr.bf16.vlgmr.msra.gmra.mxu0 %v259_v4 }
  0x4b   : > { %593 = vmatmul.mubr.bf16.vlgmr.msra.gmra.mxu1 %v261_v5 }
 0x10a   : > { %v751_v6 = vpop.f32.mrf.mxu0 }
 0x10b   : > { %v773_v7 = vpop.f32.mrf.mxu1 }
 0x10c   : > { %v752_v9 = vpop.f32.mrf.mxu0 }
 0x10d   : > { %v753_v10 = vadd.f32 %v752_v9, %v751_v6  ;;  %v774_v11 = vpop.f32.mrf.mxu1 }
 0x10e   : > { %v754_v12 = vpop.f32.mrf.mxu0  ;;  %v775_v14 = vadd.f32 %v774_v11, %v773_v7 }
 0x10f   : > { %v555_v13 = vadd.f32 %v753_v10, %v327_v8  ;;  %v776_v15 = vpop.f32.mrf.mxu1 }
 0x110   : > { %v755_v16 = vpop.f32.mrf.mxu0 }
 0x111   : > { %v595_v17 = vadd.f32 %v775_v14, %v555_v13  ;;  %v777_v18 = vpop.f32.mrf.mxu1 }
 0x113   : > { %600 = vst [vmem:[%s205_s26] sm:$0x1] %v595_v17 }
 0x114   : > { %876 = shalt.err (!%p873_p12)
}
 0x115   : > { %s877_s12 = scalar_lea.hbm %s612_s7, 16  ;;  %s881_s15 = scalar_lea.hbm %s1090_s4, 32 }
 0x116   : > { %p878_p13 = scmp.ne.s32.totalorder %s612_s7, %s877_s12  ;;  %p882_p2 = scmp.lt.s32.totalorder %s612_s7, %s1090_s4 }
 0x117   : > { %p883_p3 = scmp.lt.s32.totalorder %s881_s15, %s877_s12 }
 0x118   : > { %p879_p0 = pnand %p878_p13, %p995_p10 }
 0x119   : > { %p884_p4 = por %p883_p3, %p882_p2 }
 0x11a   : > { %p880_p1 = pneg %p879_p0 }
 0x11c   : > { %p885_p5 = pnand %p884_p4, %p880_p1 }
 0x11e   : > { %888 = shalt.err (!%p885_p5)
}
 0x11f   : > { %779 = dma.vmem_to_hbm [thread:$0]  (%p995_p10), %s615_s27, 16, %s612_s7, %s602_s8  }
 0x120 PF: > { %p785_p6 = scmp.ge.s32.totalorder %s925_s22, 2  ;;  %s626_s18 = sand.u32 1, %s913_s20  }
 0x121   : > { %s627_s19 = scalar_lea.sflag [#allocation5], %s626_s18 }
 0x122   : > { %p782_p7 = pnand %p785_p6, %p999_p11 }
 0x124   : > { %p783_p8 = pneg %p782_p7 }
 0x126   : > { %908 = dma.done.wait (%p783_p8), %s627_s19, 16  }
 0x127   : > { %910 = vsyncadd (%p783_p8), %s627_s19, 4294967280  ;;  %p20_p9 = scmp.ge.s32.totalorder %s982_s25, 4   ;;  %s1093_s20 = smov %s917_s21 }
 0x128   : > { %s1094_s21 = smov %s921_s0  ;;  %s1095_s0 = smov %s993_s28 }
 0x129   : > { %s1096_s22 = smov %s982_s25  ;;  %22 = sbr.rel (!%p20_p9) target bundleno = 18 (0x12), region = 73 }
 0x12e   :  { %631 = vsyncpa [#allocation5], 1 }
 0x12f   :  { %633 = vsyncpa [#allocation5 + $0x1], 1 }

// kernel: _lambda_.19
= control target key start
LH: loop header
LB: loop body
LE: loop exit
PB: predicated region body
PF: predicated region fallthrough
CT: control target
= control target key end

     0   :  { %s2135_s0 = inlined_call_operand.vmem [shape: bf16[16,13824], index: 0, kind: input, shape index: {}]   ;;  %s2136_s1 = inlined_call_operand.vmem [shape: bf16[13824,512], index: 1, kind: input, shape index: {}]   ;;  %s2137_s2 = inlined_call_operand.vmem [shape: f32[1,512], index: 2, kind: input, shape index: {}]   ;;  %s2138_s3 = inlined_call_operand.vmem [shape: f32[1,512], index: 3, kind: input, shape index: {}]   ;;  %s2139_s4 = inlined_call_operand.vmem [shape: bf16[16,512], index: 4, kind: output, shape index: {}]  }
   0x1   :  { %2142 = sst [smem:[#allocation8_spill]] %s2135_s0 }
   0x2   :  { %2143 = sst [smem:[#allocation9_spill]] %s2136_s1 }
   0x3   :  { %s1744_s15 = smov 0   ;;  %s1746_s16 = smov 0  }
   0x4   :  { %s1748_s17 = smov 0   ;;  %s1750_s18 = smov 0  }
   0x5   :  { %s1752_s19 = smov 0   ;;  %s1754_s20 = smov 0  }
   0x6   :  { %s1756_s21 = smov 0   ;;  %s1758_s22 = smov 0  }
   0x7   :  { %s1760_s23 = smov 0   ;;  %s1762_s24 = smov 0  }
   0x8   :  { %s1764_s25 = smov 0  }
   0x9 LB: > { %s1339_s26 = sadd.s32 4294967295, %s1716_s25   ;;  %s26_s27 = sadd.s32 1, %s1708_s23  ;;  %s1716_s25 = sphi %s1764_s25, %s14_s25   ;;  %s1712_s24 = sphi %s1762_s24, %s2162_s24   ;;  %s1708_s23 = sphi %s1760_s23, %s2161_s23   ;;  %s1704_s22 = sphi %s1758_s22, %s2160_s22   ;;  %s1700_s21 = sphi %s1756_s21, %s2159_s21   ;;  %s1696_s20 = sphi %s1754_s20, %s2158_s20   ;;  %s1692_s19 = sphi %s1752_s19, %s2157_s19   ;;  %s1688_s18 = sphi %s1750_s18, %s2156_s18   ;;  %s1684_s17 = sphi %s1748_s17, %s2155_s17   ;;  %s1680_s16 = sphi %s1746_s16, %s2154_s16   ;;  %s1676_s15 = sphi %s1744_s15, %s2153_s15  }
   0xa   : > { %p27_p0 = scmp.ge.s32.totalorder %s26_s27, 27  ;;  %s29_s28 = sadd.s32 1, %s1712_s24 }
   0xb   : > { %s42_s29 = sadd.s32 1, %s1696_s20  ;;  %p49_p1 = scmp.ne.s32.totalorder %s1696_s20, %s1692_s19 }
   0xc   : > { %s2164_s27 = smov (%p27_p0, %s26_s27), 0  ;;  %s2166_s28 = smov (!%p27_p0, %s29_s28), %s1712_s24 }
   0xd   : > { %2144 = sst [smem:[#allocation6_spill]] %s2164_s27  ;;  %s38_s30 = ssub.s32 %s1708_s23, %s2164_s27 }
   0xe   : > { %p50_p2 = scmp.eq.s32.totalorder %s1716_s25, 0  ;;  %p31_p3 = scmp.ge.s32.totalorder %s2166_s28, 2 }
   0xf   : > { %p40_p4 = scmp.eq.s32.totalorder %s38_s30, 0  ;;  %s70_s6 = sadd.s32 1, %s1688_s18 }
  0x10   : > { %p1811_p5 = por %p50_p2, %p49_p1  ;;  %s2168_s28 = smov (%p31_p3, %s2166_s28), 0 }
  0x11   : > { %2146 = sst [smem:[#allocation7_spill]] %s2168_s28  ;;  %s66_s8 = ssub.s32 %s1712_s24, %s2168_s28 }
  0x12   : > { %s1819_s7 = scalar_select %p40_p4, %s1696_s20, %s42_s29  }
  0x13   : > { %p77_p6 = scmp.ne.s32.totalorder %s1688_s18, %s1684_s17  ;;  %s67_s9 = sor.u32 %s66_s8, %s38_s30 }
  0x14   : > { %p148_p7 = scmp.eq.s32.totalorder %s66_s8, 0  ;;  %p68_p8 = scmp.eq.s32.totalorder %s67_s9, 0 }
  0x15   : > { %p1825_p9 = por %p77_p6, %p50_p2  ;;  %s150_s11 = sadd.s32 1, %s1680_s16 }
  0x16   : > { %p160_p10 = scmp.ne.s32.totalorder %s1680_s16, %s1676_s15  ;;  %p161_p11 = scmp.eq.s32.totalorder %s1339_s26, 53 }
  0x17   : > { %s1833_s12 = scalar_select %p68_p8, %s1688_s18, %s70_s6  }
  0x18   : > { %s1836_s13 = scalar_select %p148_p7, %s1680_s16, %s150_s11  }
  0x19   : > { %p1838_p12 = por %p161_p11, %p160_p10  ;;  %p1342_p13 = scmp.ge.s32.totalorder %s1716_s25, 54 }
  0x1b   : > { %183 = sbr.rel (%p1342_p13) target bundleno = 86 (0x56), region = 16 }
  0x20   : > { %186 = sbr.rel (!%p1811_p5) target bundleno = 44 (0x2c), region = 20  ;;  %s188_s29 = sand.u32 (%p1811_p5), 1, %s1696_s20  }
  0x21   : > { %s1434_s30 = sshll.u32 (%p1811_p5), %s1708_s23, 4  ;;  %s1343_s8 = sshll.u32 (%p1811_p5), %s188_s29, 5 }
  0x22   : > { %s2149_s0 = sld [smem:[#allocation8_spill]] (%p1811_p5)  ;;  %s190_s26 = scalar_lea.vmem (%p1811_p5), [#allocation3], %s1343_s8 }
  0x28   : > { %s196_s11 = scalar_lea.vmem %s2149_s0, %s1434_s30 }
  0x29   : > { %v209_v0 = vld [vmem:[%s196_s11] sm:$0xff]  ;;  %v211_v1 = vld [vmem:[%s196_s11 + $0x8] sm:$0xff]  ;;  %v213_v2 = vld [vmem:[%s196_s11 + $0x1b0] sm:$0xff] }
  0x2a   : > { %210 = vst [vmem:[%s190_s26] sm:$0xff] %v209_v0  ;;  %212 = vst [vmem:[%s190_s26 + $0x8] sm:$0xff] %v211_v1  ;;  %v215_v3 = vld [vmem:[%s196_s11 + $0x1b8] sm:$0xff] }
  0x2b   : > { %214 = vst [vmem:[%s190_s26 + $0x10] sm:$0xff] %v213_v2  ;;  %216 = vst [vmem:[%s190_s26 + $0x18] sm:$0xff] %v215_v3 }
  0x2c PF: > { %222 = sbr.rel (!%p1825_p9) target bundleno = 86 (0x56), region = 43  ;;  %s224_s5 = sand.u32 (%p1825_p9), 1, %s1688_s18  }
  0x2d   : > { %s1348_s29 = sshll.u32 (%p1825_p9), %s1712_s24, 1  ;;  %s1346_s6 = sshll.u32 (%p1825_p9), %s224_s5, 9 }
  0x2e   : > { %s1435_s30 = sshll.u32 (%p1825_p9), %s1708_s23, 8  ;;  %s2150_s1 = sld [smem:[#allocation9_spill]] (%p1825_p9) }
  0x2f   : > { %s230_s9 = sadd.s32 (%p1825_p9), %s1435_s30, %s1348_s29  ;;  %s1863_s10 = scalar_lea.vmem (%p1825_p9), [#allocation4], %s1346_s6 }
  0x30   : > { %s1350_s0 = sshll.u32 (%p1825_p9), %s230_s9, 2 }
  0x34   : > { %s1858_s27 = scalar_lea.vmem %s2150_s1, %s1350_s0 }
  0x35   : > { %v387_v4 = vld [vmem:[%s1858_s27] sm:$0xff]  ;;  %v389_v5 = vld [vmem:[%s1858_s27 + $0x10] sm:$0xff] }
  0x36   : > { %v391_v6 = vld [vmem:[%s1858_s27 + $0x20] sm:$0xff]  ;;  %388 = vst [vmem:[%s1863_s10] sm:$0xff] %v387_v4  ;;  %390 = vst [vmem:[%s1863_s10 + $0x8] sm:$0xff] %v389_v5  ;;  %v393_v7 = vld [vmem:[%s1858_s27 + $0x30] sm:$0xff] }
  0x37   : > { %392 = vst [vmem:[%s1863_s10 + $0x10] sm:$0xff] %v391_v6  ;;  %v395_v8 = vld [vmem:[%s1858_s27 + $0x40] sm:$0xff]  ;;  %v397_v9 = vld [vmem:[%s1858_s27 + $0x50] sm:$0xff]  ;;  %394 = vst [vmem:[%s1863_s10 + $0x18] sm:$0xff] %v393_v7 }
  0x38   : > { %396 = vst [vmem:[%s1863_s10 + $0x20] sm:$0xff] %v395_v8  ;;  %398 = vst [vmem:[%s1863_s10 + $0x28] sm:$0xff] %v397_v9  ;;  %v399_v10 = vld [vmem:[%s1858_s27 + $0x60] sm:$0xff]  ;;  %v401_v11 = vld [vmem:[%s1858_s27 + $0x70] sm:$0xff] }
  0x39   : > { %v403_v12 = vld [vmem:[%s1858_s27 + $0x80] sm:$0xff]  ;;  %400 = vst [vmem:[%s1863_s10 + $0x30] sm:$0xff] %v399_v10  ;;  %402 = vst [vmem:[%s1863_s10 + $0x38] sm:$0xff] %v401_v11  ;;  %v405_v13 = vld [vmem:[%s1858_s27 + $0x90] sm:$0xff] }
  0x3a   : > { %404 = vst [vmem:[%s1863_s10 + $0x40] sm:$0xff] %v403_v12  ;;  %v407_v14 = vld [vmem:[%s1858_s27 + $0xa0] sm:$0xff]  ;;  %v409_v15 = vld [vmem:[%s1858_s27 + $0xb0] sm:$0xff]  ;;  %406 = vst [vmem:[%s1863_s10 + $0x48] sm:$0xff] %v405_v13 }
  0x3b   : > { %408 = vst [vmem:[%s1863_s10 + $0x50] sm:$0xff] %v407_v14  ;;  %410 = vst [vmem:[%s1863_s10 + $0x58] sm:$0xff] %v409_v15  ;;  %v411_v16 = vld [vmem:[%s1858_s27 + $0xc0] sm:$0xff]  ;;  %v413_v17 = vld [vmem:[%s1858_s27 + $0xd0] sm:$0xff] }
  0x3c   : > { %v415_v18 = vld [vmem:[%s1858_s27 + $0xe0] sm:$0xff]  ;;  %412 = vst [vmem:[%s1863_s10 + $0x60] sm:$0xff] %v411_v16  ;;  %414 = vst [vmem:[%s1863_s10 + $0x68] sm:$0xff] %v413_v17  ;;  %v417_v19 = vld [vmem:[%s1858_s27 + $0xf0] sm:$0xff] }
  0x3d   : > { %416 = vst [vmem:[%s1863_s10 + $0x70] sm:$0xff] %v415_v18  ;;  %v419_v20 = vld [vmem:[%s1858_s27 + $0x100] sm:$0xff]  ;;  %v421_v21 = vld [vmem:[%s1858_s27 + $0x110] sm:$0xff]  ;;  %418 = vst [vmem:[%s1863_s10 + $0x78] sm:$0xff] %v417_v19 }
  0x3e   : > { %420 = vst [vmem:[%s1863_s10 + $0x80] sm:$0xff] %v419_v20  ;;  %422 = vst [vmem:[%s1863_s10 + $0x88] sm:$0xff] %v421_v21  ;;  %v423_v22 = vld [vmem:[%s1858_s27 + $0x120] sm:$0xff]  ;;  %v425_v23 = vld [vmem:[%s1858_s27 + $0x130] sm:$0xff] }
  0x3f   : > { %v427_v24 = vld [vmem:[%s1858_s27 + $0x140] sm:$0xff]  ;;  %424 = vst [vmem:[%s1863_s10 + $0x90] sm:$0xff] %v423_v22  ;;  %426 = vst [vmem:[%s1863_s10 + $0x98] sm:$0xff] %v425_v23  ;;  %v429_v25 = vld [vmem:[%s1858_s27 + $0x150] sm:$0xff] }
  0x40   : > { %428 = vst [vmem:[%s1863_s10 + $0xa0] sm:$0xff] %v427_v24  ;;  %v431_v26 = vld [vmem:[%s1858_s27 + $0x160] sm:$0xff]  ;;  %v433_v27 = vld [vmem:[%s1858_s27 + $0x170] sm:$0xff]  ;;  %430 = vst [vmem:[%s1863_s10 + $0xa8] sm:$0xff] %v429_v25 }
  0x41   : > { %432 = vst [vmem:[%s1863_s10 + $0xb0] sm:$0xff] %v431_v26  ;;  %434 = vst [vmem:[%s1863_s10 + $0xb8] sm:$0xff] %v433_v27  ;;  %v435_v28 = vld [vmem:[%s1858_s27 + $0x180] sm:$0xff]  ;;  %v437_v29 = vld [vmem:[%s1858_s27 + $0x190] sm:$0xff] }
  0x42   : > { %v439_v30 = vld [vmem:[%s1858_s27 + $0x1a0] sm:$0xff]  ;;  %436 = vst [vmem:[%s1863_s10 + $0xc0] sm:$0xff] %v435_v28  ;;  %438 = vst [vmem:[%s1863_s10 + $0xc8] sm:$0xff] %v437_v29  ;;  %v441_v31 = vld [vmem:[%s1858_s27 + $0x1b0] sm:$0xff] }
  0x43   : > { %440 = vst [vmem:[%s1863_s10 + $0xd0] sm:$0xff] %v439_v30  ;;  %v443_v32 = vld [vmem:[%s1858_s27 + $0x1c0] sm:$0xff]  ;;  %v445_v33 = vld [vmem:[%s1858_s27 + $0x1d0] sm:$0xff]  ;;  %442 = vst [vmem:[%s1863_s10 + $0xd8] sm:$0xff] %v441_v31 }
  0x44   : > { %444 = vst [vmem:[%s1863_s10 + $0xe0] sm:$0xff] %v443_v32  ;;  %446 = vst [vmem:[%s1863_s10 + $0xe8] sm:$0xff] %v445_v33  ;;  %v447_v34 = vld [vmem:[%s1858_s27 + $0x1e0] sm:$0xff]  ;;  %v449_v35 = vld [vmem:[%s1858_s27 + $0x1f0] sm:$0xff] }
  0x45   : > { %v451_v36 = vld [vmem:[%s1858_s27 + $0x200] sm:$0xff]  ;;  %448 = vst [vmem:[%s1863_s10 + $0xf0] sm:$0xff] %v447_v34  ;;  %450 = vst [vmem:[%s1863_s10 + $0xf8] sm:$0xff] %v449_v35  ;;  %v453_v37 = vld [vmem:[%s1858_s27 + $0x210] sm:$0xff] }
  0x46   : > { %452 = vst [vmem:[%s1863_s10 + $0x100] sm:$0xff] %v451_v36  ;;  %v455_v38 = vld [vmem:[%s1858_s27 + $0x220] sm:$0xff]  ;;  %v457_v39 = vld [vmem:[%s1858_s27 + $0x230] sm:$0xff]  ;;  %454 = vst [vmem:[%s1863_s10 + $0x108] sm:$0xff] %v453_v37 }
  0x47   : > { %456 = vst [vmem:[%s1863_s10 + $0x110] sm:$0xff] %v455_v38  ;;  %458 = vst [vmem:[%s1863_s10 + $0x118] sm:$0xff] %v457_v39  ;;  %v459_v40 = vld [vmem:[%s1858_s27 + $0x240] sm:$0xff]  ;;  %v461_v41 = vld [vmem:[%s1858_s27 + $0x250] sm:$0xff] }
  0x48   : > { %v463_v42 = vld [vmem:[%s1858_s27 + $0x260] sm:$0xff]  ;;  %460 = vst [vmem:[%s1863_s10 + $0x120] sm:$0xff] %v459_v40  ;;  %462 = vst [vmem:[%s1863_s10 + $0x128] sm:$0xff] %v461_v41  ;;  %v465_v43 = vld [vmem:[%s1858_s27 + $0x270] sm:$0xff] }
  0x49   : > { %464 = vst [vmem:[%s1863_s10 + $0x130] sm:$0xff] %v463_v42  ;;  %v467_v44 = vld [vmem:[%s1858_s27 + $0x280] sm:$0xff]  ;;  %v469_v45 = vld [vmem:[%s1858_s27 + $0x290] sm:$0xff]  ;;  %466 = vst [vmem:[%s1863_s10 + $0x138] sm:$0xff] %v465_v43 }
  0x4a   : > { %468 = vst [vmem:[%s1863_s10 + $0x140] sm:$0xff] %v467_v44  ;;  %470 = vst [vmem:[%s1863_s10 + $0x148] sm:$0xff] %v469_v45  ;;  %v471_v46 = vld [vmem:[%s1858_s27 + $0x2a0] sm:$0xff]  ;;  %v473_v47 = vld [vmem:[%s1858_s27 + $0x2b0] sm:$0xff] }
  0x4b   : > { %v475_v48 = vld [vmem:[%s1858_s27 + $0x2c0] sm:$0xff]  ;;  %472 = vst [vmem:[%s1863_s10 + $0x150] sm:$0xff] %v471_v46  ;;  %474 = vst [vmem:[%s1863_s10 + $0x158] sm:$0xff] %v473_v47  ;;  %v477_v49 = vld [vmem:[%s1858_s27 + $0x2d0] sm:$0xff] }
  0x4c   : > { %476 = vst [vmem:[%s1863_s10 + $0x160] sm:$0xff] %v475_v48  ;;  %v479_v50 = vld [vmem:[%s1858_s27 + $0x2e0] sm:$0xff]  ;;  %v481_v51 = vld [vmem:[%s1858_s27 + $0x2f0] sm:$0xff]  ;;  %478 = vst [vmem:[%s1863_s10 + $0x168] sm:$0xff] %v477_v49 }
  0x4d   : > { %480 = vst [vmem:[%s1863_s10 + $0x170] sm:$0xff] %v479_v50  ;;  %482 = vst [vmem:[%s1863_s10 + $0x178] sm:$0xff] %v481_v51  ;;  %v483_v52 = vld [vmem:[%s1858_s27 + $0x300] sm:$0xff]  ;;  %v485_v53 = vld [vmem:[%s1858_s27 + $0x310] sm:$0xff] }
  0x4e   : > { %v487_v54 = vld [vmem:[%s1858_s27 + $0x320] sm:$0xff]  ;;  %484 = vst [vmem:[%s1863_s10 + $0x180] sm:$0xff] %v483_v52  ;;  %486 = vst [vmem:[%s1863_s10 + $0x188] sm:$0xff] %v485_v53  ;;  %v489_v55 = vld [vmem:[%s1858_s27 + $0x330] sm:$0xff] }
  0x4f   : > { %488 = vst [vmem:[%s1863_s10 + $0x190] sm:$0xff] %v487_v54  ;;  %v491_v56 = vld [vmem:[%s1858_s27 + $0x340] sm:$0xff]  ;;  %v493_v57 = vld [vmem:[%s1858_s27 + $0x350] sm:$0xff]  ;;  %490 = vst [vmem:[%s1863_s10 + $0x198] sm:$0xff] %v489_v55 }
  0x50   : > { %492 = vst [vmem:[%s1863_s10 + $0x1a0] sm:$0xff] %v491_v56  ;;  %494 = vst [vmem:[%s1863_s10 + $0x1a8] sm:$0xff] %v493_v57  ;;  %v495_v58 = vld [vmem:[%s1858_s27 + $0x360] sm:$0xff]  ;;  %v497_v59 = vld [vmem:[%s1858_s27 + $0x370] sm:$0xff] }
  0x51   : > { %v499_v60 = vld [vmem:[%s1858_s27 + $0x380] sm:$0xff]  ;;  %496 = vst [vmem:[%s1863_s10 + $0x1b0] sm:$0xff] %v495_v58  ;;  %498 = vst [vmem:[%s1863_s10 + $0x1b8] sm:$0xff] %v497_v59  ;;  %v501_v61 = vld [vmem:[%s1858_s27 + $0x390] sm:$0xff] }
  0x52   : > { %500 = vst [vmem:[%s1863_s10 + $0x1c0] sm:$0xff] %v499_v60  ;;  %v503_v62 = vld [vmem:[%s1858_s27 + $0x3a0] sm:$0xff]  ;;  %v505_v63 = vld [vmem:[%s1858_s27 + $0x3b0] sm:$0xff]  ;;  %502 = vst [vmem:[%s1863_s10 + $0x1c8] sm:$0xff] %v501_v61 }
  0x53   : > { %504 = vst [vmem:[%s1863_s10 + $0x1d0] sm:$0xff] %v503_v62  ;;  %506 = vst [vmem:[%s1863_s10 + $0x1d8] sm:$0xff] %v505_v63  ;;  %v507_v0 = vld [vmem:[%s1858_s27 + $0x3c0] sm:$0xff]  ;;  %v509_v1 = vld [vmem:[%s1858_s27 + $0x3d0] sm:$0xff] }
  0x54   : > { %v511_v2 = vld [vmem:[%s1858_s27 + $0x3e0] sm:$0xff]  ;;  %508 = vst [vmem:[%s1863_s10 + $0x1e0] sm:$0xff] %v507_v0  ;;  %510 = vst [vmem:[%s1863_s10 + $0x1e8] sm:$0xff] %v509_v1  ;;  %v513_v3 = vld [vmem:[%s1858_s27 + $0x3f0] sm:$0xff] }
  0x55   : > { %512 = vst [vmem:[%s1863_s10 + $0x1f0] sm:$0xff] %v511_v2  ;;  %514 = vst [vmem:[%s1863_s10 + $0x1f8] sm:$0xff] %v513_v3 }
  0x56 PF: > { %p1351_p0 = scmp.ge.s32.totalorder %s1716_s25, 1  ;;  %p535_p1 = scmp.lt.s32.totalorder %s1716_s25, 55 }
  0x58   : > { %p536_p2 = pnand %p1351_p0, %p535_p1 }
  0x59   : > { %s542_s0 = sand.u32 (!%p536_p2), 1, %s1692_s19   ;;  %s549_s28 = sand.u32 (!%p536_p2), 1, %s1684_s17  }
  0x5a   : > { %539 = sbr.rel (%p536_p2) target bundleno = 400 (0x190), region = 89  ;;  %s1352_s11 = sshll.u32 (!%p536_p2), %s542_s0, 5 }
  0x5b   : > { %s1353_s26 = sshll.u32 (!%p536_p2), %s549_s28, 9  ;;  %s582_s5 = sand.u32 (!%p536_p2), 1, %s1676_s15  }
  0x5c   : > { %s1355_s29 = sshll.u32 (!%p536_p2), %s1704_s22, 1  ;;  %s1354_s27 = sshll.u32 (!%p536_p2), %s582_s5, 4 }
  0x5d   : > { %p590_p3 = scmp.lt.s32.totalorder (!%p536_p2), %s1355_s29, 3  ;;  %s2006_s19 = scalar_lea.vmem (!%p536_p2), [#allocation3], %s1352_s11 }
  0x5e   : > { %s2008_s17 = scalar_lea.vmem (!%p536_p2), [#allocation4], %s1353_s26  ;;  %s2010_s15 = scalar_lea.vmem (!%p536_p2), [#allocation5], %s1354_s27 }
  0x5f   : > { %s2170_s29 = smov (!%p590_p3, %s1355_s29), 3  ;;  %p1357_p4 = scmp.ne.s32.totalorder %s1700_s21, 0 }
  0x60   : > { %s592_s9 = scalar_lea.vmem %s2137_s2, %s2170_s29  ;;  %s597_s1 = scalar_lea.vmem %s2138_s3, %s2170_s29 }
  0x61   : > { %604 = sbr.rel (%p1357_p4) target bundleno = 105 (0x69), region = 101 }
  0x66   : > { %v1718_v4 = vmov 0.0  }
  0x67   : > { %605 = vst [vmem:[#allocation2 + $0x10] sm:$0xff] %v1718_v4  ;;  %606 = vst [vmem:[#allocation2] sm:$0xff] %v1718_v4 }
  0x68   : > { %607 = vst [vmem:[#allocation2 + $0x18] sm:$0xff] %v1718_v4  ;;  %608 = vst [vmem:[#allocation2 + $0x8] sm:$0xff] %v1718_v4 }
  0x69 PF: > { %v1528_v5 = vld [vmem:[%s2008_s17 + $0x74] ss:$8 sps:$4 sm:$0xff]   ;;  %v1532_v7 = vld [vmem:[%s2008_s17 + $0x70] ss:$8 sps:$4 sm:$0xff]   ;;  %v1534_v9 = vld [vmem:[%s2008_s17 + $0x64] ss:$8 sps:$4 sm:$0xff]  }
  0x6a   : > { %v1530_v6 = vld [vmem:[%s2008_s17 + $0x174] ss:$8 sps:$4 sm:$0xff]   ;;  %1021 = vmatprep.subr.bf16.mxu0 %v1528_v5  ;;  %v1533_v8 = vld [vmem:[%s2008_s17 + $0x170] ss:$8 sps:$4 sm:$0xff]   ;;  %v1536_v10 = vld [vmem:[%s2008_s17 + $0x164] ss:$8 sps:$4 sm:$0xff]  }
  0x6b   : > { %1064 = vmatprep.subr.bf16.mxu1 %v1530_v6  ;;  %1022 = vmatpush1.bf16.msra.mxu0 %v1532_v7  ;;  %v1538_v11 = vld [vmem:[%s2008_s17 + $0x60] ss:$8 sps:$4 sm:$0xff]   ;;  %v1540_v13 = vld [vmem:[%s2008_s17 + $0x54] ss:$8 sps:$4 sm:$0xff]   ;;  %v1544_v15 = vld [vmem:[%s2008_s17 + $0x50] ss:$8 sps:$4 sm:$0xff]  }
  0x6c   : > { %1065 = vmatpush1.bf16.msra.mxu1 %v1533_v8  ;;  %1023 = vmatprep.subr.bf16.mxu0 %v1534_v9  ;;  %v1539_v12 = vld [vmem:[%s2008_s17 + $0x160] ss:$8 sps:$4 sm:$0xff]   ;;  %v1542_v14 = vld [vmem:[%s2008_s17 + $0x154] ss:$8 sps:$4 sm:$0xff]   ;;  %v1545_v16 = vld [vmem:[%s2008_s17 + $0x150] ss:$8 sps:$4 sm:$0xff]  }
  0x6d   : > { %1066 = vmatprep.subr.bf16.mxu1 %v1536_v10  ;;  %v1546_v17 = vld [vmem:[%s2008_s17 + $0x44] ss:$8 sps:$4 sm:$0xff]   ;;  %v1550_v19 = vld [vmem:[%s2008_s17 + $0x40] ss:$8 sps:$4 sm:$0xff]   ;;  %v1552_v21 = vld [vmem:[%s2008_s17 + $0x34] ss:$8 sps:$4 sm:$0xff]  }
  0x6e   : > { %v1548_v18 = vld [vmem:[%s2008_s17 + $0x144] ss:$8 sps:$4 sm:$0xff]   ;;  %v1551_v20 = vld [vmem:[%s2008_s17 + $0x140] ss:$8 sps:$4 sm:$0xff]   ;;  %v1554_v22 = vld [vmem:[%s2008_s17 + $0x134] ss:$8 sps:$4 sm:$0xff]  }
  0x6f   : > { %1024 = vmatpush1.bf16.msra.mxu0 %v1538_v11  ;;  %v1556_v23 = vld [vmem:[%s2008_s17 + $0x30] ss:$8 sps:$4 sm:$0xff]   ;;  %v1558_v25 = vld [vmem:[%s2008_s17 + $0x24] ss:$8 sps:$4 sm:$0xff]   ;;  %v1562_v27 = vld [vmem:[%s2008_s17 + $0x20] ss:$8 sps:$4 sm:$0xff]  }
  0x70   : > { %1067 = vmatpush1.bf16.msra.mxu1 %v1539_v12  ;;  %1025 = vmatprep.subr.bf16.mxu0 %v1540_v13  ;;  %v1557_v24 = vld [vmem:[%s2008_s17 + $0x130] ss:$8 sps:$4 sm:$0xff]   ;;  %v1560_v26 = vld [vmem:[%s2008_s17 + $0x124] ss:$8 sps:$4 sm:$0xff]   ;;  %v1563_v28 = vld [vmem:[%s2008_s17 + $0x120] ss:$8 sps:$4 sm:$0xff]  }
  0x71   : > { %1068 = vmatprep.subr.bf16.mxu1 %v1542_v14  ;;  %v1564_v29 = vld [vmem:[%s2008_s17 + $0x14] ss:$8 sps:$4 sm:$0xff]   ;;  %v1568_v31 = vld [vmem:[%s2008_s17 + $0x10] ss:$8 sps:$4 sm:$0xff]   ;;  %v1570_v33 = vld [vmem:[%s2008_s17 + $0x4] ss:$8 sps:$4 sm:$0xff]  }
  0x72   : > { %v1566_v30 = vld [vmem:[%s2008_s17 + $0x114] ss:$8 sps:$4 sm:$0xff]   ;;  %v1569_v32 = vld [vmem:[%s2008_s17 + $0x110] ss:$8 sps:$4 sm:$0xff]   ;;  %v1572_v34 = vld [vmem:[%s2008_s17 + $0x104] ss:$8 sps:$4 sm:$0xff]  }
  0x73   : > { %1026 = vmatpush1.bf16.msra.mxu0 %v1544_v15  ;;  %v1574_v35 = vld [vmem:[%s2008_s17] ss:$8 sps:$4 sm:$0xff]   ;;  %v1576_v37 = vld [vmem:[%s2008_s17 + $0xf4] ss:$8 sps:$4 sm:$0xff]   ;;  %v1580_v39 = vld [vmem:[%s2008_s17 + $0xf0] ss:$8 sps:$4 sm:$0xff]  }
  0x74   : > { %1069 = vmatpush1.bf16.msra.mxu1 %v1545_v16  ;;  %1027 = vmatprep.subr.bf16.mxu0 %v1546_v17  ;;  %v1575_v36 = vld [vmem:[%s2008_s17 + $0x100] ss:$8 sps:$4 sm:$0xff]   ;;  %v1578_v38 = vld [vmem:[%s2008_s17 + $0x1f4] ss:$8 sps:$4 sm:$0xff]   ;;  %v1581_v40 = vld [vmem:[%s2008_s17 + $0x1f0] ss:$8 sps:$4 sm:$0xff]  }
  0x75   : > { %1070 = vmatprep.subr.bf16.mxu1 %v1548_v18  ;;  %v1582_v41 = vld [vmem:[%s2008_s17 + $0xe4] ss:$8 sps:$4 sm:$0xff]   ;;  %v1586_v43 = vld [vmem:[%s2008_s17 + $0xe0] ss:$8 sps:$4 sm:$0xff]   ;;  %v1588_v45 = vld [vmem:[%s2008_s17 + $0xd4] ss:$8 sps:$4 sm:$0xff]  }
  0x76   : > { %v1584_v42 = vld [vmem:[%s2008_s17 + $0x1e4] ss:$8 sps:$4 sm:$0xff]   ;;  %v1587_v44 = vld [vmem:[%s2008_s17 + $0x1e0] ss:$8 sps:$4 sm:$0xff]   ;;  %v1590_v46 = vld [vmem:[%s2008_s17 + $0x1d4] ss:$8 sps:$4 sm:$0xff]  }
  0x77   : > { %1028 = vmatpush1.bf16.msra.mxu0 %v1550_v19  ;;  %v1592_v47 = vld [vmem:[%s2008_s17 + $0xd0] ss:$8 sps:$4 sm:$0xff]   ;;  %v1594_v49 = vld [vmem:[%s2008_s17 + $0xc4] ss:$8 sps:$4 sm:$0xff]   ;;  %v1598_v51 = vld [vmem:[%s2008_s17 + $0xc0] ss:$8 sps:$4 sm:$0xff]  }
  0x78   : > { %1071 = vmatpush1.bf16.msra.mxu1 %v1551_v20  ;;  %1029 = vmatprep.subr.bf16.mxu0 %v1552_v21  ;;  %v1593_v48 = vld [vmem:[%s2008_s17 + $0x1d0] ss:$8 sps:$4 sm:$0xff]   ;;  %v1596_v50 = vld [vmem:[%s2008_s17 + $0x1c4] ss:$8 sps:$4 sm:$0xff]   ;;  %v1599_v53 = vld [vmem:[%s2008_s17 + $0x1c0] ss:$8 sps:$4 sm:$0xff]  }
  0x79   : > { %1072 = vmatprep.subr.bf16.mxu1 %v1554_v22  ;;  %v1626_v52 = vld [vmem:[%s2006_s19 + $0x4] ss:$16 sps:$4 sm:$0xff]   ;;  %v1629_v56 = vld [vmem:[%s2006_s19 + $0xc] ss:$16 sps:$4 sm:$0xff]   ;;  %v1604_v57 = vld [vmem:[%s2008_s17 + $0xb0] ss:$8 sps:$4 sm:$0xff]  }
  0x7a   : > { %v1600_v54 = vld [vmem:[%s2008_s17 + $0xb4] ss:$8 sps:$4 sm:$0xff]   ;;  %1053 = vmatprep.mubr.bf16.mxu0 %v1626_v52  ;;  %1096 = vmatprep.mubr.bf16.mxu1 %v1629_v56  ;;  %v1605_v58 = vld [vmem:[%s2008_s17 + $0x1b0] ss:$8 sps:$4 sm:$0xff]   ;;  %v1606_v59 = vld [vmem:[%s2008_s17 + $0xa4] ss:$8 sps:$4 sm:$0xff]  }
  0x7b   : > { %1030 = vmatpush1.bf16.msra.mxu0 %v1556_v23  ;;  %v1602_v55 = vld [vmem:[%s2008_s17 + $0x1b4] ss:$8 sps:$4 sm:$0xff]   ;;  %v1608_v60 = vld [vmem:[%s2008_s17 + $0x1a4] ss:$8 sps:$4 sm:$0xff]   ;;  %v1610_v61 = vld [vmem:[%s2008_s17 + $0xa0] ss:$8 sps:$4 sm:$0xff]  }
  0x7c   : > { %1073 = vmatpush1.bf16.msra.mxu1 %v1557_v24  ;;  %1031 = vmatprep.subr.bf16.mxu0 %v1558_v25  ;;  %v1611_v62 = vld [vmem:[%s2008_s17 + $0x1a0] ss:$8 sps:$4 sm:$0xff]   ;;  %v1612_v63 = vld [vmem:[%s2008_s17 + $0x94] ss:$8 sps:$4 sm:$0xff]   ;;  %v1616_v1 = vld [vmem:[%s2008_s17 + $0x90] ss:$8 sps:$4 sm:$0xff]  }
  0x7d   : > { %1074 = vmatprep.subr.bf16.mxu1 %v1560_v26  ;;  %v1614_v0 = vld [vmem:[%s2008_s17 + $0x194] ss:$8 sps:$4 sm:$0xff]   ;;  %v1617_v2 = vld [vmem:[%s2008_s17 + $0x190] ss:$8 sps:$4 sm:$0xff]   ;;  %v1618_v3 = vld [vmem:[%s2008_s17 + $0x84] ss:$8 sps:$4 sm:$0xff]  }
  0x7e   : > { %v1620_v4 = vld [vmem:[%s2008_s17 + $0x184] ss:$8 sps:$4 sm:$0xff]   ;;  %v1622_v5 = vld [vmem:[%s2008_s17 + $0x80] ss:$8 sps:$4 sm:$0xff]   ;;  %v609_v10 = vld [vmem:[#allocation2 + $0x10] sm:$0xff]  ;;  %p1426_p5 = scmp.ne.s32.totalorder %s1700_s21, 26 }
  0x7f   : > { %1032 = vmatpush1.bf16.msra.mxu0 %v1562_v27  ;;  %v1623_v6 = vld [vmem:[%s2008_s17 + $0x180] ss:$8 sps:$4 sm:$0xff]   ;;  %v611_v19 = vld [vmem:[#allocation2 + $0x18] sm:$0xff] }
  0x80   : > { %1075 = vmatpush1.bf16.msra.mxu1 %v1563_v28  ;;  %1033 = vmatprep.subr.bf16.mxu0 %v1564_v29  ;;  %v1624_v7 = vld [vmem:[%s2006_s19] ss:$16 sps:$4 sm:$0xff]   ;;  %v1627_v8 = vld [vmem:[%s2006_s19 + $0x8] ss:$16 sps:$4 sm:$0xff]  }
  0x81   : > { %1076 = vmatprep.subr.bf16.mxu1 %v1566_v30  ;;  %v610_v14 = vld [vmem:[#allocation2] sm:$0xff]  ;;  %v612_v24 = vld [vmem:[#allocation2 + $0x8] sm:$0xff] }
  0x83   : > { %1034 = vmatpush1.bf16.msra.mxu0 %v1568_v31 }
  0x84   : > { %1077 = vmatpush1.bf16.msra.mxu1 %v1569_v32  ;;  %1035 = vmatprep.subr.bf16.mxu0 %v1570_v33 }
  0x85   : > { %1078 = vmatprep.subr.bf16.mxu1 %v1572_v34 }
  0x87   : > { %1036 = vmatpush1.bf16.msra.mxu0 %v1574_v35 }
  0x88   : > { %1079 = vmatpush1.bf16.msra.mxu1 %v1575_v36  ;;  %1037 = vmatprep.subr.bf16.mxu0 %v1576_v37 }
  0x89   : > { %1080 = vmatprep.subr.bf16.mxu1 %v1578_v38 }
  0x8b   : > { %1038 = vmatpush2.bf16.msra.mxu0 %v1580_v39 }
  0x8c   : > { %1081 = vmatpush2.bf16.msra.mxu1 %v1581_v40  ;;  %1039 = vmatprep.subr.bf16.mxu0 %v1582_v41 }
  0x8d   : > { %1082 = vmatprep.subr.bf16.mxu1 %v1584_v42 }
  0x8f   : > { %1040 = vmatpush2.bf16.msra.mxu0 %v1586_v43 }
  0x90   : > { %1083 = vmatpush2.bf16.msra.mxu1 %v1587_v44  ;;  %1041 = vmatprep.subr.bf16.mxu0 %v1588_v45 }
  0x91   : > { %1084 = vmatprep.subr.bf16.mxu1 %v1590_v46 }
  0x93   : > { %1042 = vmatpush2.bf16.msra.mxu0 %v1592_v47 }
  0x94   : > { %1085 = vmatpush2.bf16.msra.mxu1 %v1593_v48  ;;  %1043 = vmatprep.subr.bf16.mxu0 %v1594_v49 }
  0x95   : > { %1086 = vmatprep.subr.bf16.mxu1 %v1596_v50 }
  0x97   : > { %1044 = vmatpush2.bf16.msra.mxu0 %v1598_v51 }
  0x98   : > { %1087 = vmatpush2.bf16.msra.mxu1 %v1599_v53  ;;  %1045 = vmatprep.subr.bf16.mxu0 %v1600_v54 }
  0x99   : > { %1088 = vmatprep.subr.bf16.mxu1 %v1602_v55 }
  0x9b   : > { %1046 = vmatpush2.bf16.msra.mxu0 %v1604_v57 }
  0x9c   : > { %1089 = vmatpush2.bf16.msra.mxu1 %v1605_v58  ;;  %1047 = vmatprep.subr.bf16.mxu0 %v1606_v59 }
  0x9d   : > { %1090 = vmatprep.subr.bf16.mxu1 %v1608_v60 }
  0x9f   : > { %1048 = vmatpush2.bf16.msra.mxu0 %v1610_v61 }
  0xa0   : > { %1091 = vmatpush2.bf16.msra.mxu1 %v1611_v62  ;;  %1049 = vmatprep.subr.bf16.mxu0 %v1612_v63 }
  0xa1   : > { %1092 = vmatprep.subr.bf16.mxu1 %v1614_v0 }
  0xa3   : > { %1050 = vmatpush2.bf16.msra.mxu0 %v1616_v1 }
  0xa4   : > { %1093 = vmatpush2.bf16.msra.mxu1 %v1617_v2  ;;  %1051 = vmatprep.subr.bf16.mxu0 %v1618_v3 }
  0xa5   : > { %1094 = vmatprep.subr.bf16.mxu1 %v1620_v4 }
  0xa7   : > { %1052 = vmatpush2.bf16.msra.mxu0 %v1622_v5 }
  0xa8   : > { %1095 = vmatpush2.bf16.msra.mxu1 %v1623_v6 }
  0xaa   : > { %1054 = vmatmul.mubr.bf16.vlgmr.msra.gmra.mxu0 %v1624_v7 }
  0xab   : > { %1097 = vmatmul.mubr.bf16.vlgmr.msra.gmra.mxu1 %v1627_v8 }
 0x16a   : > { %v1055_v9 = vpop.f32.mrf.mxu0 }
 0x16b   : > { %v1098_v11 = vpop.f32.mrf.mxu1 }
 0x16c   : > { %v1099_v12 = vadd.f32 %v1098_v11, %v1055_v9  ;;  %v1057_v13 = vpop.f32.mrf.mxu0 }
 0x16d   : > { %v1100_v15 = vpop.f32.mrf.mxu1 }
 0x16e   : > { %v1107_v16 = vadd.f32 %v1099_v12, %v609_v10  ;;  %v1101_v17 = vadd.f32 %v1100_v15, %v1057_v13  ;;  %v1059_v18 = vpop.f32.mrf.mxu0 }
 0x16f   : > { %v1102_v20 = vpop.f32.mrf.mxu1 }
 0x170   : > { %1111 = vst [vmem:[#allocation2 + $0x10] sm:$0xff] %v1107_v16  ;;  %v1108_v21 = vadd.f32 %v1101_v17, %v610_v14  ;;  %v1103_v22 = vadd.f32 %v1102_v20, %v1059_v18  ;;  %v1061_v23 = vpop.f32.mrf.mxu0 }
 0x171   : > { %v1104_v25 = vpop.f32.mrf.mxu1 }
 0x172   : > { %1112 = vst [vmem:[#allocation2] sm:$0xff] %v1108_v21  ;;  %v1109_v26 = vadd.f32 %v1103_v22, %v611_v19  ;;  %v1105_v27 = vadd.f32 %v1104_v25, %v1061_v23  ;;  %1118 = sbr.rel (%p1426_p5) target bundleno = 392 (0x188), region = 105 }
 0x174   : > { %1113 = vst [vmem:[#allocation2 + $0x18] sm:$0xff] %v1109_v26  ;;  %v1110_v28 = vadd.f32 %v1105_v27, %v612_v24 }
 0x176   : > { %1114 = vst [vmem:[#allocation2 + $0x8] sm:$0xff] %v1110_v28 }
 0x177   : > { %v1125_v29 = vlaneseq  ;;  %v1123_v31 = vld [vmem:[%s592_s9] sm:$0x3]  ;;  %v1119_v33 = vld [vmem:[#allocation2 + $0x10] sm:$0xff] }
 0x178   : > { %v1139_v32 = vld [vmem:[%s597_s1] sm:$0x3] }
 0x179   : > { %v1126_v30 = vshrl.u32 %v1125_v29, 7  ;;  %v1120_v36 = vld [vmem:[#allocation2] sm:$0xff] }
 0x17b   : > { %v1127_v34 = vsub.s32 0, %v1126_v30  ;;  %v1131_v35 = vsub.s32 1, %v1126_v30  ;;  %v1121_v37 = vld [vmem:[#allocation2 + $0x18] sm:$0xff] }
 0x17d   : > { %v1122_v38 = vld [vmem:[#allocation2 + $0x8] sm:$0xff]  ;;  %v1128_v39 = vrot.slane %v1123_v31, %v1127_v34  ;;  %v1132_v40 = vrot.slane %v1123_v31, %v1131_v35  ;;  %v1144_v41 = vrot.slane %v1139_v32, %v1127_v34  ;;  %v1148_v42 = vrot.slane %v1139_v32, %v1131_v35 }
 0x17f   : > { %v1135_v43 = vmul.f32 %v1128_v39, %v1119_v33  ;;  %v1136_v44 = vmul.f32 %v1132_v40, %v1120_v36  ;;  %v1137_v45 = vmul.f32 %v1128_v39, %v1121_v37  ;;  %v1138_v46 = vmul.f32 %v1132_v40, %v1122_v38 }
 0x181   : > { %v1151_v47 = vadd.f32 %v1144_v41, %v1135_v43  ;;  %v1152_v48 = vadd.f32 %v1148_v42, %v1136_v44  ;;  %v1153_v49 = vadd.f32 %v1144_v41, %v1137_v45  ;;  %v1154_v50 = vadd.f32 %v1148_v42, %v1138_v46 }
 0x183   : > { %v1155_v51 = vmax.f32 %v1151_v47, 0.0  ;;  %v1156_v52 = vmax.f32 %v1152_v48, 0.0  ;;  %v1157_v53 = vmax.f32 %v1153_v49, 0.0  ;;  %v1158_v54 = vmax.f32 %v1154_v50, 0.0 }
 0x185   : > { %v1436_v55 = vpack.c.bf16 %v1156_v52, %v1155_v51  ;;  %v1437_v56 = vpack.c.bf16 %v1158_v54, %v1157_v53 }
 0x187   : > { %1171 = vst [vmem:[%s2010_s15] sm:$0xff] %v1436_v55  ;;  %1172 = vst [vmem:[%s2010_s15 + $0x8] sm:$0xff] %v1437_v56 }
 0x188 PF: > { %1179 = sbr.rel (!%p1838_p12) target bundleno = 400 (0x190), region = 109  ;;  %s1438_s1 = sshll.u32 (%p1838_p12), %s1704_s22, 3 }
 0x189   : > { %s1185_s29 = scalar_lea.vmem (%p1838_p12), %s2139_s4, %s1438_s1 }
 0x18e   : > { %v1216_v57 = vld [vmem:[%s2010_s15] sm:$0xff]  ;;  %v1218_v58 = vld [vmem:[%s2010_s15 + $0x8] sm:$0xff] }
 0x18f   : > { %1217 = vst [vmem:[%s1185_s29] sm:$0xff] %v1216_v57  ;;  %1219 = vst [vmem:[%s1185_s29 + $0x10] sm:$0xff] %v1218_v58 }
 0x190 PF: > { %s14_s25 = sadd.s32 1, %s1716_s25   ;;  %s2151_s14 = sld [smem:[#allocation6_spill]] }
 0x191   : > { %p11_p6 = scmp.ge.s32.totalorder %s14_s25, 56   ;;  %s2152_s27 = sld [smem:[#allocation7_spill]] }
 0x192   : > { %s2153_s15 = smov %s1680_s16  ;;  %s2154_s16 = smov %s1836_s13 }
 0x193   : > { %s2155_s17 = smov %s1688_s18  ;;  %s2156_s18 = smov %s1833_s12 }
 0x194   : > { %s2157_s19 = smov %s1696_s20  ;;  %s2158_s20 = smov %s1819_s7 }
 0x195   : > { %s2159_s21 = smov %s1708_s23  ;;  %s2160_s22 = smov %s1712_s24 }
 0x196   : > { %s2161_s23 = smov %s2151_s14  ;;  %13 = sbr.rel (!%p11_p6) target bundleno = 9 (0x9), region = 192 }
 0x197   : > { %s2162_s24 = smov %s2152_s27 }

// kernel: _lambda_.18
= control target key start
LH: loop header
LB: loop body
LE: loop exit
PB: predicated region body
PF: predicated region fallthrough
CT: control target
= control target key end

     0   :  { %s2295_s0 = inlined_call_operand.vmem [shape: bf16[16,13824], index: 0, kind: input, shape index: {}]   ;;  %s2296_s1 = inlined_call_operand.vmem [shape: bf16[13824,512], index: 1, kind: input, shape index: {}]   ;;  %s2297_s2 = inlined_call_operand.vmem [shape: f32[1,512], index: 2, kind: input, shape index: {}]   ;;  %s2298_s3 = inlined_call_operand.vmem [shape: f32[1,512], index: 3, kind: input, shape index: {}]   ;;  %s2299_s4 = inlined_call_operand.vmem [shape: bf16[16,512], index: 4, kind: input, shape index: {}]   ;;  %s2300_s5 = inlined_call_operand.vmem [shape: bf16[16,512], index: 5, kind: output, shape index: {}]  }
   0x1   :  { %2304 = sst [smem:[#allocation11_spill]] %s2295_s0 }
   0x2   :  { %s1879_s18 = smov 0   ;;  %s1881_s19 = smov 0  }
   0x3   :  { %s1883_s20 = smov 0   ;;  %s1885_s21 = smov 0  }
   0x4   :  { %s1887_s22 = smov 0   ;;  %s1889_s23 = smov 0  }
   0x5   :  { %s1891_s24 = smov 0   ;;  %s1893_s25 = smov 0  }
   0x6   :  { %s1895_s26 = smov 0   ;;  %s1897_s27 = smov 0  }
   0x7   :  { %s1899_s28 = smov 0  }
   0x8 LB: > { %2305 = sst [smem:[#allocation7_spill]] %s1826_s23  ;;  %s1464_s29 = sadd.s32 4294967295, %s1846_s28   ;;  %s1846_s28 = sphi %s1899_s28, %s15_s28   ;;  %s1842_s27 = sphi %s1897_s27, %s2325_s27   ;;  %s1838_s26 = sphi %s1895_s26, %s2324_s26   ;;  %s1834_s25 = sphi %s1893_s25, %s2323_s25   ;;  %s1830_s24 = sphi %s1891_s24, %s2322_s24   ;;  %s1826_s23 = sphi %s1889_s23, %s2315_s23   ;;  %s1822_s22 = sphi %s1887_s22, %s2314_s22   ;;  %s1818_s21 = sphi %s1885_s21, %s2321_s21   ;;  %s1814_s20 = sphi %s1883_s20, %s2320_s20   ;;  %s1810_s19 = sphi %s1881_s19, %s2319_s19   ;;  %s1806_s18 = sphi %s1879_s18, %s2318_s18  }
   0x9   : > { %s27_s30 = sadd.s32 1, %s1838_s26  ;;  %s30_s6 = sadd.s32 1, %s1842_s27 }
   0xa   : > { %p28_p0 = scmp.ge.s32.totalorder %s27_s30, 27  ;;  %s43_s7 = sadd.s32 1, %s1826_s23 }
   0xb   : > { %p50_p1 = scmp.ne.s32.totalorder %s1826_s23, %s1822_s22  ;;  %p51_p2 = scmp.eq.s32.totalorder %s1846_s28, 0 }
   0xc   : > { %s2327_s30 = smov (%p28_p0, %s27_s30), 0  ;;  %s2329_s6 = smov (!%p28_p0, %s30_s6), %s1842_s27 }
   0xd   : > { %2306 = sst [smem:[#allocation8_spill]] %s2327_s30  ;;  %s39_s8 = ssub.s32 %s1838_s26, %s2327_s30 }
   0xe   : > { %p32_p3 = scmp.ge.s32.totalorder %s2329_s6, 2  ;;  %p41_p4 = scmp.eq.s32.totalorder %s39_s8, 0 }
   0xf   : > { %p1948_p5 = por %p51_p2, %p50_p1  ;;  %s71_s10 = sadd.s32 1, %s1818_s21 }
  0x10   : > { %s2331_s6 = smov (%p32_p3, %s2329_s6), 0  ;;  %p78_p6 = scmp.ne.s32.totalorder %s1818_s21, %s1814_s20 }
  0x11   : > { %2308 = sst [smem:[#allocation9_spill]] %s2331_s6  ;;  %s67_s12 = ssub.s32 %s1842_s27, %s2331_s6 }
  0x12   : > { %s1956_s11 = scalar_select %p41_p4, %s1826_s23, %s43_s7  }
  0x13   : > { %s68_s13 = sor.u32 %s67_s12, %s39_s8  ;;  %p149_p7 = scmp.eq.s32.totalorder %s67_s12, 0 }
  0x14   : > { %2309 = sst [smem:[#allocation10_spill]] %s1956_s11  ;;  %p69_p8 = scmp.eq.s32.totalorder %s68_s13, 0 }
  0x15   : > { %p1964_p9 = por %p78_p6, %p51_p2  ;;  %s151_s15 = sadd.s32 1, %s1810_s19 }
  0x16   : > { %p158_p10 = scmp.ne.s32.totalorder %s1810_s19, %s1806_s18  ;;  %p190_p12 = scmp.eq.s32.totalorder %s1464_s29, 53 }
  0x17   : > { %s1972_s16 = scalar_select %p69_p8, %s1818_s21, %s71_s10  }
  0x18   : > { %s1975_s17 = scalar_select %p149_p7, %s1810_s19, %s151_s15  }
  0x19   : > { %p1979_p11 = por %p158_p10, %p51_p2  ;;  %p1983_p13 = por %p190_p12, %p158_p10 }
  0x1a   : > { %p1467_p0 = scmp.ge.s32.totalorder %s1846_s28, 54 }
  0x1c   : > { %212 = sbr.rel (%p1467_p0) target bundleno = 89 (0x59), region = 16 }
  0x21   : > { %215 = sbr.rel (!%p1948_p5) target bundleno = 45 (0x2d), region = 20  ;;  %s217_s10 = sand.u32 (%p1948_p5), 1, %s1826_s23  }
  0x22   : > { %s1563_s12 = sshll.u32 (%p1948_p5), %s1838_s26, 4  ;;  %s1468_s13 = sshll.u32 (%p1948_p5), %s217_s10, 5 }
  0x23   : > { %s2313_s0 = sld [smem:[#allocation11_spill]] (%p1948_p5)  ;;  %s219_s29 = scalar_lea.vmem (%p1948_p5), [#allocation3], %s1468_s13 }
  0x29   : > { %s225_s30 = scalar_lea.vmem %s2313_s0, %s1563_s12 }
  0x2a   : > { %v238_v0 = vld [vmem:[%s225_s30] sm:$0xff]  ;;  %v240_v1 = vld [vmem:[%s225_s30 + $0x8] sm:$0xff]  ;;  %v242_v2 = vld [vmem:[%s225_s30 + $0x1b0] sm:$0xff] }
  0x2b   : > { %239 = vst [vmem:[%s219_s29] sm:$0xff] %v238_v0  ;;  %241 = vst [vmem:[%s219_s29 + $0x8] sm:$0xff] %v240_v1  ;;  %v244_v3 = vld [vmem:[%s225_s30 + $0x1b8] sm:$0xff] }
  0x2c   : > { %243 = vst [vmem:[%s219_s29 + $0x10] sm:$0xff] %v242_v2  ;;  %245 = vst [vmem:[%s219_s29 + $0x18] sm:$0xff] %v244_v3 }
  0x2d PF: > { %251 = sbr.rel (!%p1964_p9) target bundleno = 84 (0x54), region = 43  ;;  %s253_s9 = sand.u32 (%p1964_p9), 1, %s1818_s21  }
  0x2e   : > { %s1473_s10 = sshll.u32 (%p1964_p9), %s1842_s27, 1  ;;  %s1471_s6 = sshll.u32 (%p1964_p9), %s253_s9, 9 }
  0x2f   : > { %s1564_s12 = sshll.u32 (%p1964_p9), %s1838_s26, 8  ;;  %s2008_s30 = scalar_lea.vmem (%p1964_p9), [#allocation4], %s1471_s6 }
  0x30   : > { %s259_s15 = sadd.s32 (%p1964_p9), %s1564_s12, %s1473_s10 }
  0x31   : > { %s1475_s0 = sshll.u32 (%p1964_p9), %s259_s15, 2 }
  0x32   : > { %s2003_s23 = scalar_lea.vmem %s2296_s1, %s1475_s0 }
  0x33   : > { %v416_v4 = vld [vmem:[%s2003_s23] sm:$0xff]  ;;  %v418_v5 = vld [vmem:[%s2003_s23 + $0x10] sm:$0xff] }
  0x34   : > { %v420_v6 = vld [vmem:[%s2003_s23 + $0x20] sm:$0xff]  ;;  %417 = vst [vmem:[%s2008_s30] sm:$0xff] %v416_v4  ;;  %419 = vst [vmem:[%s2008_s30 + $0x8] sm:$0xff] %v418_v5  ;;  %v422_v7 = vld [vmem:[%s2003_s23 + $0x30] sm:$0xff] }
  0x35   : > { %421 = vst [vmem:[%s2008_s30 + $0x10] sm:$0xff] %v420_v6  ;;  %v424_v8 = vld [vmem:[%s2003_s23 + $0x40] sm:$0xff]  ;;  %v426_v9 = vld [vmem:[%s2003_s23 + $0x50] sm:$0xff]  ;;  %423 = vst [vmem:[%s2008_s30 + $0x18] sm:$0xff] %v422_v7 }
  0x36   : > { %425 = vst [vmem:[%s2008_s30 + $0x20] sm:$0xff] %v424_v8  ;;  %427 = vst [vmem:[%s2008_s30 + $0x28] sm:$0xff] %v426_v9  ;;  %v428_v10 = vld [vmem:[%s2003_s23 + $0x60] sm:$0xff]  ;;  %v430_v11 = vld [vmem:[%s2003_s23 + $0x70] sm:$0xff] }
  0x37   : > { %v432_v12 = vld [vmem:[%s2003_s23 + $0x80] sm:$0xff]  ;;  %429 = vst [vmem:[%s2008_s30 + $0x30] sm:$0xff] %v428_v10  ;;  %431 = vst [vmem:[%s2008_s30 + $0x38] sm:$0xff] %v430_v11  ;;  %v434_v13 = vld [vmem:[%s2003_s23 + $0x90] sm:$0xff] }
  0x38   : > { %433 = vst [vmem:[%s2008_s30 + $0x40] sm:$0xff] %v432_v12  ;;  %v436_v14 = vld [vmem:[%s2003_s23 + $0xa0] sm:$0xff]  ;;  %v438_v15 = vld [vmem:[%s2003_s23 + $0xb0] sm:$0xff]  ;;  %435 = vst [vmem:[%s2008_s30 + $0x48] sm:$0xff] %v434_v13 }
  0x39   : > { %437 = vst [vmem:[%s2008_s30 + $0x50] sm:$0xff] %v436_v14  ;;  %439 = vst [vmem:[%s2008_s30 + $0x58] sm:$0xff] %v438_v15  ;;  %v440_v16 = vld [vmem:[%s2003_s23 + $0xc0] sm:$0xff]  ;;  %v442_v17 = vld [vmem:[%s2003_s23 + $0xd0] sm:$0xff] }
  0x3a   : > { %v444_v18 = vld [vmem:[%s2003_s23 + $0xe0] sm:$0xff]  ;;  %441 = vst [vmem:[%s2008_s30 + $0x60] sm:$0xff] %v440_v16  ;;  %443 = vst [vmem:[%s2008_s30 + $0x68] sm:$0xff] %v442_v17  ;;  %v446_v19 = vld [vmem:[%s2003_s23 + $0xf0] sm:$0xff] }
  0x3b   : > { %445 = vst [vmem:[%s2008_s30 + $0x70] sm:$0xff] %v444_v18  ;;  %v448_v20 = vld [vmem:[%s2003_s23 + $0x100] sm:$0xff]  ;;  %v450_v21 = vld [vmem:[%s2003_s23 + $0x110] sm:$0xff]  ;;  %447 = vst [vmem:[%s2008_s30 + $0x78] sm:$0xff] %v446_v19 }
  0x3c   : > { %449 = vst [vmem:[%s2008_s30 + $0x80] sm:$0xff] %v448_v20  ;;  %451 = vst [vmem:[%s2008_s30 + $0x88] sm:$0xff] %v450_v21  ;;  %v452_v22 = vld [vmem:[%s2003_s23 + $0x120] sm:$0xff]  ;;  %v454_v23 = vld [vmem:[%s2003_s23 + $0x130] sm:$0xff] }
  0x3d   : > { %v456_v24 = vld [vmem:[%s2003_s23 + $0x140] sm:$0xff]  ;;  %453 = vst [vmem:[%s2008_s30 + $0x90] sm:$0xff] %v452_v22  ;;  %455 = vst [vmem:[%s2008_s30 + $0x98] sm:$0xff] %v454_v23  ;;  %v458_v25 = vld [vmem:[%s2003_s23 + $0x150] sm:$0xff] }
  0x3e   : > { %457 = vst [vmem:[%s2008_s30 + $0xa0] sm:$0xff] %v456_v24  ;;  %v460_v26 = vld [vmem:[%s2003_s23 + $0x160] sm:$0xff]  ;;  %v462_v27 = vld [vmem:[%s2003_s23 + $0x170] sm:$0xff]  ;;  %459 = vst [vmem:[%s2008_s30 + $0xa8] sm:$0xff] %v458_v25 }
  0x3f   : > { %461 = vst [vmem:[%s2008_s30 + $0xb0] sm:$0xff] %v460_v26  ;;  %463 = vst [vmem:[%s2008_s30 + $0xb8] sm:$0xff] %v462_v27  ;;  %v464_v28 = vld [vmem:[%s2003_s23 + $0x180] sm:$0xff]  ;;  %v466_v29 = vld [vmem:[%s2003_s23 + $0x190] sm:$0xff] }
  0x40   : > { %v468_v30 = vld [vmem:[%s2003_s23 + $0x1a0] sm:$0xff]  ;;  %465 = vst [vmem:[%s2008_s30 + $0xc0] sm:$0xff] %v464_v28  ;;  %467 = vst [vmem:[%s2008_s30 + $0xc8] sm:$0xff] %v466_v29  ;;  %v470_v31 = vld [vmem:[%s2003_s23 + $0x1b0] sm:$0xff] }
  0x41   : > { %469 = vst [vmem:[%s2008_s30 + $0xd0] sm:$0xff] %v468_v30  ;;  %v472_v32 = vld [vmem:[%s2003_s23 + $0x1c0] sm:$0xff]  ;;  %v474_v33 = vld [vmem:[%s2003_s23 + $0x1d0] sm:$0xff]  ;;  %471 = vst [vmem:[%s2008_s30 + $0xd8] sm:$0xff] %v470_v31 }
  0x42   : > { %473 = vst [vmem:[%s2008_s30 + $0xe0] sm:$0xff] %v472_v32  ;;  %475 = vst [vmem:[%s2008_s30 + $0xe8] sm:$0xff] %v474_v33  ;;  %v476_v34 = vld [vmem:[%s2003_s23 + $0x1e0] sm:$0xff]  ;;  %v478_v35 = vld [vmem:[%s2003_s23 + $0x1f0] sm:$0xff] }
  0x43   : > { %v480_v36 = vld [vmem:[%s2003_s23 + $0x200] sm:$0xff]  ;;  %477 = vst [vmem:[%s2008_s30 + $0xf0] sm:$0xff] %v476_v34  ;;  %479 = vst [vmem:[%s2008_s30 + $0xf8] sm:$0xff] %v478_v35  ;;  %v482_v37 = vld [vmem:[%s2003_s23 + $0x210] sm:$0xff] }
  0x44   : > { %481 = vst [vmem:[%s2008_s30 + $0x100] sm:$0xff] %v480_v36  ;;  %v484_v38 = vld [vmem:[%s2003_s23 + $0x220] sm:$0xff]  ;;  %v486_v39 = vld [vmem:[%s2003_s23 + $0x230] sm:$0xff]  ;;  %483 = vst [vmem:[%s2008_s30 + $0x108] sm:$0xff] %v482_v37 }
  0x45   : > { %485 = vst [vmem:[%s2008_s30 + $0x110] sm:$0xff] %v484_v38  ;;  %487 = vst [vmem:[%s2008_s30 + $0x118] sm:$0xff] %v486_v39  ;;  %v488_v40 = vld [vmem:[%s2003_s23 + $0x240] sm:$0xff]  ;;  %v490_v41 = vld [vmem:[%s2003_s23 + $0x250] sm:$0xff] }
  0x46   : > { %v492_v42 = vld [vmem:[%s2003_s23 + $0x260] sm:$0xff]  ;;  %489 = vst [vmem:[%s2008_s30 + $0x120] sm:$0xff] %v488_v40  ;;  %491 = vst [vmem:[%s2008_s30 + $0x128] sm:$0xff] %v490_v41  ;;  %v494_v43 = vld [vmem:[%s2003_s23 + $0x270] sm:$0xff] }
  0x47   : > { %493 = vst [vmem:[%s2008_s30 + $0x130] sm:$0xff] %v492_v42  ;;  %v496_v44 = vld [vmem:[%s2003_s23 + $0x280] sm:$0xff]  ;;  %v498_v45 = vld [vmem:[%s2003_s23 + $0x290] sm:$0xff]  ;;  %495 = vst [vmem:[%s2008_s30 + $0x138] sm:$0xff] %v494_v43 }
  0x48   : > { %497 = vst [vmem:[%s2008_s30 + $0x140] sm:$0xff] %v496_v44  ;;  %499 = vst [vmem:[%s2008_s30 + $0x148] sm:$0xff] %v498_v45  ;;  %v500_v46 = vld [vmem:[%s2003_s23 + $0x2a0] sm:$0xff]  ;;  %v502_v47 = vld [vmem:[%s2003_s23 + $0x2b0] sm:$0xff] }
  0x49   : > { %v504_v48 = vld [vmem:[%s2003_s23 + $0x2c0] sm:$0xff]  ;;  %501 = vst [vmem:[%s2008_s30 + $0x150] sm:$0xff] %v500_v46  ;;  %503 = vst [vmem:[%s2008_s30 + $0x158] sm:$0xff] %v502_v47  ;;  %v506_v49 = vld [vmem:[%s2003_s23 + $0x2d0] sm:$0xff] }
  0x4a   : > { %505 = vst [vmem:[%s2008_s30 + $0x160] sm:$0xff] %v504_v48  ;;  %v508_v50 = vld [vmem:[%s2003_s23 + $0x2e0] sm:$0xff]  ;;  %v510_v51 = vld [vmem:[%s2003_s23 + $0x2f0] sm:$0xff]  ;;  %507 = vst [vmem:[%s2008_s30 + $0x168] sm:$0xff] %v506_v49 }
  0x4b   : > { %509 = vst [vmem:[%s2008_s30 + $0x170] sm:$0xff] %v508_v50  ;;  %511 = vst [vmem:[%s2008_s30 + $0x178] sm:$0xff] %v510_v51  ;;  %v512_v52 = vld [vmem:[%s2003_s23 + $0x300] sm:$0xff]  ;;  %v514_v53 = vld [vmem:[%s2003_s23 + $0x310] sm:$0xff] }
  0x4c   : > { %v516_v54 = vld [vmem:[%s2003_s23 + $0x320] sm:$0xff]  ;;  %513 = vst [vmem:[%s2008_s30 + $0x180] sm:$0xff] %v512_v52  ;;  %515 = vst [vmem:[%s2008_s30 + $0x188] sm:$0xff] %v514_v53  ;;  %v518_v55 = vld [vmem:[%s2003_s23 + $0x330] sm:$0xff] }
  0x4d   : > { %517 = vst [vmem:[%s2008_s30 + $0x190] sm:$0xff] %v516_v54  ;;  %v520_v56 = vld [vmem:[%s2003_s23 + $0x340] sm:$0xff]  ;;  %v522_v57 = vld [vmem:[%s2003_s23 + $0x350] sm:$0xff]  ;;  %519 = vst [vmem:[%s2008_s30 + $0x198] sm:$0xff] %v518_v55 }
  0x4e   : > { %521 = vst [vmem:[%s2008_s30 + $0x1a0] sm:$0xff] %v520_v56  ;;  %523 = vst [vmem:[%s2008_s30 + $0x1a8] sm:$0xff] %v522_v57  ;;  %v524_v58 = vld [vmem:[%s2003_s23 + $0x360] sm:$0xff]  ;;  %v526_v59 = vld [vmem:[%s2003_s23 + $0x370] sm:$0xff] }
  0x4f   : > { %v528_v60 = vld [vmem:[%s2003_s23 + $0x380] sm:$0xff]  ;;  %525 = vst [vmem:[%s2008_s30 + $0x1b0] sm:$0xff] %v524_v58  ;;  %527 = vst [vmem:[%s2008_s30 + $0x1b8] sm:$0xff] %v526_v59  ;;  %v530_v61 = vld [vmem:[%s2003_s23 + $0x390] sm:$0xff] }
  0x50   : > { %529 = vst [vmem:[%s2008_s30 + $0x1c0] sm:$0xff] %v528_v60  ;;  %v532_v62 = vld [vmem:[%s2003_s23 + $0x3a0] sm:$0xff]  ;;  %v534_v63 = vld [vmem:[%s2003_s23 + $0x3b0] sm:$0xff]  ;;  %531 = vst [vmem:[%s2008_s30 + $0x1c8] sm:$0xff] %v530_v61 }
  0x51   : > { %533 = vst [vmem:[%s2008_s30 + $0x1d0] sm:$0xff] %v532_v62  ;;  %535 = vst [vmem:[%s2008_s30 + $0x1d8] sm:$0xff] %v534_v63  ;;  %v536_v0 = vld [vmem:[%s2003_s23 + $0x3c0] sm:$0xff]  ;;  %v538_v1 = vld [vmem:[%s2003_s23 + $0x3d0] sm:$0xff] }
  0x52   : > { %v540_v2 = vld [vmem:[%s2003_s23 + $0x3e0] sm:$0xff]  ;;  %537 = vst [vmem:[%s2008_s30 + $0x1e0] sm:$0xff] %v536_v0  ;;  %539 = vst [vmem:[%s2008_s30 + $0x1e8] sm:$0xff] %v538_v1  ;;  %v542_v3 = vld [vmem:[%s2003_s23 + $0x3f0] sm:$0xff] }
  0x53   : > { %541 = vst [vmem:[%s2008_s30 + $0x1f0] sm:$0xff] %v540_v2  ;;  %543 = vst [vmem:[%s2008_s30 + $0x1f8] sm:$0xff] %v542_v3 }
  0x54 PF: > { %565 = sbr.rel (!%p1979_p11) target bundleno = 89 (0x59), region = 89  ;;  %s567_s0 = sand.u32 (%p1979_p11), 1, %s1810_s19  }
  0x55   : > { %s1565_s11 = sshll.u32 (%p1979_p11), %s1842_s27, 3  ;;  %s1476_s14 = sshll.u32 (%p1979_p11), %s567_s0, 4 }
  0x56   : > { %s575_s10 = scalar_lea.vmem (%p1979_p11), %s2299_s4, %s1565_s11  ;;  %s569_s6 = scalar_lea.vmem (%p1979_p11), [#allocation5], %s1476_s14 }
  0x57   : > { %v606_v4 = vld [vmem:[%s575_s10] sm:$0xff] (%p1979_p11)  ;;  %v608_v5 = vld [vmem:[%s575_s10 + $0x10] sm:$0xff] (%p1979_p11) }
  0x58   : > { %607 = vst [vmem:[%s569_s6] sm:$0xff] (%p1979_p11), %v606_v4  ;;  %609 = vst [vmem:[%s569_s6 + $0x8] sm:$0xff] (%p1979_p11), %v608_v5 }
  0x59 PF: > { %p1479_p1 = scmp.ge.s32.totalorder %s1846_s28, 1  ;;  %p614_p2 = scmp.lt.s32.totalorder %s1846_s28, 55 }
  0x5b   : > { %p615_p3 = pnand %p1479_p1, %p614_p2 }
  0x5c   : > { %s621_s23 = sand.u32 (!%p615_p3), 1, %s1822_s22   ;;  %s628_s7 = sand.u32 (!%p615_p3), 1, %s1814_s20  }
  0x5d   : > { %618 = sbr.rel (%p615_p3) target bundleno = 407 (0x197), region = 127  ;;  %s1480_s12 = sshll.u32 (!%p615_p3), %s621_s23, 5 }
  0x5e   : > { %s1481_s15 = sshll.u32 (!%p615_p3), %s628_s7, 9  ;;  %s635_s13 = sand.u32 (!%p615_p3), 1, %s1806_s18  }
  0x5f   : > { %s1484_s30 = sshll.u32 (!%p615_p3), %s1834_s25, 1  ;;  %s2148_s0 = sshll.u32 (!%p615_p3), %s635_s13, 4 }
  0x60   : > { %p682_p4 = scmp.lt.s32.totalorder (!%p615_p3), %s1484_s30, 3  ;;  %s2160_s10 = scalar_lea.vmem (!%p615_p3), [#allocation3], %s1480_s12 }
  0x61   : > { %s2162_s18 = scalar_lea.vmem (!%p615_p3), [#allocation4], %s1481_s15  ;;  %s637_s6 = scalar_lea.vmem (!%p615_p3), [#allocation5], %s2148_s0 }
  0x62   : > { %s2333_s30 = smov (!%p682_p4, %s1484_s30), 3  ;;  %s2166_s23 = scalar_lea.vmem [#allocation6], %s2148_s0 }
  0x63   : > { %s684_s29 = scalar_lea.vmem %s2297_s2, %s2333_s30  ;;  %s689_s20 = scalar_lea.vmem %s2298_s3, %s2333_s30 }
  0x64   : > { %p1486_p5 = scmp.ne.s32.totalorder %s1830_s24, 0 }
  0x66   : > { %698 = sbr.rel (%p1486_p5) target bundleno = 110 (0x6e), region = 143 }
  0x6b   : > { %v1848_v6 = vmov 0.0  }
  0x6c   : > { %699 = vst [vmem:[#allocation2 + $0x10] sm:$0xff] %v1848_v6  ;;  %700 = vst [vmem:[#allocation2] sm:$0xff] %v1848_v6 }
  0x6d   : > { %701 = vst [vmem:[#allocation2 + $0x18] sm:$0xff] %v1848_v6  ;;  %702 = vst [vmem:[#allocation2 + $0x8] sm:$0xff] %v1848_v6 }
  0x6e PF: > { %v1658_v7 = vld [vmem:[%s2162_s18 + $0x74] ss:$8 sps:$4 sm:$0xff]   ;;  %v1662_v9 = vld [vmem:[%s2162_s18 + $0x70] ss:$8 sps:$4 sm:$0xff]   ;;  %v1664_v11 = vld [vmem:[%s2162_s18 + $0x64] ss:$8 sps:$4 sm:$0xff]  }
  0x6f   : > { %v1660_v8 = vld [vmem:[%s2162_s18 + $0x174] ss:$8 sps:$4 sm:$0xff]   ;;  %1115 = vmatprep.subr.bf16.mxu0 %v1658_v7  ;;  %v1663_v10 = vld [vmem:[%s2162_s18 + $0x170] ss:$8 sps:$4 sm:$0xff]   ;;  %v1666_v12 = vld [vmem:[%s2162_s18 + $0x164] ss:$8 sps:$4 sm:$0xff]  }
  0x70   : > { %1158 = vmatprep.subr.bf16.mxu1 %v1660_v8  ;;  %1116 = vmatpush1.bf16.msra.mxu0 %v1662_v9  ;;  %v1668_v13 = vld [vmem:[%s2162_s18 + $0x60] ss:$8 sps:$4 sm:$0xff]   ;;  %v1670_v15 = vld [vmem:[%s2162_s18 + $0x54] ss:$8 sps:$4 sm:$0xff]   ;;  %v1674_v17 = vld [vmem:[%s2162_s18 + $0x50] ss:$8 sps:$4 sm:$0xff]  }
  0x71   : > { %1159 = vmatpush1.bf16.msra.mxu1 %v1663_v10  ;;  %1117 = vmatprep.subr.bf16.mxu0 %v1664_v11  ;;  %v1669_v14 = vld [vmem:[%s2162_s18 + $0x160] ss:$8 sps:$4 sm:$0xff]   ;;  %v1672_v16 = vld [vmem:[%s2162_s18 + $0x154] ss:$8 sps:$4 sm:$0xff]   ;;  %v1675_v18 = vld [vmem:[%s2162_s18 + $0x150] ss:$8 sps:$4 sm:$0xff]  }
  0x72   : > { %1160 = vmatprep.subr.bf16.mxu1 %v1666_v12  ;;  %v1676_v19 = vld [vmem:[%s2162_s18 + $0x44] ss:$8 sps:$4 sm:$0xff]   ;;  %v1680_v21 = vld [vmem:[%s2162_s18 + $0x40] ss:$8 sps:$4 sm:$0xff]   ;;  %v1682_v23 = vld [vmem:[%s2162_s18 + $0x34] ss:$8 sps:$4 sm:$0xff]  }
  0x73   : > { %v1678_v20 = vld [vmem:[%s2162_s18 + $0x144] ss:$8 sps:$4 sm:$0xff]   ;;  %v1681_v22 = vld [vmem:[%s2162_s18 + $0x140] ss:$8 sps:$4 sm:$0xff]   ;;  %v1684_v24 = vld [vmem:[%s2162_s18 + $0x134] ss:$8 sps:$4 sm:$0xff]  }
  0x74   : > { %1118 = vmatpush1.bf16.msra.mxu0 %v1668_v13  ;;  %v1686_v25 = vld [vmem:[%s2162_s18 + $0x30] ss:$8 sps:$4 sm:$0xff]   ;;  %v1688_v27 = vld [vmem:[%s2162_s18 + $0x24] ss:$8 sps:$4 sm:$0xff]   ;;  %v1692_v29 = vld [vmem:[%s2162_s18 + $0x20] ss:$8 sps:$4 sm:$0xff]  }
  0x75   : > { %1161 = vmatpush1.bf16.msra.mxu1 %v1669_v14  ;;  %1119 = vmatprep.subr.bf16.mxu0 %v1670_v15  ;;  %v1687_v26 = vld [vmem:[%s2162_s18 + $0x130] ss:$8 sps:$4 sm:$0xff]   ;;  %v1690_v28 = vld [vmem:[%s2162_s18 + $0x124] ss:$8 sps:$4 sm:$0xff]   ;;  %v1693_v30 = vld [vmem:[%s2162_s18 + $0x120] ss:$8 sps:$4 sm:$0xff]  }
  0x76   : > { %1162 = vmatprep.subr.bf16.mxu1 %v1672_v16  ;;  %v1694_v31 = vld [vmem:[%s2162_s18 + $0x14] ss:$8 sps:$4 sm:$0xff]   ;;  %v1698_v33 = vld [vmem:[%s2162_s18 + $0x10] ss:$8 sps:$4 sm:$0xff]   ;;  %v1700_v35 = vld [vmem:[%s2162_s18 + $0x4] ss:$8 sps:$4 sm:$0xff]  }
  0x77   : > { %v1696_v32 = vld [vmem:[%s2162_s18 + $0x114] ss:$8 sps:$4 sm:$0xff]   ;;  %v1699_v34 = vld [vmem:[%s2162_s18 + $0x110] ss:$8 sps:$4 sm:$0xff]   ;;  %v1702_v36 = vld [vmem:[%s2162_s18 + $0x104] ss:$8 sps:$4 sm:$0xff]  }
  0x78   : > { %1120 = vmatpush1.bf16.msra.mxu0 %v1674_v17  ;;  %v1704_v37 = vld [vmem:[%s2162_s18] ss:$8 sps:$4 sm:$0xff]   ;;  %v1706_v39 = vld [vmem:[%s2162_s18 + $0xf4] ss:$8 sps:$4 sm:$0xff]   ;;  %v1710_v41 = vld [vmem:[%s2162_s18 + $0xf0] ss:$8 sps:$4 sm:$0xff]  }
  0x79   : > { %1163 = vmatpush1.bf16.msra.mxu1 %v1675_v18  ;;  %1121 = vmatprep.subr.bf16.mxu0 %v1676_v19  ;;  %v1705_v38 = vld [vmem:[%s2162_s18 + $0x100] ss:$8 sps:$4 sm:$0xff]   ;;  %v1708_v40 = vld [vmem:[%s2162_s18 + $0x1f4] ss:$8 sps:$4 sm:$0xff]   ;;  %v1711_v42 = vld [vmem:[%s2162_s18 + $0x1f0] ss:$8 sps:$4 sm:$0xff]  }
  0x7a   : > { %1164 = vmatprep.subr.bf16.mxu1 %v1678_v20  ;;  %v1712_v43 = vld [vmem:[%s2162_s18 + $0xe4] ss:$8 sps:$4 sm:$0xff]   ;;  %v1716_v45 = vld [vmem:[%s2162_s18 + $0xe0] ss:$8 sps:$4 sm:$0xff]   ;;  %v1718_v47 = vld [vmem:[%s2162_s18 + $0xd4] ss:$8 sps:$4 sm:$0xff]  }
  0x7b   : > { %v1714_v44 = vld [vmem:[%s2162_s18 + $0x1e4] ss:$8 sps:$4 sm:$0xff]   ;;  %v1717_v46 = vld [vmem:[%s2162_s18 + $0x1e0] ss:$8 sps:$4 sm:$0xff]   ;;  %v1720_v48 = vld [vmem:[%s2162_s18 + $0x1d4] ss:$8 sps:$4 sm:$0xff]  }
  0x7c   : > { %1122 = vmatpush1.bf16.msra.mxu0 %v1680_v21  ;;  %v1722_v49 = vld [vmem:[%s2162_s18 + $0xd0] ss:$8 sps:$4 sm:$0xff]   ;;  %v1724_v51 = vld [vmem:[%s2162_s18 + $0xc4] ss:$8 sps:$4 sm:$0xff]   ;;  %v1728_v53 = vld [vmem:[%s2162_s18 + $0xc0] ss:$8 sps:$4 sm:$0xff]  }
  0x7d   : > { %1165 = vmatpush1.bf16.msra.mxu1 %v1681_v22  ;;  %1123 = vmatprep.subr.bf16.mxu0 %v1682_v23  ;;  %v1723_v50 = vld [vmem:[%s2162_s18 + $0x1d0] ss:$8 sps:$4 sm:$0xff]   ;;  %v1726_v52 = vld [vmem:[%s2162_s18 + $0x1c4] ss:$8 sps:$4 sm:$0xff]   ;;  %v1729_v55 = vld [vmem:[%s2162_s18 + $0x1c0] ss:$8 sps:$4 sm:$0xff]  }
  0x7e   : > { %1166 = vmatprep.subr.bf16.mxu1 %v1684_v24  ;;  %v1756_v54 = vld [vmem:[%s2160_s10 + $0x4] ss:$16 sps:$4 sm:$0xff]   ;;  %v1759_v58 = vld [vmem:[%s2160_s10 + $0xc] ss:$16 sps:$4 sm:$0xff]   ;;  %v1734_v59 = vld [vmem:[%s2162_s18 + $0xb0] ss:$8 sps:$4 sm:$0xff]  }
  0x7f   : > { %v1730_v56 = vld [vmem:[%s2162_s18 + $0xb4] ss:$8 sps:$4 sm:$0xff]   ;;  %1147 = vmatprep.mubr.bf16.mxu0 %v1756_v54  ;;  %1190 = vmatprep.mubr.bf16.mxu1 %v1759_v58  ;;  %v1735_v60 = vld [vmem:[%s2162_s18 + $0x1b0] ss:$8 sps:$4 sm:$0xff]   ;;  %v1736_v61 = vld [vmem:[%s2162_s18 + $0xa4] ss:$8 sps:$4 sm:$0xff]  }
  0x80   : > { %1124 = vmatpush1.bf16.msra.mxu0 %v1686_v25  ;;  %v1732_v57 = vld [vmem:[%s2162_s18 + $0x1b4] ss:$8 sps:$4 sm:$0xff]   ;;  %v1738_v62 = vld [vmem:[%s2162_s18 + $0x1a4] ss:$8 sps:$4 sm:$0xff]   ;;  %v1740_v63 = vld [vmem:[%s2162_s18 + $0xa0] ss:$8 sps:$4 sm:$0xff]  }
  0x81   : > { %1167 = vmatpush1.bf16.msra.mxu1 %v1687_v26  ;;  %1125 = vmatprep.subr.bf16.mxu0 %v1688_v27  ;;  %v1741_v0 = vld [vmem:[%s2162_s18 + $0x1a0] ss:$8 sps:$4 sm:$0xff]   ;;  %v1742_v1 = vld [vmem:[%s2162_s18 + $0x94] ss:$8 sps:$4 sm:$0xff]   ;;  %v1746_v3 = vld [vmem:[%s2162_s18 + $0x90] ss:$8 sps:$4 sm:$0xff]  }
  0x82   : > { %1168 = vmatprep.subr.bf16.mxu1 %v1690_v28  ;;  %v1744_v2 = vld [vmem:[%s2162_s18 + $0x194] ss:$8 sps:$4 sm:$0xff]   ;;  %v1747_v4 = vld [vmem:[%s2162_s18 + $0x190] ss:$8 sps:$4 sm:$0xff]   ;;  %v1748_v5 = vld [vmem:[%s2162_s18 + $0x84] ss:$8 sps:$4 sm:$0xff]  }
  0x83   : > { %v1750_v6 = vld [vmem:[%s2162_s18 + $0x184] ss:$8 sps:$4 sm:$0xff]   ;;  %v1752_v7 = vld [vmem:[%s2162_s18 + $0x80] ss:$8 sps:$4 sm:$0xff]   ;;  %v703_v12 = vld [vmem:[#allocation2 + $0x10] sm:$0xff]  ;;  %p1555_p6 = scmp.ne.s32.totalorder %s1830_s24, 26 }
  0x84   : > { %1126 = vmatpush1.bf16.msra.mxu0 %v1692_v29  ;;  %v1753_v8 = vld [vmem:[%s2162_s18 + $0x180] ss:$8 sps:$4 sm:$0xff]   ;;  %v705_v21 = vld [vmem:[#allocation2 + $0x18] sm:$0xff] }
  0x85   : > { %1169 = vmatpush1.bf16.msra.mxu1 %v1693_v30  ;;  %1127 = vmatprep.subr.bf16.mxu0 %v1694_v31  ;;  %v1754_v9 = vld [vmem:[%s2160_s10] ss:$16 sps:$4 sm:$0xff]   ;;  %v1757_v10 = vld [vmem:[%s2160_s10 + $0x8] ss:$16 sps:$4 sm:$0xff]  }
  0x86   : > { %1170 = vmatprep.subr.bf16.mxu1 %v1696_v32  ;;  %v704_v16 = vld [vmem:[#allocation2] sm:$0xff]  ;;  %v706_v26 = vld [vmem:[#allocation2 + $0x8] sm:$0xff] }
  0x88   : > { %1128 = vmatpush1.bf16.msra.mxu0 %v1698_v33 }
  0x89   : > { %1171 = vmatpush1.bf16.msra.mxu1 %v1699_v34  ;;  %1129 = vmatprep.subr.bf16.mxu0 %v1700_v35 }
  0x8a   : > { %1172 = vmatprep.subr.bf16.mxu1 %v1702_v36 }
  0x8c   : > { %1130 = vmatpush1.bf16.msra.mxu0 %v1704_v37 }
  0x8d   : > { %1173 = vmatpush1.bf16.msra.mxu1 %v1705_v38  ;;  %1131 = vmatprep.subr.bf16.mxu0 %v1706_v39 }
  0x8e   : > { %1174 = vmatprep.subr.bf16.mxu1 %v1708_v40 }
  0x90   : > { %1132 = vmatpush2.bf16.msra.mxu0 %v1710_v41 }
  0x91   : > { %1175 = vmatpush2.bf16.msra.mxu1 %v1711_v42  ;;  %1133 = vmatprep.subr.bf16.mxu0 %v1712_v43 }
  0x92   : > { %1176 = vmatprep.subr.bf16.mxu1 %v1714_v44 }
  0x94   : > { %1134 = vmatpush2.bf16.msra.mxu0 %v1716_v45 }
  0x95   : > { %1177 = vmatpush2.bf16.msra.mxu1 %v1717_v46  ;;  %1135 = vmatprep.subr.bf16.mxu0 %v1718_v47 }
  0x96   : > { %1178 = vmatprep.subr.bf16.mxu1 %v1720_v48 }
  0x98   : > { %1136 = vmatpush2.bf16.msra.mxu0 %v1722_v49 }
  0x99   : > { %1179 = vmatpush2.bf16.msra.mxu1 %v1723_v50  ;;  %1137 = vmatprep.subr.bf16.mxu0 %v1724_v51 }
  0x9a   : > { %1180 = vmatprep.subr.bf16.mxu1 %v1726_v52 }
  0x9c   : > { %1138 = vmatpush2.bf16.msra.mxu0 %v1728_v53 }
  0x9d   : > { %1181 = vmatpush2.bf16.msra.mxu1 %v1729_v55  ;;  %1139 = vmatprep.subr.bf16.mxu0 %v1730_v56 }
  0x9e   : > { %1182 = vmatprep.subr.bf16.mxu1 %v1732_v57 }
  0xa0   : > { %1140 = vmatpush2.bf16.msra.mxu0 %v1734_v59 }
  0xa1   : > { %1183 = vmatpush2.bf16.msra.mxu1 %v1735_v60  ;;  %1141 = vmatprep.subr.bf16.mxu0 %v1736_v61 }
  0xa2   : > { %1184 = vmatprep.subr.bf16.mxu1 %v1738_v62 }
  0xa4   : > { %1142 = vmatpush2.bf16.msra.mxu0 %v1740_v63 }
  0xa5   : > { %1185 = vmatpush2.bf16.msra.mxu1 %v1741_v0  ;;  %1143 = vmatprep.subr.bf16.mxu0 %v1742_v1 }
  0xa6   : > { %1186 = vmatprep.subr.bf16.mxu1 %v1744_v2 }
  0xa8   : > { %1144 = vmatpush2.bf16.msra.mxu0 %v1746_v3 }
  0xa9   : > { %1187 = vmatpush2.bf16.msra.mxu1 %v1747_v4  ;;  %1145 = vmatprep.subr.bf16.mxu0 %v1748_v5 }
  0xaa   : > { %1188 = vmatprep.subr.bf16.mxu1 %v1750_v6 }
  0xac   : > { %1146 = vmatpush2.bf16.msra.mxu0 %v1752_v7 }
  0xad   : > { %1189 = vmatpush2.bf16.msra.mxu1 %v1753_v8 }
  0xaf   : > { %1148 = vmatmul.mubr.bf16.vlgmr.msra.gmra.mxu0 %v1754_v9 }
  0xb0   : > { %1191 = vmatmul.mubr.bf16.vlgmr.msra.gmra.mxu1 %v1757_v10 }
 0x16f   : > { %v1149_v11 = vpop.f32.mrf.mxu0 }
 0x170   : > { %v1192_v13 = vpop.f32.mrf.mxu1 }
 0x171   : > { %v1193_v14 = vadd.f32 %v1192_v13, %v1149_v11  ;;  %v1151_v15 = vpop.f32.mrf.mxu0 }
 0x172   : > { %v1194_v17 = vpop.f32.mrf.mxu1 }
 0x173   : > { %v1201_v18 = vadd.f32 %v1193_v14, %v703_v12  ;;  %v1195_v19 = vadd.f32 %v1194_v17, %v1151_v15  ;;  %v1153_v20 = vpop.f32.mrf.mxu0 }
 0x174   : > { %v1196_v22 = vpop.f32.mrf.mxu1 }
 0x175   : > { %1205 = vst [vmem:[#allocation2 + $0x10] sm:$0xff] %v1201_v18  ;;  %v1202_v23 = vadd.f32 %v1195_v19, %v704_v16  ;;  %v1197_v24 = vadd.f32 %v1196_v22, %v1153_v20  ;;  %v1155_v25 = vpop.f32.mrf.mxu0 }
 0x176   : > { %v1198_v27 = vpop.f32.mrf.mxu1 }
 0x177   : > { %1206 = vst [vmem:[#allocation2] sm:$0xff] %v1202_v23  ;;  %v1203_v28 = vadd.f32 %v1197_v24, %v705_v21  ;;  %v1199_v29 = vadd.f32 %v1198_v27, %v1155_v25  ;;  %1212 = sbr.rel (%p1555_p6) target bundleno = 399 (0x18f), region = 147 }
 0x179   : > { %1207 = vst [vmem:[#allocation2 + $0x18] sm:$0xff] %v1203_v28  ;;  %v1204_v30 = vadd.f32 %v1199_v29, %v706_v26 }
 0x17b   : > { %1208 = vst [vmem:[#allocation2 + $0x8] sm:$0xff] %v1204_v30 }
 0x17c   : > { %v1219_v31 = vlaneseq  ;;  %v1217_v33 = vld [vmem:[%s684_s29] sm:$0x3]  ;;  %v1213_v35 = vld [vmem:[#allocation2 + $0x10] sm:$0xff]  ;;  %v1250_v39 = vld [vmem:[%s637_s6 + $0x8] sm:$0xff] }
 0x17d   : > { %v1233_v34 = vld [vmem:[%s689_s20] sm:$0x3]  ;;  %v1253_v49 = vunpack.c.l.bf16 %v1250_v39  ;;  %v1254_v50 = vunpack.c.h.bf16 %v1250_v39 }
 0x17e   : > { %v1220_v32 = vshrl.u32 %v1219_v31, 7  ;;  %v1249_v38 = vld [vmem:[%s637_s6] sm:$0xff] }
 0x17f   : > { %v1214_v40 = vld [vmem:[#allocation2] sm:$0xff]  ;;  %v1251_v47 = vunpack.c.l.bf16 %v1249_v38  ;;  %v1252_v48 = vunpack.c.h.bf16 %v1249_v38 }
 0x180   : > { %v1221_v36 = vsub.s32 0, %v1220_v32  ;;  %v1225_v37 = vsub.s32 1, %v1220_v32  ;;  %v1215_v41 = vld [vmem:[#allocation2 + $0x18] sm:$0xff] }
 0x182   : > { %v1216_v42 = vld [vmem:[#allocation2 + $0x8] sm:$0xff]  ;;  %v1222_v43 = vrot.slane %v1217_v33, %v1221_v36  ;;  %v1226_v44 = vrot.slane %v1217_v33, %v1225_v37  ;;  %v1238_v45 = vrot.slane %v1233_v34, %v1221_v36  ;;  %v1242_v46 = vrot.slane %v1233_v34, %v1225_v37 }
 0x184   : > { %v1229_v51 = vmul.f32 %v1222_v43, %v1213_v35  ;;  %v1230_v52 = vmul.f32 %v1226_v44, %v1214_v40  ;;  %v1231_v53 = vmul.f32 %v1222_v43, %v1215_v41  ;;  %v1232_v54 = vmul.f32 %v1226_v44, %v1216_v42 }
 0x186   : > { %v1245_v55 = vadd.f32 %v1238_v45, %v1229_v51  ;;  %v1246_v56 = vadd.f32 %v1242_v46, %v1230_v52  ;;  %v1247_v57 = vadd.f32 %v1238_v45, %v1231_v53  ;;  %v1248_v58 = vadd.f32 %v1242_v46, %v1232_v54 }
 0x188   : > { %v1255_v59 = vadd.f32 %v1251_v47, %v1245_v55  ;;  %v1256_v60 = vadd.f32 %v1252_v48, %v1246_v56  ;;  %v1257_v61 = vadd.f32 %v1253_v49, %v1247_v57  ;;  %v1258_v62 = vadd.f32 %v1254_v50, %v1248_v58 }
 0x18a   : > { %v1259_v63 = vmax.f32 %v1255_v59, 0.0  ;;  %v1260_v0 = vmax.f32 %v1256_v60, 0.0  ;;  %v1261_v1 = vmax.f32 %v1257_v61, 0.0  ;;  %v1262_v2 = vmax.f32 %v1258_v62, 0.0 }
 0x18c   : > { %v1566_v3 = vpack.c.bf16 %v1260_v0, %v1259_v63  ;;  %v1567_v4 = vpack.c.bf16 %v1262_v2, %v1261_v1 }
 0x18e   : > { %1275 = vst [vmem:[%s2166_s23] sm:$0xff] %v1566_v3  ;;  %1276 = vst [vmem:[%s2166_s23 + $0x8] sm:$0xff] %v1567_v4 }
 0x18f PF: > { %1283 = sbr.rel (!%p1983_p13) target bundleno = 407 (0x197), region = 151  ;;  %s1568_s24 = sshll.u32 (%p1983_p13), %s1834_s25, 3 }
 0x190   : > { %s1289_s11 = scalar_lea.vmem (%p1983_p13), %s2300_s5, %s1568_s24 }
 0x195   : > { %v1320_v5 = vld [vmem:[%s2166_s23] sm:$0xff]  ;;  %v1322_v6 = vld [vmem:[%s2166_s23 + $0x8] sm:$0xff] }
 0x196   : > { %1321 = vst [vmem:[%s1289_s11] sm:$0xff] %v1320_v5  ;;  %1323 = vst [vmem:[%s1289_s11 + $0x10] sm:$0xff] %v1322_v6 }
 0x197 PF: > { %s15_s28 = sadd.s32 1, %s1846_s28   ;;  %s2314_s22 = sld [smem:[#allocation7_spill]] }
 0x198   : > { %p12_p7 = scmp.ge.s32.totalorder %s15_s28, 56   ;;  %s2315_s23 = sld [smem:[#allocation10_spill]] }
 0x199   : > { %s2316_s8 = sld [smem:[#allocation8_spill]]  ;;  %s2318_s18 = smov %s1810_s19 }
 0x19a   : > { %s2317_s14 = sld [smem:[#allocation9_spill]]  ;;  %s2319_s19 = smov %s1975_s17 }
 0x19b   : > { %s2320_s20 = smov %s1818_s21  ;;  %s2321_s21 = smov %s1972_s16 }
 0x19c   : > { %s2322_s24 = smov %s1838_s26  ;;  %s2323_s25 = smov %s1842_s27 }
 0x19d   :  { %14 = sbr.rel (!%p12_p7) target bundleno = 8 (0x8), region = 242 }
 0x19f   : > { %s2324_s26 = smov %s2316_s8 }
 0x1a0   : > { %s2325_s27 = smov %s2317_s14 }

</bundles_post_ra>
